<compile_context>
chip_gen: v7x
topology: tpu7x:2x2x1
jax: 0.10.0
libtpu: 0.0.40
codegen_flags: <defaults>
</compile_context>

<pallas_src>
import functools

import jax
import jax.numpy as jnp
import numpy as np
from jax.experimental import pallas as pl
from jax.experimental.pallas import tpu as pltpu


# ------------------------------ Pallas kernel -------------------------------

def _unet_up_kernel(x0_ref, skip_ref, x0h_ref, skh_ref, wph_ref, bt_ref,
                    w1u_ref, w1s_ref, b1_ref, w2_ref, b2_ref, o_ref,
                    x0p, upp, skp, h1p, *, TR, W, Cin, Cout, cdt):
    """One (batch, row-tile) step of the fused unetUp forward.

    x0_ref  : (1, TH, W, Cin)    low-res core rows of this tile (bf16)
    skip_ref: (1, TR, Wo, Cout)  skip core rows of this tile (bf16)
    x0h_ref : (1, 4, W, Cin)     x0 halo rows [-2,-1,+TH,+TH+1] (zero-masked)
    skh_ref : (1, 4, Wo, Cout)   skip halo rows [-2,-1,+TR,+TR+1] (zero-masked)
    wph_ref : (2, 2, 4*Cin, Cout) deconv sub-pixel phase weights
    w1u/w1s : (9*Cout, Cout)     conv1 weights split into up-/skip-channel halves
    w2_ref  : (9*Cout, Cout)     conv2 weights
    bt/b1/b2: (1, Cout)          biases (f32)
    o_ref   : (1, TR, Wo, Cout)  output rows of this tile (f32)
    x0p/upp/skp/h1p : padded (by 1 col each side, with 2/1 halo rows) VMEM scratch.
    """
    TH = TR // 2
    Wo = 2 * W
    PR = TH + 2                              # rows per deconv phase (incl. halo)
    t = pl.program_id(1)
    nT = pl.num_programs(1)

    def zed(shape):
        return jnp.zeros(shape, cdt)

    # ---- stage 0: assemble padded x0 window (x0 rows [t*TH-2, t*TH+TH+2)) ----
    x0p[:, 0:1, :] = zed((TH + 4, 1, Cin))          # zero W borders only
    x0p[:, W + 1:W + 2, :] = zed((TH + 4, 1, Cin))
    x0p[0:2, 1:W + 1, :] = x0h_ref[0, 0:2]
    x0p[2:TH + 2, 1:W + 1, :] = x0_ref[0]
    x0p[TH + 2:TH + 4, 1:W + 1, :] = x0h_ref[0, 2:4]

    # ---- stage 1: ConvTranspose2d(k=4,s=2,p=1) via 4 sub-pixel 2x2 phases ----
    def deconv_phase(r, c):
        if Cin >= 128:                               # per-tap accumulation (big K)
            acc = None
            for tap, (dh, dw) in enumerate([(0, 0), (0, 1), (1, 0), (1, 1)]):
                a = x0p[r + dh:r + dh + PR, c + dw:c + dw + W, :].reshape(PR * W, Cin)
                part = jnp.dot(a, wph_ref[r, c, tap * Cin:(tap + 1) * Cin, :],
                               preferred_element_type=jnp.float32)
                acc = part if acc is None else acc + part
        else:                                        # folded K = 4*Cin (tiny channels)
            slabs = [x0p[r + dh:r + dh + PR, c + dw:c + dw + W, :]
                     for dh in range(2) for dw in range(2)]
            patch = jnp.concatenate(slabs, axis=-1).reshape(PR * W, 4 * Cin)
            acc = jnp.dot(patch, wph_ref[r, c], preferred_element_type=jnp.float32)
        return acc.reshape(PR, W, Cout)

    def icols(a, b):                                 # interleave even/odd columns
        return jnp.concatenate([a[:, :, None, :], b[:, :, None, :]],
                               axis=2).reshape(PR, Wo, Cout)

    row_e = icols(deconv_phase(0, 0), deconv_phase(0, 1))
    row_o = icols(deconv_phase(1, 0), deconv_phase(1, 1))
    up = jnp.concatenate([row_e[:, None], row_o[:, None]],
                         axis=1).reshape(TR + 4, Wo, Cout)
    up = up + bt_ref[0:1, :]                         # bias in f32

    upp[:, 0:1, :] = zed((TR + 4, 1, Cout))
    upp[:, Wo + 1:Wo + 2, :] = zed((TR + 4, 1, Cout))
    upp[0:TR + 4, 1:Wo + 1, :] = up.astype(cdt)

    # rows outside the image (only at the first/last row tile) must be zero,
    # otherwise the deconv bias leaks into the conv1 zero padding.
    @pl.when(t == 0)
    def _():
        upp[0:2, :, :] = zed((2, Wo + 2, Cout))

    @pl.when(t == nT - 1)
    def _():
        upp[TR + 2:TR + 4, :, :] = zed((2, Wo + 2, Cout))

    # ---- stage 2: skip tile (+halo) into its own padded scratch (no concat) ----
    skp[:, 0:1, :] = zed((TR + 4, 1, Cout))
    skp[:, Wo + 1:Wo + 2, :] = zed((TR + 4, 1, Cout))
    skp[0:2, 1:Wo + 1, :] = skh_ref[0, 0:2]
    skp[2:TR + 2, 1:Wo + 1, :] = skip_ref[0]
    skp[TR + 2:TR + 4, 1:Wo + 1, :] = skh_ref[0, 2:4]

    # ---- 3x3 conv helper: sum of per-source contributions, f32 accumulate ----
    def conv3x3(sources, Hin):
        Hout = Hin - 2
        acc = None
        for src, wref, Cs in sources:
            if Cs >= 128:                            # per-tap: 9 matmuls of K=Cs
                tap = 0
                for dh in range(3):
                    for dw in range(3):
                        a = src[dh:dh + Hout, dw:dw + Wo, :].reshape(Hout * Wo, Cs)
                        part = jnp.dot(a, wref[tap * Cs:(tap + 1) * Cs, :],
                                       preferred_element_type=jnp.float32)
                        acc = part if acc is None else acc + part
                        tap += 1
            else:                                    # folded K = 9*Cs (tiny channels)
                slabs = [src[dh:dh + Hout, dw:dw + Wo, :]
                         for dh in range(3) for dw in range(3)]
                patch = jnp.concatenate(slabs, axis=-1).reshape(Hout * Wo, 9 * Cs)
                part = jnp.dot(patch, wref[...], preferred_element_type=jnp.float32)
                acc = part if acc is None else acc + part
        return acc                                   # (Hout*Wo, Cout) f32

    # ---- stage 3: conv1 + ReLU, written straight into bf16 padded scratch ----
    h1 = conv3x3([(upp, w1u_ref, Cout), (skp, w1s_ref, Cout)], TR + 4)
    h1p[:, 0:1, :] = zed((TR + 2, 1, Cout))
    h1p[:, Wo + 1:Wo + 2, :] = zed((TR + 2, 1, Cout))
    h1p[0:TR + 2, 1:Wo + 1, :] = jnp.maximum(h1 + b1_ref[0:1, :], 0.0
                                             ).reshape(TR + 2, Wo, Cout).astype(cdt)

    @pl.when(t == 0)
    def _():
        h1p[0:1, :, :] = zed((1, Wo + 2, Cout))

    @pl.when(t == nT - 1)
    def _():
        h1p[TR + 1:TR + 2, :, :] = zed((1, Wo + 2, Cout))

    # ---- stage 4: conv2 + ReLU -> output tile ----
    out = conv3x3([(h1p, w2_ref, Cout)], TR + 2)
    o_ref[0] = jnp.maximum(out + b2_ref[0:1, :], 0.0
                           ).reshape(TR, Wo, Cout).astype(o_ref.dtype)


# --------------------------- weight pre-transforms ---------------------------

def _make_deconv_phase_weights(wt):
    """torch ConvTranspose2d weight (Cin, Cout, 4, 4) -> (2, 2, 4*Cin, Cout)."""
    w = jnp.transpose(wt, (2, 3, 0, 1))                      # (kh, kw, Cin, Cout)
    rows = []
    for r in range(2):
        cols = []
        for c in range(2):
            taps = [w[3 - r - 2 * dh, 3 - c - 2 * dw]        # (Cin, Cout)
                    for dh in range(2) for dw in range(2)]
            cols.append(jnp.concatenate(taps, axis=0))       # (4*Cin, Cout)
        rows.append(jnp.stack(cols, axis=0))
    return jnp.stack(rows, axis=0)                           # (2, 2, 4*Cin, Cout)


def _fold_conv3x3_weights(w):
    """torch Conv2d weight (Cout, Cin, 3, 3) -> (9*Cin, Cout), K ordered (kh, kw, ci)."""
    Cout, Cin = w.shape[0], w.shape[1]
    return jnp.transpose(w, (2, 3, 1, 0)).reshape(9 * Cin, Cout)


# ----------------------------- tiling heuristics ------------------------------

def _tile_footprint_bytes(TR, H, W, Cin, Cout):
    TH = TR // 2
    Wo = 2 * W
    bpe = 2  # bf16
    scratch = ((TH + 4) * (W + 2) * Cin + 2 * (TR + 4) * (Wo + 2) * Cout
               + (TR + 2) * (Wo + 2) * Cout) * bpe
    blocks = 2 * ((TH * W * Cin + TR * Wo * Cout + 4 * W * Cin + 4 * Wo * Cout) * bpe
                  + TR * Wo * Cout * 4)                      # double-buffered in/out
    weights = (16 * Cin * Cout + 27 * Cout * Cout) * bpe + 3 * Cout * 4
    temps = 3 * (TR + 4) * Wo * Cout * 4                     # f32 up / conv accumulators
    return scratch + blocks + weights + temps


def _choose_row_tile(H, W, Cin, Cout, budget_bytes=20 * 1024 * 1024):
    """Largest even divisor of Ho=2H whose per-step footprint fits the budget."""
    Ho = 2 * H
    best = 2
    for TR in range(2, min(Ho, 512) + 1, 2):
        if Ho % TR:
            continue
        if _tile_footprint_bytes(TR, H, W, Cin, Cout) <= budget_bytes:
            best = TR
    return best


# ----------------------------- parameter setup -------------------------------

def init_unet_up_params(key, in_size, out_size):
    """Deterministic synthetic parameters (shapes follow the PyTorch module, is_deconv=True)."""
    k1, k2, k3, k4, k5, k6 = jax.random.split(key, 6)
    wt = jax.random.normal(k1, (in_size, out_size, 4, 4), jnp.float32) * jnp.sqrt(
        2.0 / (in_size * 16))
    bt = 0.01 * jax.random.normal(k2, (out_size,), jnp.float32)
    w1 = jax.random.normal(k3, (out_size, 2 * out_size, 3, 3), jnp.float32) * jnp.sqrt(
        2.0 / (2 * out_size * 9))
    b1 = 0.01 * jax.random.normal(k4, (out_size,), jnp.float32)
    w2 = jax.random.normal(k5, (out_size, out_size, 3, 3), jnp.float32) * jnp.sqrt(
        2.0 / (out_size * 9))
    b2 = 0.01 * jax.random.normal(k6, (out_size,), jnp.float32)
    return dict(wt=wt, bt=bt, w1=w1, b1=b1, w2=w2, b2=b2)


# ------------------------------- forward pass --------------------------------

def unet_up_forward(params, x0_nhwc, skip_nhwc, *, row_tile=None,
                    dot_dtype=jnp.bfloat16):
    """unetUp.forward with is_deconv=True, n_concat=2 (one skip connection)."""
    N, H, W, Cin = x0_nhwc.shape
    Cout = params["wt"].shape[1]
    Ho, Wo = 2 * H, 2 * W
    assert skip_nhwc.shape == (N, Ho, Wo, Cout)

    TR = row_tile if row_tile is not None else _choose_row_tile(H, W, Cin, Cout)
    assert TR % 2 == 0 and Ho % TR == 0, "row tile must be even and divide 2*H"
    TH = TR // 2
    T = Ho // TR

    # bf16 inputs: halves HBM->VMEM DMA; matches the bf16-at-conv-input policy.
    x0 = x0_nhwc.astype(dot_dtype)
    skip = skip_nhwc.astype(dot_dtype)

    # per-tile 2-row halos above/below (zero where outside the image), packed
    # as (N*T, 4, W', C') so every input keeps a plain Blocked BlockSpec.
    def make_halo(img, tile, n_rows):
        base = np.arange(T) * tile
        rows = np.stack([base - 2, base - 1, base + tile, base + tile + 1], axis=1)
        valid = (rows >= 0) & (rows < n_rows)
        safe = np.clip(rows, 0, n_rows - 1)
        h = jnp.take(img, jnp.asarray(safe.reshape(-1), np.int32), axis=1)
        h = h.reshape(img.shape[0], T, 4, img.shape[2], img.shape[3])
        h = jnp.where(jnp.asarray(valid)[None, :, :, None, None], h,
                      jnp.zeros_like(h))
        return h.reshape(img.shape[0] * T, 4, img.shape[2], img.shape[3])

    x0_halo = make_halo(x0, TH, H)                    # (N*T, 4, W, Cin)
    skip_halo = make_halo(skip, TR, Ho)               # (N*T, 4, Wo, Cout)

    wph = _make_deconv_phase_weights(params["wt"]).astype(dot_dtype)
    w1u = _fold_conv3x3_weights(params["w1"][:, :Cout]).astype(dot_dtype)
    w1s = _fold_conv3x3_weights(params["w1"][:, Cout:]).astype(dot_dtype)
    w2f = _fold_conv3x3_weights(params["w2"]).astype(dot_dtype)
    bt = params["bt"].reshape(1, Cout).astype(jnp.float32)
    b1 = params["b1"].reshape(1, Cout).astype(jnp.float32)
    b2 = params["b2"].reshape(1, Cout).astype(jnp.float32)

    kernel = functools.partial(_unet_up_kernel, TR=TR, W=W, Cin=Cin, Cout=Cout,
                               cdt=dot_dtype)

    bpe = jnp.dtype(dot_dtype).itemsize
    footprint = _tile_footprint_bytes(TR, H, W, Cin, Cout)
    vmem_limit = int(min(64 * 1024 * 1024, max(32 * 1024 * 1024, 2 * footprint)))

    flops = 2 * N * Ho * Wo * Cout * (4 * Cin + 9 * 2 * Cout + 9 * Cout)
    bytes_accessed = int(x0.size * bpe + skip.size * bpe + x0_halo.size * bpe
                         + skip_halo.size * bpe + N * Ho * Wo * Cout * 4
                         + (wph.size + w1u.size + w1s.size + w2f.size) * bpe)

    return pl.pallas_call(
        kernel,
        out_shape=jax.ShapeDtypeStruct((N, Ho, Wo, Cout), jnp.float32),
        grid=(N, T),
        in_specs=[
            pl.BlockSpec((1, TH, W, Cin), lambda n, t: (n, t, 0, 0)),
            pl.BlockSpec((1, TR, Wo, Cout), lambda n, t: (n, t, 0, 0)),
            pl.BlockSpec((1, 4, W, Cin), lambda n, t, T=T: (n * T + t, 0, 0, 0)),
            pl.BlockSpec((1, 4, Wo, Cout), lambda n, t, T=T: (n * T + t, 0, 0, 0)),
            pl.BlockSpec((2, 2, 4 * Cin, Cout), lambda n, t: (0, 0, 0, 0)),
            pl.BlockSpec((1, Cout), lambda n, t: (0, 0)),
            pl.BlockSpec((9 * Cout, Cout), lambda n, t: (0, 0)),
            pl.BlockSpec((9 * Cout, Cout), lambda n, t: (0, 0)),
            pl.BlockSpec((1, Cout), lambda n, t: (0, 0)),
            pl.BlockSpec((9 * Cout, Cout), lambda n, t: (0, 0)),
            pl.BlockSpec((1, Cout), lambda n, t: (0, 0)),
        ],
        out_specs=pl.BlockSpec((1, TR, Wo, Cout), lambda n, t: (n, t, 0, 0)),
        scratch_shapes=[
            pltpu.VMEM((TH + 4, W + 2, Cin), dot_dtype),     # padded x0 window
            pltpu.VMEM((TR + 4, Wo + 2, Cout), dot_dtype),   # padded up rows
            pltpu.VMEM((TR + 4, Wo + 2, Cout), dot_dtype),   # padded skip rows
            pltpu.VMEM((TR + 2, Wo + 2, Cout), dot_dtype),   # padded conv1 output
        ],
        compiler_params=pltpu.CompilerParams(
            dimension_semantics=("parallel", "parallel"),
            vmem_limit_bytes=vmem_limit),
        cost_estimate=pl.CostEstimate(flops=int(flops), transcendentals=0,
                                      bytes_accessed=bytes_accessed),
    )(x0, skip, x0_halo, skip_halo, wph, bt, w1u, w1s, b1, w2f, b2)

# TODO(synk): the is_deconv=False branch (nn.UpsamplingBilinear2d) is not implemented;
#             this script instantiates the deconv branch (the module's default use).


# --------------------------------- reference ---------------------------------

def _ref_forward(params, x0_nhwc, skip_nhwc, dot_dtype=jnp.bfloat16):
    """lax.conv reference using the same precision policy (bf16 MXU, f32 accumulate)."""
    dn = ("NHWC", "HWIO", "NHWC")
    f32 = jnp.float32
    wt_conv = jnp.transpose(params["wt"][:, :, ::-1, ::-1], (2, 3, 0, 1))
    up = jax.lax.conv_general_dilated(
        x0_nhwc.astype(dot_dtype), wt_conv.astype(dot_dtype),
        window_strides=(1, 1), padding=[(2, 2), (2, 2)], lhs_dilation=(2, 2),
        dimension_numbers=dn, preferred_element_type=f32) + params["bt"]
    x = jnp.concatenate([up, skip_nhwc], axis=-1)
    w1 = jnp.transpose(params["w1"], (2, 3, 1, 0))
    x = jax.nn.relu(jax.lax.conv_general_dilated(
        x.astype(dot_dtype), w1.astype(dot_dtype), (1, 1), [(1, 1), (1, 1)],
        dimension_numbers=dn, preferred_element_type=f32) + params["b1"])
    w2 = jnp.transpose(params["w2"], (2, 3, 1, 0))
    x = jax.nn.relu(jax.lax.conv_general_dilated(
        x.astype(dot_dtype), w2.astype(dot_dtype), (1, 1), [(1, 1), (1, 1)],
        dimension_numbers=dn, preferred_element_type=f32) + params["b2"])
    return x


# ----------------------------------- main ------------------------------------

if __name__ == "__main__":
    key = jax.random.PRNGKey(0)
    in_size, out_size = 8, 4
    N, H, W = 2, 8, 8

    kp, kx, ks = jax.random.split(key, 3)
    params = init_unet_up_params(kp, in_size, out_size)

    # PyTorch-convention inputs (NCHW): inputs0 at low res, one skip at high res.
    inputs0_nchw = jax.random.normal(kx, (N, in_size, H, W), jnp.float32)
    skip_nchw = jax.random.normal(ks, (N, out_size, 2 * H, 2 * W), jnp.float32)

    # convert once to kernel layout (NHWC)
    x0 = jnp.transpose(inputs0_nchw, (0, 2, 3, 1))
    skip = jnp.transpose(skip_nchw, (0, 2, 3, 1))

    # row_tile=8 -> 2 row tiles per image: exercises the halo/tiling path.
    fwd = jax.jit(functools.partial(unet_up_forward, row_tile=8))
    out_nhwc = jax.block_until_ready(fwd(params, x0, skip))
    out_nchw = jnp.transpose(out_nhwc, (0, 3, 1, 2))          # back to PyTorch NCHW

    ref_nchw = jnp.transpose(_ref_forward(params, x0, skip), (0, 3, 1, 2))
    np.testing.assert_allclose(np.asarray(out_nchw), np.asarray(ref_nchw),
                               rtol=5e-3, atol=5e-3)
    assert out_nchw.shape == (N, out_size, 2 * H, 2 * W)
    print("KERNEL_OK")
</pallas_src>

<mosaic_0001>
module attributes {stable_mosaic.version = 11 : i64} {
  func.func @_unet_up_kernel(%arg0: i32, %arg1: i32, %arg2: memref<1x4x8x8xbf16, #tpu.memory_space<vmem>>, %arg3: memref<1x8x16x4xbf16, #tpu.memory_space<vmem>>, %arg4: memref<1x4x8x8xbf16, #tpu.memory_space<vmem>>, %arg5: memref<1x4x16x4xbf16, #tpu.memory_space<vmem>>, %arg6: memref<2x2x32x4xbf16, #tpu.memory_space<vmem>>, %arg7: memref<1x4xf32, #tpu.memory_space<vmem>>, %arg8: memref<36x4xbf16, #tpu.memory_space<vmem>>, %arg9: memref<36x4xbf16, #tpu.memory_space<vmem>>, %arg10: memref<1x4xf32, #tpu.memory_space<vmem>>, %arg11: memref<36x4xbf16, #tpu.memory_space<vmem>>, %arg12: memref<1x4xf32, #tpu.memory_space<vmem>>, %arg13: memref<1x8x16x4xf32, #tpu.memory_space<vmem>>, %arg14: memref<8x10x8xbf16, #tpu.memory_space<vmem>>, %arg15: memref<12x18x4xbf16, #tpu.memory_space<vmem>>, %arg16: memref<12x18x4xbf16, #tpu.memory_space<vmem>>, %arg17: memref<10x18x4xbf16, #tpu.memory_space<vmem>>) attributes {dimension_semantics = [#tpu.dimension_semantics<parallel>, #tpu.dimension_semantics<parallel>], iteration_bounds = array<i64: 2, 2>, scalar_prefetch = 0 : i64, scratch_operands = 4 : i64, tpu.core_type = #tpu.core_type<tc>, window_params = [{transform_indices = @transform_0, window_bounds = array<i64: 1, 4, 8, 8>}, {transform_indices = @transform_1, window_bounds = array<i64: 1, 8, 16, 4>}, {transform_indices = @transform_2, window_bounds = array<i64: 1, 4, 8, 8>}, {transform_indices = @transform_3, window_bounds = array<i64: 1, 4, 16, 4>}, {pipeline_mode = #tpu.pipeline_mode<synchronous>, transform_indices = @transform_4, window_bounds = array<i64: 2, 2, 32, 4>}, {pipeline_mode = #tpu.pipeline_mode<synchronous>, transform_indices = @transform_5, window_bounds = array<i64: 1, 4>}, {pipeline_mode = #tpu.pipeline_mode<synchronous>, transform_indices = @transform_6, window_bounds = array<i64: 36, 4>}, {pipeline_mode = #tpu.pipeline_mode<synchronous>, transform_indices = @transform_7, window_bounds = array<i64: 36, 4>}, {pipeline_mode = #tpu.pipeline_mode<synchronous>, transform_indices = @transform_8, window_bounds = array<i64: 1, 4>}, {pipeline_mode = #tpu.pipeline_mode<synchronous>, transform_indices = @transform_9, window_bounds = array<i64: 36, 4>}, {pipeline_mode = #tpu.pipeline_mode<synchronous>, transform_indices = @transform_10, window_bounds = array<i64: 1, 4>}, {transform_indices = @transform_11, window_bounds = array<i64: 1, 8, 16, 4>}]} {
    %cst = arith.constant 0.000000e+00 : bf16
    %0 = vector.broadcast %cst : bf16 to vector<8x1x8xbf16>
    %c0 = arith.constant 0 : index
    %c0_0 = arith.constant 0 : index
    %c0_1 = arith.constant 0 : index
    %1 = vector.load %arg14[%c0, %c0_0, %c0_1] : memref<8x10x8xbf16, #tpu.memory_space<vmem>>, vector<8x1x8xbf16>
    tpu.vector_store %arg14[%c0, %c0_0, %c0_1], %0 {strides = array<i32>} : memref<8x10x8xbf16, #tpu.memory_space<vmem>>, vector<8x1x8xbf16>,
    %cst_2 = arith.constant 0.000000e+00 : bf16
    %2 = vector.broadcast %cst_2 : bf16 to vector<8x1x8xbf16>
    %c0_3 = arith.constant 0 : index
    %c9 = arith.constant 9 : index
    %c0_4 = arith.constant 0 : index
    %3 = vector.load %arg14[%c0_3, %c9, %c0_4] : memref<8x10x8xbf16, #tpu.memory_space<vmem>>, vector<8x1x8xbf16>
    tpu.vector_store %arg14[%c0_3, %c9, %c0_4], %2 {strides = array<i32>} : memref<8x10x8xbf16, #tpu.memory_space<vmem>>, vector<8x1x8xbf16>,
    %c0_5 = arith.constant 0 : index
    %c0_6 = arith.constant 0 : index
    %c0_7 = arith.constant 0 : index
    %c0_8 = arith.constant 0 : index
    %4 = vector.load %arg4[%c0_5, %c0_6, %c0_7, %c0_8] : memref<1x4x8x8xbf16, #tpu.memory_space<vmem>>, vector<1x2x8x8xbf16>
    %5 = vector.shape_cast %4 : vector<1x2x8x8xbf16> to vector<2x8x8xbf16>
    %c0_9 = arith.constant 0 : index
    %c1 = arith.constant 1 : index
    %c0_10 = arith.constant 0 : index
    %6 = vector.load %arg14[%c0_9, %c1, %c0_10] : memref<8x10x8xbf16, #tpu.memory_space<vmem>>, vector<2x8x8xbf16>
    tpu.vector_store %arg14[%c0_9, %c1, %c0_10], %5 {strides = array<i32>} : memref<8x10x8xbf16, #tpu.memory_space<vmem>>, vector<2x8x8xbf16>,
    %c0_11 = arith.constant 0 : index
    %c0_12 = arith.constant 0 : index
    %c0_13 = arith.constant 0 : index
    %c0_14 = arith.constant 0 : index
    %7 = vector.load %arg2[%c0_11, %c0_12, %c0_13, %c0_14] : memref<1x4x8x8xbf16, #tpu.memory_space<vmem>>, vector<1x4x8x8xbf16>
    %8 = vector.shape_cast %7 : vector<1x4x8x8xbf16> to vector<4x8x8xbf16>
    %c2 = arith.constant 2 : index
    %c1_15 = arith.constant 1 : index
    %c0_16 = arith.constant 0 : index
    %9 = vector.load %arg14[%c2, %c1_15, %c0_16] : memref<8x10x8xbf16, #tpu.memory_space<vmem>>, vector<4x8x8xbf16>
    tpu.vector_store %arg14[%c2, %c1_15, %c0_16], %8 {strides = array<i32>} : memref<8x10x8xbf16, #tpu.memory_space<vmem>>, vector<4x8x8xbf16>,
    %c0_17 = arith.constant 0 : index
    %c2_18 = arith.constant 2 : index
    %c0_19 = arith.constant 0 : index
    %c0_20 = arith.constant 0 : index
    %10 = vector.load %arg4[%c0_17, %c2_18, %c0_19, %c0_20] : memref<1x4x8x8xbf16, #tpu.memory_space<vmem>>, vector<1x2x8x8xbf16>
    %11 = vector.shape_cast %10 : vector<1x2x8x8xbf16> to vector<2x8x8xbf16>
    %c6 = arith.constant 6 : index
    %c1_21 = arith.constant 1 : index
    %c0_22 = arith.constant 0 : index
    %12 = vector.load %arg14[%c6, %c1_21, %c0_22] : memref<8x10x8xbf16, #tpu.memory_space<vmem>>, vector<2x8x8xbf16>
    tpu.vector_store %arg14[%c6, %c1_21, %c0_22], %11 {strides = array<i32>} : memref<8x10x8xbf16, #tpu.memory_space<vmem>>, vector<2x8x8xbf16>,
    %c0_23 = arith.constant 0 : index
    %c0_24 = arith.constant 0 : index
    %c0_25 = arith.constant 0 : index
    %13 = vector.load %arg14[%c0_23, %c0_24, %c0_25] : memref<8x10x8xbf16, #tpu.memory_space<vmem>>, vector<6x8x8xbf16>
    %c0_26 = arith.constant 0 : index
    %c1_27 = arith.constant 1 : index
    %c0_28 = arith.constant 0 : index
    %14 = vector.load %arg14[%c0_26, %c1_27, %c0_28] : memref<8x10x8xbf16, #tpu.memory_space<vmem>>, vector<6x8x8xbf16>
    %c1_29 = arith.constant 1 : index
    %c0_30 = arith.constant 0 : index
    %c0_31 = arith.constant 0 : index
    %15 = vector.load %arg14[%c1_29, %c0_30, %c0_31] : memref<8x10x8xbf16, #tpu.memory_space<vmem>>, vector<6x8x8xbf16>
    %c1_32 = arith.constant 1 : index
    %c1_33 = arith.constant 1 : index
    %c0_34 = arith.constant 0 : index
    %16 = vector.load %arg14[%c1_32, %c1_33, %c0_34] : memref<8x10x8xbf16, #tpu.memory_space<vmem>>, vector<6x8x8xbf16>
    %17 = tpu.concatenate %13, %14, %15, %16 in 2 : vector<6x8x8xbf16>, vector<6x8x8xbf16>, vector<6x8x8xbf16>, vector<6x8x8xbf16> -> vector<6x8x32xbf16>
    %18 = vector.shape_cast %17 : vector<6x8x32xbf16> to vector<48x32xbf16>
    %c0_35 = arith.constant 0 : index
    %c0_36 = arith.constant 0 : index
    %c0_37 = arith.constant 0 : index
    %c0_38 = arith.constant 0 : index
    %19 = vector.load %arg6[%c0_35, %c0_36, %c0_37, %c0_38] : memref<2x2x32x4xbf16, #tpu.memory_space<vmem>>, vector<1x1x32x4xbf16>
    %20 = vector.shape_cast %19 : vector<1x1x32x4xbf16> to vector<32x4xbf16>
    %cst_39 = arith.constant dense<0.000000e+00> : vector<48x4xf32>
    %21 = tpu.matmul %18, %20, %cst_39 {dimension_numbers = #tpu.dot_dimension_numbers<[1], [0], [0], [1], [0, 0, 1, 1], [], []>} : vector<48x32xbf16>, vector<32x4xbf16>, vector<48x4xf32> -> vector<48x4xf32>
    %22 = vector.shape_cast %21 : vector<48x4xf32> to vector<6x8x4xf32>
    %c0_40 = arith.constant 0 : index
    %c1_41 = arith.constant 1 : index
    %c0_42 = arith.constant 0 : index
    %23 = vector.load %arg14[%c0_40, %c1_41, %c0_42] : memref<8x10x8xbf16, #tpu.memory_space<vmem>>, vector<6x8x8xbf16>
    %c0_43 = arith.constant 0 : index
    %c2_44 = arith.constant 2 : index
    %c0_45 = arith.constant 0 : index
    %24 = vector.load %arg14[%c0_43, %c2_44, %c0_45] : memref<8x10x8xbf16, #tpu.memory_space<vmem>>, vector<6x8x8xbf16>
    %c1_46 = arith.constant 1 : index
    %c1_47 = arith.constant 1 : index
    %c0_48 = arith.constant 0 : index
    %25 = vector.load %arg14[%c1_46, %c1_47, %c0_48] : memref<8x10x8xbf16, #tpu.memory_space<vmem>>, vector<6x8x8xbf16>
    %c1_49 = arith.constant 1 : index
    %c2_50 = arith.constant 2 : index
    %c0_51 = arith.constant 0 : index
    %26 = vector.load %arg14[%c1_49, %c2_50, %c0_51] : memref<8x10x8xbf16, #tpu.memory_space<vmem>>, vector<6x8x8xbf16>
    %27 = tpu.concatenate %23, %24, %25, %26 in 2 : vector<6x8x8xbf16>, vector<6x8x8xbf16>, vector<6x8x8xbf16>, vector<6x8x8xbf16> -> vector<6x8x32xbf16>
    %28 = vector.shape_cast %27 : vector<6x8x32xbf16> to vector<48x32xbf16>
    %c0_52 = arith.constant 0 : index
    %c1_53 = arith.constant 1 : index
    %c0_54 = arith.constant 0 : index
    %c0_55 = arith.constant 0 : index
    %29 = vector.load %arg6[%c0_52, %c1_53, %c0_54, %c0_55] : memref<2x2x32x4xbf16, #tpu.memory_space<vmem>>, vector<1x1x32x4xbf16>
    %30 = vector.shape_cast %29 : vector<1x1x32x4xbf16> to vector<32x4xbf16>
    %cst_56 = arith.constant dense<0.000000e+00> : vector<48x4xf32>
    %31 = tpu.matmul %28, %30, %cst_56 {dimension_numbers = #tpu.dot_dimension_numbers<[1], [0], [0], [1], [0, 0, 1, 1], [], []>} : vector<48x32xbf16>, vector<32x4xbf16>, vector<48x4xf32> -> vector<48x4xf32>
    %32 = vector.shape_cast %31 : vector<48x4xf32> to vector<6x8x4xf32>
    %33 = vector.shape_cast %22 : vector<6x8x4xf32> to vector<6x8x1x4xf32>
    %34 = vector.shape_cast %32 : vector<6x8x4xf32> to vector<6x8x1x4xf32>
    %35 = tpu.concatenate %33, %34 in 2 : vector<6x8x1x4xf32>, vector<6x8x1x4xf32> -> vector<6x8x2x4xf32>
    %36 = vector.shape_cast %35 : vector<6x8x2x4xf32> to vector<6x16x4xf32>
    %c1_57 = arith.constant 1 : index
    %c0_58 = arith.constant 0 : index
    %c0_59 = arith.constant 0 : index
    %37 = vector.load %arg14[%c1_57, %c0_58, %c0_59] : memref<8x10x8xbf16, #tpu.memory_space<vmem>>, vector<6x8x8xbf16>
    %c1_60 = arith.constant 1 : index
    %c1_61 = arith.constant 1 : index
    %c0_62 = arith.constant 0 : index
    %38 = vector.load %arg14[%c1_60, %c1_61, %c0_62] : memref<8x10x8xbf16, #tpu.memory_space<vmem>>, vector<6x8x8xbf16>
    %c2_63 = arith.constant 2 : index
    %c0_64 = arith.constant 0 : index
    %c0_65 = arith.constant 0 : index
    %39 = vector.load %arg14[%c2_63, %c0_64, %c0_65] : memref<8x10x8xbf16, #tpu.memory_space<vmem>>, vector<6x8x8xbf16>
    %c2_66 = arith.constant 2 : index
    %c1_67 = arith.constant 1 : index
    %c0_68 = arith.constant 0 : index
    %40 = vector.load %arg14[%c2_66, %c1_67, %c0_68] : memref<8x10x8xbf16, #tpu.memory_space<vmem>>, vector<6x8x8xbf16>
    %41 = tpu.concatenate %37, %38, %39, %40 in 2 : vector<6x8x8xbf16>, vector<6x8x8xbf16>, vector<6x8x8xbf16>, vector<6x8x8xbf16> -> vector<6x8x32xbf16>
    %42 = vector.shape_cast %41 : vector<6x8x32xbf16> to vector<48x32xbf16>
    %c1_69 = arith.constant 1 : index
    %c0_70 = arith.constant 0 : index
    %c0_71 = arith.constant 0 : index
    %c0_72 = arith.constant 0 : index
    %43 = vector.load %arg6[%c1_69, %c0_70, %c0_71, %c0_72] : memref<2x2x32x4xbf16, #tpu.memory_space<vmem>>, vector<1x1x32x4xbf16>
    %44 = vector.shape_cast %43 : vector<1x1x32x4xbf16> to vector<32x4xbf16>
    %cst_73 = arith.constant dense<0.000000e+00> : vector<48x4xf32>
    %45 = tpu.matmul %42, %44, %cst_73 {dimension_numbers = #tpu.dot_dimension_numbers<[1], [0], [0], [1], [0, 0, 1, 1], [], []>} : vector<48x32xbf16>, vector<32x4xbf16>, vector<48x4xf32> -> vector<48x4xf32>
    %46 = vector.shape_cast %45 : vector<48x4xf32> to vector<6x8x4xf32>
    %c1_74 = arith.constant 1 : index
    %c1_75 = arith.constant 1 : index
    %c0_76 = arith.constant 0 : index
    %47 = vector.load %arg14[%c1_74, %c1_75, %c0_76] : memref<8x10x8xbf16, #tpu.memory_space<vmem>>, vector<6x8x8xbf16>
    %c1_77 = arith.constant 1 : index
    %c2_78 = arith.constant 2 : index
    %c0_79 = arith.constant 0 : index
    %48 = vector.load %arg14[%c1_77, %c2_78, %c0_79] : memref<8x10x8xbf16, #tpu.memory_space<vmem>>, vector<6x8x8xbf16>
    %c2_80 = arith.constant 2 : index
    %c1_81 = arith.constant 1 : index
    %c0_82 = arith.constant 0 : index
    %49 = vector.load %arg14[%c2_80, %c1_81, %c0_82] : memref<8x10x8xbf16, #tpu.memory_space<vmem>>, vector<6x8x8xbf16>
    %c2_83 = arith.constant 2 : index
    %c2_84 = arith.constant 2 : index
    %c0_85 = arith.constant 0 : index
    %50 = vector.load %arg14[%c2_83, %c2_84, %c0_85] : memref<8x10x8xbf16, #tpu.memory_space<vmem>>, vector<6x8x8xbf16>
    %51 = tpu.concatenate %47, %48, %49, %50 in 2 : vector<6x8x8xbf16>, vector<6x8x8xbf16>, vector<6x8x8xbf16>, vector<6x8x8xbf16> -> vector<6x8x32xbf16>
    %52 = vector.shape_cast %51 : vector<6x8x32xbf16> to vector<48x32xbf16>
    %c1_86 = arith.constant 1 : index
    %c1_87 = arith.constant 1 : index
    %c0_88 = arith.constant 0 : index
    %c0_89 = arith.constant 0 : index
    %53 = vector.load %arg6[%c1_86, %c1_87, %c0_88, %c0_89] : memref<2x2x32x4xbf16, #tpu.memory_space<vmem>>, vector<1x1x32x4xbf16>
    %54 = vector.shape_cast %53 : vector<1x1x32x4xbf16> to vector<32x4xbf16>
    %cst_90 = arith.constant dense<0.000000e+00> : vector<48x4xf32>
    %55 = tpu.matmul %52, %54, %cst_90 {dimension_numbers = #tpu.dot_dimension_numbers<[1], [0], [0], [1], [0, 0, 1, 1], [], []>} : vector<48x32xbf16>, vector<32x4xbf16>, vector<48x4xf32> -> vector<48x4xf32>
    %56 = vector.shape_cast %55 : vector<48x4xf32> to vector<6x8x4xf32>
    %57 = vector.shape_cast %46 : vector<6x8x4xf32> to vector<6x8x1x4xf32>
    %58 = vector.shape_cast %56 : vector<6x8x4xf32> to vector<6x8x1x4xf32>
    %59 = tpu.concatenate %57, %58 in 2 : vector<6x8x1x4xf32>, vector<6x8x1x4xf32> -> vector<6x8x2x4xf32>
    %60 = vector.shape_cast %59 : vector<6x8x2x4xf32> to vector<6x16x4xf32>
    %61 = vector.shape_cast %36 : vector<6x16x4xf32> to vector<6x1x16x4xf32>
    %62 = vector.shape_cast %60 : vector<6x16x4xf32> to vector<6x1x16x4xf32>
    %63 = tpu.concatenate %61, %62 in 1 : vector<6x1x16x4xf32>, vector<6x1x16x4xf32> -> vector<6x2x16x4xf32>
    %64 = vector.shape_cast %63 : vector<6x2x16x4xf32> to vector<12x16x4xf32>
    %c0_91 = arith.constant 0 : index
    %c0_92 = arith.constant 0 : index
    %65 = vector.load %arg7[%c0_91, %c0_92] : memref<1x4xf32, #tpu.memory_space<vmem>>, vector<1x4xf32>
    %66 = vector.shape_cast %65 : vector<1x4xf32> to vector<1x1x4xf32>
    %67 = vector.broadcast %66 : vector<1x1x4xf32> to vector<12x16x4xf32>
    %68 = arith.addf %64, %67 : vector<12x16x4xf32>
    %cst_93 = arith.constant 0.000000e+00 : bf16
    %69 = vector.broadcast %cst_93 : bf16 to vector<12x1x4xbf16>
    %c0_94 = arith.constant 0 : index
    %c0_95 = arith.constant 0 : index
    %c0_96 = arith.constant 0 : index
    %70 = vector.load %arg15[%c0_94, %c0_95, %c0_96] : memref<12x18x4xbf16, #tpu.memory_space<vmem>>, vector<12x1x4xbf16>
    tpu.vector_store %arg15[%c0_94, %c0_95, %c0_96], %69 {strides = array<i32>} : memref<12x18x4xbf16, #tpu.memory_space<vmem>>, vector<12x1x4xbf16>,
    %cst_97 = arith.constant 0.000000e+00 : bf16
    %71 = vector.broadcast %cst_97 : bf16 to vector<12x1x4xbf16>
    %c0_98 = arith.constant 0 : index
    %c17 = arith.constant 17 : index
    %c0_99 = arith.constant 0 : index
    %72 = vector.load %arg15[%c0_98, %c17, %c0_99] : memref<12x18x4xbf16, #tpu.memory_space<vmem>>, vector<12x1x4xbf16>
    tpu.vector_store %arg15[%c0_98, %c17, %c0_99], %71 {strides = array<i32>} : memref<12x18x4xbf16, #tpu.memory_space<vmem>>, vector<12x1x4xbf16>,
    %73 = arith.truncf %68 : vector<12x16x4xf32> to vector<12x16x4xbf16>
    %c0_100 = arith.constant 0 : index
    %c1_101 = arith.constant 1 : index
    %c0_102 = arith.constant 0 : index
    %74 = vector.load %arg15[%c0_100, %c1_101, %c0_102] : memref<12x18x4xbf16, #tpu.memory_space<vmem>>, vector<12x16x4xbf16>
    tpu.vector_store %arg15[%c0_100, %c1_101, %c0_102], %73 {strides = array<i32>} : memref<12x18x4xbf16, #tpu.memory_space<vmem>>, vector<12x16x4xbf16>,
    %c0_i32 = arith.constant 0 : i32
    %75 = arith.cmpi eq, %arg1, %c0_i32 : i32
    %76 = arith.extui %75 : i1 to i32
    %c0_i32_103 = arith.constant 0 : i32
    %77 = arith.cmpi ne, %76, %c0_i32_103 : i32
    scf.if %77 {
      %cst_248 = arith.constant 0.000000e+00 : bf16
      %161 = vector.broadcast %cst_248 : bf16 to vector<2x18x4xbf16>
      %c0_249 = arith.constant 0 : index
      %c0_250 = arith.constant 0 : index
      %c0_251 = arith.constant 0 : index
      %162 = vector.load %arg15[%c0_249, %c0_250, %c0_251] : memref<12x18x4xbf16, #tpu.memory_space<vmem>>, vector<2x18x4xbf16>
      tpu.vector_store %arg15[%c0_249, %c0_250, %c0_251], %161 {strides = array<i32>} : memref<12x18x4xbf16, #tpu.memory_space<vmem>>, vector<2x18x4xbf16>,
    } else {
    }
    %c1_i32 = arith.constant 1 : i32
    %78 = arith.cmpi eq, %arg1, %c1_i32 : i32
    %79 = arith.extui %78 : i1 to i32
    %c0_i32_104 = arith.constant 0 : i32
    %80 = arith.cmpi ne, %79, %c0_i32_104 : i32
    scf.if %80 {
      %cst_248 = arith.constant 0.000000e+00 : bf16
      %161 = vector.broadcast %cst_248 : bf16 to vector<2x18x4xbf16>
      %c10_249 = arith.constant 10 : index
      %c0_250 = arith.constant 0 : index
      %c0_251 = arith.constant 0 : index
      %162 = vector.load %arg15[%c10_249, %c0_250, %c0_251] : memref<12x18x4xbf16, #tpu.memory_space<vmem>>, vector<2x18x4xbf16>
      tpu.vector_store %arg15[%c10_249, %c0_250, %c0_251], %161 {strides = array<i32>} : memref<12x18x4xbf16, #tpu.memory_space<vmem>>, vector<2x18x4xbf16>,
    } else {
    }
    %cst_105 = arith.constant 0.000000e+00 : bf16
    %81 = vector.broadcast %cst_105 : bf16 to vector<12x1x4xbf16>
    %c0_106 = arith.constant 0 : index
    %c0_107 = arith.constant 0 : index
    %c0_108 = arith.constant 0 : index
    %82 = vector.load %arg16[%c0_106, %c0_107, %c0_108] : memref<12x18x4xbf16, #tpu.memory_space<vmem>>, vector<12x1x4xbf16>
    tpu.vector_store %arg16[%c0_106, %c0_107, %c0_108], %81 {strides = array<i32>} : memref<12x18x4xbf16, #tpu.memory_space<vmem>>, vector<12x1x4xbf16>,
    %cst_109 = arith.constant 0.000000e+00 : bf16
    %83 = vector.broadcast %cst_109 : bf16 to vector<12x1x4xbf16>
    %c0_110 = arith.constant 0 : index
    %c17_111 = arith.constant 17 : index
    %c0_112 = arith.constant 0 : index
    %84 = vector.load %arg16[%c0_110, %c17_111, %c0_112] : memref<12x18x4xbf16, #tpu.memory_space<vmem>>, vector<12x1x4xbf16>
    tpu.vector_store %arg16[%c0_110, %c17_111, %c0_112], %83 {strides = array<i32>} : memref<12x18x4xbf16, #tpu.memory_space<vmem>>, vector<12x1x4xbf16>,
    %c0_113 = arith.constant 0 : index
    %c0_114 = arith.constant 0 : index
    %c0_115 = arith.constant 0 : index
    %c0_116 = arith.constant 0 : index
    %85 = vector.load %arg5[%c0_113, %c0_114, %c0_115, %c0_116] : memref<1x4x16x4xbf16, #tpu.memory_space<vmem>>, vector<1x2x16x4xbf16>
    %86 = vector.shape_cast %85 : vector<1x2x16x4xbf16> to vector<2x16x4xbf16>
    %c0_117 = arith.constant 0 : index
    %c1_118 = arith.constant 1 : index
    %c0_119 = arith.constant 0 : index
    %87 = vector.load %arg16[%c0_117, %c1_118, %c0_119] : memref<12x18x4xbf16, #tpu.memory_space<vmem>>, vector<2x16x4xbf16>
    tpu.vector_store %arg16[%c0_117, %c1_118, %c0_119], %86 {strides = array<i32>} : memref<12x18x4xbf16, #tpu.memory_space<vmem>>, vector<2x16x4xbf16>,
    %c0_120 = arith.constant 0 : index
    %c0_121 = arith.constant 0 : index
    %c0_122 = arith.constant 0 : index
    %c0_123 = arith.constant 0 : index
    %88 = vector.load %arg3[%c0_120, %c0_121, %c0_122, %c0_123] : memref<1x8x16x4xbf16, #tpu.memory_space<vmem>>, vector<1x8x16x4xbf16>
    %89 = vector.shape_cast %88 : vector<1x8x16x4xbf16> to vector<8x16x4xbf16>
    %c2_124 = arith.constant 2 : index
    %c1_125 = arith.constant 1 : index
    %c0_126 = arith.constant 0 : index
    %90 = vector.load %arg16[%c2_124, %c1_125, %c0_126] : memref<12x18x4xbf16, #tpu.memory_space<vmem>>, vector<8x16x4xbf16>
    tpu.vector_store %arg16[%c2_124, %c1_125, %c0_126], %89 {strides = array<i32>} : memref<12x18x4xbf16, #tpu.memory_space<vmem>>, vector<8x16x4xbf16>,
    %c0_127 = arith.constant 0 : index
    %c2_128 = arith.constant 2 : index
    %c0_129 = arith.constant 0 : index
    %c0_130 = arith.constant 0 : index
    %91 = vector.load %arg5[%c0_127, %c2_128, %c0_129, %c0_130] : memref<1x4x16x4xbf16, #tpu.memory_space<vmem>>, vector<1x2x16x4xbf16>
    %92 = vector.shape_cast %91 : vector<1x2x16x4xbf16> to vector<2x16x4xbf16>
    %c10 = arith.constant 10 : index
    %c1_131 = arith.constant 1 : index
    %c0_132 = arith.constant 0 : index
    %93 = vector.load %arg16[%c10, %c1_131, %c0_132] : memref<12x18x4xbf16, #tpu.memory_space<vmem>>, vector<2x16x4xbf16>
    tpu.vector_store %arg16[%c10, %c1_131, %c0_132], %92 {strides = array<i32>} : memref<12x18x4xbf16, #tpu.memory_space<vmem>>, vector<2x16x4xbf16>,
    %c0_133 = arith.constant 0 : index
    %c0_134 = arith.constant 0 : index
    %c0_135 = arith.constant 0 : index
    %94 = vector.load %arg15[%c0_133, %c0_134, %c0_135] : memref<12x18x4xbf16, #tpu.memory_space<vmem>>, vector<10x16x4xbf16>
    %c0_136 = arith.constant 0 : index
    %c1_137 = arith.constant 1 : index
    %c0_138 = arith.constant 0 : index
    %95 = vector.load %arg15[%c0_136, %c1_137, %c0_138] : memref<12x18x4xbf16, #tpu.memory_space<vmem>>, vector<10x16x4xbf16>
    %c0_139 = arith.constant 0 : index
    %c2_140 = arith.constant 2 : index
    %c0_141 = arith.constant 0 : index
    %96 = vector.load %arg15[%c0_139, %c2_140, %c0_141] : memref<12x18x4xbf16, #tpu.memory_space<vmem>>, vector<10x16x4xbf16>
    %c1_142 = arith.constant 1 : index
    %c0_143 = arith.constant 0 : index
    %c0_144 = arith.constant 0 : index
    %97 = vector.load %arg15[%c1_142, %c0_143, %c0_144] : memref<12x18x4xbf16, #tpu.memory_space<vmem>>, vector<10x16x4xbf16>
    %c1_145 = arith.constant 1 : index
    %c1_146 = arith.constant 1 : index
    %c0_147 = arith.constant 0 : index
    %98 = vector.load %arg15[%c1_145, %c1_146, %c0_147] : memref<12x18x4xbf16, #tpu.memory_space<vmem>>, vector<10x16x4xbf16>
    %c1_148 = arith.constant 1 : index
    %c2_149 = arith.constant 2 : index
    %c0_150 = arith.constant 0 : index
    %99 = vector.load %arg15[%c1_148, %c2_149, %c0_150] : memref<12x18x4xbf16, #tpu.memory_space<vmem>>, vector<10x16x4xbf16>
    %c2_151 = arith.constant 2 : index
    %c0_152 = arith.constant 0 : index
    %c0_153 = arith.constant 0 : index
    %100 = vector.load %arg15[%c2_151, %c0_152, %c0_153] : memref<12x18x4xbf16, #tpu.memory_space<vmem>>, vector<10x16x4xbf16>
    %c2_154 = arith.constant 2 : index
    %c1_155 = arith.constant 1 : index
    %c0_156 = arith.constant 0 : index
    %101 = vector.load %arg15[%c2_154, %c1_155, %c0_156] : memref<12x18x4xbf16, #tpu.memory_space<vmem>>, vector<10x16x4xbf16>
    %c2_157 = arith.constant 2 : index
    %c2_158 = arith.constant 2 : index
    %c0_159 = arith.constant 0 : index
    %102 = vector.load %arg15[%c2_157, %c2_158, %c0_159] : memref<12x18x4xbf16, #tpu.memory_space<vmem>>, vector<10x16x4xbf16>
    %103 = tpu.concatenate %94, %95, %96, %97, %98, %99, %100, %101, %102 in 2 : vector<10x16x4xbf16>, vector<10x16x4xbf16>, vector<10x16x4xbf16>, vector<10x16x4xbf16>, vector<10x16x4xbf16>, vector<10x16x4xbf16>, vector<10x16x4xbf16>, vector<10x16x4xbf16>, vector<10x16x4xbf16> -> vector<10x16x36xbf16>
    %104 = vector.shape_cast %103 : vector<10x16x36xbf16> to vector<160x36xbf16>
    %c0_160 = arith.constant 0 : index
    %c0_161 = arith.constant 0 : index
    %105 = vector.load %arg8[%c0_160, %c0_161] : memref<36x4xbf16, #tpu.memory_space<vmem>>, vector<36x4xbf16>
    %cst_162 = arith.constant dense<0.000000e+00> : vector<160x4xf32>
    %106 = tpu.matmul %104, %105, %cst_162 {dimension_numbers = #tpu.dot_dimension_numbers<[1], [0], [0], [1], [0, 0, 1, 1], [], []>} : vector<160x36xbf16>, vector<36x4xbf16>, vector<160x4xf32> -> vector<160x4xf32>
    %c0_163 = arith.constant 0 : index
    %c0_164 = arith.constant 0 : index
    %c0_165 = arith.constant 0 : index
    %107 = vector.load %arg16[%c0_163, %c0_164, %c0_165] : memref<12x18x4xbf16, #tpu.memory_space<vmem>>, vector<10x16x4xbf16>
    %c0_166 = arith.constant 0 : index
    %c1_167 = arith.constant 1 : index
    %c0_168 = arith.constant 0 : index
    %108 = vector.load %arg16[%c0_166, %c1_167, %c0_168] : memref<12x18x4xbf16, #tpu.memory_space<vmem>>, vector<10x16x4xbf16>
    %c0_169 = arith.constant 0 : index
    %c2_170 = arith.constant 2 : index
    %c0_171 = arith.constant 0 : index
    %109 = vector.load %arg16[%c0_169, %c2_170, %c0_171] : memref<12x18x4xbf16, #tpu.memory_space<vmem>>, vector<10x16x4xbf16>
    %c1_172 = arith.constant 1 : index
    %c0_173 = arith.constant 0 : index
    %c0_174 = arith.constant 0 : index
    %110 = vector.load %arg16[%c1_172, %c0_173, %c0_174] : memref<12x18x4xbf16, #tpu.memory_space<vmem>>, vector<10x16x4xbf16>
    %c1_175 = arith.constant 1 : index
    %c1_176 = arith.constant 1 : index
    %c0_177 = arith.constant 0 : index
    %111 = vector.load %arg16[%c1_175, %c1_176, %c0_177] : memref<12x18x4xbf16, #tpu.memory_space<vmem>>, vector<10x16x4xbf16>
    %c1_178 = arith.constant 1 : index
    %c2_179 = arith.constant 2 : index
    %c0_180 = arith.constant 0 : index
    %112 = vector.load %arg16[%c1_178, %c2_179, %c0_180] : memref<12x18x4xbf16, #tpu.memory_space<vmem>>, vector<10x16x4xbf16>
    %c2_181 = arith.constant 2 : index
    %c0_182 = arith.constant 0 : index
    %c0_183 = arith.constant 0 : index
    %113 = vector.load %arg16[%c2_181, %c0_182, %c0_183] : memref<12x18x4xbf16, #tpu.memory_space<vmem>>, vector<10x16x4xbf16>
    %c2_184 = arith.constant 2 : index
    %c1_185 = arith.constant 1 : index
    %c0_186 = arith.constant 0 : index
    %114 = vector.load %arg16[%c2_184, %c1_185, %c0_186] : memref<12x18x4xbf16, #tpu.memory_space<vmem>>, vector<10x16x4xbf16>
    %c2_187 = arith.constant 2 : index
    %c2_188 = arith.constant 2 : index
    %c0_189 = arith.constant 0 : index
    %115 = vector.load %arg16[%c2_187, %c2_188, %c0_189] : memref<12x18x4xbf16, #tpu.memory_space<vmem>>, vector<10x16x4xbf16>
    %116 = tpu.concatenate %107, %108, %109, %110, %111, %112, %113, %114, %115 in 2 : vector<10x16x4xbf16>, vector<10x16x4xbf16>, vector<10x16x4xbf16>, vector<10x16x4xbf16>, vector<10x16x4xbf16>, vector<10x16x4xbf16>, vector<10x16x4xbf16>, vector<10x16x4xbf16>, vector<10x16x4xbf16> -> vector<10x16x36xbf16>
    %117 = vector.shape_cast %116 : vector<10x16x36xbf16> to vector<160x36xbf16>
    %c0_190 = arith.constant 0 : index
    %c0_191 = arith.constant 0 : index
    %118 = vector.load %arg9[%c0_190, %c0_191] : memref<36x4xbf16, #tpu.memory_space<vmem>>, vector<36x4xbf16>
    %cst_192 = arith.constant dense<0.000000e+00> : vector<160x4xf32>
    %119 = tpu.matmul %117, %118, %cst_192 {dimension_numbers = #tpu.dot_dimension_numbers<[1], [0], [0], [1], [0, 0, 1, 1], [], []>} : vector<160x36xbf16>, vector<36x4xbf16>, vector<160x4xf32> -> vector<160x4xf32>
    %120 = arith.addf %106, %119 : vector<160x4xf32>
    %cst_193 = arith.constant 0.000000e+00 : bf16
    %121 = vector.broadcast %cst_193 : bf16 to vector<10x1x4xbf16>
    %c0_194 = arith.constant 0 : index
    %c0_195 = arith.constant 0 : index
    %c0_196 = arith.constant 0 : index
    %122 = vector.load %arg17[%c0_194, %c0_195, %c0_196] : memref<10x18x4xbf16, #tpu.memory_space<vmem>>, vector<10x1x4xbf16>
    tpu.vector_store %arg17[%c0_194, %c0_195, %c0_196], %121 {strides = array<i32>} : memref<10x18x4xbf16, #tpu.memory_space<vmem>>, vector<10x1x4xbf16>,
    %cst_197 = arith.constant 0.000000e+00 : bf16
    %123 = vector.broadcast %cst_197 : bf16 to vector<10x1x4xbf16>
    %c0_198 = arith.constant 0 : index
    %c17_199 = arith.constant 17 : index
    %c0_200 = arith.constant 0 : index
    %124 = vector.load %arg17[%c0_198, %c17_199, %c0_200] : memref<10x18x4xbf16, #tpu.memory_space<vmem>>, vector<10x1x4xbf16>
    tpu.vector_store %arg17[%c0_198, %c17_199, %c0_200], %123 {strides = array<i32>} : memref<10x18x4xbf16, #tpu.memory_space<vmem>>, vector<10x1x4xbf16>,
    %c0_201 = arith.constant 0 : index
    %c0_202 = arith.constant 0 : index
    %125 = vector.load %arg10[%c0_201, %c0_202] : memref<1x4xf32, #tpu.memory_space<vmem>>, vector<1x4xf32>
    %126 = vector.broadcast %125 : vector<1x4xf32> to vector<160x4xf32>
    %127 = arith.addf %120, %126 : vector<160x4xf32>
    %cst_203 = arith.constant 0.000000e+00 : f32
    %128 = vector.broadcast %cst_203 : f32 to vector<160x4xf32>
    %129 = arith.maximumf %127, %128 : vector<160x4xf32>
    %130 = vector.shape_cast %129 : vector<160x4xf32> to vector<10x16x4xf32>
    %131 = arith.truncf %130 : vector<10x16x4xf32> to vector<10x16x4xbf16>
    %c0_204 = arith.constant 0 : index
    %c1_205 = arith.constant 1 : index
    %c0_206 = arith.constant 0 : index
    %132 = vector.load %arg17[%c0_204, %c1_205, %c0_206] : memref<10x18x4xbf16, #tpu.memory_space<vmem>>, vector<10x16x4xbf16>
    tpu.vector_store %arg17[%c0_204, %c1_205, %c0_206], %131 {strides = array<i32>} : memref<10x18x4xbf16, #tpu.memory_space<vmem>>, vector<10x16x4xbf16>,
    %c0_i32_207 = arith.constant 0 : i32
    %133 = arith.cmpi eq, %arg1, %c0_i32_207 : i32
    %134 = arith.extui %133 : i1 to i32
    %c0_i32_208 = arith.constant 0 : i32
    %135 = arith.cmpi ne, %134, %c0_i32_208 : i32
    scf.if %135 {
      %cst_248 = arith.constant 0.000000e+00 : bf16
      %161 = vector.broadcast %cst_248 : bf16 to vector<1x18x4xbf16>
      %c0_249 = arith.constant 0 : index
      %c0_250 = arith.constant 0 : index
      %c0_251 = arith.constant 0 : index
      %162 = vector.load %arg17[%c0_249, %c0_250, %c0_251] : memref<10x18x4xbf16, #tpu.memory_space<vmem>>, vector<1x18x4xbf16>
      tpu.vector_store %arg17[%c0_249, %c0_250, %c0_251], %161 {strides = array<i32>} : memref<10x18x4xbf16, #tpu.memory_space<vmem>>, vector<1x18x4xbf16>,
    } else {
    }
    %c1_i32_209 = arith.constant 1 : i32
    %136 = arith.cmpi eq, %arg1, %c1_i32_209 : i32
    %137 = arith.extui %136 : i1 to i32
    %c0_i32_210 = arith.constant 0 : i32
    %138 = arith.cmpi ne, %137, %c0_i32_210 : i32
    scf.if %138 {
      %cst_248 = arith.constant 0.000000e+00 : bf16
      %161 = vector.broadcast %cst_248 : bf16 to vector<1x18x4xbf16>
      %c9_249 = arith.constant 9 : index
      %c0_250 = arith.constant 0 : index
      %c0_251 = arith.constant 0 : index
      %162 = vector.load %arg17[%c9_249, %c0_250, %c0_251] : memref<10x18x4xbf16, #tpu.memory_space<vmem>>, vector<1x18x4xbf16>
      tpu.vector_store %arg17[%c9_249, %c0_250, %c0_251], %161 {strides = array<i32>} : memref<10x18x4xbf16, #tpu.memory_space<vmem>>, vector<1x18x4xbf16>,
    } else {
    }
    %c0_211 = arith.constant 0 : index
    %c0_212 = arith.constant 0 : index
    %c0_213 = arith.constant 0 : index
    %139 = vector.load %arg17[%c0_211, %c0_212, %c0_213] : memref<10x18x4xbf16, #tpu.memory_space<vmem>>, vector<8x16x4xbf16>
    %c0_214 = arith.constant 0 : index
    %c1_215 = arith.constant 1 : index
    %c0_216 = arith.constant 0 : index
    %140 = vector.load %arg17[%c0_214, %c1_215, %c0_216] : memref<10x18x4xbf16, #tpu.memory_space<vmem>>, vector<8x16x4xbf16>
    %c0_217 = arith.constant 0 : index
    %c2_218 = arith.constant 2 : index
    %c0_219 = arith.constant 0 : index
    %141 = vector.load %arg17[%c0_217, %c2_218, %c0_219] : memref<10x18x4xbf16, #tpu.memory_space<vmem>>, vector<8x16x4xbf16>
    %c1_220 = arith.constant 1 : index
    %c0_221 = arith.constant 0 : index
    %c0_222 = arith.constant 0 : index
    %142 = vector.load %arg17[%c1_220, %c0_221, %c0_222] : memref<10x18x4xbf16, #tpu.memory_space<vmem>>, vector<8x16x4xbf16>
    %c1_223 = arith.constant 1 : index
    %c1_224 = arith.constant 1 : index
    %c0_225 = arith.constant 0 : index
    %143 = vector.load %arg17[%c1_223, %c1_224, %c0_225] : memref<10x18x4xbf16, #tpu.memory_space<vmem>>, vector<8x16x4xbf16>
    %c1_226 = arith.constant 1 : index
    %c2_227 = arith.constant 2 : index
    %c0_228 = arith.constant 0 : index
    %144 = vector.load %arg17[%c1_226, %c2_227, %c0_228] : memref<10x18x4xbf16, #tpu.memory_space<vmem>>, vector<8x16x4xbf16>
    %c2_229 = arith.constant 2 : index
    %c0_230 = arith.constant 0 : index
    %c0_231 = arith.constant 0 : index
    %145 = vector.load %arg17[%c2_229, %c0_230, %c0_231] : memref<10x18x4xbf16, #tpu.memory_space<vmem>>, vector<8x16x4xbf16>
    %c2_232 = arith.constant 2 : index
    %c1_233 = arith.constant 1 : index
    %c0_234 = arith.constant 0 : index
    %146 = vector.load %arg17[%c2_232, %c1_233, %c0_234] : memref<10x18x4xbf16, #tpu.memory_space<vmem>>, vector<8x16x4xbf16>
    %c2_235 = arith.constant 2 : index
    %c2_236 = arith.constant 2 : index
    %c0_237 = arith.constant 0 : index
    %147 = vector.load %arg17[%c2_235, %c2_236, %c0_237] : memref<10x18x4xbf16, #tpu.memory_space<vmem>>, vector<8x16x4xbf16>
    %148 = tpu.concatenate %139, %140, %141, %142, %143, %144, %145, %146, %147 in 2 : vector<8x16x4xbf16>, vector<8x16x4xbf16>, vector<8x16x4xbf16>, vector<8x16x4xbf16>, vector<8x16x4xbf16>, vector<8x16x4xbf16>, vector<8x16x4xbf16>, vector<8x16x4xbf16>, vector<8x16x4xbf16> -> vector<8x16x36xbf16>
    %149 = vector.shape_cast %148 : vector<8x16x36xbf16> to vector<128x36xbf16>
    %c0_238 = arith.constant 0 : index
    %c0_239 = arith.constant 0 : index
    %150 = vector.load %arg11[%c0_238, %c0_239] : memref<36x4xbf16, #tpu.memory_space<vmem>>, vector<36x4xbf16>
    %cst_240 = arith.constant dense<0.000000e+00> : vector<128x4xf32>
    %151 = tpu.matmul %149, %150, %cst_240 {dimension_numbers = #tpu.dot_dimension_numbers<[1], [0], [0], [1], [0, 0, 1, 1], [], []>} : vector<128x36xbf16>, vector<36x4xbf16>, vector<128x4xf32> -> vector<128x4xf32>
    %c0_241 = arith.constant 0 : index
    %c0_242 = arith.constant 0 : index
    %152 = vector.load %arg12[%c0_241, %c0_242] : memref<1x4xf32, #tpu.memory_space<vmem>>, vector<1x4xf32>
    %153 = vector.broadcast %152 : vector<1x4xf32> to vector<128x4xf32>
    %154 = arith.addf %151, %153 : vector<128x4xf32>
    %cst_243 = arith.constant 0.000000e+00 : f32
    %155 = vector.broadcast %cst_243 : f32 to vector<128x4xf32>
    %156 = arith.maximumf %154, %155 : vector<128x4xf32>
    %157 = vector.shape_cast %156 : vector<128x4xf32> to vector<8x16x4xf32>
    %c0_244 = arith.constant 0 : index
    %c0_245 = arith.constant 0 : index
    %c0_246 = arith.constant 0 : index
    %c0_247 = arith.constant 0 : index
    %158 = vector.load %arg13[%c0_244, %c0_245, %c0_246, %c0_247] : memref<1x8x16x4xf32, #tpu.memory_space<vmem>>, vector<1x8x16x4xf32>
    %159 = vector.shape_cast %158 : vector<1x8x16x4xf32> to vector<8x16x4xf32>
    %160 = vector.shape_cast %157 : vector<8x16x4xf32> to vector<1x8x16x4xf32>
    tpu.vector_store %arg13[%c0_244, %c0_245, %c0_246, %c0_247], %160 {strides = array<i32>} : memref<1x8x16x4xf32, #tpu.memory_space<vmem>>, vector<1x8x16x4xf32>,
    return
  }
  func.func @transform_0(%arg0: i32, %arg1: i32) -> (i32, i32, i32, i32) {
    %c0_i32 = arith.constant 0 : i32
    %c0_i32_0 = arith.constant 0 : i32
    %c0_i32_1 = arith.constant 0 : i32
    return %arg0, %arg1, %c0_i32, %c0_i32_0 : i32, i32, i32, i32
  }
  func.func @transform_1(%arg0: i32, %arg1: i32) -> (i32, i32, i32, i32) {
    %c0_i32 = arith.constant 0 : i32
    %c0_i32_0 = arith.constant 0 : i32
    %c0_i32_1 = arith.constant 0 : i32
    return %arg0, %arg1, %c0_i32, %c0_i32_0 : i32, i32, i32, i32
  }
  func.func @transform_2(%arg0: i32, %arg1: i32) -> (i32, i32, i32, i32) {
    %c2_i32 = arith.constant 2 : i32
    %0 = arith.muli %arg0, %c2_i32 : i32
    %1 = arith.addi %0, %arg1 : i32
    %c0_i32 = arith.constant 0 : i32
    %c0_i32_0 = arith.constant 0 : i32
    %c0_i32_1 = arith.constant 0 : i32
    %c0_i32_2 = arith.constant 0 : i32
    return %1, %c0_i32, %c0_i32_0, %c0_i32_1 : i32, i32, i32, i32
  }
  func.func @transform_3(%arg0: i32, %arg1: i32) -> (i32, i32, i32, i32) {
    %c2_i32 = arith.constant 2 : i32
    %0 = arith.muli %arg0, %c2_i32 : i32
    %1 = arith.addi %0, %arg1 : i32
    %c0_i32 = arith.constant 0 : i32
    %c0_i32_0 = arith.constant 0 : i32
    %c0_i32_1 = arith.constant 0 : i32
    %c0_i32_2 = arith.constant 0 : i32
    return %1, %c0_i32, %c0_i32_0, %c0_i32_1 : i32, i32, i32, i32
  }
  func.func @transform_4(%arg0: i32, %arg1: i32) -> (i32, i32, i32, i32) {
    %c0_i32 = arith.constant 0 : i32
    %c0_i32_0 = arith.constant 0 : i32
    %c0_i32_1 = arith.constant 0 : i32
    %c0_i32_2 = arith.constant 0 : i32
    %c0_i32_3 = arith.constant 0 : i32
    return %c0_i32, %c0_i32_0, %c0_i32_1, %c0_i32_2 : i32, i32, i32, i32
  }
  func.func @transform_5(%arg0: i32, %arg1: i32) -> (i32, i32) {
    %c0_i32 = arith.constant 0 : i32
    %c0_i32_0 = arith.constant 0 : i32
    %c0_i32_1 = arith.constant 0 : i32
    return %c0_i32, %c0_i32_0 : i32, i32
  }
  func.func @transform_6(%arg0: i32, %arg1: i32) -> (i32, i32) {
    %c0_i32 = arith.constant 0 : i32
    %c0_i32_0 = arith.constant 0 : i32
    %c0_i32_1 = arith.constant 0 : i32
    return %c0_i32, %c0_i32_0 : i32, i32
  }
  func.func @transform_7(%arg0: i32, %arg1: i32) -> (i32, i32) {
    %c0_i32 = arith.constant 0 : i32
    %c0_i32_0 = arith.constant 0 : i32
    %c0_i32_1 = arith.constant 0 : i32
    return %c0_i32, %c0_i32_0 : i32, i32
  }
  func.func @transform_8(%arg0: i32, %arg1: i32) -> (i32, i32) {
    %c0_i32 = arith.constant 0 : i32
    %c0_i32_0 = arith.constant 0 : i32
    %c0_i32_1 = arith.constant 0 : i32
    return %c0_i32, %c0_i32_0 : i32, i32
  }
  func.func @transform_9(%arg0: i32, %arg1: i32) -> (i32, i32) {
    %c0_i32 = arith.constant 0 : i32
    %c0_i32_0 = arith.constant 0 : i32
    %c0_i32_1 = arith.constant 0 : i32
    return %c0_i32, %c0_i32_0 : i32, i32
  }
  func.func @transform_10(%arg0: i32, %arg1: i32) -> (i32, i32) {
    %c0_i32 = arith.constant 0 : i32
    %c0_i32_0 = arith.constant 0 : i32
    %c0_i32_1 = arith.constant 0 : i32
    return %c0_i32, %c0_i32_0 : i32, i32
  }
  func.func @transform_11(%arg0: i32, %arg1: i32) -> (i32, i32, i32, i32) {
    %c0_i32 = arith.constant 0 : i32
    %c0_i32_0 = arith.constant 0 : i32
    %c0_i32_1 = arith.constant 0 : i32
    return %arg0, %arg1, %c0_i32, %c0_i32_0 : i32, i32, i32, i32
  }
}

</mosaic_0001>

<bundles_post_ra>
// kernel: unet_up_forward.1
= control target key start
LH: loop header
LB: loop body
LE: loop exit
PB: predicated region body
PF: predicated region fallthrough
CT: control target
= control target key end

     0   :  { %s11310_s17 = smov 0   ;;  %s11312_s18 = smov 0   ;;  %s15180_s0 = inlined_call_operand.vmem [shape: bf16[2,8,8,8], index: 0, kind: input, shape index: {}]   ;;  %s15181_s1 = inlined_call_operand.vmem [shape: bf16[2,16,16,4], index: 1, kind: input, shape index: {}]   ;;  %s15182_s2 = inlined_call_operand.vmem [shape: bf16[4,4,8,8], index: 2, kind: input, shape index: {}]   ;;  %s15183_s3 = inlined_call_operand.vmem [shape: bf16[4,4,16,4], index: 3, kind: input, shape index: {}]   ;;  %s15184_s4 = inlined_call_operand.vmem [shape: bf16[2,2,32,4], index: 4, kind: input, shape index: {}]   ;;  %s15185_s5 = inlined_call_operand.vmem [shape: f32[1,4], index: 5, kind: input, shape index: {}]   ;;  %s15186_s6 = inlined_call_operand.vmem [shape: bf16[36,4], index: 6, kind: input, shape index: {}]   ;;  %s15187_s7 = inlined_call_operand.vmem [shape: bf16[36,4], index: 7, kind: input, shape index: {}]   ;;  %s15188_s8 = inlined_call_operand.vmem [shape: f32[1,4], index: 8, kind: input, shape index: {}]   ;;  %s15189_s9 = inlined_call_operand.vmem [shape: bf16[36,4], index: 9, kind: input, shape index: {}]   ;;  %s15190_s10 = inlined_call_operand.vmem [shape: f32[1,4], index: 10, kind: input, shape index: {}]   ;;  %s15191_s11 = inlined_call_operand.vmem [shape: f32[2,16,16,4], index: 11, kind: output, shape index: {}]  }
   0x1   :  { %s11314_s19 = smov 0   ;;  %s11316_s20 = smov 0  }
   0x2   :  { %s11318_s21 = smov 0  }
   0x3 LB: > { %s30_s22 = sadd.s32 1, %s11224_s19  ;;  %s33_s23 = sadd.s32 1, %s11228_s20  ;;  %s11232_s21 = sphi %s11318_s21, %s21_s21   ;;  %s11228_s20 = sphi %s11316_s20, %s15287_s20   ;;  %s11224_s19 = sphi %s11314_s19, %s15286_s19   ;;  %s11220_s18 = sphi %s11312_s18, %s15285_s18   ;;  %s11216_s17 = sphi %s11310_s17, %s15284_s17  }
   0x4   : > { %p31_p0 = scmp.ge.s32.totalorder %s30_s22, 2  ;;  %p10070_p1 = scmp.ge.s32.totalorder %s11232_s21, 1 }
   0x5   : > { %p412_p2 = scmp.lt.s32.totalorder %s11232_s21, 5 }
   0x6   : > { %s15289_s22 = smov (%p31_p0, %s30_s22), 0  ;;  %s15291_s23 = smov (!%p31_p0, %s33_s23), %s11228_s20 }
   0x7   : > { %p413_p3 = pnand %p10070_p1, %p412_p2  ;;  %p35_p4 = scmp.ge.s32.totalorder %s15291_s23, 2 }
   0x9   : > { %s15293_s23 = smov (%p35_p4, %s15291_s23), 0  ;;  %416 = sbr.rel (%p413_p3) target bundleno = 1840 (0x730), region = 64 }
  0x10   : > { %s10078_s24 = sshll.u32 %s11220_s18, 1  ;;  %vm536_vm0 = vcmask 57344   ;;  %vm537_vm1 = vsmask.f32 256  ;;  %v542_v0 = vld [vmem:[#allocation2 + $0x8] sm:$0x1] }
  0x11   : > { %s507_s25 = sadd.s32 %s11216_s17, %s10078_s24  ;;  %vm11347_vm2 = vmand %vm536_vm0, %vm537_vm1  ;;  %vm563_vm3 = vsmask.f32 7938  ;;  %v568_v2 = vld [vmem:[#allocation2 + $0xc] sm:$0x1]  ;;  %s10071_s26 = sshll.u32 %s11216_s17, 2  ;;  %vm611_vm5 = vcmask 60416  }
  0x12   : > { %p508_p5 = scmp.lt.s32.totalorder %s507_s25, 3  ;;  %v543_v3 = vsel %vm11347_vm2, 0, %v542_v0  ;;  %vm11354_vm4 = vmand %vm536_vm0, %vm563_vm3  ;;  %v548_v5 = vld [vmem:[#allocation2 + $0x18] sm:$0x1]  ;;  %p486_p6 = scmp.lt.s32.totalorder %s11220_s18, 1  ;;  %vm11238_vm7 = vmmov 0  }
  0x13   : > { %544 = vst [vmem:[#allocation2 + $0x8] sm:$0x1] %v543_v3  ;;  %v569_v6 = vsel %vm11354_vm4, 0, %v568_v2  ;;  %p11364_p7 = scmp.lt.s32.totalorder %s10071_s26, 7  ;;  %v549_v7 = vsel %vm11347_vm2, 0, %v548_v5  ;;  %vm11411_vm6 = vmand %vm611_vm5, %vm563_vm3  ;;  %vm941_vm8 = vcmask 64512  }
  0x14   : > { %v574_v8 = vld [vmem:[#allocation2 + $0x1c] sm:$0x1]  ;;  %s15295_s25 = smov (!%p508_p5, %s507_s25), 3  ;;  %570 = vst [vmem:[#allocation2 + $0xc] sm:$0x1] %v569_v6  ;;  %s15297_s18 = smov (!%p486_p6, %s11220_s18), 1 }
  0x15   : > { %550 = vst [vmem:[#allocation2 + $0x18] sm:$0x1] %v549_v7  ;;  %v575_v9 = vsel %vm11354_vm4, 0, %v574_v8  ;;  %v545_v10 = vld [vmem:[#allocation2 + $0x10] sm:$0x1]  ;;  %s10552_s28 = sshll.u32 %s15295_s25, 4 }
  0x16   : > { %v539_v11 = vld [vmem:[#allocation2] sm:$0x1]  ;;  %576 = vst [vmem:[#allocation2 + $0x1c] sm:$0x1] %v575_v9  ;;  %v546_v12 = vsel %vm11347_vm2, 0, %v545_v10  ;;  %s10553_s29 = sshll.u32 %s15295_s25, 5  ;;  %s11384_s13 = scalar_lea.vmem %s15182_s2, %s10552_s28 }
  0x17   : > { %v540_v13 = vsel %vm11347_vm2, 0, %v539_v11  ;;  %v565_v14 = vld [vmem:[#allocation2 + $0x4] sm:$0x1]  ;;  %547 = vst [vmem:[#allocation2 + $0x10] sm:$0x1] %v546_v12  ;;  %s11389_s16 = scalar_lea.vmem %s15183_s3, %s10553_s29  ;;  %s15299_s26 = smov (!%p11364_p7, %s10071_s26), 7 }
  0x18   : > { %541 = vst [vmem:[#allocation2] sm:$0x1] %v540_v13  ;;  %v566_v15 = vsel %vm11354_vm4, 0, %v565_v14  ;;  %v551_v16 = vld [vmem:[#allocation2 + $0x20] sm:$0x1]  ;;  %s10072_s24 = sshll.u32 %s15297_s18, 3 }
  0x19   : > { %567 = vst [vmem:[#allocation2 + $0x4] sm:$0x1] %v566_v15  ;;  %v552_v17 = vsel %vm11347_vm2, 0, %v551_v16  ;;  %v577_v18 = vld [vmem:[#allocation2 + $0x24] sm:$0x1]  ;;  %s10074_s25 = sshll.u32 %s11216_s17, 3  ;;  %s491_s28 = sadd.s32 %s10072_s24, %s15299_s26 }
  0x1a   : > { %v571_v19 = vld [vmem:[#allocation2 + $0x14] sm:$0x1]  ;;  %v590_v20 = vld [vmem:[%s11384_s13 + $0x4] sm:$0xf]  ;;  %v589_v21 = vld [vmem:[%s11384_s13] sm:$0xf] }
  0x1b   : > { %553 = vst [vmem:[#allocation2 + $0x20] sm:$0x1] %v552_v17  ;;  %v578_v22 = vsel %vm11354_vm4, 0, %v577_v18  ;;  %v600_v23 = vshrl.u32 %v590_v20, 16  ;;  %v603_v24 = vshll.u32 %v590_v20, 16  ;;  %v592_v25 = vshrl.u32 %v589_v21, 16 }
  0x1c   : > { %v595_v26 = vshll.u32 %v589_v21, 16  ;;  %579 = vst [vmem:[#allocation2 + $0x24] sm:$0x1] %v578_v22  ;;  %p11403_p8 = scmp.lt.s32.totalorder %s10074_s25, 15  ;;  %v572_v27 = vsel %vm11354_vm4, 0, %v571_v19  ;;  %s10073_s27 = sshll.u32 %s491_s28, 2 }
  0x1d   : > { %v554_v28 = vld [vmem:[#allocation2 + $0x28] sm:$0x1]  ;;  %v602_v29 = vrot.slane %v600_v23, 7  ;;  %v594_v30 = vrot.slane %v592_v25, 7  ;;  %573 = vst [vmem:[#allocation2 + $0x14] sm:$0x1] %v572_v27  ;;  %s11418_s12 = scalar_lea.vmem %s15180_s0, %s10073_s27 }
  0x1e   : > { %v619_v32 = vld [vmem:[#allocation2 + $0x8] sm:$0xf]  ;;  %v622_v33 = vld [vmem:[#allocation2 + $0xc] sm:$0x1]  ;;  %s10076_s14 = sshll.u32 %s15297_s18, 5  ;;  %v555_v34 = vsel %vm11347_vm2, 0, %v554_v28 }
  0x1f   : > { %v605_v35 = vor.u32 %v603_v24, %v602_v29  ;;  %v606_v36 = vrot.slane %v602_v29, 4  ;;  %s15301_s25 = smov (!%p11403_p8, %s10074_s25), 15  ;;  %v626_v37 = vld [vmem:[%s11418_s12 + $0x4] sm:$0xf]  ;;  %v625_v38 = vld [vmem:[%s11418_s12] sm:$0xf]  ;;  %v597_v39 = vor.u32 %v595_v26, %v594_v30 }
  0x20   : > { %556 = vst [vmem:[#allocation2 + $0x28] sm:$0x1] %v555_v34  ;;  %v638_v40 = vshrl.u32 %v626_v37, 16  ;;  %v641_v41 = vshll.u32 %v626_v37, 16  ;;  %v630_v42 = vshrl.u32 %v625_v38, 16  ;;  %v633_v43 = vshll.u32 %v625_v38, 16 }
  0x21   : > { %v620_v44 = vsel %vm11411_vm6, %v605_v35, %v619_v32  ;;  %v623_v45 = vsel %vm11347_vm2, %v606_v36, %v622_v33  ;;  %s10075_s18 = sshll.u32 %s15301_s25, 1  ;;  %v676_v46 = vld [vmem:[#allocation2 + $0x18] sm:$0xf]  ;;  %v598_v47 = vrot.slane %v594_v30, 4  ;;  %v613_v48 = vld [vmem:[#allocation2] sm:$0xf] }
  0x22   : > { %v616_v49 = vld [vmem:[#allocation2 + $0x4] sm:$0x1]  ;;  %621 = vst [vmem:[#allocation2 + $0x8] sm:$0xf] %v620_v44  ;;  %624 = vst [vmem:[#allocation2 + $0xc] sm:$0x1] %v623_v45  ;;  %s502_s15 = sadd.s32 %s10076_s14, %s10075_s18  ;;  %v614_v53 = vsel %vm11411_vm6, %v597_v39, %v613_v48 }
  0x23   : > { %v640_v50 = vrot.slane %v638_v40, 7  ;;  %v679_v51 = vld [vmem:[#allocation2 + $0x1c] sm:$0x1]  ;;  %v632_v52 = vrot.slane %v630_v42, 7  ;;  %v627_v54 = vld [vmem:[%s11418_s12 + $0x8] sm:$0xf]  ;;  %v617_v56 = vsel %vm11347_vm2, %v598_v47, %v616_v49 }
  0x24   : > { %s10077_s24 = sshll.u32 %s502_s15, 2  ;;  %s10087_s28 = sshll.u32 %s502_s15, 3  ;;  %v670_v55 = vld [vmem:[#allocation2 + $0x10] sm:$0xf]  ;;  %615 = vst [vmem:[#allocation2] sm:$0xf] %v614_v53 }
  0x25   : > { %v646_v57 = vshrl.u32 %v627_v54, 16  ;;  %v649_v58 = vshll.u32 %v627_v54, 16  ;;  %s11439_s27 = scalar_lea.vmem %s15181_s1, %s10077_s24  ;;  %s11444_s14 = scalar_lea.vmem %s15191_s11, %s10087_s28  ;;  %v643_v59 = vor.u32 %v641_v41, %v640_v50  ;;  %v644_v60 = vrot.slane %v640_v50, 4  ;;  %618 = vst [vmem:[#allocation2 + $0x4] sm:$0x1] %v617_v56 }
  0x26   : > { %v635_v61 = vor.u32 %v633_v43, %v632_v52  ;;  %v636_v62 = vrot.slane %v632_v52, 4  ;;  %v673_v63 = vld [vmem:[#allocation2 + $0x14] sm:$0x1]  ;;  %v580_v0 = vld [vmem:[#allocation2 + $0x2c] sm:$0x1]  ;;  %s11234_s18 = smov 16  }
  0x27   : > { %v648_v2 = vrot.slane %v646_v57, 7  ;;  %v682_v3 = vld [vmem:[#allocation2 + $0x20] sm:$0xf]  ;;  %v581_v5 = vsel %vm11354_vm4, 0, %v580_v0  ;;  %v677_v6 = vsel %vm11411_vm6, %v643_v59, %v676_v46  ;;  %v680_v7 = vsel %vm11347_vm2, %v644_v60, %v679_v51  ;;  %v685_v9 = vld [vmem:[#allocation2 + $0x24] sm:$0x1] }
  0x28   : > { %v671_v8 = vsel %vm11411_vm6, %v635_v61, %v670_v55  ;;  %v674_v10 = vsel %vm11347_vm2, %v636_v62, %v673_v63  ;;  %582 = vst [vmem:[#allocation2 + $0x2c] sm:$0x1] %v581_v5  ;;  %v557_v11 = vld [vmem:[#allocation2 + $0x30] sm:$0x1]  ;;  %v583_v12 = vld [vmem:[#allocation2 + $0x34] sm:$0x1] }
  0x29   : > { %678 = vst [vmem:[#allocation2 + $0x18] sm:$0xf] %v677_v6  ;;  %681 = vst [vmem:[#allocation2 + $0x1c] sm:$0x1] %v680_v7  ;;  %v651_v13 = vor.u32 %v649_v58, %v648_v2  ;;  %v652_v14 = vrot.slane %v648_v2, 4  ;;  %v558_v15 = vsel %vm11347_vm2, 0, %v557_v11 }
  0x2a   : > { %672 = vst [vmem:[#allocation2 + $0x10] sm:$0xf] %v671_v8  ;;  %675 = vst [vmem:[#allocation2 + $0x14] sm:$0x1] %v674_v10  ;;  %v584_v16 = vsel %vm11354_vm4, 0, %v583_v12  ;;  %s11236_s15 = smov 24  }
  0x2b   : > { %v743_v17 = vld [vmem:[#allocation2 + $0x8] sm:$0xf]  ;;  %v683_v18 = vsel %vm11411_vm6, %v651_v13, %v682_v3  ;;  %v686_v19 = vsel %vm11347_vm2, %v652_v14, %v685_v9  ;;  %559 = vst [vmem:[#allocation2 + $0x30] sm:$0x1] %v558_v15  ;;  %585 = vst [vmem:[#allocation2 + $0x34] sm:$0x1] %v584_v16 }
  0x2c   : > { %v11464_v20 = vld [vmem:[#allocation2 + $0x8] sm:$0xf]  ;;  %v10096_v21 = vcombine.low %v743_v17, %v743_v17  ;;  %v11466_v22 = vld [vmem:[#allocation2] sm:$0xf]  ;;  %684 = vst [vmem:[#allocation2 + $0x20] sm:$0xf] %v683_v18 }
  0x2d   : > { %687 = vst [vmem:[#allocation2 + $0x24] sm:$0x1] %v686_v19  ;;  %v737_v23 = vld [vmem:[#allocation2 + $0xc] sm:$0x1]  ;;  %v736_v24 = vld [vmem:[#allocation2 + $0x4] sm:$0x1] }
  0x2e   : > { %857 = vrot.lane.b32.xlu1 %v10096_v21, %s11234_s18  ;;  %v11470_v25 = vcombine.low %v11466_v22, %v736_v24  ;;  %v11473_v26 = vcombine.low %v11464_v20, %v737_v23  ;;  %v11475_v27 = vld [vmem:[#allocation2 + $0xc] sm:$0x1]  ;;  %v1085_v51 = vld [vmem:[#allocation2 + $0x8] sm:$0xe]  ;;  %v1084_v5 = vld [vmem:[#allocation2] sm:$0xe] }
  0x2f   : > { %v11489_v39 = vcombine.low %v743_v17, %v11475_v27  ;;  %v628_v44 = vld [vmem:[%s11418_s12 + $0xc] sm:$0xf]  ;;  %v10088_v52 = vld [vmem:[%s11384_s13 + $0x8] sm:$0xf]  ;;  %v11523_v62 = vcombine.low %v1085_v51, %v737_v23  ;;  %s11235_s12 = smov 8   ;;  %v10116_v16 = vcombine.low %v1084_v5, %v736_v24  ;;  %vm973_vm9 = vcmask 195584  }
  0x30   : > { %v745_v28 = vld [vmem:[#allocation2 + $0x18] sm:$0xf]  ;;  %v788_v35 = vshll.u32 %v11470_v25, 16  ;;  %v795_v36 = vshll.u32 %v11473_v26, 16  ;;  %v11486_v38 = vld [vmem:[#allocation2 + $0x1c] sm:$0x1] }
  0x31   : > { %v744_v29 = vld [vmem:[#allocation2 + $0x10] sm:$0xf]  ;;  %v10098_v30 = vcombine.low %v745_v28, %v745_v28  ;;  %v11477_v33 = vld [vmem:[#allocation2 + $0x14] sm:$0x1]  ;;  %v11479_v34 = vld [vmem:[#allocation2 + $0x18] sm:$0xf] }
  0x32   : > { %v10097_v32 = vcombine.low %v744_v29, %v744_v29  ;;  %v11484_v37 = vcombine.low %v744_v29, %v11477_v33  ;;  %v786_v40 = vshrl.u32 %v11470_v25, 16  ;;  %v11498_v43 = vcombine.low %v11479_v34, %v11486_v38  ;;  %v11501_v47 = vld [vmem:[#allocation2 + $0x10] sm:$0xf]  ;;  %v11503_v48 = vld [vmem:[#allocation2 + $0x14] sm:$0x1]  ;;  %p10231_p9 = scmp.ne.s32.totalorder %s11216_s17, 0 }
  0x33   : > { %861 = vrot.lane.b32.xlu0 %v10098_v30, %s11234_s18  ;;  %v746_v41 = vld [vmem:[#allocation2 + $0x20] sm:$0xf]  ;;  %v790_v45 = vrot.slane %v788_v35, 1  ;;  %v890_v49 = vshll.u32 %v11489_v39, 16  ;;  %v11508_v53 = vld [vmem:[#allocation2 + $0x1c] sm:$0x1]  ;;  %v11521_v61 = vcombine.low %v11501_v47, %v11503_v48 }
  0x34   : > { %859 = vrot.lane.b32.xlu1 %v10097_v32, %s11234_s18  ;;  %v11494_v42 = vld [vmem:[#allocation2 + $0x24] sm:$0x1]  ;;  %v10099_v46 = vcombine.low %v746_v41, %v746_v41  ;;  %v897_v50 = vshll.u32 %v11484_v37, 16  ;;  %v793_v55 = vshrl.u32 %v11473_v26, 16  ;;  %v797_v56 = vrot.slane %v795_v36, 1 }
  0x35   : > { %v11511_v54 = vcombine.low %v746_v41, %v11494_v42  ;;  %v895_v57 = vshrl.u32 %v11484_v37, 16  ;;  %v791_v58 = vor.u32 %v790_v45, %v786_v40  ;;  %v809_v60 = vshll.u32 %v11498_v43, 16  ;;  %v1091_v17 = vld [vmem:[#allocation2 + $0x10] sm:$0xe]  ;;  %v688_v19 = vld [vmem:[#allocation2 + $0x28] sm:$0xf] }
  0x36   : > { %v899_v59 = vrot.slane %v897_v50, 1  ;;  %v654_v63 = vshrl.u32 %v628_v44, 16  ;;  %v11526_v0 = vcombine.low %v745_v28, %v11508_v53  ;;  %v888_v2 = vshrl.u32 %v11489_v39, 16  ;;  %v691_v29 = vld [vmem:[#allocation2 + $0x2c] sm:$0x1] }
  0x37   : > { %1168 = vrot.lane.b32.xlu0 %v11489_v39, %s11234_s18  ;;  %v892_v3 = vrot.slane %v890_v49, 1  ;;  %v698_v6 = vshrl.u32 %v10088_v52, 16  ;;  %v798_v7 = vor.u32 %v797_v56, %v793_v55  ;;  %v911_v8 = vshll.u32 %v11511_v54, 16  ;;  %v718_v41 = vld [vmem:[#allocation2 + $0x30] sm:$0xf] }
  0x38   : > { %863 = vrot.lane.b32.xlu1 %v10099_v46, %s11234_s18  ;;  %v657_v9 = vshll.u32 %v628_v44, 16  ;;  %v701_v10 = vshll.u32 %v10088_v52, 16  ;;  %v11533_v11 = vor.u32 %v899_v59, %v895_v57  ;;  %v807_v12 = vshrl.u32 %v11498_v43, 16  ;;  %v1090_v46 = vld [vmem:[#allocation2 + $0x8] sm:$0xe] }
  0x39   : > { %v811_v13 = vrot.slane %v809_v60, 1  ;;  %v802_v14 = vshll.u32 %v11521_v61, 16  ;;  %v1124_v15 = vshll.u32 %v11523_v62, 16  ;;  %v656_v18 = vrot.slane %v654_v63, 7  ;;  %v721_v50 = vld [vmem:[#allocation2 + $0x34] sm:$0x1] }
  0x3a   : > { %v11538_v21 = vor.u32 %v892_v3, %v888_v2  ;;  %v909_v23 = vshrl.u32 %v11511_v54, 16  ;;  %v904_v28 = vshll.u32 %v11526_v0, 16  ;;  %v700_v30 = vrot.slane %v698_v6, 7  ;;  %v11553_v60 = vld [vmem:[#allocation2 + $0x20] sm:$0xf] }
  0x3b   : > { %827 = vrot.lane.b32.xlu0 %v791_v58, %s11235_s12  ;;  %v800_v32 = vshrl.u32 %v11521_v61, 16  ;;  %v913_v35 = vrot.slane %v911_v8, 1  ;;  %v659_v36 = vor.u32 %v657_v9, %v656_v18  ;;  %v660_v40 = vrot.slane %v656_v18, 4 }
  0x3c   : > { %1170 = vrot.lane.b32.xlu1 %v11484_v37, %s11234_s18  ;;  %v812_v24 = vor.u32 %v811_v13, %v807_v12  ;;  %v804_v44 = vrot.slane %v802_v14, 1  ;;  %v10123_v45 = vcombine.low %v1091_v17, %v11477_v33  ;;  %v703_v49 = vor.u32 %v701_v10, %v700_v30  ;;  %v11555_v33 = vld [vmem:[#allocation2 + $0x24] sm:$0x1] }
  0x3d   : > { %v1122_v51 = vshrl.u32 %v11523_v62, 16  ;;  %v689_v52 = vsel %vm11411_vm6, %v659_v36, %v688_v19  ;;  %v692_v55 = vsel %vm11347_vm2, %v660_v40, %v691_v29  ;;  %v704_v56 = vrot.slane %v700_v30, 4 }
  0x3e   : > { %v902_v57 = vshrl.u32 %v11526_v0, 16  ;;  %v1126_v58 = vrot.slane %v1124_v15, 1  ;;  %v1117_v59 = vshll.u32 %v10116_v16, 16  ;;  %690 = vst [vmem:[#allocation2 + $0x28] sm:$0xf] %v689_v52  ;;  %v719_v62 = vsel %vm11411_vm6, %v703_v49, %v718_v41 }
  0x3f   : > { %829 = vrot.lane.b32.xlu0 %v798_v7, %s11235_s12  ;;  %693 = vst [vmem:[#allocation2 + $0x2c] sm:$0x1] %v692_v55  ;;  %v10122_v63 = vcombine.low %v1090_v46, %v11475_v27  ;;  %720 = vst [vmem:[#allocation2 + $0x30] sm:$0xf] %v719_v62  ;;  %v722_v2 = vsel %vm11347_vm2, %v704_v56, %v721_v50  ;;  %v805_v3 = vor.u32 %v804_v44, %v800_v32  ;;  %vm960_vm10 = vcmask 130048  }
  0x40   : > { %931 = vrot.lane.b32.xlu1 %v11533_v11, %s11236_s15  ;;  %v11565_v5 = vor.u32 %v913_v35, %v909_v23  ;;  %v906_v6 = vrot.slane %v904_v28, 1  ;;  %v1208_v7 = vshll.u32 %v10123_v45, 16  ;;  %723 = vst [vmem:[#allocation2 + $0x34] sm:$0x1] %v722_v2  ;;  %v1115_v8 = vshrl.u32 %v10116_v16, 16 }
  0x41   : > { %v1119_v9 = vrot.slane %v1117_v59, 1  ;;  %v1201_v10 = vshll.u32 %v10122_v63, 16  ;;  %v11569_v27 = vcombine.low %v11553_v60, %v11555_v33  ;;  %v1127_v13 = vor.u32 %v1126_v58, %v1122_v51  ;;  %v1086_v58 = vld [vmem:[#allocation2 + $0x10] sm:$0xe]  ;;  %v1093_v59 = vld [vmem:[#allocation2 + $0x20] sm:$0xe] }
  0x42   : > { %v11574_v12 = vor.u32 %v906_v6, %v902_v57  ;;  %v1206_v14 = vshrl.u32 %v10123_v45, 16  ;;  %v1210_v15 = vrot.slane %v1208_v7, 1  ;;  %v1199_v28 = vshrl.u32 %v10122_v63, 16 }
  0x43   : > { %929 = vrot.lane.b32.xlu0 %v11538_v21, %s11236_s15  ;;  %v1120_v23 = vor.u32 %v1119_v9, %v1115_v8  ;;  %v1203_v29 = vrot.slane %v1201_v10, 1  ;;  %v816_v30 = vshll.u32 %v11569_v27, 16  ;;  %v814_v49 = vshrl.u32 %v11569_v27, 16  ;;  %v560_v8 = vld [vmem:[#allocation2 + $0x38] sm:$0x1] }
  0x44   : > { %833 = vrot.lane.b32.xlu1 %v812_v24, %s11235_s12  ;;  %v11590_v35 = vor.u32 %v1210_v15, %v1206_v14  ;;  %v1087_v24 = vld [vmem:[#allocation2 + $0x18] sm:$0xe]  ;;  %v11617_v9 = vcombine.low %v1093_v59, %v11494_v42  ;;  %v586_v10 = vld [vmem:[#allocation2 + $0x3c] sm:$0x1]  ;;  %v561_v42 = vsel %vm11347_vm2, 0, %v560_v8  ;;  %vm15196_vm11 = vcmask 261120  }
  0x45   : > { %v11576_v17 = vld [vmem:[#allocation2 + $0x28] sm:$0xf]  ;;  %v818_v50 = vrot.slane %v816_v30, 1  ;;  %v10119_v51 = vcombine.low %v1087_v24, %v11486_v38  ;;  %v11604_v52 = vor.u32 %v1203_v29, %v1199_v28  ;;  %v10118_v38 = vcombine.low %v1086_v58, %v11503_v48  ;;  %v1092_v30 = vld [vmem:[#allocation2 + $0x18] sm:$0xe] }
  0x46   : > { %v11578_v18 = vld [vmem:[#allocation2 + $0x2c] sm:$0x1]  ;;  %v748_v19 = vld [vmem:[#allocation2 + $0x30] sm:$0xf]  ;;  %v747_v44 = vld [vmem:[#allocation2 + $0x28] sm:$0xf] }
  0x47   : > { %831 = vrot.lane.b32.xlu0 %v805_v3, %s11235_s12  ;;  %v11582_v16 = vcombine.low %v11576_v17, %v11578_v18  ;;  %v11585_v32 = vld [vmem:[#allocation2 + $0x34] sm:$0x1]  ;;  %v11597_v45 = vld [vmem:[#allocation2 + $0x2c] sm:$0x1]  ;;  %v819_v62 = vor.u32 %v818_v50, %v814_v49  ;;  %v1138_v63 = vshll.u32 %v10119_v51, 16  ;;  %v10101_v2 = vcombine.low %v748_v19, %v748_v19 }
  0x48   : > { %935 = vrot.lane.b32.xlu1 %v11565_v5, %s11236_s15  ;;  %v11595_v41 = vcombine.low %v748_v19, %v11585_v32  ;;  %v11607_v56 = vcombine.low %v747_v44, %v11597_v45  ;;  %v10100_v14 = vcombine.low %v747_v44, %v747_v44  ;;  %v1136_v15 = vshrl.u32 %v10119_v51, 16  ;;  %562 = vst [vmem:[#allocation2 + $0x38] sm:$0x1] %v561_v42  ;;  %v1094_v1 = vld [vmem:[#allocation2 + $0x28] sm:$0xe] }
  0x49   : > { %v821_v36 = vshrl.u32 %v11582_v16, 16  ;;  %v823_v40 = vshll.u32 %v11582_v16, 16  ;;  %v1140_v48 = vrot.slane %v1138_v63, 1  ;;  %v1222_v49 = vshll.u32 %v11617_v9, 16 }
  0x4a   : > { %v925_v57 = vshll.u32 %v11595_v41, 16  ;;  %v923_v3 = vshrl.u32 %v11595_v41, 16  ;;  %v918_v7 = vshll.u32 %v11607_v56, 16  ;;  %v916_v28 = vshrl.u32 %v11607_v56, 16 }
  0x4b   : > { %933 = vrot.lane.b32.xlu0 %v11574_v12, %s11236_s15  ;;  %v825_v46 = vrot.slane %v823_v40, 1  ;;  %v587_v40 = vsel %vm11354_vm4, 0, %v586_v10  ;;  %v10124_v50 = vcombine.low %v1092_v30, %v11508_v53  ;;  %v11237_v53 = vmov 0.0  }
  0x4c   : > { %1158 = vrot.lane.b32.xlu1 %v1127_v13, %s11235_s12  ;;  %v927_v6 = vrot.slane %v925_v57, 1  ;;  %v10089_v13 = vld [vmem:[%s11384_s13 + $0xc] sm:$0xf]  ;;  %v920_v29 = vrot.slane %v918_v7, 1  ;;  %588 = vst [vmem:[#allocation2 + $0x3c] sm:$0x1] %v587_v40  ;;  %v1141_v57 = vor.u32 %v1140_v48, %v1136_v15  ;;  %10655 = vmatprep.subr.bf16.mxu1 %v11237_v53 }
  0x4d   : > { %v826_v55 = vor.u32 %v825_v46, %v821_v36  ;;  %v1089_v36 = vld [vmem:[#allocation2 + $0x28] sm:$0xe]  ;;  %v706_v24 = vshrl.u32 %v10089_v13, 16  ;;  %v709_v44 = vshll.u32 %v10089_v13, 16  ;;  %v1129_v46 = vshrl.u32 %v10118_v38, 16  ;;  %10687 = vmatprep.subr.bf16.mxu0 %v11237_v53  ;;  %10659 = vmatprep.mubr.msk.bf16.mxu1 %vm11238_vm7, %v11237_v53 }
  0x4e   : > { %v11622_v19 = vor.u32 %v927_v6, %v923_v3  ;;  %v11637_v4 = vor.u32 %v920_v29, %v916_v28  ;;  %v10121_v59 = vcombine.low %v1089_v36, %v11578_v18  ;;  %v10918_v6 = vld [vmem:[%s15184_s4 + $0x8] sm:$0xff]   ;;  %v1220_v7 = vshrl.u32 %v11617_v9, 16  ;;  %10691 = vmatprep.mubr.msk.bf16.mxu0 %vm11238_vm7, %v11237_v53 }
  0x4f   : > { %1156 = vrot.lane.b32.xlu0 %v1120_v23, %s11235_s12  ;;  %v1131_v23 = vshll.u32 %v10118_v38, 16  ;;  %v708_v51 = vrot.slane %v706_v24, 7  ;;  %v1224_v8 = vrot.slane %v1222_v49, 1  ;;  %v724_v13 = vld [vmem:[#allocation2 + $0x38] sm:$0xf]  ;;  %v1213_v9 = vshrl.u32 %v10124_v50, 16 }
  0x50   : > { %1242 = vrot.lane.b32.xlu1 %v11590_v35, %s11236_s15  ;;  %v1152_v10 = vshll.u32 %v10121_v59, 16  ;;  %v1150_v29 = vshrl.u32 %v10121_v59, 16  ;;  %v10126_v49 = vcombine.low %v1094_v1, %v11597_v45  ;;  %v2702_v1 = vld [vmem:[#allocation2 + $0x20] sm:$0xe]  ;;  %vm1318_vm12 = vsmask.f32 3328 }
  0x51   : > { %v1133_v58 = vrot.slane %v1131_v23, 1  ;;  %v711_v63 = vor.u32 %v709_v44, %v708_v51  ;;  %v712_v38 = vrot.slane %v708_v51, 4  ;;  %v1225_v31 = vor.u32 %v1224_v8, %v1220_v7  ;;  %v2435_v7 = vld [vmem:[#allocation2 + $0x18] sm:$0xf] }
  0x52   : > { %v1154_v30 = vrot.slane %v1152_v10, 1  ;;  %v2434_v10 = vld [vmem:[#allocation2 + $0x10] sm:$0xf]  ;;  %vm1319_vm13 = vsmask.f32 7440  ;;  %vm15193_vm15 = vcmask 24576  }
  0x53   : > { %1240 = vrot.lane.b32.xlu0 %v11604_v52, %s11236_s15  ;;  %v1134_v18 = vor.u32 %v1133_v58, %v1129_v46  ;;  %v727_v15 = vld [vmem:[#allocation2 + $0x3c] sm:$0x1]  ;;  %v2701_v58 = vld [vmem:[#allocation2 + $0x18] sm:$0xe]  ;;  %vm11828_vm14 = vmor %vm1318_vm12, %vm1319_vm13  ;;  %vm2385_vm4 = vcmask 1040384   ;;  %vm15194_vm5 = vcmask 27648  }
  0x54   : > { %837 = vrot.lane.b32.xlu1 %v826_v55, %s11235_s12  ;;  %v10917_v55 = vld [vmem:[%s15184_s4] sm:$0xff]   ;;  %v728_v48 = vsel %vm11347_vm2, %v712_v38, %v727_v15  ;;  %v1155_v24 = vor.u32 %v1154_v30, %v1150_v29  ;;  %v2440_v38 = vld [vmem:[#allocation2 + $0x14] sm:$0x1]  ;;  %v2443_v15 = vld [vmem:[#allocation2 + $0x2c] sm:$0x1] }
  0x55   : > { %10656 = vmatpush3.bf16.msra.mxu1 %v10917_v55  ;;  %729 = vst [vmem:[#allocation2 + $0x3c] sm:$0x1] %v728_v48  ;;  %v1229_v55 = vshll.u32 %v10126_v49, 16  ;;  %v2703_v48 = vld [vmem:[#allocation2 + $0x28] sm:$0xe]  ;;  %vm11949_vm0 = vmand %vm15193_vm15, %vm537_vm1 }
  0x56   : > { %10657 = vmatprep.subr.bf16.mxu1 %v11237_v53  ;;  %v10179_v30 = vcombine.low %v2703_v48, %v2443_v15  ;;  %vm11955_vm2 = vmand %vm15193_vm15, %vm563_vm3 }
  0x57   : > { %835 = vrot.lane.b32.xlu0 %v819_v62, %s11235_s12  ;;  %v1088_v62 = vld [vmem:[#allocation2 + $0x20] sm:$0xe] }
  0x58   : > { %867 = vrot.lane.b32.xlu1 %v10101_v2, %s11234_s18  ;;  %v1215_v2 = vshll.u32 %v10124_v50, 16  ;;  %v10120_v3 = vcombine.low %v1088_v62, %v11555_v33  ;;  %v725_v33 = vsel %vm11411_vm6, %v711_v63, %v724_v13  ;;  %v1227_v62 = vshrl.u32 %v10126_v49, 16 }
  0x59   : > { %726 = vst [vmem:[#allocation2 + $0x38] sm:$0xf] %v725_v33  ;;  %10658 = vmatpush3.bf16.msra.mxu1 %v10918_v6  ;;  %v1231_v63 = vrot.slane %v1229_v55, 1  ;;  %vm4778_vm6 = vsmask.f32 4368 }
  0x5a   : > { %v1217_v23 = vrot.slane %v1215_v2, 1  ;;  %v1145_v28 = vshll.u32 %v10120_v3, 16  ;;  %10671 = vmatprep.subr.bf16.mxu1 %v11237_v53  ;;  %v1143_v40 = vshrl.u32 %v10120_v3, 16  ;;  %v2700_v2 = vld [vmem:[#allocation2 + $0x10] sm:$0xe]  ;;  %vm12255_vm12 = vmor %vm537_vm1, %vm4778_vm6 }
  0x5b   : > { %865 = vrot.lane.b32.xlu0 %v10100_v14, %s11234_s18  ;;  %v1095_v14 = vld [vmem:[#allocation2 + $0x30] sm:$0xe]  ;;  %v11679_v3 = vor.u32 %v1231_v63, %v1227_v62  ;;  %v10176_v6 = vcombine.low %v2700_v2, %v2440_v38  ;;  %v10926_v63 = vld [vmem:[%s15184_s4 + $0x28] sm:$0xff]  }
  0x5c   : > { %939 = vrot.lane.b32.xlu1 %v11622_v19, %s11236_s15  ;;  %v10127_v42 = vcombine.low %v1095_v14, %v11585_v32  ;;  %v1218_v36 = vor.u32 %v1217_v23, %v1213_v9  ;;  %v1147_v44 = vrot.slane %v1145_v28, 1  ;;  %v10158_v9 = vcombine.low %v2434_v10, %v2440_v38 }
  0x5d   : > { %v2751_v33 = vshll.u32 %v10176_v6, 16  ;;  %v2749_v28 = vshrl.u32 %v10176_v6, 16 }
  0x5e   : > { %v1236_v46 = vshll.u32 %v10127_v42, 16  ;;  %v1148_v32 = vor.u32 %v1147_v44, %v1143_v40  ;;  %v1234_v50 = vshrl.u32 %v10127_v42, 16  ;;  %v2442_v42 = vld [vmem:[#allocation2 + $0x24] sm:$0x1]  ;;  %v11690_v44 = vld [vmem:[#allocation2 + $0x28] sm:$0xf] }
  0x5f   : > { %937 = vrot.lane.b32.xlu0 %v11637_v4, %s11236_s15  ;;  %v2753_v29 = vrot.slane %v2751_v33, 1  ;;  %v10178_v40 = vcombine.low %v2702_v1, %v2442_v42  ;;  %v2509_v6 = vshll.u32 %v10158_v9, 16  ;;  %v11731_v1 = vld [vmem:[#allocation2 + $0x30] sm:$0xf] }
  0x60   : > { %1162 = vrot.lane.b32.xlu1 %v1141_v57, %s11235_s12  ;;  %v1238_v51 = vrot.slane %v1236_v46, 1  ;;  %v2441_v57 = vld [vmem:[#allocation2 + $0x1c] sm:$0x1]  ;;  %v2770_v46 = vshrl.u32 %v10179_v30, 16 }
  0x61   : > { %v10177_v45 = vcombine.low %v2701_v58, %v2441_v57  ;;  %v10159_v8 = vcombine.low %v2435_v7, %v2441_v57  ;;  %v2763_v57 = vshrl.u32 %v10178_v40, 16  ;;  %v2511_v48 = vrot.slane %v2509_v6, 1 }
  0x62   : > { %v11673_v59 = vor.u32 %v1238_v51, %v1234_v50  ;;  %v11697_v50 = vld [vmem:[#allocation2 + $0x20] sm:$0xf] }
  0x63   : > { %1160 = vrot.lane.b32.xlu0 %v1134_v18, %s11235_s12  ;;  %v2758_v18 = vshll.u32 %v10177_v45, 16  ;;  %v2756_v13 = vshrl.u32 %v10177_v45, 16  ;;  %v11703_v51 = vcombine.low %v11697_v50, %v2442_v42  ;;  %v10153_v45 = vcombine.low %v2435_v7, %v2435_v7 }
  0x64   : > { %1174 = vrot.lane.b32.xlu1 %v11511_v54, %s11234_s18  ;;  %v2514_v38 = vshrl.u32 %v10159_v8, 16 }
  0x65   : > { %v2760_v14 = vrot.slane %v2758_v18, 1  ;;  %v2445_v18 = vld [vmem:[#allocation2 + $0x3c] sm:$0x1] }
  0x67   : > { %1172 = vrot.lane.b32.xlu0 %v11526_v0, %s11234_s18  ;;  %v2761_v23 = vor.u32 %v2760_v14, %v2756_v13  ;;  %v2705_v13 = vld [vmem:[#allocation2 + $0x38] sm:$0xe]  ;;  %v10152_v14 = vcombine.low %v2434_v10, %v2434_v10 }
  0x68   : > { %1246 = vrot.lane.b32.xlu1 %v1225_v31, %s11236_s15 }
  0x6b   : > { %1244 = vrot.lane.b32.xlu0 %v1218_v36, %s11236_s15 }
  0x6c   : > { %1166 = vrot.lane.b32.xlu1 %v1155_v24, %s11235_s12  ;;  %v2772_v24 = vshll.u32 %v10179_v30, 16  ;;  %v11723_v30 = vld [vmem:[#allocation2 + $0x38] sm:$0xf] }
  0x6e   : > { %v2774_v49 = vrot.slane %v2772_v24, 1 }
  0x6f   : > { %1164 = vrot.lane.b32.xlu0 %v1148_v32, %s11235_s12  ;;  %v2765_v32 = vshll.u32 %v10178_v40, 16 }
  0x70   : > { %1178 = vrot.lane.b32.xlu1 %v11595_v41, %s11234_s18  ;;  %v2775_v55 = vor.u32 %v2774_v49, %v2770_v46 }
  0x71   : > { %v2767_v58 = vrot.slane %v2765_v32, 1 }
  0x73   : > { %1176 = vrot.lane.b32.xlu0 %v11607_v56, %s11234_s18  ;;  %v2768_v62 = vor.u32 %v2767_v58, %v2763_v57  ;;  %v10155_v57 = vcombine.low %v11690_v44, %v11690_v44 }
  0x74   : > { %1250 = vrot.lane.b32.xlu1 %v11673_v59, %s11236_s15 }
  0x77   : > { %1248 = vrot.lane.b32.xlu0 %v11679_v3, %s11236_s15 }
  0x78   : > { %2708 = vrot.lane.b32.xlu1 %v11590_v35, %s11235_s12  ;;  %v2754_v35 = vor.u32 %v2753_v29, %v2749_v28  ;;  %v2444_v28 = vld [vmem:[#allocation2 + $0x34] sm:$0x1]  ;;  %v2704_v29 = vld [vmem:[#allocation2 + $0x30] sm:$0xe] }
  0x79   : > { %v10180_v7 = vcombine.low %v2704_v29, %v2444_v28 }
  0x7b   : > { %2706 = vrot.lane.b32.xlu0 %v11604_v52, %s11235_s12  ;;  %v11695_v52 = vcombine.low %v11690_v44, %v2443_v15  ;;  %v2507_v15 = vshrl.u32 %v10158_v9, 16  ;;  %v2779_v42 = vshll.u32 %v10180_v7, 16  ;;  %v2777_v24 = vshrl.u32 %v10180_v7, 16 }
  0x7c   : > { %2720 = vrot.lane.b32.xlu1 %v10159_v8, %s11234_s18  ;;  %v10156_v7 = vcombine.low %v11731_v1, %v11731_v1 }
  0x7d   : > { %v2530_v32 = vshll.u32 %v11695_v52, 16  ;;  %v2528_v58 = vshrl.u32 %v11695_v52, 16 }
  0x7f   : > { %2718 = vrot.lane.b32.xlu0 %v10158_v9, %s11234_s18 }
  0x80   : > { %2792 = vrot.lane.b32.xlu1 %v2761_v23, %s11236_s15  ;;  %v10181_v23 = vcombine.low %v2705_v13, %v2445_v18 }
  0x82   : > { %v2784_v10 = vshrl.u32 %v10181_v23, 16 }
  0x83   : > { %2790 = vrot.lane.b32.xlu0 %v2754_v35, %s11236_s15  ;;  %v11738_v35 = vcombine.low %v11731_v1, %v2444_v28 }
  0x84   : > { %2712 = vrot.lane.b32.xlu1 %v1225_v31, %s11235_s12  ;;  %v10925_v31 = vld [vmem:[%s15184_s4 + $0x20] sm:$0xff]  }
  0x85   : > { %10688 = vmatpush3.bf16.msra.mxu0 %v10925_v31  ;;  %v2532_v31 = vrot.slane %v2530_v32, 1 }
  0x86   : > { %10689 = vmatprep.subr.bf16.mxu0 %v11237_v53 }
  0x87   : > { %2710 = vrot.lane.b32.xlu0 %v1218_v36, %s11235_s12  ;;  %v2516_v36 = vshll.u32 %v10159_v8, 16  ;;  %v2786_v8 = vshll.u32 %v10181_v23, 16 }
  0x88   : > { %2724 = vrot.lane.b32.xlu1 %v11695_v52, %s11234_s18 }
  0x89   : > { %v2518_v2 = vrot.slane %v2516_v36, 1  ;;  %10690 = vmatpush3.bf16.msra.mxu0 %v10926_v63  ;;  %v2788_v9 = vrot.slane %v2786_v8, 1 }
  0x8b   : > { %2722 = vrot.lane.b32.xlu0 %v11703_v51, %s11234_s18  ;;  %v2519_v33 = vor.u32 %v2518_v2, %v2514_v38  ;;  %v2789_v40 = vor.u32 %v2788_v9, %v2784_v10  ;;  %v2521_v38 = vshrl.u32 %v11703_v51, 16 }
  0x8c   : > { %2796 = vrot.lane.b32.xlu1 %v2775_v55, %s11236_s15 }
  0x8f   : > { %2794 = vrot.lane.b32.xlu0 %v2768_v62, %s11236_s15  ;;  %v2523_v62 = vshll.u32 %v11703_v51, 16 }
  0x90   : > { %2448 = vrot.lane.b32.xlu1 %v11533_v11, %s11235_s12  ;;  %v2512_v11 = vor.u32 %v2511_v48, %v2507_v15  ;;  %v10157_v15 = vcombine.low %v11723_v30, %v11723_v30 }
  0x91   : > { %v2525_v44 = vrot.slane %v2523_v62, 1 }
  0x93   : > { %2446 = vrot.lane.b32.xlu0 %v11538_v21, %s11235_s12  ;;  %v11729_v21 = vcombine.low %v11723_v30, %v2445_v18  ;;  %v2526_v6 = vor.u32 %v2525_v44, %v2521_v38 }
  0x94   : > { %2478 = vrot.lane.b32.xlu1 %v10153_v45, %s11234_s18  ;;  %v10154_v45 = vcombine.low %v11697_v50, %v11697_v50 }
  0x95   : > { %v2544_v18 = vshll.u32 %v11729_v21, 16  ;;  %v2542_v48 = vshrl.u32 %v11729_v21, 16 }
  0x97   : > { %2476 = vrot.lane.b32.xlu0 %v10152_v14, %s11234_s18  ;;  %v2537_v14 = vshll.u32 %v11738_v35, 16  ;;  %v2546_v23 = vrot.slane %v2544_v18, 1 }
  0x98   : > { %2550 = vrot.lane.b32.xlu1 %v2519_v33, %s11236_s15 }
  0x99   : > { %v2547_v30 = vor.u32 %v2546_v23, %v2542_v48  ;;  %v2539_v10 = vrot.slane %v2537_v14, 1 }
  0x9b   : > { %2548 = vrot.lane.b32.xlu0 %v2512_v11, %s11236_s15 }
  0x9c   : > { %2716 = vrot.lane.b32.xlu1 %v11673_v59, %s11235_s12  ;;  %v2781_v59 = vrot.slane %v2779_v42, 1 }
  0x9e   : > { %v2782_v49 = vor.u32 %v2781_v59, %v2777_v24 }
  0x9f   : > { %2714 = vrot.lane.b32.xlu0 %v11679_v3, %s11235_s12 }
  0xa0   : > { %2728 = vrot.lane.b32.xlu1 %v11729_v21, %s11234_s18  ;;  %v858_v46 = vpop.permute.xlu1 %857  ;;  %v2535_v21 = vshrl.u32 %v11738_v35, 16 }
  0xa3   : > { %2726 = vrot.lane.b32.xlu0 %v11738_v35, %s11234_s18 }
  0xa4   : > { %2800 = vrot.lane.b32.xlu1 %v2789_v40, %s11236_s15 }
  0xa5   : > { %v11744_v55 = vpop.permute.xlu0 %861 }
  0xa6   : > { %v860_v3 = vpop.permute.xlu1 %859 }
  0xa7   : > { %2798 = vrot.lane.b32.xlu0 %v2782_v49, %s11236_s15 }
  0xa8   : > { %2452 = vrot.lane.b32.xlu1 %v11565_v5, %s11235_s12  ;;  %v2533_v5 = vor.u32 %v2532_v31, %v2528_v58 }
  0xa9   : > { %v11753_v36 = vpop.permute.xlu0 %1168 }
  0xaa   : > { %v864_v63 = vpop.permute.xlu1 %863 }
  0xab   : > { %2450 = vrot.lane.b32.xlu0 %v11574_v12, %s11235_s12 }
  0xac   : > { %2482 = vrot.lane.b32.xlu1 %v10155_v57, %s11234_s18 }
  0xad   : > { %v828_v2 = vpop.permute.xlu0 %827 }
  0xae   : > { %v1171_v52 = vpop.permute.xlu1 %1170  ;;  %v944_v50 = vsel %vm941_vm8, %v11466_v22, %v828_v2 }
  0xaf   : > { %2480 = vrot.lane.b32.xlu0 %v10154_v45, %s11234_s18 }
  0xb0   : > { %2554 = vrot.lane.b32.xlu1 %v2533_v5, %s11236_s15 }
  0xb1   : > { %v830_v12 = vpop.permute.xlu0 %829 }
  0xb2   : > { %v932_v13 = vpop.permute.xlu1 %931  ;;  %v947_v51 = vsel %vm941_vm8, %v11464_v20, %v830_v12  ;;  %v962_v20 = vsel %vm960_vm10, %v944_v50, %v858_v46 }
  0xb3   : > { %2552 = vrot.lane.b32.xlu0 %v2526_v6, %s11236_s15  ;;  %v964_v33 = vsel %vm960_vm10, %v947_v51, %v860_v3 }
  0xb4   : > { %2456 = vrot.lane.b32.xlu1 %v11622_v19, %s11235_s12  ;;  %v977_v22 = vsel %vm973_vm9, %v964_v33, %v932_v13  ;;  %v10921_v19 = vld [vmem:[%s15184_s4 + $0x10] sm:$0xff]  }
  0xb5   : > { %v930_v28 = vpop.permute.xlu0 %929 }
  0xb6   : > { %v834_v29 = vpop.permute.xlu1 %833  ;;  %v975_v11 = vsel %vm973_vm9, %v962_v20, %v930_v28 }
  0xb7   : > { %v10108_v8 = vcombine.low %v975_v11, %v977_v22  ;;  %2454 = vrot.lane.b32.xlu0 %v11637_v4, %s11235_s12  ;;  %v953_v9 = vsel %vm941_vm8, %v11479_v34, %v834_v29  ;;  %v10922_v4 = vld [vmem:[%s15184_s4 + $0x18] sm:$0xff]   ;;  %v2540_v34 = vor.u32 %v2539_v10, %v2535_v21 }
  0xb8   : > { %2486 = vrot.lane.b32.xlu1 %v10157_v15, %s11234_s18  ;;  %v968_v35 = vsel %vm960_vm10, %v953_v9, %v864_v63 }
  0xb9   : > { %10660 = vmatmul.mubr.msk.bf16.vlgmr.msra.gmra.mrb[0].mxu1 %vm15196_vm11, %v10108_v8  ;;  %v832_v42 = vpop.permute.xlu0 %831 }
  0xba   : > { %v936_v1 = vpop.permute.xlu1 %935  ;;  %v950_v40 = vsel %vm941_vm8, %v11501_v47, %v832_v42  ;;  %10663 = vmatprep.mubr.msk.bf16.mxu1 %vm11238_vm7, %v11237_v53  ;;  %10672 = vmatpush3.bf16.msra.mxu1 %v10921_v19 }
  0xbb   : > { %2484 = vrot.lane.b32.xlu0 %v10156_v7, %s11234_s18  ;;  %v981_v24 = vsel %vm973_vm9, %v968_v35, %v936_v1  ;;  %10673 = vmatprep.subr.bf16.mxu1 %v11237_v53  ;;  %v966_v47 = vsel %vm960_vm10, %v950_v40, %v11744_v55 }
  0xbc   : > { %2558 = vrot.lane.b32.xlu1 %v2547_v30, %s11236_s15 }
  0xbd   : > { %v934_v59 = vpop.permute.xlu0 %933 }
  0xbe   : > { %v1159_v46 = vpop.permute.xlu1 %1158  ;;  %v979_v49 = vsel %vm973_vm9, %v966_v47, %v934_v59  ;;  %10674 = vmatpush3.bf16.msra.mxu1 %v10922_v4 }
  0xbf   : > { %v1255_v32 = vsel %vm941_vm8, %v11473_v26, %v1159_v46  ;;  %v10109_v3 = vcombine.low %v979_v49, %v981_v24  ;;  %2556 = vrot.lane.b32.xlu0 %v2540_v34, %s11236_s15  ;;  %10703 = vmatprep.subr.bf16.mxu1 %v11237_v53 }
  0xc0   : > { %v1267_v58 = vsel %vm960_vm10, %v1255_v32, %v1171_v52 }
  0xc1   : > { %10664 = vmatmul.mubr.msk.bf16.gmra.mrb[4].mxu1 %vm15196_vm11, %v10109_v3  ;;  %v1157_v57 = vpop.permute.xlu0 %1156  ;;  %v10923_v3 = vld [vmem:[%s15184_s4 + $0x30] sm:$0xff]  }
  0xc2   : > { %v1243_v31 = vpop.permute.xlu1 %1242  ;;  %v1253_v55 = vsel %vm941_vm8, %v11470_v25, %v1157_v57  ;;  %10667 = vmatprep.mubr.msk.bf16.mxu1 %vm11238_vm7, %v11237_v53 }
  0xc3   : > { %v1279_v62 = vsel %vm973_vm9, %v1267_v58, %v1243_v31  ;;  %v1265_v63 = vsel %vm960_vm10, %v1253_v55, %v11753_v36 }
  0xc4   : > { %v10130_v26 = vcombine.low %v1279_v62, %v1279_v62  ;;  %v10131_v48 = vcombine.high %v1279_v62, %v1279_v62 }
  0xc5   : > { %v1241_v45 = vpop.permute.xlu0 %1240 }
  0xc6   : > { %v838_v5 = vpop.permute.xlu1 %837  ;;  %v1277_v38 = vsel %vm973_vm9, %v1265_v63, %v1241_v45  ;;  %v1336_v2 = vshrl.u32 %v10130_v26, 16  ;;  %v1339_v52 = vshll.u32 %v10130_v26, 16  ;;  %v1345_v30 = vshll.u32 %v10131_v48, 16 }
  0xc7   : > { %v10128_v44 = vcombine.low %v1277_v38, %v1277_v38  ;;  %v10129_v23 = vcombine.high %v1277_v38, %v1277_v38  ;;  %v959_v36 = vsel %vm941_vm8, %v11576_v17, %v838_v5  ;;  %v10924_v38 = vld [vmem:[%s15184_s4 + $0x38] sm:$0xff]  }
  0xc8   : > { %v1338_v13 = vrot.slane %v1336_v2, 4  ;;  %v1341_v50 = vrot.slane %v1339_v52, 5  ;;  %v1347_v4 = vrot.slane %v1345_v30, 5 }
  0xc9   : > { %v1322_v6 = vshrl.u32 %v10128_v44, 16  ;;  %v1325_v18 = vshll.u32 %v10128_v44, 16  ;;  %v836_v12 = vpop.permute.xlu0 %835  ;;  %v1331_v21 = vshll.u32 %v10129_v23, 16 }
  0xca   : > { %v868_v25 = vpop.permute.xlu1 %867  ;;  %v1342_v20 = vor.u32 %v1341_v50, %v1338_v13  ;;  %v956_v29 = vsel %vm941_vm8, %v11553_v60, %v836_v12 }
  0xcb   : > { %v1324_v51 = vrot.slane %v1322_v6, 4  ;;  %v1327_v14 = vrot.slane %v1325_v18, 5  ;;  %v972_v22 = vsel %vm960_vm10, %v959_v36, %v868_v25  ;;  %v1333_v35 = vrot.slane %v1331_v21, 5 }
  0xcc   : > { %v1343_v9 = vrot.slane %v1342_v20, 4 }
  0xcd   : > { %v866_v33 = vpop.permute.xlu0 %865  ;;  %v1328_v28 = vor.u32 %v1327_v14, %v1324_v51 }
  0xce   : > { %v940_v15 = vpop.permute.xlu1 %939  ;;  %v970_v7 = vsel %vm960_vm10, %v956_v29, %v866_v33  ;;  %v1348_v34 = vsel %vm11828_vm14, %v1343_v9, %v1347_v4 }
  0xcf   : > { %v985_v11 = vsel %vm973_vm9, %v972_v22, %v940_v15  ;;  %v1329_v42 = vrot.slane %v1328_v28, 4 }
  0xd1   : > { %v938_v19 = vpop.permute.xlu0 %937  ;;  %v1334_v24 = vsel %vm11828_vm14, %v1329_v42, %v1333_v35 }
  0xd2   : > { %v1163_v8 = vpop.permute.xlu1 %1162  ;;  %v983_v10 = vsel %vm973_vm9, %v970_v7, %v938_v19  ;;  %v10144_v57 = vcombine.low %v1334_v24, %v1348_v34 }
  0xd3   : > { %v10110_v17 = vcombine.low %v983_v10, %v985_v11  ;;  %v1259_v47 = vsel %vm941_vm8, %v11498_v43, %v1163_v8 }
  0xd5   : > { %10668 = vmatmul.mubr.msk.bf16.gmra.mrb[8].mxu1 %vm15196_vm11, %v10110_v17  ;;  %v1161_v60 = vpop.permute.xlu0 %1160 }
  0xd6   : > { %v1175_v40 = vpop.permute.xlu1 %1174  ;;  %10675 = vmatprep.mubr.msk.bf16.mxu1 %vm11238_vm7, %v11237_v53  ;;  %v1257_v31 = vsel %vm941_vm8, %v11521_v61, %v1161_v60 }
  0xd7   : > { %v1271_v59 = vsel %vm960_vm10, %v1259_v47, %v1175_v40 }
  0xd9   : > { %v1173_v46 = vpop.permute.xlu0 %1172 }
  0xda   : > { %v1247_v49 = vpop.permute.xlu1 %1246  ;;  %v1269_v55 = vsel %vm960_vm10, %v1257_v31, %v1173_v46 }
  0xdb   : > { %v1283_v32 = vsel %vm973_vm9, %v1271_v59, %v1247_v49 }
  0xdc   : > { %v10134_v58 = vcombine.low %v1283_v32, %v1283_v32  ;;  %v10135_v62 = vcombine.high %v1283_v32, %v1283_v32 }
  0xdd   : > { %10676 = vmatmul.mubr.msk.bf16.vlgmr.msra.gmra.mrb[12].mxu1 %vm15196_vm11, %v10144_v57  ;;  %v1245_v63 = vpop.permute.xlu0 %1244 }
  0xde   : > { %v1364_v26 = vshrl.u32 %v10134_v58, 16  ;;  %v1367_v43 = vshll.u32 %v10134_v58, 16  ;;  %v1167_v45 = vpop.permute.xlu1 %1166  ;;  %v1281_v5 = vsel %vm973_vm9, %v1269_v55, %v1245_v63  ;;  %10679 = vmatprep.mubr.msk.bf16.mxu1 %vm11238_vm7, %v11237_v53  ;;  %10704 = vmatpush3.bf16.msra.mxu1 %v10923_v3  ;;  %v1373_v18 = vshll.u32 %v10135_v62, 16 }
  0xdf   : > { %v10132_v2 = vcombine.low %v1281_v5, %v1281_v5  ;;  %10705 = vmatprep.subr.bf16.mxu1 %v11237_v53  ;;  %v10133_v52 = vcombine.high %v1281_v5, %v1281_v5  ;;  %v1263_v48 = vsel %vm941_vm8, %v11582_v16, %v1167_v45 }
  0xe0   : > { %v1366_v61 = vrot.slane %v1364_v26, 4  ;;  %v1369_v44 = vrot.slane %v1367_v43, 5  ;;  %v1375_v23 = vrot.slane %v1373_v18, 5 }
  0xe1   : > { %v1350_v12 = vshrl.u32 %v10132_v2, 16  ;;  %v1353_v25 = vshll.u32 %v10132_v2, 16  ;;  %v1165_v13 = vpop.permute.xlu0 %1164  ;;  %v1359_v15 = vshll.u32 %v10133_v52, 16 }
  0xe2   : > { %v1370_v6 = vor.u32 %v1369_v44, %v1366_v61  ;;  %v1179_v50 = vpop.permute.xlu1 %1178  ;;  %10706 = vmatpush3.bf16.msra.mxu1 %v10924_v38  ;;  %v1261_v29 = vsel %vm941_vm8, %v11569_v27, %v1165_v13 }
  0xe3   : > { %v1352_v14 = vrot.slane %v1350_v12, 4  ;;  %v1355_v33 = vrot.slane %v1353_v25, 5  ;;  %v1275_v22 = vsel %vm960_vm10, %v1263_v48, %v1179_v50  ;;  %v1361_v8 = vrot.slane %v1359_v15, 5 }
  0xe4   : > { %v1371_v51 = vrot.slane %v1370_v6, 4 }
  0xe5   : > { %v1356_v36 = vor.u32 %v1355_v33, %v1352_v14  ;;  %v1177_v20 = vpop.permute.xlu0 %1176 }
  0xe6   : > { %v1251_v28 = vpop.permute.xlu1 %1250  ;;  %v1376_v7 = vsel %vm11828_vm14, %v1371_v51, %v1375_v23  ;;  %v1273_v21 = vsel %vm960_vm10, %v1261_v29, %v1177_v20 }
  0xe7   : > { %v1287_v11 = vsel %vm973_vm9, %v1275_v22, %v1251_v28  ;;  %v1357_v19 = vrot.slane %v1356_v36, 4 }
  0xe8   : > { %v10138_v30 = vcombine.low %v1287_v11, %v1287_v11  ;;  %v10139_v10 = vcombine.high %v1287_v11, %v1287_v11 }
  0xe9   : > { %v1362_v16 = vsel %vm11828_vm14, %v1357_v19, %v1361_v8  ;;  %v1249_v42 = vpop.permute.xlu0 %1248 }
  0xea   : > { %v1392_v17 = vshrl.u32 %v10138_v30, 16  ;;  %v1395_v9 = vshll.u32 %v10138_v30, 16  ;;  %v2709_v60 = vpop.permute.xlu1 %2708  ;;  %v1285_v27 = vsel %vm973_vm9, %v1273_v21, %v1249_v42  ;;  %v10145_v40 = vcombine.low %v1362_v16, %v1376_v7 }
  0xeb   : > { %v10136_v34 = vcombine.low %v1285_v27, %v1285_v27  ;;  %v10137_v24 = vcombine.high %v1285_v27, %v1285_v27  ;;  %v1401_v59 = vshll.u32 %v10139_v10, 16  ;;  %v2805_v62 = vsel %vm941_vm8, %v11484_v37, %v2709_v60 }
  0xec   : > { %v1394_v4 = vrot.slane %v1392_v17, 4  ;;  %v1397_v35 = vrot.slane %v1395_v9, 5  ;;  %10680 = vmatmul.mubr.msk.bf16.gmra.mrb[16].mxu1 %vm15196_vm11, %v10145_v40 }
  0xed   : > { %v1378_v46 = vshrl.u32 %v10136_v34, 16  ;;  %v1381_v49 = vshll.u32 %v10136_v34, 16  ;;  %v2707_v32 = vpop.permute.xlu0 %2706  ;;  %10683 = vmatprep.mubr.msk.bf16.mxu1 %vm11238_vm7, %v11237_v53  ;;  %v1387_v55 = vshll.u32 %v10137_v24, 16  ;;  %v1403_v26 = vrot.slane %v1401_v59, 5 }
  0xee   : > { %v1398_v47 = vor.u32 %v1397_v35, %v1394_v4  ;;  %v2721_v3 = vpop.permute.xlu1 %2720  ;;  %v2803_v38 = vsel %vm941_vm8, %v11489_v39, %v2707_v32 }
  0xef   : > { %v1380_v58 = vrot.slane %v1378_v46, 4  ;;  %v1383_v31 = vrot.slane %v1381_v49, 5  ;;  %v2817_v63 = vsel %vm960_vm10, %v2805_v62, %v2721_v3  ;;  %v1389_v52 = vrot.slane %v1387_v55, 5 }
  0xf0   : > { %v1399_v57 = vrot.slane %v1398_v47, 4 }
  0xf1   : > { %v1384_v43 = vor.u32 %v1383_v31, %v1380_v58  ;;  %v2719_v45 = vpop.permute.xlu0 %2718 }
  0xf2   : > { %v2793_v5 = vpop.permute.xlu1 %2792  ;;  %v1404_v44 = vsel %vm11828_vm14, %v1399_v57, %v1403_v26  ;;  %v2815_v18 = vsel %vm960_vm10, %v2803_v38, %v2719_v45 }
  0xf3   : > { %v2829_v61 = vsel %vm973_vm9, %v2817_v63, %v2793_v5  ;;  %v1385_v2 = vrot.slane %v1384_v43, 4 }
  0xf4   : > { %v10184_v6 = vcombine.low %v2829_v61, %v2829_v61  ;;  %v10185_v12 = vcombine.high %v2829_v61, %v2829_v61 }
  0xf5   : > { %v1390_v37 = vsel %vm11828_vm14, %v1385_v2, %v1389_v52  ;;  %v2791_v50 = vpop.permute.xlu0 %2790 }
  0xf6   : > { %v2883_v25 = vshrl.u32 %v10184_v6, 16  ;;  %v2886_v13 = vshll.u32 %v10184_v6, 16  ;;  %v2713_v51 = vpop.permute.xlu1 %2712  ;;  %v2827_v39 = vsel %vm973_vm9, %v2815_v18, %v2791_v50  ;;  %v10146_v14 = vcombine.low %v1390_v37, %v1404_v44 }
  0xf7   : > { %v10182_v48 = vcombine.low %v2827_v39, %v2827_v39  ;;  %v10183_v23 = vcombine.high %v2827_v39, %v2827_v39  ;;  %v2892_v22 = vshll.u32 %v10185_v12, 16  ;;  %v2809_v21 = vsel %vm941_vm8, %v11511_v54, %v2713_v51  ;;  %v10927_v12 = vld [vmem:[#allocation2 + $0x10] sm:$0xf] }
  0xf8   : > { %v2885_v33 = vrot.slane %v2883_v25, 4  ;;  %v2888_v15 = vrot.slane %v2886_v13, 5  ;;  %10684 = vmatmul.mubr.msk.bf16.gmra.mrb[20].mxu1 %vm15196_vm11, %v10146_v14  ;;  %v10928_v14 = vld [vmem:[#allocation2 + $0x8] sm:$0xf] }
  0xf9   : > { %v2869_v20 = vshrl.u32 %v10182_v48, 16  ;;  %v2872_v28 = vshll.u32 %v10182_v48, 16  ;;  %v2711_v29 = vpop.permute.xlu0 %2710  ;;  %10707 = vmatprep.mubr.msk.bf16.mxu1 %vm11238_vm7, %v11237_v53  ;;  %v2878_v30 = vshll.u32 %v10183_v23, 16  ;;  %v2894_v16 = vrot.slane %v2892_v22, 5 }
  0xfa   : > { %v2889_v36 = vor.u32 %v2888_v15, %v2885_v33  ;;  %v2725_v11 = vpop.permute.xlu1 %2724  ;;  %v2807_v60 = vsel %vm941_vm8, %v11526_v0, %v2711_v29 }
  0xfb   : > { %v2871_v19 = vrot.slane %v2869_v20, 4  ;;  %v2874_v8 = vrot.slane %v2872_v28, 5  ;;  %v2821_v17 = vsel %vm960_vm10, %v2809_v21, %v2725_v11  ;;  %v2880_v35 = vrot.slane %v2878_v30, 5 }
  0xfc   : > { %v2890_v7 = vrot.slane %v2889_v36, 4 }
  0xfd   : > { %v2875_v10 = vor.u32 %v2874_v8, %v2871_v19  ;;  %v2723_v9 = vpop.permute.xlu0 %2722 }
  0xfe   : > { %v2797_v42 = vpop.permute.xlu1 %2796  ;;  %v2895_v40 = vsel %vm11828_vm14, %v2890_v7, %v2894_v16  ;;  %v2819_v24 = vsel %vm960_vm10, %v2807_v60, %v2723_v9 }
  0xff   : > { %v2833_v27 = vsel %vm973_vm9, %v2821_v17, %v2797_v42  ;;  %v2876_v4 = vrot.slane %v2875_v10, 4 }
 0x100   : > { %v10188_v34 = vcombine.low %v2833_v27, %v2833_v27  ;;  %v10189_v47 = vcombine.high %v2833_v27, %v2833_v27 }
 0x101   : > { %v2881_v54 = vsel %vm11828_vm14, %v2876_v4, %v2880_v35  ;;  %v2795_v49 = vpop.permute.xlu0 %2794 }
 0x102   : > { %v2911_v59 = vshrl.u32 %v10188_v34, 16  ;;  %v2914_v46 = vshll.u32 %v10188_v34, 16  ;;  %v2449_v32 = vpop.permute.xlu1 %2448  ;;  %v10198_v3 = vcombine.low %v2881_v54, %v2895_v40  ;;  %v2831_v0 = vsel %vm973_vm9, %v2819_v24, %v2795_v49 }
 0x103   : > { %v10186_v31 = vcombine.low %v2831_v0, %v2831_v0  ;;  %v10187_v55 = vcombine.high %v2831_v0, %v2831_v0  ;;  %v2920_v26 = vshll.u32 %v10189_v47, 16  ;;  %v2565_v25 = vsel %vm941_vm8, %v10927_v12, %v2449_v32 }
 0x104   : > { %v2913_v57 = vrot.slane %v2911_v59, 4  ;;  %v2916_v58 = vrot.slane %v2914_v46, 5  ;;  %10708 = vmatmul.mubr.msk.bf16.vlgmr.msra.gmra.mrb[24].mxu1 %vm15196_vm11, %v10198_v3 }
 0x105   : > { %v2897_v43 = vshrl.u32 %v10186_v31, 16  ;;  %v2900_v63 = vshll.u32 %v10186_v31, 16  ;;  %v2447_v45 = vpop.permute.xlu0 %2446  ;;  %10711 = vmatprep.mubr.msk.bf16.mxu1 %vm11238_vm7, %v11237_v53  ;;  %v2906_v2 = vshll.u32 %v10187_v55, 16  ;;  %v2922_v52 = vrot.slane %v2920_v26, 5 }
 0x106   : > { %v2917_v62 = vor.u32 %v2916_v58, %v2913_v57  ;;  %v2479_v5 = vpop.permute.xlu1 %2478  ;;  %v2562_v33 = vsel %vm941_vm8, %v10928_v14, %v2447_v45 }
 0x107   : > { %v2899_v61 = vrot.slane %v2897_v43, 4  ;;  %v2902_v44 = vrot.slane %v2900_v63, 5  ;;  %v2908_v51 = vrot.slane %v2906_v2, 5  ;;  %v2581_v39 = vsel %vm960_vm10, %v2565_v25, %v2479_v5  ;;  %v10929_v43 = vld [vmem:[#allocation2 + $0x20] sm:$0xf] }
 0x108   : > { %v2918_v38 = vrot.slane %v2917_v62, 4 }
 0x109   : > { %v2903_v6 = vor.u32 %v2902_v44, %v2899_v61  ;;  %v2477_v18 = vpop.permute.xlu0 %2476  ;;  %v10930_v44 = vld [vmem:[#allocation2 + $0x18] sm:$0xf] }
 0x10a   : > { %v2551_v37 = vpop.permute.xlu1 %2550  ;;  %v2923_v13 = vsel %vm11828_vm14, %v2918_v38, %v2922_v52  ;;  %v2579_v23 = vsel %vm960_vm10, %v2562_v33, %v2477_v18  ;;  %v10931_v33 = vld [vmem:[#allocation2 + $0x30] sm:$0xf] }
 0x10b   : > { %v2904_v50 = vrot.slane %v2903_v6, 4  ;;  %v2593_v15 = vsel %vm973_vm9, %v2581_v39, %v2551_v37 }
 0x10d   : > { %v2909_v48 = vsel %vm11828_vm14, %v2904_v50, %v2908_v51  ;;  %v2549_v36 = vpop.permute.xlu0 %2548 }
 0x10e   : > { %v2717_v22 = vpop.permute.xlu1 %2716  ;;  %v2591_v20 = vsel %vm973_vm9, %v2579_v23, %v2549_v36  ;;  %v10199_v28 = vcombine.low %v2909_v48, %v2923_v13  ;;  %v10932_v23 = vld [vmem:[#allocation2 + $0x28] sm:$0xf] }
 0x10f   : > { %v10168_v29 = vcombine.low %v2591_v20, %v2593_v15  ;;  %v2813_v19 = vsel %vm941_vm8, %v11595_v41, %v2717_v22 }
 0x110   : > { %10712 = vmatmul.mubr.msk.bf16.gmra.mrb[28].mxu1 %vm15196_vm11, %v10199_v28 }
 0x111   : > { %10692 = vmatmul.mubr.msk.bf16.vlgmr.msra.gmra.mrb[0].mxu0 %vm15196_vm11, %v10168_v29  ;;  %v2715_v11 = vpop.permute.xlu0 %2714  ;;  %10715 = vmatprep.mubr.msk.bf16.mxu1 %vm11238_vm7, %v11237_v53 }
 0x112   : > { %v2729_v7 = vpop.permute.xlu1 %2728  ;;  %10695 = vmatprep.mubr.msk.bf16.mxu0 %vm11238_vm7, %v11237_v53  ;;  %v2811_v17 = vsel %vm941_vm8, %v11607_v56, %v2715_v11 }
 0x113   : > { %v2825_v8 = vsel %vm960_vm10, %v2813_v19, %v2729_v7  ;;  %v4105_v19 = vld [vmem:[#allocation3] sm:$0x1] }
 0x115   : > { %v2727_v30 = vpop.permute.xlu0 %2726 }
 0x116   : > { %v2801_v21 = vpop.permute.xlu1 %2800  ;;  %v2823_v9 = vsel %vm960_vm10, %v2811_v17, %v2727_v30  ;;  %v4106_v30 = vsel %vm11949_vm0, 0, %v4105_v19 }
 0x117   : > { %v2837_v16 = vsel %vm973_vm9, %v2825_v8, %v2801_v21  ;;  %v4142_v8 = vld [vmem:[#allocation3 + $0x8] sm:$0x1]  ;;  %4107 = vst [vmem:[#allocation3] sm:$0x1] %v4106_v30 }
 0x118   : > { %v10192_v10 = vcombine.low %v2837_v16, %v2837_v16  ;;  %v10193_v42 = vcombine.high %v2837_v16, %v2837_v16  ;;  %v4143_v21 = vsel %vm11955_vm2, 0, %v4142_v8  ;;  %v4111_v16 = vld [vmem:[#allocation3 + $0x18] sm:$0x1] }
 0x119   : > { %v2799_v40 = vpop.permute.xlu0 %2798  ;;  %4144 = vst [vmem:[#allocation3 + $0x8] sm:$0x1] %v4143_v21  ;;  %v4112_v17 = vsel %vm11949_vm0, 0, %v4111_v16 }
 0x11a   : > { %v2939_v60 = vshrl.u32 %v10192_v10, 16  ;;  %v2942_v27 = vshll.u32 %v10192_v10, 16  ;;  %v2453_v4 = vpop.permute.xlu1 %2452  ;;  %v2835_v35 = vsel %vm973_vm9, %v2823_v9, %v2799_v40  ;;  %v2948_v59 = vshll.u32 %v10193_v42, 16  ;;  %v4148_v10 = vld [vmem:[#allocation3 + $0x20] sm:$0x1] }
 0x11b   : > { %v10190_v24 = vcombine.low %v2835_v35, %v2835_v35  ;;  %v10191_v54 = vcombine.high %v2835_v35, %v2835_v35  ;;  %v2571_v63 = vsel %vm941_vm8, %v10929_v43, %v2453_v4  ;;  %v4149_v9 = vsel %vm11955_vm2, 0, %v4148_v10  ;;  %4113 = vst [vmem:[#allocation3 + $0x18] sm:$0x1] %v4112_v17  ;;  %v4117_v42 = vld [vmem:[#allocation3 + $0x30] sm:$0x1] }
 0x11c   : > { %v2941_v41 = vrot.slane %v2939_v60, 4  ;;  %v2944_v34 = vrot.slane %v2942_v27, 5  ;;  %v2950_v31 = vrot.slane %v2948_v59, 5  ;;  %4150 = vst [vmem:[#allocation3 + $0x20] sm:$0x1] %v4149_v9  ;;  %v4118_v27 = vsel %vm11949_vm0, 0, %v4117_v42 }
 0x11d   : > { %v2925_v46 = vshrl.u32 %v10190_v24, 16  ;;  %v2928_v49 = vshll.u32 %v10190_v24, 16  ;;  %v2451_v32 = vpop.permute.xlu0 %2450  ;;  %v2934_v58 = vshll.u32 %v10191_v54, 16  ;;  %v4154_v60 = vld [vmem:[#allocation3 + $0x38] sm:$0x1] }
 0x11e   : > { %v2945_v47 = vor.u32 %v2944_v34, %v2941_v41  ;;  %v2483_v3 = vpop.permute.xlu1 %2482  ;;  %v2568_v2 = vsel %vm941_vm8, %v10930_v44, %v2451_v32  ;;  %v4155_v40 = vsel %vm11955_vm2, 0, %v4154_v60  ;;  %4119 = vst [vmem:[#allocation3 + $0x30] sm:$0x1] %v4118_v27  ;;  %v4123_v4 = vld [vmem:[#allocation3 + $0x48] sm:$0x1] }
 0x11f   : > { %v2927_v0 = vrot.slane %v2925_v46, 4  ;;  %v2930_v57 = vrot.slane %v2928_v49, 5  ;;  %v2936_v38 = vrot.slane %v2934_v58, 5  ;;  %v2585_v61 = vsel %vm960_vm10, %v2571_v63, %v2483_v3  ;;  %4156 = vst [vmem:[#allocation3 + $0x38] sm:$0x1] %v4155_v40 }
 0x120   : > { %v2946_v56 = vrot.slane %v2945_v47, 4  ;;  %v4160_v35 = vld [vmem:[#allocation3 + $0x50] sm:$0x1]  ;;  %v4124_v41 = vsel %vm11949_vm0, 0, %v4123_v4  ;;  %v4129_v24 = vld [vmem:[#allocation3 + $0x60] sm:$0x1] }
 0x121   : > { %v2931_v55 = vor.u32 %v2930_v57, %v2927_v0  ;;  %v2481_v62 = vpop.permute.xlu0 %2480  ;;  %v4161_v34 = vsel %vm11955_vm2, 0, %v4160_v35  ;;  %4125 = vst [vmem:[#allocation3 + $0x48] sm:$0x1] %v4124_v41  ;;  %v4166_v54 = vld [vmem:[#allocation3 + $0x68] sm:$0x1]  ;;  %v4130_v47 = vsel %vm11949_vm0, 0, %v4129_v24 }
 0x122   : > { %v2555_v26 = vpop.permute.xlu1 %2554  ;;  %v2951_v45 = vsel %vm11828_vm14, %v2946_v56, %v2950_v31  ;;  %v2583_v18 = vsel %vm960_vm10, %v2568_v2, %v2481_v62  ;;  %4162 = vst [vmem:[#allocation3 + $0x50] sm:$0x1] %v4161_v34  ;;  %v4167_v59 = vsel %vm11955_vm2, 0, %v4166_v54  ;;  %4131 = vst [vmem:[#allocation3 + $0x60] sm:$0x1] %v4130_v47  ;;  %v1507_v56 = vlaneseq }
 0x123   : > { %v2932_v5 = vrot.slane %v2931_v55, 4  ;;  %v2597_v52 = vsel %vm973_vm9, %v2585_v61, %v2555_v26  ;;  %4168 = vst [vmem:[#allocation3 + $0x68] sm:$0x1] %v4167_v59  ;;  %v4135_v49 = vld [vmem:[#allocation3 + $0x78] sm:$0x1] }
 0x124   : > { %v11239_v32 = vmov 1966171168   ;;  %v4136_v57 = vsel %vm11949_vm0, 0, %v4135_v49  ;;  %v4172_v58 = vld [vmem:[#allocation3 + $0x80] sm:$0x1]  ;;  %v1508_v43 = vshrl.u32 %v1507_v56, 7 }
 0x125   : > { %v2937_v6 = vsel %vm11828_vm14, %v2932_v5, %v2936_v38  ;;  %v2553_v37 = vpop.permute.xlu0 %2552  ;;  %v1505_v3 = vunpack.c.l.s4 %v11239_v32  ;;  %4137 = vst [vmem:[#allocation3 + $0x78] sm:$0x1] %v4136_v57  ;;  %v4173_v55 = vsel %vm11955_vm2, 0, %v4172_v58  ;;  %v4108_v32 = vld [vmem:[#allocation3 + $0xc] sm:$0x1] }
 0x126   : > { %v2457_v12 = vpop.permute.xlu1 %2456  ;;  %v2595_v25 = vsel %vm973_vm9, %v2583_v18, %v2553_v37  ;;  %v10200_v13 = vcombine.low %v2937_v6, %v2951_v45  ;;  %4174 = vst [vmem:[#allocation3 + $0x80] sm:$0x1] %v4173_v55  ;;  %v11240_v45 = vmov 1983009808   ;;  %v10206_v37 = vld [vmem:[%s15185_s5] ss:$0 sm:$0xff] }
 0x127   : > { %v10169_v50 = vcombine.low %v2595_v25, %v2597_v52  ;;  %v2577_v15 = vsel %vm941_vm8, %v10931_v33, %v2457_v12  ;;  %v1506_v26 = vunpack.c.0.s8 %v1505_v3  ;;  %v3988_v5 = vunpack.c.l.s4 %v11240_v45  ;;  %v4145_v3 = vld [vmem:[#allocation3 + $0x14] sm:$0x1] }
 0x128   : > { %10716 = vmatmul.mubr.msk.bf16.gmra.mrb[32].mxu1 %vm15196_vm11, %v10200_v13  ;;  %v3986_v13 = vcombine.high %v10206_v37, %v10206_v37  ;;  %v12021_v10 = vsub.s32 0, %v1508_v43  ;;  %v4109_v58 = vsel %vm11949_vm0, 0, %v4108_v32 }
 0x129   : > { %10696 = vmatmul.mubr.msk.bf16.gmra.mrb[4].mxu0 %vm15196_vm11, %v10169_v50  ;;  %v2455_v51 = vpop.permute.xlu0 %2454  ;;  %v11983_v38 = vsub.s32 %v1506_v26, %v1508_v43  ;;  %v3989_v6 = vunpack.c.0.s8 %v3988_v5  ;;  %4110 = vst [vmem:[#allocation3 + $0xc] sm:$0x1] %v4109_v58 }
 0x12a   : > { %v2487_v39 = vpop.permute.xlu1 %2486  ;;  %10699 = vmatprep.mubr.msk.bf16.mxu0 %vm11238_vm7, %v11237_v53  ;;  %v2574_v36 = vsel %vm941_vm8, %v10932_v23, %v2455_v51  ;;  %vm12245_vm7 = vmand %vm15194_vm5, %vm563_vm3 }
 0x12b   : > { %v2589_v48 = vsel %vm960_vm10, %v2577_v15, %v2487_v39  ;;  %v11990_v50 = vsub.s32 %v3989_v6, %v1508_v43 }
 0x12d   : > { %v2485_v14 = vpop.permute.xlu0 %2484  ;;  %v11996_v23 = vrot.slane %v10206_v37, %v11990_v50 }
 0x12e   : > { %v2559_v1 = vpop.permute.xlu1 %2558  ;;  %v2587_v20 = vsel %vm960_vm10, %v2574_v36, %v2485_v14  ;;  %v11999_v36 = vrot.slane %v3986_v13, %v11990_v50 }
 0x12f   : > { %v2601_v22 = vsel %vm973_vm9, %v2589_v48, %v2559_v1  ;;  %v12026_v42 = vcombine.high %v11996_v23, %v11996_v23 }
 0x130   : > { %v12030_v60 = vcombine.high %v11999_v36, %v11999_v36 }
 0x131   : > { %v2557_v28 = vpop.permute.xlu0 %2556 }
 0x132   : > { %v2599_v29 = vsel %vm973_vm9, %v2587_v20, %v2557_v28 }
 0x133   : > { %v10170_v11 = vcombine.low %v2599_v29, %v2601_v22 }
 0x135   : > { %10700 = vmatmul.mubr.msk.bf16.gmra.mrb[8].mxu0 %vm15196_vm11, %v10170_v11 }
 0x18c   : > { %v1061_v46 = vpop.f32.mrb[0].mxu1 }
 0x18d   : > { %v10661_v0 = vpop.f32.mrb[1].mxu1  ;;  %v1503_v2 = vcombine.high %v1061_v46, %v1061_v46  ;;  %v1510_v18 = vrot.slane %v1061_v46, %v11983_v38 }
 0x18e   : > { %v1064_v31 = vpop.f32.mrb[2].mxu1 }
 0x18f   : > { %v10662_v62 = vpop.f32.mrb[3].mxu1  ;;  %v1552_v12 = vcombine.high %v1064_v31, %v1064_v31  ;;  %v1517_v25 = vrot.slane %v1503_v2, %v11983_v38  ;;  %v1518_v51 = vcombine.high %v1510_v18, %v1510_v18  ;;  %v1559_v39 = vrot.slane %v1064_v31, %v11983_v38 }
 0x190   : > { %v12002_v22 = vrot.slane %v1510_v18, %v11983_v38  ;;  %v4146_v31 = vsel %vm11955_vm2, 0, %v4145_v3 }
 0x191   : > { %v1566_v14 = vrot.slane %v1552_v12, %v11983_v38  ;;  %v1519_v33 = vcombine.high %v1517_v25, %v1517_v25  ;;  %v12005_v20 = vrot.slane %v1517_v25, %v11983_v38  ;;  %v12008_v28 = vrot.slane %v1518_v51, %v11983_v38  ;;  %4147 = vst [vmem:[#allocation3 + $0x14] sm:$0x1] %v4146_v31 }
 0x192   : > { %v1567_v29 = vcombine.high %v1559_v39, %v1559_v39  ;;  %v12011_v19 = vrot.slane %v1559_v39, %v11983_v38  ;;  %v1548_v27 = vcombine.high %v12002_v22, %v12002_v22 }
 0x193   : > { %v1568_v11 = vcombine.high %v1566_v14, %v1566_v14  ;;  %v12015_v30 = vrot.slane %v1519_v33, %v11983_v38  ;;  %v12018_v21 = vrot.slane %v1566_v14, %v11983_v38  ;;  %v1549_v40 = vcombine.high %v12005_v20, %v12005_v20 }
 0x194   : > { %v1069_v63 = vpop.f32.mrb[4].mxu1  ;;  %v1550_v4 = vcombine.high %v12008_v28, %v12008_v28  ;;  %v12039_v35 = vrot.slane %v1567_v29, %v11983_v38  ;;  %v1597_v34 = vcombine.high %v12011_v19, %v12011_v19 }
 0x195   : > { %v10665_v61 = vpop.f32.mrb[5].mxu1  ;;  %v1601_v1 = vcombine.high %v1069_v63, %v1069_v63  ;;  %v1608_v15 = vrot.slane %v1069_v63, %v11983_v38  ;;  %v12042_v41 = vrot.slane %v1568_v11, %v11983_v38  ;;  %v1551_v47 = vcombine.high %v12015_v30, %v12015_v30 }
 0x196   : > { %v1072_v44 = vpop.f32.mrb[6].mxu1  ;;  %v1598_v59 = vcombine.high %v12018_v21, %v12018_v21  ;;  %v1599_v55 = vcombine.high %v12039_v35, %v12039_v35 }
 0x197   : > { %v10666_v52 = vpop.f32.mrb[7].mxu1  ;;  %v1650_v48 = vcombine.high %v1072_v44, %v1072_v44  ;;  %v1615_v8 = vrot.slane %v1601_v1, %v11983_v38  ;;  %v1657_v16 = vrot.slane %v1072_v44, %v11983_v38  ;;  %v1616_v17 = vcombine.high %v1608_v15, %v1608_v15 }
 0x198   : > { %v12047_v54 = vrot.slane %v1608_v15, %v11983_v38  ;;  %v1600_v45 = vcombine.high %v12042_v41, %v12042_v41 }
 0x199   : > { %v1664_v9 = vrot.slane %v1650_v48, %v11983_v38  ;;  %v1617_v24 = vcombine.high %v1615_v8, %v1615_v8  ;;  %v12054_v46 = vrot.slane %v1615_v8, %v11983_v38  ;;  %v1665_v49 = vcombine.high %v1657_v16, %v1657_v16 }
 0x19a   : > { %v12057_v56 = vrot.slane %v1616_v17, %v11983_v38  ;;  %v12066_v62 = vrot.slane %v1657_v16, %v11983_v38  ;;  %v1646_v61 = vcombine.high %v12047_v54, %v12047_v54 }
 0x19b   : > { %v1666_v0 = vcombine.high %v1664_v9, %v1664_v9  ;;  %v12072_v5 = vrot.slane %v1617_v24, %v11983_v38  ;;  %v12077_v44 = vrot.slane %v1664_v9, %v11983_v38  ;;  %v12080_v52 = vrot.slane %v1665_v49, %v11983_v38 }
 0x19c   : > { %v1647_v25 = vcombine.high %v12054_v46, %v12054_v46  ;;  %v1648_v13 = vcombine.high %v12057_v56, %v12057_v56 }
 0x19d   : > { %v12088_v51 = vrot.slane %v1666_v0, %v11983_v38 }
 0x1a8   : > { %v1077_v57 = vpop.f32.mrb[8].mxu1 }
 0x1a9   : > { %v1699_v26 = vcombine.high %v1077_v57, %v1077_v57  ;;  %v1706_v43 = vrot.slane %v1077_v57, %v11983_v38  ;;  %v10669_v63 = vpop.f32.mrb[9].mxu1 }
 0x1aa   : > { %v1080_v2 = vpop.f32.mrb[10].mxu1 }
 0x1ab   : > { %v1713_v6 = vrot.slane %v1699_v26, %v11983_v38  ;;  %v1714_v18 = vcombine.high %v1706_v43, %v1706_v43  ;;  %v1748_v37 = vcombine.high %v1080_v2, %v1080_v2  ;;  %v10670_v12 = vpop.f32.mrb[11].mxu1  ;;  %v1755_v39 = vrot.slane %v1080_v2, %v11983_v38 }
 0x1ac   : > { %v12094_v33 = vrot.slane %v1706_v43, %v11983_v38 }
 0x1ad   : > { %v1715_v1 = vcombine.high %v1713_v6, %v1713_v6  ;;  %v12097_v15 = vrot.slane %v1713_v6, %v11983_v38  ;;  %v12100_v48 = vrot.slane %v1714_v18, %v11983_v38  ;;  %v1762_v29 = vrot.slane %v1748_v37, %v11983_v38 }
 0x1ae   : > { %v1763_v11 = vcombine.high %v1755_v39, %v1755_v39  ;;  %v12104_v8 = vrot.slane %v1755_v39, %v11983_v38 }
 0x1af   : > { %v12113_v24 = vrot.slane %v1715_v1, %v11983_v38  ;;  %v1764_v32 = vcombine.high %v1762_v29, %v1762_v29  ;;  %v12118_v3 = vrot.slane %v1762_v29, %v11983_v38 }
 0x1b0   : > { %v12121_v0 = vrot.slane %v1763_v11, %v11983_v38  ;;  %v1474_v57 = vpop.f32.mrb[12].mxu1 }
 0x1b1   : > { %v1851_v26 = vcombine.high %v1474_v57, %v1474_v57  ;;  %v1858_v43 = vrot.slane %v1474_v57, %v11983_v38  ;;  %v10677_v63 = vpop.f32.mrb[13].mxu1  ;;  %v12133_v18 = vrot.slane %v1764_v32, %v11983_v38 }
 0x1b2   : > { %v1477_v12 = vpop.f32.mrb[14].mxu1 }
 0x1b3   : > { %v1865_v39 = vrot.slane %v1851_v26, %v11983_v38  ;;  %v1866_v1 = vcombine.high %v1858_v43, %v1858_v43  ;;  %v1874_v29 = vrot.slane %v1858_v43, %v11983_v38  ;;  %v1900_v11 = vcombine.high %v1477_v12, %v1477_v12  ;;  %v10678_v57 = vpop.f32.mrb[15].mxu1 }
 0x1b4   : > { %v1907_v31 = vrot.slane %v1477_v12, %v11983_v38 }
 0x1b5   : > { %v1867_v37 = vcombine.high %v1865_v39, %v1865_v39  ;;  %v1881_v2 = vrot.slane %v1865_v39, %v11983_v38  ;;  %v1888_v26 = vrot.slane %v1866_v1, %v11983_v38  ;;  %v1896_v58 = vcombine.high %v1874_v29, %v1874_v29 }
 0x1b6   : > { %v2148_v43 = vrot.slane %v1874_v29, %v12021_v10  ;;  %v1914_v57 = vrot.slane %v1900_v11, %v11983_v38  ;;  %v1915_v49 = vcombine.high %v1907_v31, %v1907_v31  ;;  %v12151_v63 = vrot.slane %v1907_v31, %v11983_v38 }
 0x1b7   : > { %v1895_v6 = vrot.slane %v1867_v37, %v11983_v38  ;;  %v1897_v17 = vcombine.high %v1881_v2, %v1881_v2  ;;  %v1898_v32 = vcombine.high %v1888_v26, %v1888_v26  ;;  %v2152_v12 = vrot.slane %v1888_v26, %v12021_v10 }
 0x1b8   : > { %v2156_v9 = vrot.slane %v1896_v58, %v12021_v10  ;;  %v2164_v39 = vrot.slane %v1881_v2, %v12021_v10  ;;  %v2386_v1 = vsel %vm2385_vm4, %v12002_v22, %v2148_v43  ;;  %v1916_v29 = vcombine.high %v1914_v57, %v1914_v57 }
 0x1b9   : > { %v1899_v14 = vcombine.high %v1895_v6, %v1895_v6  ;;  %v2160_v11 = vrot.slane %v1898_v32, %v12021_v10  ;;  %v2168_v31 = vrot.slane %v1895_v6, %v12021_v10  ;;  %v2172_v16 = vrot.slane %v1897_v17, %v12021_v10 }
 0x1ba   : > { %v2387_v37 = vsel %vm2385_vm4, %v12008_v28, %v2152_v12  ;;  %v2388_v58 = vsel %vm2385_vm4, %v1548_v27, %v2156_v9  ;;  %v2390_v2 = vsel %vm2385_vm4, %v12005_v20, %v2164_v39  ;;  %v4007_v26 = vadd.f32 %v11996_v23, %v2386_v1 }
 0x1bb   : > { %v2176_v43 = vrot.slane %v1899_v14, %v12021_v10  ;;  %v2389_v17 = vsel %vm2385_vm4, %v1550_v4, %v2160_v11  ;;  %v2391_v6 = vsel %vm2385_vm4, %v12015_v30, %v2168_v31  ;;  %v2392_v22 = vsel %vm2385_vm4, %v1549_v40, %v2172_v16 }
 0x1bc   : > { %v4008_v27 = vadd.f32 %v12026_v42, %v2387_v37  ;;  %v4009_v9 = vadd.f32 %v11999_v36, %v2388_v58  ;;  %v4010_v32 = vadd.f32 %v12030_v60, %v2389_v17  ;;  %v4011_v14 = vadd.f32 %v11996_v23, %v2390_v2 }
 0x1bd   : > { %v2393_v28 = vsel %vm2385_vm4, %v1551_v47, %v2176_v43  ;;  %v4012_v4 = vadd.f32 %v12026_v42, %v2391_v6  ;;  %v4013_v12 = vadd.f32 %v11999_v36, %v2392_v22  ;;  %v1930_v20 = vrot.slane %v1914_v57, %v11983_v38 }
 0x1be   : > { %v4014_v40 = vadd.f32 %v12030_v60, %v2393_v28  ;;  %v4274_v16 = vcombine.low %v4007_v26, %v4008_v27  ;;  %v4275_v39 = vcombine.low %v4009_v9, %v4010_v32  ;;  %v1937_v1 = vrot.slane %v1915_v49, %v11983_v38 }
 0x1bf   : > { %v4291_v11 = vcombine.low %v4011_v14, %v4012_v4  ;;  %v1944_v31 = vrot.slane %v1916_v29, %v11983_v38  ;;  %v1945_v30 = vcombine.high %v12151_v63, %v12151_v63  ;;  %v1946_v47 = vcombine.high %v1930_v20, %v1930_v20  ;;  %v12198_v37 = vpop.f32.mrb[16].mxu1 }
 0x1c0   : > { %v4282_v58 = vrot.slane %v4274_v16, %v11990_v50  ;;  %v4289_v57 = vrot.slane %v4275_v39, %v11990_v50  ;;  %v4292_v2 = vcombine.low %v4013_v12, %v4014_v40  ;;  %v1947_v26 = vcombine.high %v1937_v1, %v1937_v1  ;;  %v10681_v43 = vpop.f32.mrb[17].mxu1 }
 0x1c1   : > { %v4299_v17 = vrot.slane %v4291_v11, %v11990_v50  ;;  %v1948_v49 = vcombine.high %v1944_v31, %v1944_v31  ;;  %v2180_v29 = vrot.slane %v12151_v63, %v12021_v10  ;;  %v2184_v6 = vrot.slane %v1937_v1, %v12021_v10  ;;  %v12206_v22 = vpop.f32.mrb[18].mxu1 }
 0x1c2   : > { %v4290_v27 = vcombine.low %v4282_v58, %v4289_v57  ;;  %v4306_v9 = vrot.slane %v4292_v2, %v11990_v50  ;;  %v2188_v32 = vrot.slane %v1945_v30, %v12021_v10  ;;  %v2192_v14 = vrot.slane %v1947_v26, %v12021_v10  ;;  %v10682_v28 = vpop.f32.mrb[19].mxu1 }
 0x1c3   : > { %v2196_v4 = vrot.slane %v1930_v20, %v12021_v10  ;;  %v2200_v12 = vrot.slane %v1944_v31, %v12021_v10  ;;  %v2204_v40 = vrot.slane %v1946_v47, %v12021_v10  ;;  %v2208_v63 = vrot.slane %v1948_v49, %v12021_v10 }
 0x1c4   : > { %v4307_v16 = vcombine.low %v4299_v17, %v4306_v9  ;;  %v10554_v39 = vpack.c.bf16 %v4290_v27, %v4290_v27  ;;  %v2394_v1 = vsel %vm2385_vm4, %v12011_v19, %v2180_v29  ;;  %v2395_v11 = vsel %vm2385_vm4, %v12039_v35, %v2184_v6 }
 0x1c5   : > { %v2396_v30 = vsel %vm2385_vm4, %v1597_v34, %v2188_v32  ;;  %v2397_v20 = vsel %vm2385_vm4, %v1599_v55, %v2192_v14  ;;  %v2398_v31 = vsel %vm2385_vm4, %v12018_v21, %v2196_v4  ;;  %v2399_v47 = vsel %vm2385_vm4, %v12042_v41, %v2200_v12  ;;  %v5022_v41 = vld [vmem:[#allocation3] sm:$0xf]  ;;  %v5027_v12 = vld [vmem:[#allocation3 + $0x8] sm:$0x1] }
 0x1c6   : > { %v10555_v58 = vpack.c.bf16 %v4307_v16, %v4307_v16  ;;  %v4781_v57 = vshrl.u32 %v10554_v39, 16  ;;  %v4784_v2 = vshll.u32 %v10554_v39, 16  ;;  %v2400_v19 = vsel %vm2385_vm4, %v1598_v59, %v2204_v40 }
 0x1c7   : > { %v2401_v35 = vsel %vm2385_vm4, %v1600_v45, %v2208_v63  ;;  %v4023_v34 = vadd.f32 %v11996_v23, %v2394_v1  ;;  %v4024_v55 = vadd.f32 %v12026_v42, %v2395_v11  ;;  %v4025_v26 = vadd.f32 %v11999_v36, %v2396_v30 }
 0x1c8   : > { %v4783_v43 = vrot.slane %v4781_v57, 7  ;;  %v4789_v17 = vshrl.u32 %v10555_v58, 16  ;;  %v4792_v49 = vshll.u32 %v10555_v58, 16  ;;  %v4026_v29 = vadd.f32 %v12030_v60, %v2397_v20 }
 0x1c9   : > { %v4027_v59 = vadd.f32 %v11996_v23, %v2398_v31  ;;  %v4028_v45 = vadd.f32 %v12026_v42, %v2399_v47  ;;  %v4029_v6 = vadd.f32 %v11999_v36, %v2400_v19  ;;  %v4030_v27 = vadd.f32 %v12030_v60, %v2401_v35 }
 0x1ca   : > { %v4786_v9 = vor.u32 %v4784_v2, %v4783_v43  ;;  %v4787_v32 = vrot.slane %v4783_v43, 4  ;;  %v4791_v14 = vrot.slane %v4789_v17, 7  ;;  %v4342_v28 = vcombine.low %v4023_v34, %v4024_v55 }
 0x1cb   : > { %v4343_v40 = vcombine.low %v4025_v26, %v4026_v29  ;;  %v4359_v63 = vcombine.low %v4027_v59, %v4028_v45  ;;  %v4360_v16 = vcombine.low %v4029_v6, %v4030_v27  ;;  %v1949_v39 = vcombine.high %v12198_v37, %v12198_v37  ;;  %v12261_v1 = vpop.f32.mrb[20].mxu1 }
 0x1cc   : > { %v4794_v11 = vor.u32 %v4792_v49, %v4791_v14  ;;  %v4796_v30 = vrot.slane %v4791_v14, 4  ;;  %v5023_v20 = vsel %vm12245_vm7, %v4786_v9, %v5022_v41  ;;  %v4350_v31 = vrot.slane %v4342_v28, %v11990_v50  ;;  %v10685_v47 = vpop.f32.mrb[21].mxu1 }
 0x1cd   : > { %5024 = vst [vmem:[#allocation3] sm:$0xf] %v5023_v20  ;;  %v4357_v58 = vrot.slane %v4343_v40, %v11990_v50  ;;  %v4367_v57 = vrot.slane %v4359_v63, %v11990_v50  ;;  %v4374_v2 = vrot.slane %v4360_v16, %v11990_v50  ;;  %v1956_v19 = vrot.slane %v12198_v37, %v11983_v38  ;;  %v12271_v35 = vpop.f32.mrb[22].mxu1 }
 0x1ce   : > { %v4795_v34 = vsel %vm12255_vm12, %v4787_v32, %v4794_v11  ;;  %v5028_v55 = vsel %vm11949_vm0, %v4796_v30, %v5027_v12  ;;  %v1963_v26 = vrot.slane %v1949_v39, %v11983_v38  ;;  %v1998_v43 = vcombine.high %v12206_v22, %v12206_v22  ;;  %v10686_v17 = vpop.f32.mrb[23].mxu1 }
 0x1cf   : > { %5026 = vst.msk [vmem:[#allocation3 + $0x4] sm:$0xf] %vm15194_vm5, %v4795_v34  ;;  %5029 = vst [vmem:[#allocation3 + $0x8] sm:$0x1] %v5028_v55  ;;  %v4358_v49 = vcombine.low %v4350_v31, %v4357_v58  ;;  %v4375_v29 = vcombine.low %v4367_v57, %v4374_v2  ;;  %v1964_v37 = vcombine.high %v1956_v19, %v1956_v19  ;;  %v5037_v55 = vld [vmem:[#allocation3 + $0x18] sm:$0xf] }
 0x1d0   : > { %v1972_v41 = vrot.slane %v1956_v19, %v11983_v38  ;;  %v1965_v59 = vcombine.high %v1963_v26, %v1963_v26  ;;  %v1979_v45 = vrot.slane %v1963_v26, %v11983_v38  ;;  %v12285_v6 = vrot.slane %v12206_v22, %v11983_v38  ;;  %v5041_v26 = vld [vmem:[#allocation3 + $0x20] sm:$0x1] }
 0x1d1   : > { %v12288_v27 = vrot.slane %v1998_v43, %v11983_v38  ;;  %v10558_v9 = vpack.c.bf16 %v4358_v49, %v4358_v49  ;;  %v10559_v32 = vpack.c.bf16 %v4375_v29, %v4375_v29  ;;  %v1986_v14 = vrot.slane %v1964_v37, %v11983_v38 }
 0x1d2   : > { %v1994_v28 = vcombine.high %v1972_v41, %v1972_v41  ;;  %v1993_v12 = vrot.slane %v1965_v59, %v11983_v38  ;;  %v1995_v40 = vcombine.high %v1979_v45, %v1979_v45  ;;  %v2212_v63 = vrot.slane %v1972_v41, %v12021_v10 }
 0x1d3   : > { %v2228_v16 = vrot.slane %v1979_v45, %v12021_v10  ;;  %v4815_v39 = vshrl.u32 %v10558_v9, 16  ;;  %v4818_v11 = vshll.u32 %v10558_v9, 16  ;;  %v4823_v30 = vshrl.u32 %v10559_v32, 16 }
 0x1d4   : > { %v4826_v22 = vshll.u32 %v10559_v32, 16  ;;  %v1996_v20 = vcombine.high %v1986_v14, %v1986_v14  ;;  %v1997_v31 = vcombine.high %v1993_v12, %v1993_v12  ;;  %v2216_v47 = vrot.slane %v1986_v14, %v12021_v10 }
 0x1d5   : > { %v2220_v58 = vrot.slane %v1994_v28, %v12021_v10  ;;  %v4817_v57 = vrot.slane %v4815_v39, 7  ;;  %v4825_v2 = vrot.slane %v4823_v30, 7  ;;  %v2232_v19 = vrot.slane %v1993_v12, %v12021_v10 }
 0x1d6   : > { %v2236_v34 = vrot.slane %v1995_v40, %v12021_v10  ;;  %v2224_v43 = vrot.slane %v1996_v20, %v12021_v10  ;;  %v2240_v17 = vrot.slane %v1997_v31, %v12021_v10  ;;  %v2402_v49 = vsel %vm2385_vm4, %v12047_v54, %v2212_v63 }
 0x1d7   : > { %v2403_v29 = vsel %vm2385_vm4, %v12057_v56, %v2216_v47  ;;  %v4820_v37 = vor.u32 %v4818_v11, %v4817_v57  ;;  %v4821_v41 = vrot.slane %v4817_v57, 4  ;;  %v4828_v59 = vor.u32 %v4826_v22, %v4825_v2  ;;  %v12304_v9 = vpop.f32.mrb[24].mxu1 }
 0x1d8   : > { %v4830_v45 = vrot.slane %v4825_v2, 4  ;;  %v2404_v32 = vsel %vm2385_vm4, %v1646_v61, %v2220_v58  ;;  %v2405_v14 = vsel %vm2385_vm4, %v1648_v13, %v2224_v43  ;;  %v2406_v28 = vsel %vm2385_vm4, %v12054_v46, %v2228_v16  ;;  %v10709_v40 = vpop.f32.mrb[25].mxu1 }
 0x1d9   : > { %v2407_v12 = vsel %vm2385_vm4, %v12072_v5, %v2232_v19  ;;  %v4829_v63 = vsel %vm12255_vm12, %v4821_v41, %v4828_v59  ;;  %v5038_v54 = vsel %vm12245_vm7, %v4820_v37, %v5037_v55  ;;  %v2408_v56 = vsel %vm2385_vm4, %v1647_v25, %v2236_v34  ;;  %v12328_v13 = vpop.f32.mrb[26].mxu1 }
 0x1da   : > { %v5042_v61 = vsel %vm11949_vm0, %v4830_v45, %v5041_v26  ;;  %5039 = vst [vmem:[#allocation3 + $0x18] sm:$0xf] %v5038_v54  ;;  %5040 = vst.msk [vmem:[#allocation3 + $0x1c] sm:$0xf] %vm15194_vm5, %v4829_v63  ;;  %v15216_v16 = vcombine.high %v12072_v5, %v12072_v5  ;;  %v4039_v11 = vadd.f32 %v11996_v23, %v2402_v49  ;;  %v10710_v46 = vpop.f32.mrb[27].mxu1 }
 0x1db   : > { %5043 = vst [vmem:[#allocation3 + $0x20] sm:$0x1] %v5042_v61  ;;  %v4040_v30 = vadd.f32 %v12026_v42, %v2403_v29  ;;  %v4041_v22 = vadd.f32 %v11999_v36, %v2404_v32  ;;  %v4042_v25 = vadd.f32 %v12030_v60, %v2405_v14  ;;  %v4043_v20 = vadd.f32 %v11996_v23, %v2406_v28 }
 0x1dc   : > { %v2409_v39 = vsel %vm2385_vm4, %v15216_v16, %v2240_v17  ;;  %v4044_v31 = vadd.f32 %v12026_v42, %v2407_v12  ;;  %v4045_v47 = vadd.f32 %v11999_v36, %v2408_v56  ;;  %v2013_v57 = vcombine.high %v12285_v6, %v12285_v6 }
 0x1dd   : > { %v4046_v58 = vadd.f32 %v12030_v60, %v2409_v39  ;;  %v4410_v5 = vcombine.low %v4039_v11, %v4040_v30  ;;  %v2014_v2 = vcombine.high %v12288_v27, %v12288_v27  ;;  %v4411_v19 = vcombine.low %v4041_v22, %v4042_v25 }
 0x1de   : > { %v4427_v34 = vcombine.low %v4043_v20, %v4044_v31  ;;  %v2021_v55 = vrot.slane %v12285_v6, %v11983_v38  ;;  %v2028_v26 = vrot.slane %v12288_v27, %v11983_v38  ;;  %v2035_v49 = vrot.slane %v2013_v57, %v11983_v38 }
 0x1df   : > { %v4418_v43 = vrot.slane %v4410_v5, %v11990_v50  ;;  %v4428_v17 = vcombine.low %v4045_v47, %v4046_v58  ;;  %v2042_v29 = vrot.slane %v2014_v2, %v11983_v38  ;;  %v4425_v37 = vrot.slane %v4411_v19, %v11990_v50 }
 0x1e0   : > { %v4435_v41 = vrot.slane %v4427_v34, %v11990_v50  ;;  %v2043_v59 = vcombine.high %v2021_v55, %v2021_v55  ;;  %v2044_v45 = vcombine.high %v2028_v26, %v2028_v26  ;;  %v2045_v14 = vcombine.high %v2035_v49, %v2035_v49 }
 0x1e1   : > { %v4442_v32 = vrot.slane %v4428_v17, %v11990_v50  ;;  %v2046_v6 = vcombine.high %v2042_v29, %v2042_v29  ;;  %v2244_v28 = vrot.slane %v2021_v55, %v12021_v10  ;;  %v4426_v27 = vcombine.low %v4418_v43, %v4425_v37 }
 0x1e2   : > { %v2248_v12 = vrot.slane %v2035_v49, %v12021_v10  ;;  %v2252_v40 = vrot.slane %v2043_v59, %v12021_v10  ;;  %v2260_v63 = vrot.slane %v2028_v26, %v12021_v10  ;;  %v2256_v61 = vrot.slane %v2045_v14, %v12021_v10 }
 0x1e3   : > { %v4443_v54 = vcombine.low %v4435_v41, %v4442_v32  ;;  %v2264_v56 = vrot.slane %v2042_v29, %v12021_v10  ;;  %v2268_v16 = vrot.slane %v2044_v45, %v12021_v10  ;;  %v10562_v39 = vpack.c.bf16 %v4426_v27, %v4426_v27  ;;  %v12369_v46 = vpop.f32.mrb[28].mxu1 }
 0x1e4   : > { %v2272_v11 = vrot.slane %v2046_v6, %v12021_v10  ;;  %v2410_v30 = vsel %vm2385_vm4, %v12066_v62, %v2244_v28  ;;  %v2411_v22 = vsel %vm2385_vm4, %v12080_v52, %v2248_v12  ;;  %v15217_v20 = vcombine.high %v12066_v62, %v12066_v62  ;;  %v12381_v57 = vpop.f32.mrb[0].mxu0  ;;  %v10713_v2 = vpop.f32.mrb[29].mxu1  ;;  %v5051_v12 = vld [vmem:[#allocation3 + $0x30] sm:$0xf] }
 0x1e5   : > { %v10563_v25 = vpack.c.bf16 %v4443_v54, %v4443_v54  ;;  %v15218_v47 = vcombine.high %v12080_v52, %v12080_v52  ;;  %v2414_v5 = vsel %vm2385_vm4, %v12077_v44, %v2260_v63  ;;  %v4849_v19 = vshrl.u32 %v10562_v39, 16  ;;  %v10693_v43 = vpop.f32.mrb[1].mxu0  ;;  %v12389_v52 = vpop.f32.mrb[30].mxu1 }
 0x1e6   : > { %v2412_v31 = vsel %vm2385_vm4, %v15217_v20, %v2252_v40  ;;  %v4852_v34 = vshll.u32 %v10562_v39, 16  ;;  %v2415_v55 = vsel %vm2385_vm4, %v12088_v51, %v2264_v56  ;;  %v15219_v62 = vcombine.high %v12077_v44, %v12077_v44  ;;  %v12396_v59 = vpop.f32.mrb[2].mxu0  ;;  %v10714_v45 = vpop.f32.mrb[31].mxu1  ;;  %v5055_v56 = vld [vmem:[#allocation3 + $0x38] sm:$0x1] }
 0x1e7   : > { %v2413_v58 = vsel %vm2385_vm4, %v15218_v47, %v2256_v61  ;;  %v4857_v17 = vshrl.u32 %v10563_v25, 16  ;;  %v4860_v49 = vshll.u32 %v10563_v25, 16  ;;  %v15220_v29 = vcombine.high %v12088_v51, %v12088_v51  ;;  %v10694_v28 = vpop.f32.mrb[3].mxu0 }
 0x1e8   : > { %v2416_v26 = vsel %vm2385_vm4, %v15219_v62, %v2268_v16  ;;  %v4055_v41 = vadd.f32 %v11996_v23, %v2410_v30  ;;  %v4851_v32 = vrot.slane %v4849_v19, 7  ;;  %v4056_v44 = vadd.f32 %v12026_v42, %v2411_v22 }
 0x1e9   : > { %v2417_v37 = vsel %vm2385_vm4, %v15220_v29, %v2272_v11  ;;  %v4057_v14 = vadd.f32 %v11999_v36, %v2412_v31  ;;  %v4058_v6 = vadd.f32 %v12030_v60, %v2413_v58  ;;  %v4859_v27 = vrot.slane %v4857_v17, 7 }
 0x1ea   : > { %v4059_v40 = vadd.f32 %v11996_v23, %v2414_v5  ;;  %v4060_v51 = vadd.f32 %v12026_v42, %v2415_v55  ;;  %v4061_v63 = vadd.f32 %v11999_v36, %v2416_v26  ;;  %v4854_v54 = vor.u32 %v4852_v34, %v4851_v32 }
 0x1eb   : > { %v4855_v61 = vrot.slane %v4851_v32, 4  ;;  %v4062_v16 = vadd.f32 %v12030_v60, %v2417_v37  ;;  %v4478_v39 = vcombine.low %v4055_v41, %v4056_v44  ;;  %v4862_v11 = vor.u32 %v4860_v49, %v4859_v27 }
 0x1ec   : > { %v4864_v30 = vrot.slane %v4859_v27, 4  ;;  %v4479_v22 = vcombine.low %v4057_v14, %v4058_v6  ;;  %v4495_v25 = vcombine.low %v4059_v40, %v4060_v51  ;;  %v5052_v20 = vsel %vm12245_vm7, %v4854_v54, %v5051_v12 }
 0x1ed   : > { %v4486_v31 = vrot.slane %v4478_v39, %v11990_v50  ;;  %v4496_v47 = vcombine.low %v4061_v63, %v4062_v16  ;;  %v2047_v58 = vcombine.high %v12261_v1, %v12261_v1  ;;  %v4863_v5 = vsel %vm12255_vm12, %v4855_v61, %v4862_v11  ;;  %5053 = vst [vmem:[#allocation3 + $0x30] sm:$0xf] %v5052_v20 }
 0x1ee   : > { %v5056_v2 = vsel %vm11949_vm0, %v4864_v30, %v5055_v56  ;;  %v4493_v19 = vrot.slane %v4479_v22, %v11990_v50  ;;  %v4503_v34 = vrot.slane %v4495_v25, %v11990_v50  ;;  %5054 = vst.msk [vmem:[#allocation3 + $0x34] sm:$0xf] %vm15194_vm5, %v4863_v5  ;;  %v2054_v62 = vrot.slane %v12261_v1, %v11983_v38 }
 0x1ef   : > { %5057 = vst [vmem:[#allocation3 + $0x38] sm:$0x1] %v5056_v2  ;;  %v4510_v55 = vrot.slane %v4496_v47, %v11990_v50  ;;  %v2061_v26 = vrot.slane %v2047_v58, %v11983_v38  ;;  %v2096_v43 = vcombine.high %v12271_v35, %v12271_v35  ;;  %v12425_v49 = vrot.slane %v12271_v35, %v11983_v38  ;;  %v5065_v47 = vld [vmem:[#allocation3 + $0x48] sm:$0xf] }
 0x1f0   : > { %v4494_v17 = vcombine.low %v4486_v31, %v4493_v19  ;;  %v3398_v29 = vcombine.high %v12304_v9, %v12304_v9  ;;  %v12431_v37 = vrot.slane %v12304_v9, %v11983_v38  ;;  %v2062_v45 = vcombine.high %v2054_v62, %v2054_v62 }
 0x1f1   : > { %v4511_v41 = vcombine.low %v4503_v34, %v4510_v55  ;;  %v2063_v1 = vcombine.high %v2061_v26, %v2061_v26  ;;  %v2070_v32 = vrot.slane %v2054_v62, %v11983_v38  ;;  %v2077_v14 = vrot.slane %v2061_v26, %v11983_v38  ;;  %v5069_v55 = vld [vmem:[#allocation3 + $0x50] sm:$0x1] }
 0x1f2   : > { %v10566_v44 = vpack.c.bf16 %v4494_v17, %v4494_v17  ;;  %v12436_v6 = vrot.slane %v2096_v43, %v11983_v38  ;;  %v2111_v35 = vcombine.high %v12425_v49, %v12425_v49  ;;  %v2084_v27 = vrot.slane %v2062_v45, %v11983_v38 }
 0x1f3   : > { %v10567_v28 = vpack.c.bf16 %v4511_v41, %v4511_v41  ;;  %v2091_v12 = vrot.slane %v2063_v1, %v11983_v38  ;;  %v2092_v40 = vcombine.high %v2070_v32, %v2070_v32  ;;  %v2093_v54 = vcombine.high %v2077_v14, %v2077_v14 }
 0x1f4   : > { %v4883_v51 = vshrl.u32 %v10566_v44, 16  ;;  %v4886_v63 = vshll.u32 %v10566_v44, 16  ;;  %v2276_v61 = vrot.slane %v2070_v32, %v12021_v10  ;;  %v2094_v39 = vcombine.high %v2084_v27, %v2084_v27 }
 0x1f5   : > { %v4891_v56 = vshrl.u32 %v10567_v28, 16  ;;  %v4894_v16 = vshll.u32 %v10567_v28, 16  ;;  %v2095_v11 = vcombine.high %v2091_v12, %v2091_v12  ;;  %v2280_v22 = vrot.slane %v2084_v27, %v12021_v10 }
 0x1f6   : > { %v4885_v30 = vrot.slane %v4883_v51, 7  ;;  %v2284_v25 = vrot.slane %v2092_v40, %v12021_v10  ;;  %v2292_v20 = vrot.slane %v2077_v14, %v12021_v10  ;;  %v2288_v58 = vrot.slane %v2094_v39, %v12021_v10 }
 0x1f7   : > { %v4893_v31 = vrot.slane %v4891_v56, 7  ;;  %v2296_v5 = vrot.slane %v2091_v12, %v12021_v10  ;;  %v2300_v2 = vrot.slane %v2093_v54, %v12021_v10  ;;  %v2304_v62 = vrot.slane %v2095_v11, %v12021_v10 }
 0x1f8   : > { %v4888_v19 = vor.u32 %v4886_v63, %v4885_v30  ;;  %v4889_v34 = vrot.slane %v4885_v30, 4  ;;  %v2418_v26 = vsel %vm2385_vm4, %v12094_v33, %v2276_v61  ;;  %v2419_v41 = vsel %vm2385_vm4, %v12100_v48, %v2280_v22 }
 0x1f9   : > { %v4896_v43 = vor.u32 %v4894_v16, %v4893_v31  ;;  %v4898_v17 = vrot.slane %v4893_v31, 4  ;;  %v15221_v45 = vcombine.high %v12094_v33, %v12094_v33  ;;  %v15222_v44 = vcombine.high %v12100_v48, %v12100_v48 }
 0x1fa   : > { %v5066_v32 = vsel %vm12245_vm7, %v4888_v19, %v5065_v47  ;;  %v2422_v28 = vsel %vm2385_vm4, %v12097_v15, %v2292_v20  ;;  %v2423_v27 = vsel %vm2385_vm4, %v12113_v24, %v2296_v5  ;;  %v15223_v40 = vcombine.high %v12097_v15, %v12097_v15 }
 0x1fb   : > { %v2420_v1 = vsel %vm2385_vm4, %v15221_v45, %v2284_v25  ;;  %v2421_v14 = vsel %vm2385_vm4, %v15222_v44, %v2288_v58  ;;  %v4897_v12 = vsel %vm12255_vm12, %v4889_v34, %v4896_v43  ;;  %5067 = vst [vmem:[#allocation3 + $0x48] sm:$0xf] %v5066_v32  ;;  %v5070_v33 = vsel %vm11949_vm0, %v4898_v17, %v5069_v55  ;;  %v12489_v30 = vpop.f32.mrb[32].mxu1 }
 0x1fc   : > { %v2424_v48 = vsel %vm2385_vm4, %v15223_v40, %v2300_v2  ;;  %v15224_v51 = vcombine.high %v12113_v24, %v12113_v24  ;;  %5068 = vst.msk [vmem:[#allocation3 + $0x4c] sm:$0xf] %vm15194_vm5, %v4897_v12  ;;  %5071 = vst [vmem:[#allocation3 + $0x50] sm:$0x1] %v5070_v33  ;;  %v4071_v54 = vadd.f32 %v11996_v23, %v2418_v26  ;;  %v12495_v47 = vpop.f32.mrb[4].mxu0  ;;  %v10717_v58 = vpop.f32.mrb[33].mxu1 }
 0x1fd   : > { %v4072_v61 = vadd.f32 %v12026_v42, %v2419_v41  ;;  %v4073_v56 = vadd.f32 %v11999_v36, %v2420_v1  ;;  %v4074_v16 = vadd.f32 %v12030_v60, %v2421_v14  ;;  %v4075_v15 = vadd.f32 %v11996_v23, %v2422_v28  ;;  %v10697_v55 = vpop.f32.mrb[5].mxu0 }
 0x1fe   : > { %v2425_v63 = vsel %vm2385_vm4, %v15224_v51, %v2304_v62  ;;  %v4076_v39 = vadd.f32 %v12026_v42, %v2423_v27  ;;  %v4077_v11 = vadd.f32 %v11999_v36, %v2424_v48  ;;  %v2112_v20 = vcombine.high %v12436_v6, %v12436_v6  ;;  %v12500_v62 = vpop.f32.mrb[34].mxu1  ;;  %v12505_v41 = vpop.f32.mrb[6].mxu0 }
 0x1ff   : > { %v4078_v24 = vadd.f32 %v12030_v60, %v2425_v63  ;;  %v4546_v22 = vcombine.low %v4071_v54, %v4072_v61  ;;  %v4547_v25 = vcombine.low %v4073_v56, %v4074_v16  ;;  %v2119_v31 = vrot.slane %v12425_v49, %v11983_v38  ;;  %v10718_v45 = vpop.f32.mrb[35].mxu1 }
 0x200   : > { %v4563_v5 = vcombine.low %v4075_v15, %v4076_v39  ;;  %v2126_v19 = vrot.slane %v12436_v6, %v11983_v38  ;;  %v2133_v34 = vrot.slane %v2111_v35, %v11983_v38  ;;  %v2140_v17 = vrot.slane %v2112_v20, %v11983_v38  ;;  %v10698_v35 = vpop.f32.mrb[7].mxu0  ;;  %v5079_v45 = vld [vmem:[#allocation3 + $0x60] sm:$0xf] }
 0x201   : > { %v4564_v2 = vcombine.low %v4077_v11, %v4078_v24  ;;  %v4554_v26 = vrot.slane %v4546_v22, %v11990_v50  ;;  %v4561_v43 = vrot.slane %v4547_v25, %v11990_v50  ;;  %v2141_v49 = vcombine.high %v2119_v31, %v2119_v31  ;;  %v5083_v35 = vld [vmem:[#allocation3 + $0x68] sm:$0x1] }
 0x202   : > { %v4571_v1 = vrot.slane %v4563_v5, %v11990_v50  ;;  %v2142_v6 = vcombine.high %v2126_v19, %v2126_v19  ;;  %v2143_v44 = vcombine.high %v2133_v34, %v2133_v34  ;;  %v2144_v28 = vcombine.high %v2140_v17, %v2140_v17 }
 0x203   : > { %v4578_v32 = vrot.slane %v4564_v2, %v11990_v50  ;;  %v4562_v14 = vcombine.low %v4554_v26, %v4561_v43  ;;  %v2308_v27 = vrot.slane %v2119_v31, %v12021_v10  ;;  %v2312_v12 = vrot.slane %v2133_v34, %v12021_v10 }
 0x204   : > { %v2316_v40 = vrot.slane %v2141_v49, %v12021_v10  ;;  %v2320_v48 = vrot.slane %v2143_v44, %v12021_v10  ;;  %v2324_v51 = vrot.slane %v2126_v19, %v12021_v10  ;;  %v2328_v54 = vrot.slane %v2140_v17, %v12021_v10 }
 0x205   : > { %v4579_v33 = vcombine.low %v4571_v1, %v4578_v32  ;;  %v10570_v63 = vpack.c.bf16 %v4562_v14, %v4562_v14  ;;  %v2332_v61 = vrot.slane %v2142_v6, %v12021_v10  ;;  %v2336_v56 = vrot.slane %v2144_v28, %v12021_v10 }
 0x206   : > { %v2426_v15 = vsel %vm2385_vm4, %v12104_v8, %v2308_v27  ;;  %v2427_v39 = vsel %vm2385_vm4, %v12121_v0, %v2312_v12  ;;  %v15225_v11 = vcombine.high %v12104_v8, %v12104_v8  ;;  %v15226_v20 = vcombine.high %v12121_v0, %v12121_v0 }
 0x207   : > { %v10571_v16 = vpack.c.bf16 %v4579_v33, %v4579_v33  ;;  %v4917_v22 = vshrl.u32 %v10570_v63, 16  ;;  %v4920_v25 = vshll.u32 %v10570_v63, 16  ;;  %v2430_v58 = vsel %vm2385_vm4, %v12118_v3, %v2324_v51 }
 0x208   : > { %v2428_v24 = vsel %vm2385_vm4, %v15225_v11, %v2316_v40  ;;  %v2429_v31 = vsel %vm2385_vm4, %v15226_v20, %v2320_v48  ;;  %v2431_v19 = vsel %vm2385_vm4, %v12133_v18, %v2328_v54  ;;  %v15227_v8 = vcombine.high %v12118_v3, %v12118_v3  ;;  %v12548_v28 = vpop.f32.mrb[8].mxu0 }
 0x209   : > { %v4925_v5 = vshrl.u32 %v10571_v16, 16  ;;  %v4928_v2 = vshll.u32 %v10571_v16, 16  ;;  %v4919_v55 = vrot.slane %v4917_v22, 7  ;;  %v15228_v26 = vcombine.high %v12133_v18, %v12133_v18  ;;  %v10701_v48 = vpop.f32.mrb[9].mxu0 }
 0x20a   : > { %v2432_v34 = vsel %vm2385_vm4, %v15227_v8, %v2332_v61  ;;  %v4087_v43 = vadd.f32 %v11996_v23, %v2426_v15  ;;  %v4088_v17 = vadd.f32 %v12026_v42, %v2427_v39  ;;  %v4089_v1 = vadd.f32 %v11999_v36, %v2428_v24 }
 0x20b   : > { %v2433_v0 = vsel %vm2385_vm4, %v15228_v26, %v2336_v56  ;;  %v4927_v49 = vrot.slane %v4925_v5, 7  ;;  %v4090_v32 = vadd.f32 %v12030_v60, %v2429_v31  ;;  %v4091_v3 = vadd.f32 %v11996_v23, %v2430_v58  ;;  %v12557_v56 = vpop.f32.mrb[10].mxu0 }
 0x20c   : > { %v4922_v6 = vor.u32 %v4920_v25, %v4919_v55  ;;  %v4923_v44 = vrot.slane %v4919_v55, 4  ;;  %v4092_v14 = vadd.f32 %v12026_v42, %v2431_v19  ;;  %v4093_v18 = vadd.f32 %v11999_v36, %v2432_v34  ;;  %15229 = vst [vmem:[#allocation6_spill] sm:$0xff] %v12557_v56  ;;  %v10702_v24 = vpop.f32.mrb[11].mxu0 }
 0x20d   : > { %v4930_v27 = vor.u32 %v4928_v2, %v4927_v49  ;;  %v4932_v12 = vrot.slane %v4927_v49, 4  ;;  %v4094_v33 = vadd.f32 %v12030_v60, %v2433_v0  ;;  %v4614_v40 = vcombine.low %v4087_v43, %v4088_v17 }
 0x20e   : > { %v5080_v51 = vsel %vm12245_vm7, %v4922_v6, %v5079_v45  ;;  %v4615_v63 = vcombine.low %v4089_v1, %v4090_v32  ;;  %v4631_v54 = vcombine.low %v4091_v3, %v4092_v14  ;;  %v3412_v61 = vrot.slane %v3398_v29, %v11983_v38 }
 0x20f   : > { %v4931_v16 = vsel %vm12255_vm12, %v4923_v44, %v4930_v27  ;;  %5081 = vst [vmem:[#allocation3 + $0x60] sm:$0xf] %v5080_v51  ;;  %v5084_v15 = vsel %vm11949_vm0, %v4932_v12, %v5083_v35  ;;  %v4622_v39 = vrot.slane %v4614_v40, %v11990_v50  ;;  %v4632_v11 = vcombine.low %v4093_v18, %v4094_v33 }
 0x210   : > { %5082 = vst.msk [vmem:[#allocation3 + $0x64] sm:$0xf] %vm15194_vm5, %v4931_v16  ;;  %5085 = vst [vmem:[#allocation3 + $0x68] sm:$0x1] %v5084_v15  ;;  %v4629_v22 = vrot.slane %v4615_v63, %v11990_v50  ;;  %v4639_v9 = vrot.slane %v4631_v54, %v11990_v50  ;;  %v3413_v29 = vcombine.high %v12431_v37, %v12431_v37 }
 0x211   : > { %v3414_v25 = vcombine.high %v3412_v61, %v3412_v61  ;;  %v4646_v20 = vrot.slane %v4632_v11, %v11990_v50  ;;  %v12572_v31 = vrot.slane %v12431_v37, %v11983_v38  ;;  %v12575_v58 = vrot.slane %v3412_v61, %v11983_v38  ;;  %v5093_v61 = vld [vmem:[#allocation3 + $0x78] sm:$0xf] }
 0x212   : > { %v3447_v5 = vcombine.high %v12328_v13, %v12328_v13  ;;  %v4630_v2 = vcombine.low %v4622_v39, %v4629_v22  ;;  %v12580_v19 = vrot.slane %v3413_v29, %v11983_v38  ;;  %v3454_v34 = vrot.slane %v12328_v13, %v11983_v38  ;;  %v5097_v22 = vld [vmem:[#allocation3 + $0x80] sm:$0x1] }
 0x213   : > { %v12583_v8 = vrot.slane %v3414_v25, %v11983_v38  ;;  %v4647_v55 = vcombine.low %v4639_v9, %v4646_v20  ;;  %v3443_v37 = vcombine.high %v12572_v31, %v12572_v31  ;;  %v3444_v26 = vcombine.high %v12575_v58, %v12575_v58 }
 0x214   : > { %v3695_v0 = vrot.slane %v12572_v31, %v12021_v10  ;;  %v10574_v43 = vpack.c.bf16 %v4630_v2, %v4630_v2  ;;  %v3445_v17 = vcombine.high %v12580_v19, %v12580_v19  ;;  %v3699_v13 = vrot.slane %v12580_v19, %v12021_v10 }
 0x215   : > { %v3446_v49 = vcombine.high %v12583_v8, %v12583_v8  ;;  %v10575_v45 = vpack.c.bf16 %v4647_v55, %v4647_v55  ;;  %v12600_v1 = vrot.slane %v3443_v37, %v12021_v10  ;;  %v3711_v32 = vrot.slane %v12575_v58, %v12021_v10 }
 0x216   : > { %v3715_v3 = vrot.slane %v12583_v8, %v12021_v10  ;;  %v4951_v6 = vshrl.u32 %v10574_v43, 16  ;;  %v4954_v44 = vshll.u32 %v10574_v43, 16  ;;  %v12607_v35 = vrot.slane %v3445_v17, %v12021_v10 }
 0x217   : > { %v12610_v14 = vrot.slane %v3444_v26, %v12021_v10  ;;  %v4959_v18 = vshrl.u32 %v10575_v45, 16  ;;  %v4962_v27 = vshll.u32 %v10575_v45, 16  ;;  %v12613_v12 = vrot.slane %v3446_v49, %v12021_v10 }
 0x218   : > { %v3461_v33 = vrot.slane %v3447_v5, %v11983_v38  ;;  %v4953_v40 = vrot.slane %v4951_v6, 7  ;;  %v3462_v48 = vcombine.high %v3454_v34, %v3454_v34  ;;  %v12617_v51 = vrot.slane %v3454_v34, %v11983_v38  ;;  %v5034_v6 = vld [vmem:[#allocation3 + $0x14] sm:$0x1] }
 0x219   : > { %v3496_v63 = vcombine.high %v12369_v46, %v12369_v46  ;;  %v4961_v54 = vrot.slane %v4959_v18, 7  ;;  %v3503_v39 = vrot.slane %v12369_v46, %v11983_v38 }
 0x21a   : > { %v3463_v16 = vcombine.high %v3461_v33, %v3461_v33  ;;  %v12622_v15 = vrot.slane %v3461_v33, %v11983_v38  ;;  %v4956_v11 = vor.u32 %v4954_v44, %v4953_v40  ;;  %v4957_v24 = vrot.slane %v4953_v40, 4 }
 0x21b   : > { %v12627_v9 = vrot.slane %v3462_v48, %v11983_v38  ;;  %v3492_v29 = vcombine.high %v12617_v51, %v12617_v51  ;;  %v4964_v25 = vor.u32 %v4962_v27, %v4961_v54  ;;  %v4966_v20 = vrot.slane %v4961_v54, 4 }
 0x21c   : > { %v12632_v5 = vrot.slane %v3463_v16, %v11983_v38  ;;  %v3493_v2 = vcombine.high %v12622_v15, %v12622_v15  ;;  %v5094_v46 = vsel %vm12245_vm7, %v4956_v11, %v5093_v61  ;;  %v3510_v33 = vrot.slane %v3496_v63, %v11983_v38 }
 0x21d   : > { %v3494_v34 = vcombine.high %v12627_v9, %v12627_v9  ;;  %v4965_v26 = vsel %vm12255_vm12, %v4957_v24, %v4964_v25  ;;  %5095 = vst [vmem:[#allocation3 + $0x78] sm:$0xf] %v5094_v46  ;;  %v5098_v43 = vsel %vm11949_vm0, %v4966_v20, %v5097_v22  ;;  %v12651_v49 = vrot.slane %v3492_v29, %v12021_v10 }
 0x21e   : > { %v3495_v17 = vcombine.high %v12632_v5, %v12632_v5  ;;  %5096 = vst.msk [vmem:[#allocation3 + $0x7c] sm:$0xf] %vm15194_vm5, %v4965_v26  ;;  %5099 = vst [vmem:[#allocation3 + $0x80] sm:$0x1] %v5098_v43  ;;  %v12662_v18 = vrot.slane %v3493_v2, %v12021_v10  ;;  %v3511_v40 = vcombine.high %v3503_v39, %v3503_v39 }
 0x21f   : > { %v12655_v45 = vrot.slane %v3494_v34, %v12021_v10  ;;  %v12669_v48 = vrot.slane %v3503_v39, %v11983_v38  ;;  %v3050_v54 = vcombine.high %v12381_v57, %v12381_v57  ;;  %v3057_v61 = vrot.slane %v12381_v57, %v11983_v38 }
 0x220   : > { %v12665_v27 = vrot.slane %v3495_v17, %v12021_v10  ;;  %v3545_v16 = vcombine.high %v12389_v52, %v12389_v52  ;;  %v3552_v11 = vrot.slane %v12389_v52, %v11983_v38  ;;  %v3512_v24 = vcombine.high %v3510_v33, %v3510_v33 }
 0x221   : > { %v12680_v22 = vrot.slane %v3510_v33, %v11983_v38  ;;  %v12683_v63 = vrot.slane %v3511_v40, %v11983_v38  ;;  %v3541_v39 = vcombine.high %v12669_v48, %v12669_v48  ;;  %v3064_v57 = vrot.slane %v3050_v54, %v11983_v38 }
 0x222   : > { %v3065_v25 = vcombine.high %v3057_v61, %v3057_v61  ;;  %v3073_v20 = vrot.slane %v3057_v61, %v11983_v38  ;;  %v12692_v52 = vrot.slane %v3512_v24, %v11983_v38  ;;  %v3559_v61 = vrot.slane %v3545_v16, %v11983_v38 }
 0x223   : > { %v3542_v2 = vcombine.high %v12680_v22, %v12680_v22  ;;  %v3543_v46 = vcombine.high %v12683_v63, %v12683_v63  ;;  %v12701_v26 = vrot.slane %v3541_v39, %v12021_v10  ;;  %v3066_v17 = vcombine.high %v3064_v57, %v3064_v57 }
 0x224   : > { %v3080_v33 = vrot.slane %v3064_v57, %v11983_v38  ;;  %v3544_v40 = vcombine.high %v12692_v52, %v12692_v52  ;;  %v3087_v39 = vrot.slane %v3065_v25, %v11983_v38  ;;  %v3095_v43 = vcombine.high %v3073_v20, %v3073_v20 }
 0x225   : > { %v12709_v54 = vrot.slane %v3543_v46, %v12021_v10  ;;  %v12714_v24 = vrot.slane %v3542_v2, %v12021_v10  ;;  %v3094_v34 = vrot.slane %v3066_v17, %v11983_v38  ;;  %v3932_v46 = vsel %vm2385_vm4, %v3073_v20, %v3695_v0 }
 0x226   : > { %v3096_v29 = vcombine.high %v3080_v33, %v3080_v33  ;;  %v12719_v57 = vrot.slane %v3544_v40, %v12021_v10  ;;  %v3936_v2 = vsel %vm2385_vm4, %v3080_v33, %v3711_v32  ;;  %v3097_v25 = vcombine.high %v3087_v39, %v3087_v39 }
 0x227   : > { %v3098_v44 = vcombine.high %v3094_v34, %v3094_v34  ;;  %v3933_v17 = vsel %vm2385_vm4, %v3087_v39, %v3699_v13  ;;  %v3934_v40 = vsel %vm2385_vm4, %v3095_v43, %v12600_v1  ;;  %v3937_v31 = vsel %vm2385_vm4, %v3094_v34, %v3715_v3 }
 0x228   : > { %v3938_v58 = vsel %vm2385_vm4, %v3096_v29, %v12610_v14  ;;  %v4015_v0 = vadd.f32 %v11996_v23, %v3932_v46  ;;  %v4016_v32 = vadd.f32 %v12026_v42, %v3933_v17  ;;  %v3935_v19 = vsel %vm2385_vm4, %v3097_v25, %v12607_v35 }
 0x229   : > { %v3939_v13 = vsel %vm2385_vm4, %v3098_v44, %v12613_v12  ;;  %v4017_v1 = vadd.f32 %v11999_v36, %v3934_v40  ;;  %v4019_v16 = vadd.f32 %v11996_v23, %v3936_v2  ;;  %v4018_v8 = vadd.f32 %v12030_v60, %v3935_v19 }
 0x22a   : > { %v4020_v3 = vadd.f32 %v12026_v42, %v3937_v31  ;;  %v4021_v14 = vadd.f32 %v11999_v36, %v3938_v58  ;;  %v4022_v29 = vadd.f32 %v12030_v60, %v3939_v13  ;;  %v4308_v20 = vcombine.low %v4015_v0, %v4016_v32 }
 0x22b   : > { %v3560_v34 = vcombine.high %v3552_v11, %v3552_v11  ;;  %v3561_v43 = vcombine.high %v3559_v61, %v3559_v61  ;;  %v12755_v35 = vrot.slane %v3552_v11, %v11983_v38  ;;  %v4309_v33 = vcombine.low %v4017_v1, %v4018_v8 }
 0x22c   : > { %v4325_v12 = vcombine.low %v4019_v16, %v4020_v3  ;;  %v4326_v44 = vcombine.low %v4021_v14, %v4022_v29  ;;  %v12758_v39 = vrot.slane %v3559_v61, %v11983_v38  ;;  %v4316_v46 = vrot.slane %v4308_v20, %v11990_v50  ;;  %v4114_v3 = vld [vmem:[#allocation3 + $0x24] sm:$0x1]  ;;  %v4151_v14 = vld [vmem:[#allocation3 + $0x2c] sm:$0x1] }
 0x22d   : > { %v12762_v2 = vrot.slane %v3560_v34, %v11983_v38  ;;  %v12765_v25 = vrot.slane %v3561_v43, %v11983_v38  ;;  %v3590_v17 = vcombine.high %v12755_v35, %v12755_v35  ;;  %v4323_v11 = vrot.slane %v4309_v33, %v11990_v50 }
 0x22e   : > { %v4333_v40 = vrot.slane %v4325_v12, %v11990_v50  ;;  %v4340_v31 = vrot.slane %v4326_v44, %v11990_v50  ;;  %v3591_v61 = vcombine.high %v12758_v39, %v12758_v39  ;;  %v3099_v44 = vcombine.high %v12396_v59, %v12396_v59 }
 0x22f   : > { %v3592_v58 = vcombine.high %v12762_v2, %v12762_v2  ;;  %v3593_v0 = vcombine.high %v12765_v25, %v12765_v25  ;;  %v4324_v13 = vcombine.low %v4316_v46, %v4323_v11  ;;  %v12783_v16 = vrot.slane %v3590_v17, %v12021_v10 }
 0x230   : > { %v4341_v1 = vcombine.low %v4333_v40, %v4340_v31  ;;  %v12793_v34 = vrot.slane %v3591_v61, %v12021_v10  ;;  %v3106_v46 = vrot.slane %v12396_v59, %v11983_v38  ;;  %v4115_v17 = vsel %vm11949_vm0, 0, %v4114_v3 }
 0x231   : > { %v12788_v29 = vrot.slane %v3592_v58, %v12021_v10  ;;  %v12796_v43 = vrot.slane %v3593_v0, %v12021_v10  ;;  %v10556_v33 = vpack.c.bf16 %v4324_v13, %v4324_v13  ;;  %v4152_v11 = vsel %vm11955_vm2, 0, %v4151_v14  ;;  %4116 = vst [vmem:[#allocation3 + $0x24] sm:$0x1] %v4115_v17 }
 0x232   : > { %v10557_v12 = vpack.c.bf16 %v4341_v1, %v4341_v1  ;;  %v3594_v40 = vcombine.high %v12489_v30, %v12489_v30  ;;  %v3601_v31 = vrot.slane %v12489_v30, %v11983_v38  ;;  %4153 = vst [vmem:[#allocation3 + $0x2c] sm:$0x1] %v4152_v11  ;;  %v3113_v59 = vrot.slane %v3099_v44, %v11983_v38  ;;  %v5030_v30 = vld [vmem:[#allocation3 + $0xc] sm:$0xf] }
 0x233   : > { %15230 = vst [vmem:[#allocation7_spill] sm:$0xff] %v12796_v43  ;;  %v4798_v61 = vshrl.u32 %v10556_v33, 16  ;;  %v4801_v58 = vshll.u32 %v10556_v33, 16  ;;  %v3114_v1 = vcombine.high %v3106_v46, %v3106_v46  ;;  %v3122_v3 = vrot.slane %v3106_v46, %v11983_v38 }
 0x234   : > { %v4806_v0 = vshrl.u32 %v10557_v12, 16  ;;  %v4809_v13 = vshll.u32 %v10557_v12, 16  ;;  %v3608_v20 = vrot.slane %v3594_v40, %v11983_v38  ;;  %v3609_v19 = vcombine.high %v3601_v31, %v3601_v31 }
 0x235   : > { %v4800_v14 = vrot.slane %v4798_v61, 7  ;;  %v12814_v32 = vrot.slane %v3601_v31, %v11983_v38  ;;  %v3115_v33 = vcombine.high %v3113_v59, %v3113_v59  ;;  %v3129_v12 = vrot.slane %v3113_v59, %v11983_v38 }
 0x236   : > { %v4808_v8 = vrot.slane %v4806_v0, 7  ;;  %v3136_v17 = vrot.slane %v3114_v1, %v11983_v38  ;;  %v3144_v11 = vcombine.high %v3122_v3, %v3122_v3  ;;  %v15231_v31 = vrot.slane %v12617_v51, %v12021_v10 }
 0x237   : > { %v4803_v44 = vor.u32 %v4801_v58, %v4800_v14  ;;  %v4804_v37 = vrot.slane %v4800_v14, 4  ;;  %v3143_v40 = vrot.slane %v3115_v33, %v11983_v38  ;;  %v3145_v61 = vcombine.high %v3129_v12, %v3129_v12 }
 0x238   : > { %v4811_v55 = vor.u32 %v4809_v13, %v4808_v8  ;;  %v4813_v46 = vrot.slane %v4808_v8, 4  ;;  %v3146_v0 = vcombine.high %v3136_v17, %v3136_v17  ;;  %v3940_v56 = vsel %vm2385_vm4, %v3122_v3, %v15231_v31 }
 0x239   : > { %v5031_v59 = vsel %vm12245_vm7, %v4803_v44, %v5030_v30  ;;  %v15232_v8 = vrot.slane %v12627_v9, %v12021_v10  ;;  %v3147_v51 = vcombine.high %v3143_v40, %v3143_v40  ;;  %v3942_v1 = vsel %vm2385_vm4, %v3144_v11, %v12651_v49 }
 0x23a   : > { %v4812_v43 = vsel %vm12255_vm12, %v4804_v37, %v4811_v55  ;;  %v5035_v58 = vsel %vm11949_vm0, %v4813_v46, %v5034_v6  ;;  %5032 = vst [vmem:[#allocation3 + $0xc] sm:$0xf] %v5031_v59  ;;  %v3943_v55 = vsel %vm2385_vm4, %v3146_v0, %v12655_v45  ;;  %v15233_v37 = vrot.slane %v12622_v15, %v12021_v10 }
 0x23b   : > { %v3941_v13 = vsel %vm2385_vm4, %v3136_v17, %v15232_v8  ;;  %5033 = vst.msk [vmem:[#allocation3 + $0x10] sm:$0xf] %vm15194_vm5, %v4812_v43  ;;  %5036 = vst [vmem:[#allocation3 + $0x14] sm:$0x1] %v5035_v58  ;;  %v15234_v9 = vrot.slane %v12632_v5, %v12021_v10  ;;  %v3946_v43 = vsel %vm2385_vm4, %v3145_v61, %v12662_v18 }
 0x23c   : > { %v3944_v6 = vsel %vm2385_vm4, %v3129_v12, %v15233_v37  ;;  %v4031_v14 = vadd.f32 %v11996_v23, %v3940_v56  ;;  %v4032_v49 = vadd.f32 %v12026_v42, %v3941_v13  ;;  %v3947_v45 = vsel %vm2385_vm4, %v3147_v51, %v12665_v27 }
 0x23d   : > { %v3945_v3 = vsel %vm2385_vm4, %v3143_v40, %v15234_v9  ;;  %v4033_v30 = vadd.f32 %v11999_v36, %v3942_v1  ;;  %v4034_v15 = vadd.f32 %v12030_v60, %v3943_v55  ;;  %v4035_v33 = vadd.f32 %v11996_v23, %v3944_v6  ;;  %v4120_v9 = vld [vmem:[#allocation3 + $0x3c] sm:$0x1] }
 0x23e   : > { %v4036_v5 = vadd.f32 %v12026_v42, %v3945_v3  ;;  %v4037_v12 = vadd.f32 %v11999_v36, %v3946_v43  ;;  %v4038_v17 = vadd.f32 %v12030_v60, %v3947_v45  ;;  %v4376_v18 = vcombine.low %v4031_v14, %v4032_v49  ;;  %v4157_v3 = vld [vmem:[#allocation3 + $0x44] sm:$0x1] }
 0x23f   : > { %v4377_v11 = vcombine.low %v4033_v30, %v4034_v15  ;;  %v3610_v56 = vcombine.high %v3608_v20, %v3608_v20  ;;  %v12859_v44 = vrot.slane %v3608_v20, %v11983_v38  ;;  %v12862_v27 = vrot.slane %v3609_v19, %v11983_v38 }
 0x240   : > { %v4384_v46 = vrot.slane %v4376_v18, %v11990_v50  ;;  %v4393_v40 = vcombine.low %v4035_v33, %v4036_v5  ;;  %v4394_v61 = vcombine.low %v4037_v12, %v4038_v17  ;;  %v3639_v0 = vcombine.high %v12814_v32, %v12814_v32 }
 0x241   : > { %v4391_v31 = vrot.slane %v4377_v11, %v11990_v50  ;;  %v12869_v59 = vrot.slane %v3610_v56, %v11983_v38  ;;  %v3640_v58 = vcombine.high %v12859_v44, %v12859_v44  ;;  %v3641_v20 = vcombine.high %v12862_v27, %v12862_v27 }
 0x242   : > { %v4401_v19 = vrot.slane %v4393_v40, %v11990_v50  ;;  %v4408_v8 = vrot.slane %v4394_v61, %v11990_v50  ;;  %v3823_v13 = vrot.slane %v12814_v32, %v12021_v10  ;;  %v3827_v51 = vrot.slane %v12862_v27, %v12021_v10 }
 0x243   : > { %v4392_v1 = vcombine.low %v4384_v46, %v4391_v31  ;;  %v3642_v55 = vcombine.high %v12869_v59, %v12869_v59  ;;  %v12884_v37 = vrot.slane %v3639_v0, %v12021_v10  ;;  %v12887_v6 = vrot.slane %v3641_v20, %v12021_v10 }
 0x244   : > { %v4409_v43 = vcombine.low %v4401_v19, %v4408_v8  ;;  %v3839_v14 = vrot.slane %v12859_v44, %v12021_v10  ;;  %v12894_v45 = vrot.slane %v3640_v58, %v12021_v10  ;;  %v3148_v33 = vcombine.high %v12495_v47, %v12495_v47 }
 0x245   : > { %v10560_v30 = vpack.c.bf16 %v4392_v1, %v4392_v1  ;;  %v12897_v15 = vrot.slane %v3642_v55, %v12021_v10  ;;  %v3155_v5 = vrot.slane %v12495_v47, %v11983_v38  ;;  %v4121_v17 = vsel %vm11949_vm0, 0, %v4120_v9  ;;  %v5044_v9 = vld [vmem:[#allocation3 + $0x24] sm:$0xf] }
 0x246   : > { %v10561_v12 = vpack.c.bf16 %v4409_v43, %v4409_v43  ;;  %v4158_v18 = vsel %vm11955_vm2, 0, %v4157_v3  ;;  %v3643_v11 = vcombine.high %v12500_v62, %v12500_v62  ;;  %v3162_v40 = vrot.slane %v3148_v33, %v11983_v38  ;;  %4122 = vst [vmem:[#allocation3 + $0x3c] sm:$0x1] %v4121_v17  ;;  %v5048_v17 = vld [vmem:[#allocation3 + $0x2c] sm:$0x1] }
 0x247   : > { %v4832_v56 = vshrl.u32 %v10560_v30, 16  ;;  %v4835_v46 = vshll.u32 %v10560_v30, 16  ;;  %v3163_v61 = vcombine.high %v3155_v5, %v3155_v5  ;;  %4159 = vst [vmem:[#allocation3 + $0x44] sm:$0x1] %v4158_v18  ;;  %v3171_v47 = vrot.slane %v3155_v5, %v11983_v38 }
 0x248   : > { %v4840_v0 = vshrl.u32 %v10561_v12, 16  ;;  %v4843_v31 = vshll.u32 %v10561_v12, 16  ;;  %v3650_v58 = vrot.slane %v12500_v62, %v11983_v38  ;;  %v3164_v19 = vcombine.high %v3162_v40, %v3162_v40 }
 0x249   : > { %v4834_v20 = vrot.slane %v4832_v56, 7  ;;  %v3178_v8 = vrot.slane %v3162_v40, %v11983_v38  ;;  %v3185_v1 = vrot.slane %v3163_v61, %v11983_v38  ;;  %v3193_v3 = vcombine.high %v3171_v47, %v3171_v47 }
 0x24a   : > { %v4842_v55 = vrot.slane %v4840_v0, 7  ;;  %v15235_v43 = vrot.slane %v12669_v48, %v12021_v10  ;;  %v3657_v33 = vrot.slane %v3643_v11, %v11983_v38  ;;  %v3192_v62 = vrot.slane %v3164_v19, %v11983_v38 }
 0x24b   : > { %v4837_v5 = vor.u32 %v4835_v46, %v4834_v20  ;;  %v4838_v12 = vrot.slane %v4834_v20, 4  ;;  %v3194_v18 = vcombine.high %v3178_v8, %v3178_v8  ;;  %v3195_v49 = vcombine.high %v3185_v1, %v3185_v1 }
 0x24c   : > { %v3948_v30 = vsel %vm2385_vm4, %v3171_v47, %v15235_v43  ;;  %v4845_v56 = vor.u32 %v4843_v31, %v4842_v55  ;;  %v4847_v40 = vrot.slane %v4842_v55, 4  ;;  %v15236_v61 = vrot.slane %v12683_v63, %v12021_v10 }
 0x24d   : > { %v5045_v48 = vsel %vm12245_vm7, %v4837_v5, %v5044_v9  ;;  %v3196_v47 = vcombine.high %v3192_v62, %v3192_v62  ;;  %v3950_v11 = vsel %vm2385_vm4, %v3193_v3, %v12701_v26  ;;  %v15237_v46 = vrot.slane %v12680_v22, %v12021_v10 }
 0x24e   : > { %v3949_v0 = vsel %vm2385_vm4, %v3185_v1, %v15236_v61  ;;  %v4846_v31 = vsel %vm12255_vm12, %v4838_v12, %v4845_v56  ;;  %5046 = vst [vmem:[#allocation3 + $0x24] sm:$0xf] %v5045_v48  ;;  %v5049_v63 = vsel %vm11949_vm0, %v4847_v40, %v5048_v17  ;;  %v3951_v19 = vsel %vm2385_vm4, %v3195_v49, %v12709_v54 }
 0x24f   : > { %v3952_v20 = vsel %vm2385_vm4, %v3178_v8, %v15237_v46  ;;  %v15238_v1 = vrot.slane %v12692_v52, %v12021_v10  ;;  %5047 = vst.msk [vmem:[#allocation3 + $0x28] sm:$0xf] %vm15194_vm5, %v4846_v31  ;;  %5050 = vst [vmem:[#allocation3 + $0x2c] sm:$0x1] %v5049_v63  ;;  %v3954_v22 = vsel %vm2385_vm4, %v3194_v18, %v12714_v24 }
 0x250   : > { %v3955_v8 = vsel %vm2385_vm4, %v3196_v47, %v12719_v57  ;;  %v4047_v55 = vadd.f32 %v11996_v23, %v3948_v30  ;;  %v4048_v9 = vadd.f32 %v12026_v42, %v3949_v0  ;;  %v4049_v54 = vadd.f32 %v11999_v36, %v3950_v11 }
 0x251   : > { %v3953_v26 = vsel %vm2385_vm4, %v3192_v62, %v15238_v1  ;;  %v4050_v49 = vadd.f32 %v12030_v60, %v3951_v19  ;;  %v4051_v52 = vadd.f32 %v11996_v23, %v3952_v20  ;;  %v4053_v43 = vadd.f32 %v11999_v36, %v3954_v22  ;;  %v4163_v22 = vld [vmem:[#allocation3 + $0x5c] sm:$0x1] }
 0x252   : > { %v4052_v3 = vadd.f32 %v12026_v42, %v3953_v26  ;;  %v4054_v5 = vadd.f32 %v12030_v60, %v3955_v8  ;;  %v4444_v24 = vcombine.low %v4047_v55, %v4048_v9  ;;  %v3658_v12 = vcombine.high %v3650_v58, %v3650_v58  ;;  %v4126_v26 = vld [vmem:[#allocation3 + $0x54] sm:$0x1] }
 0x253   : > { %v4445_v17 = vcombine.low %v4049_v54, %v4050_v49  ;;  %v3659_v62 = vcombine.high %v3657_v33, %v3657_v33  ;;  %v12957_v30 = vrot.slane %v3650_v58, %v11983_v38  ;;  %v12961_v40 = vrot.slane %v3657_v33, %v11983_v38 }
 0x254   : > { %v4461_v57 = vcombine.low %v4051_v52, %v4052_v3  ;;  %v4452_v18 = vrot.slane %v4444_v24, %v11990_v50  ;;  %v4462_v56 = vcombine.low %v4053_v43, %v4054_v5  ;;  %v12964_v61 = vrot.slane %v3658_v12, %v11983_v38 }
 0x255   : > { %v4459_v0 = vrot.slane %v4445_v17, %v11990_v50  ;;  %v12969_v47 = vrot.slane %v3659_v62, %v11983_v38  ;;  %v3688_v58 = vcombine.high %v12957_v30, %v12957_v30  ;;  %v3689_v46 = vcombine.high %v12961_v40, %v12961_v40 }
 0x256   : > { %v4469_v48 = vrot.slane %v4461_v57, %v11990_v50  ;;  %v4476_v11 = vrot.slane %v4462_v56, %v11990_v50  ;;  %v3690_v33 = vcombine.high %v12964_v61, %v12964_v61  ;;  %v3855_v20 = vrot.slane %v12957_v30, %v12021_v10 }
 0x257   : > { %v4460_v31 = vcombine.low %v4452_v18, %v4459_v0  ;;  %v3691_v63 = vcombine.high %v12969_v47, %v12969_v47  ;;  %v3859_v19 = vrot.slane %v12964_v61, %v12021_v10  ;;  %v12985_v1 = vrot.slane %v3688_v58, %v12021_v10 }
 0x258   : > { %v4477_v8 = vcombine.low %v4469_v48, %v4476_v11  ;;  %v12988_v55 = vrot.slane %v3690_v33, %v12021_v10  ;;  %v12995_v52 = vrot.slane %v3689_v46, %v12021_v10  ;;  %v3197_v43 = vcombine.high %v12505_v41, %v12505_v41 }
 0x259   : > { %v10564_v49 = vpack.c.bf16 %v4460_v31, %v4460_v31  ;;  %v12998_v3 = vrot.slane %v3691_v63, %v12021_v10  ;;  %v3204_v24 = vrot.slane %v12505_v41, %v11983_v38  ;;  %v4127_v12 = vsel %vm11949_vm0, 0, %v4126_v26  ;;  %v5058_v26 = vld [vmem:[#allocation3 + $0x3c] sm:$0xf] }
 0x25a   : > { %v10565_v5 = vpack.c.bf16 %v4477_v8, %v4477_v8  ;;  %v4164_v17 = vsel %vm11955_vm2, 0, %v4163_v22  ;;  %v3211_v18 = vrot.slane %v3197_v43, %v11983_v38  ;;  %4128 = vst [vmem:[#allocation3 + $0x54] sm:$0x1] %v4127_v12  ;;  %v3246_v56 = vcombine.high %v12548_v28, %v12548_v28 }
 0x25b   : > { %v4866_v57 = vshrl.u32 %v10564_v49, 16  ;;  %v4869_v62 = vshll.u32 %v10564_v49, 16  ;;  %4165 = vst [vmem:[#allocation3 + $0x5c] sm:$0x1] %v4164_v17  ;;  %v3212_v58 = vcombine.high %v3204_v24, %v3204_v24  ;;  %v3220_v41 = vrot.slane %v3204_v24, %v11983_v38  ;;  %v5062_v24 = vld [vmem:[#allocation3 + $0x44] sm:$0x1] }
 0x25c   : > { %v4874_v0 = vshrl.u32 %v10565_v5, 16  ;;  %v4877_v48 = vshll.u32 %v10565_v5, 16  ;;  %v3213_v46 = vcombine.high %v3211_v18, %v3211_v18  ;;  %v3227_v33 = vrot.slane %v3211_v18, %v11983_v38 }
 0x25d   : > { %v4868_v11 = vrot.slane %v4866_v57, 7  ;;  %v3253_v31 = vrot.slane %v12548_v28, %v11983_v38  ;;  %v3234_v22 = vrot.slane %v3212_v58, %v11983_v38  ;;  %v3242_v8 = vcombine.high %v3220_v41, %v3220_v41 }
 0x25e   : > { %v4876_v63 = vrot.slane %v4874_v0, 7  ;;  %v15239_v49 = vrot.slane %v12755_v35, %v12021_v10  ;;  %v3241_v17 = vrot.slane %v3213_v46, %v11983_v38  ;;  %v3243_v57 = vcombine.high %v3227_v33, %v3227_v33 }
 0x25f   : > { %v4871_v5 = vor.u32 %v4869_v62, %v4868_v11  ;;  %v4872_v12 = vrot.slane %v4868_v11, 4  ;;  %v3244_v9 = vcombine.high %v3234_v22, %v3234_v22  ;;  %v15240_v28 = vrot.slane %v12762_v2, %v12021_v10 }
 0x260   : > { %v3956_v43 = vsel %vm2385_vm4, %v3220_v41, %v15239_v49  ;;  %v4879_v18 = vor.u32 %v4877_v48, %v4876_v63  ;;  %v4881_v54 = vrot.slane %v4876_v63, 4  ;;  %v3245_v35 = vcombine.high %v3241_v17, %v3241_v17 }
 0x261   : > { %v3957_v0 = vsel %vm2385_vm4, %v3234_v22, %v15240_v28  ;;  %v5059_v58 = vsel %vm12245_vm7, %v4871_v5, %v5058_v26  ;;  %v3958_v62 = vsel %vm2385_vm4, %v3242_v8, %v12783_v16  ;;  %v15241_v41 = vrot.slane %v12758_v39, %v12021_v10 }
 0x262   : > { %v4880_v48 = vsel %vm12255_vm12, %v4872_v12, %v4879_v18  ;;  %5060 = vst [vmem:[#allocation3 + $0x3c] sm:$0xf] %v5059_v58  ;;  %v5063_v2 = vsel %vm11949_vm0, %v4881_v54, %v5062_v24  ;;  %v3959_v46 = vsel %vm2385_vm4, %v3244_v9, %v12788_v29  ;;  %v15242_v63 = vrot.slane %v12765_v25, %v12021_v10 }
 0x263   : > { %v3960_v11 = vsel %vm2385_vm4, %v3227_v33, %v15241_v41  ;;  %5061 = vst.msk [vmem:[#allocation3 + $0x40] sm:$0xf] %vm15194_vm5, %v4880_v48  ;;  %5064 = vst [vmem:[#allocation3 + $0x44] sm:$0x1] %v5063_v2  ;;  %v3962_v39 = vsel %vm2385_vm4, %v3243_v57, %v12793_v34  ;;  %v15243_v33 = vld [vmem:[#allocation7_spill] sm:$0xff]  ;;  %v4063_v22 = vadd.f32 %v11996_v23, %v3956_v43 }
 0x264   : > { %v3961_v16 = vsel %vm2385_vm4, %v3241_v17, %v15242_v63  ;;  %v3963_v26 = vsel %vm2385_vm4, %v3245_v35, %v15243_v33  ;;  %v4064_v54 = vadd.f32 %v12026_v42, %v3957_v0  ;;  %v4065_v29 = vadd.f32 %v11999_v36, %v3958_v62 }
 0x265   : > { %v4066_v9 = vadd.f32 %v12030_v60, %v3959_v46  ;;  %v4067_v25 = vadd.f32 %v11996_v23, %v3960_v11  ;;  %v4068_v8 = vadd.f32 %v12026_v42, %v3961_v16  ;;  %v4069_v49 = vadd.f32 %v11999_v36, %v3962_v39 }
 0x266   : > { %v4070_v5 = vadd.f32 %v12030_v60, %v3963_v26  ;;  %v4512_v34 = vcombine.low %v4063_v22, %v4064_v54  ;;  %v3260_v12 = vrot.slane %v3246_v56, %v11983_v38  ;;  %v3261_v43 = vcombine.high %v3253_v31, %v3253_v31 }
 0x267   : > { %v4513_v24 = vcombine.low %v4065_v29, %v4066_v9  ;;  %v4529_v17 = vcombine.low %v4067_v25, %v4068_v8  ;;  %v3269_v57 = vrot.slane %v3253_v31, %v11983_v38  ;;  %v15244_v32 = vrot.slane %v12869_v59, %v12021_v10  ;;  %v4132_v59 = vld [vmem:[#allocation3 + $0x6c] sm:$0x1]  ;;  %v4169_v25 = vld [vmem:[#allocation3 + $0x74] sm:$0x1] }
 0x268   : > { %v4520_v18 = vrot.slane %v4512_v34, %v11990_v50  ;;  %v4530_v28 = vcombine.low %v4069_v49, %v4070_v5  ;;  %v3262_v0 = vcombine.high %v3260_v12, %v3260_v12  ;;  %v3276_v58 = vrot.slane %v3260_v12, %v11983_v38 }
 0x269   : > { %v4527_v35 = vrot.slane %v4513_v24, %v11990_v50  ;;  %v4537_v62 = vrot.slane %v4529_v17, %v11990_v50  ;;  %v3283_v41 = vrot.slane %v3261_v43, %v11983_v38  ;;  %v3291_v11 = vcombine.high %v3269_v57, %v3269_v57 }
 0x26a   : > { %v4544_v56 = vrot.slane %v4530_v28, %v11990_v50  ;;  %v3290_v48 = vrot.slane %v3262_v0, %v11983_v38  ;;  %v3292_v2 = vcombine.high %v3276_v58, %v3276_v58  ;;  %v3964_v31 = vsel %vm2385_vm4, %v3269_v57, %v3823_v13  ;;  %v5072_v28 = vld [vmem:[#allocation3 + $0x54] sm:$0xf] }
 0x26b   : > { %v4528_v46 = vcombine.low %v4520_v18, %v4527_v35  ;;  %v3293_v63 = vcombine.high %v3283_v41, %v3283_v41  ;;  %v3965_v16 = vsel %vm2385_vm4, %v3283_v41, %v3827_v51  ;;  %v3966_v39 = vsel %vm2385_vm4, %v3291_v11, %v12884_v37  ;;  %v5076_v11 = vld [vmem:[#allocation3 + $0x5c] sm:$0x1] }
 0x26c   : > { %v4545_v33 = vcombine.low %v4537_v62, %v4544_v56  ;;  %v3294_v26 = vcombine.high %v3290_v48, %v3290_v48  ;;  %v3968_v22 = vsel %vm2385_vm4, %v3276_v58, %v3839_v14  ;;  %v3969_v13 = vsel %vm2385_vm4, %v3290_v48, %v15244_v32  ;;  %v15245_v48 = vld [vmem:[#allocation6_spill] sm:$0xff] }
 0x26d   : > { %v10568_v54 = vpack.c.bf16 %v4528_v46, %v4528_v46  ;;  %v3967_v27 = vsel %vm2385_vm4, %v3293_v63, %v12887_v6  ;;  %v3970_v51 = vsel %vm2385_vm4, %v3292_v2, %v12894_v45  ;;  %v4079_v37 = vadd.f32 %v11996_v23, %v3964_v31 }
 0x26e   : > { %v10569_v29 = vpack.c.bf16 %v4545_v33, %v4545_v33  ;;  %v3971_v44 = vsel %vm2385_vm4, %v3294_v26, %v12897_v15  ;;  %v4080_v14 = vadd.f32 %v12026_v42, %v3965_v16  ;;  %v4081_v9 = vadd.f32 %v11999_v36, %v3966_v39  ;;  %v4138_v39 = vld [vmem:[#allocation3 + $0x84] sm:$0x1] }
 0x26f   : > { %v4900_v8 = vshrl.u32 %v10568_v54, 16  ;;  %v4903_v49 = vshll.u32 %v10568_v54, 16  ;;  %v4082_v5 = vadd.f32 %v12030_v60, %v3967_v27  ;;  %v4083_v6 = vadd.f32 %v11996_v23, %v3968_v22 }
 0x270   : > { %v4908_v34 = vshrl.u32 %v10569_v29, 16  ;;  %v4911_v45 = vshll.u32 %v10569_v29, 16  ;;  %v4084_v12 = vadd.f32 %v12026_v42, %v3969_v13  ;;  %v4085_v24 = vadd.f32 %v11999_v36, %v3970_v51  ;;  %v4175_v13 = vld [vmem:[#allocation3 + $0x8c] sm:$0x1] }
 0x271   : > { %v4902_v17 = vrot.slane %v4900_v8, 7  ;;  %v4086_v15 = vadd.f32 %v12030_v60, %v3971_v44  ;;  %v4133_v43 = vsel %vm11949_vm0, 0, %v4132_v59  ;;  %v4170_v57 = vsel %vm11955_vm2, 0, %v4169_v25 }
 0x272   : > { %v4910_v18 = vrot.slane %v4908_v34, 7  ;;  %4134 = vst [vmem:[#allocation3 + $0x6c] sm:$0x1] %v4133_v43  ;;  %4171 = vst [vmem:[#allocation3 + $0x74] sm:$0x1] %v4170_v57  ;;  %v4580_v0 = vcombine.low %v4079_v37, %v4080_v14  ;;  %v4581_v58 = vcombine.low %v4081_v9, %v4082_v5  ;;  %v4597_v35 = vcombine.low %v4083_v6, %v4084_v12 }
 0x273   : > { %v4905_v62 = vor.u32 %v4903_v49, %v4902_v17  ;;  %v4906_v41 = vrot.slane %v4902_v17, 4  ;;  %v4598_v56 = vcombine.low %v4085_v24, %v4086_v15  ;;  %v3295_v2 = vcombine.high %v15245_v48, %v15245_v48 }
 0x274   : > { %v4913_v31 = vor.u32 %v4911_v45, %v4910_v18  ;;  %v4915_v46 = vrot.slane %v4910_v18, 4  ;;  %v4588_v63 = vrot.slane %v4580_v0, %v11990_v50  ;;  %v4595_v16 = vrot.slane %v4581_v58, %v11990_v50 }
 0x275   : > { %v5073_v33 = vsel %vm12245_vm7, %v4905_v62, %v5072_v28  ;;  %v4605_v26 = vrot.slane %v4597_v35, %v11990_v50  ;;  %v4612_v22 = vrot.slane %v4598_v56, %v11990_v50  ;;  %v3302_v32 = vrot.slane %v15245_v48, %v11983_v38 }
 0x276   : > { %v4914_v54 = vsel %vm12255_vm12, %v4906_v41, %v4913_v31  ;;  %5074 = vst [vmem:[#allocation3 + $0x54] sm:$0xf] %v5073_v33  ;;  %v5077_v27 = vsel %vm11949_vm0, %v4915_v46, %v5076_v11  ;;  %v4596_v51 = vcombine.low %v4588_v63, %v4595_v16  ;;  %v3309_v37 = vrot.slane %v3295_v2, %v11983_v38 }
 0x277   : > { %5075 = vst.msk [vmem:[#allocation3 + $0x58] sm:$0xf] %vm15194_vm5, %v4914_v54  ;;  %5078 = vst [vmem:[#allocation3 + $0x5c] sm:$0x1] %v5077_v27  ;;  %v4613_v29 = vcombine.low %v4605_v26, %v4612_v22  ;;  %v3310_v44 = vcombine.high %v3302_v32, %v3302_v32  ;;  %v3318_v14 = vrot.slane %v3302_v32, %v11983_v38  ;;  %v4139_v9 = vsel %vm11949_vm0, 0, %v4138_v39 }
 0x278   : > { %v10572_v59 = vpack.c.bf16 %v4596_v51, %v4596_v51  ;;  %v3311_v25 = vcombine.high %v3309_v37, %v3309_v37  ;;  %v3325_v8 = vrot.slane %v3309_v37, %v11983_v38  ;;  %4140 = vst [vmem:[#allocation3 + $0x84] sm:$0x1] %v4139_v9  ;;  %v4176_v49 = vsel %vm11955_vm2, 0, %v4175_v13 }
 0x279   : > { %v10573_v5 = vpack.c.bf16 %v4613_v29, %v4613_v29  ;;  %v3332_v6 = vrot.slane %v3310_v44, %v11983_v38  ;;  %v3340_v34 = vcombine.high %v3318_v14, %v3318_v14  ;;  %v3972_v45 = vsel %vm2385_vm4, %v3318_v14, %v3855_v20  ;;  %4177 = vst [vmem:[#allocation3 + $0x8c] sm:$0x1] %v4176_v49  ;;  %v5086_v62 = vld [vmem:[#allocation3 + $0x6c] sm:$0xf]  ;;  %v5090_v48 = vld [vmem:[#allocation3 + $0x74] sm:$0x1] }
 0x27a   : > { %v4934_v12 = vshrl.u32 %v10572_v59, 16  ;;  %v4937_v24 = vshll.u32 %v10572_v59, 16  ;;  %v3339_v17 = vrot.slane %v3311_v25, %v11983_v38  ;;  %v3341_v15 = vcombine.high %v3325_v8, %v3325_v8 }
 0x27b   : > { %v4942_v43 = vshrl.u32 %v10573_v5, 16  ;;  %v4945_v57 = vshll.u32 %v10573_v5, 16  ;;  %v3342_v18 = vcombine.high %v3332_v6, %v3332_v6  ;;  %v3973_v28 = vsel %vm2385_vm4, %v3332_v6, %v3859_v19 }
 0x27c   : > { %v4936_v0 = vrot.slane %v4934_v12, 7  ;;  %v3343_v58 = vcombine.high %v3339_v17, %v3339_v17  ;;  %v3974_v30 = vsel %vm2385_vm4, %v3340_v34, %v12985_v1  ;;  %v15246_v20 = vrot.slane %v12961_v40, %v12021_v10 }
 0x27d   : > { %v4944_v38 = vrot.slane %v4942_v43, 7  ;;  %v3975_v41 = vsel %vm2385_vm4, %v3342_v18, %v12988_v55  ;;  %v15247_v61 = vrot.slane %v12969_v47, %v12021_v10  ;;  %v3978_v11 = vsel %vm2385_vm4, %v3341_v15, %v12995_v52 }
 0x27e   : > { %v3976_v35 = vsel %vm2385_vm4, %v3325_v8, %v15246_v20  ;;  %v4939_v56 = vor.u32 %v4937_v24, %v4936_v0  ;;  %v4940_v1 = vrot.slane %v4936_v0, 4  ;;  %v3979_v40 = vsel %vm2385_vm4, %v3343_v58, %v12998_v3 }
 0x27f   : > { %v3977_v19 = vsel %vm2385_vm4, %v3339_v17, %v15247_v61  ;;  %v4095_v2 = vadd.f32 %v11996_v23, %v3972_v45  ;;  %v4947_v31 = vor.u32 %v4945_v57, %v4944_v38  ;;  %v4949_v46 = vrot.slane %v4944_v38, 4  ;;  %v5100_v49 = vld [vmem:[#allocation3 + $0x84] sm:$0xf] }
 0x280   : > { %v4096_v55 = vadd.f32 %v12026_v42, %v3973_v28  ;;  %v4097_v63 = vadd.f32 %v11999_v36, %v3974_v30  ;;  %v5087_v10 = vsel %vm12245_vm7, %v4939_v56, %v5086_v62  ;;  %v4098_v47 = vadd.f32 %v12030_v60, %v3975_v41  ;;  %v5104_v6 = vld [vmem:[#allocation3 + $0x8c] sm:$0x1] }
 0x281   : > { %v4099_v52 = vadd.f32 %v11996_v23, %v3976_v35  ;;  %v4100_v16 = vadd.f32 %v12026_v42, %v3977_v19  ;;  %v4948_v3 = vsel %vm12255_vm12, %v4940_v1, %v4947_v31  ;;  %5088 = vst [vmem:[#allocation3 + $0x6c] sm:$0xf] %v5087_v10  ;;  %v5091_v39 = vsel %vm11949_vm0, %v4949_v46, %v5090_v48 }
 0x282   : > { %v4101_v33 = vadd.f32 %v11999_v36, %v3978_v11  ;;  %v4102_v26 = vadd.f32 %v12030_v60, %v3979_v40  ;;  %5089 = vst.msk [vmem:[#allocation3 + $0x70] sm:$0xf] %vm15194_vm5, %v4948_v3  ;;  %5092 = vst [vmem:[#allocation3 + $0x74] sm:$0x1] %v5091_v39  ;;  %v4648_v22 = vcombine.low %v4095_v2, %v4096_v55  ;;  %v11241_v15 = vmov (!%p10231_p9), 0  }
 0x283   : > { %v4649_v32 = vcombine.low %v4097_v63, %v4098_v47  ;;  %v4665_v13 = vcombine.low %v4099_v52, %v4100_v16  ;;  %5111 = vst.msk [vmem:[#allocation3] sm:$0xf] (!%p10231_p9), %vm15194_vm5, %v11241_v15  ;;  %5112 = vst.msk [vmem:[#allocation3 + $0x4] sm:$0xf] (!%p10231_p9), %vm15194_vm5, %v11241_v15 }
 0x284   : > { %v4666_v23 = vcombine.low %v4101_v33, %v4102_v26  ;;  %v4656_v42 = vrot.slane %v4648_v22, %v11990_v50  ;;  %5114 = vst.msk [vmem:[#allocation3 + $0x8] sm:$0x1] (!%p10231_p9), %vm15193_vm15, %v11241_v15  ;;  %5117 = vst.msk [vmem:[#allocation3 + $0x14] sm:$0x1] (!%p10231_p9), %vm15193_vm15, %v11241_v15 }
 0x285   : > { %v4663_v54 = vrot.slane %v4649_v32, %v11990_v50  ;;  %v4673_v27 = vrot.slane %v4665_v13, %v11990_v50  ;;  %5115 = vst.msk [vmem:[#allocation3 + $0xc] sm:$0xf] (!%p10231_p9), %vm15194_vm5, %v11241_v15  ;;  %5116 = vst.msk [vmem:[#allocation3 + $0x10] sm:$0xf] (!%p10231_p9), %vm15194_vm5, %v11241_v15 }
 0x286   : > { %v4680_v51 = vrot.slane %v4666_v23, %v11990_v50 }
 0x287   : > { %v4664_v37 = vcombine.low %v4656_v42, %v4663_v54 }
 0x288   : > { %v4681_v29 = vcombine.low %v4673_v27, %v4680_v51 }
 0x289   : > { %v10576_v36 = vpack.c.bf16 %v4664_v37, %v4664_v37 }
 0x28a   : > { %v10577_v44 = vpack.c.bf16 %v4681_v29, %v4681_v29 }
 0x28b   : > { %v4968_v60 = vshrl.u32 %v10576_v36, 16  ;;  %v4971_v59 = vshll.u32 %v10576_v36, 16 }
 0x28c   : > { %v4976_v14 = vshrl.u32 %v10577_v44, 16  ;;  %v4979_v8 = vshll.u32 %v10577_v44, 16 }
 0x28d   : > { %v4970_v9 = vrot.slane %v4968_v60, 7  ;;  %5110 = sbr.rel (%p10231_p9) target bundleno = 660 (0x294), region = 68 }
 0x28e   : > { %v4978_v25 = vrot.slane %v4976_v14, 7 }
 0x28f   : > { %v4973_v5 = vor.u32 %v4971_v59, %v4970_v9  ;;  %v4974_v34 = vrot.slane %v4970_v9, 4 }
 0x290   : > { %v4981_v45 = vor.u32 %v4979_v8, %v4978_v25  ;;  %v4983_v12 = vrot.slane %v4978_v25, 4 }
 0x291   : > { %v5101_v24 = vsel %vm12245_vm7, %v4973_v5, %v5100_v49 }
 0x292   : > { %v4982_v50 = vsel %vm12255_vm12, %v4974_v34, %v4981_v45  ;;  %5102 = vst [vmem:[#allocation3 + $0x84] sm:$0xf] %v5101_v24  ;;  %v5105_v17 = vsel %vm11949_vm0, %v4983_v12, %v5104_v6 }
 0x293   : > { %5103 = vst.msk [vmem:[#allocation3 + $0x88] sm:$0xf] %vm15194_vm5, %v4982_v50  ;;  %5106 = vst [vmem:[#allocation3 + $0x8c] sm:$0x1] %v5105_v17 }
 0x294 PF: > { %p10232_p10 = scmp.ne.s32.totalorder %s11216_s17, 1 }
 0x295   : > { %v11242_v43 = vmov (!%p10232_p10), 0  }
 0x296   : > { %5121 = sbr.rel (%p10232_p10) target bundleno = 669 (0x29d), region = 72  ;;  %5123 = vst.msk [vmem:[#allocation3 + $0x78] sm:$0xf] (!%p10232_p10), %vm15194_vm5, %v11242_v43  ;;  %5124 = vst.msk [vmem:[#allocation3 + $0x7c] sm:$0xf] (!%p10232_p10), %vm15194_vm5, %v11242_v43 }
 0x297   : > { %5126 = vst.msk [vmem:[#allocation3 + $0x80] sm:$0x1] (!%p10232_p10), %vm15193_vm15, %v11242_v43  ;;  %5129 = vst.msk [vmem:[#allocation3 + $0x8c] sm:$0x1] (!%p10232_p10), %vm15193_vm15, %v11242_v43 }
 0x298   : > { %5127 = vst.msk [vmem:[#allocation3 + $0x84] sm:$0xf] (!%p10232_p10), %vm15194_vm5, %v11242_v43  ;;  %5128 = vst.msk [vmem:[#allocation3 + $0x88] sm:$0xf] (!%p10232_p10), %vm15194_vm5, %v11242_v43 }
 0x29d PF: > { %v5136_v57 = vld [vmem:[#allocation4 + $0x18] sm:$0x1]  ;;  %v5260_v18 = vld [vmem:[%s11439_s27] sm:$0xf]  ;;  %v5261_v28 = vld [vmem:[%s11439_s27 + $0x4] sm:$0xf] }
 0x29e   : > { %v5137_v0 = vsel %vm11949_vm0, 0, %v5136_v57  ;;  %v5277_v58 = vshrl.u32 %v5260_v18, 16  ;;  %v5280_v30 = vshll.u32 %v5260_v18, 16  ;;  %v5285_v20 = vshrl.u32 %v5261_v28, 16  ;;  %v5133_v38 = vld [vmem:[#allocation4 + $0xc] sm:$0x1] }
 0x29f   : > { %5138 = vst [vmem:[#allocation4 + $0x18] sm:$0x1] %v5137_v0  ;;  %v5288_v35 = vshll.u32 %v5261_v28, 16  ;;  %v5204_v62 = vld [vmem:[%s11389_s16 + $0x8] sm:$0xf]  ;;  %v5134_v19 = vsel %vm11949_vm0, 0, %v5133_v38 }
 0x2a0   : > { %v5279_v41 = vrot.slane %v5277_v58, 7  ;;  %v13198_v61 = vrot.slane %v5285_v20, 7  ;;  %v5205_v11 = vld [vmem:[%s11389_s16 + $0xc] sm:$0xf]  ;;  %v5224_v56 = vshrl.u32 %v5204_v62, 16  ;;  %v5227_v1 = vshll.u32 %v5204_v62, 16 }
 0x2a1   : > { %5135 = vst [vmem:[#allocation4 + $0xc] sm:$0x1] %v5134_v19  ;;  %v5232_v48 = vshrl.u32 %v5205_v11, 16  ;;  %v5235_v40 = vshll.u32 %v5205_v11, 16  ;;  %v5139_v2 = vld [vmem:[#allocation4 + $0x24] sm:$0x1] }
 0x2a2   : > { %v5282_v31 = vor.u32 %v5280_v30, %v5279_v41  ;;  %v5283_v46 = vrot.slane %v5279_v41, 4  ;;  %v5290_v55 = vor.u32 %v5288_v35, %v13198_v61  ;;  %v5262_v63 = vld [vmem:[%s11439_s27 + $0x8] sm:$0xf]  ;;  %v5263_v10 = vld [vmem:[%s11439_s27 + $0xc] sm:$0xf]  ;;  %v5226_v47 = vrot.slane %v5224_v56, 7 }
 0x2a3   : > { %v13206_v52 = vrot.slane %v5232_v48, 7  ;;  %v5140_v16 = vsel %vm11949_vm0, 0, %v5139_v2  ;;  %v5294_v3 = vshrl.u32 %v5262_v63, 16  ;;  %v5169_v39 = vld [vmem:[#allocation4 + $0x14] sm:$0x1]  ;;  %v5297_v26 = vshll.u32 %v5262_v63, 16 }
 0x2a4   : > { %v5291_v33 = vsel %vm12255_vm12, %v5283_v46, %v5290_v55  ;;  %5141 = vst [vmem:[#allocation4 + $0x24] sm:$0x1] %v5140_v16  ;;  %v5302_v22 = vshrl.u32 %v5263_v10, 16  ;;  %v5305_v32 = vshll.u32 %v5263_v10, 16  ;;  %v5130_v13 = vld [vmem:[#allocation4] sm:$0x1]  ;;  %v5229_v23 = vor.u32 %v5227_v1, %v5226_v47 }
 0x2a5   : > { %5440 = vst.msk [vmem:[#allocation4 + $0x1c] sm:$0xf] %vm15194_vm5, %v5291_v33  ;;  %v5230_v42 = vrot.slane %v5226_v47, 4  ;;  %v5237_v54 = vor.u32 %v5235_v40, %v13206_v52  ;;  %v5166_v27 = vld [vmem:[#allocation4 + $0x8] sm:$0x1]  ;;  %v5296_v29 = vrot.slane %v5294_v3, 7 }
 0x2a6   : > { %v5202_v51 = vld [vmem:[%s11389_s16] sm:$0xf]  ;;  %v5437_v37 = vld [vmem:[#allocation4 + $0x18] sm:$0xf]  ;;  %v13215_v36 = vrot.slane %v5302_v22, 7  ;;  %v5170_v44 = vsel %vm11955_vm2, 0, %v5169_v39 }
 0x2a7   : > { %v5131_v60 = vsel %vm11949_vm0, 0, %v5130_v13  ;;  %v5438_v14 = vsel %vm12245_vm7, %v5282_v31, %v5437_v37  ;;  %v5238_v9 = vsel %vm12255_vm12, %v5230_v42, %v5237_v54  ;;  %5171 = vst [vmem:[#allocation4 + $0x14] sm:$0x1] %v5170_v44  ;;  %v5167_v59 = vsel %vm11955_vm2, 0, %v5166_v27  ;;  %v5203_v25 = vld [vmem:[%s11389_s16 + $0x4] sm:$0xf] }
 0x2a8   : > { %5132 = vst [vmem:[#allocation4] sm:$0x1] %v5131_v60  ;;  %v5207_v8 = vshrl.u32 %v5202_v51, 16  ;;  %v5172_v49 = vld [vmem:[#allocation4 + $0x20] sm:$0x1]  ;;  %v5299_v6 = vor.u32 %v5297_v26, %v5296_v29  ;;  %v5300_v34 = vrot.slane %v5296_v29, 4  ;;  %v5307_v45 = vor.u32 %v5305_v32, %v13215_v36 }
 0x2a9   : > { %5439 = vst [vmem:[#allocation4 + $0x18] sm:$0xf] %v5438_v14  ;;  %v5253_v5 = vld [vmem:[#allocation4 + $0xc] sm:$0xf]  ;;  %5256 = vst.msk [vmem:[#allocation4 + $0x10] sm:$0xf] %vm15194_vm5, %v5238_v9 }
 0x2aa   : > { %5168 = vst [vmem:[#allocation4 + $0x8] sm:$0x1] %v5167_v59  ;;  %v5175_v12 = vld [vmem:[#allocation4 + $0x2c] sm:$0x1]  ;;  %v5254_v24 = vsel %vm12245_vm7, %v5229_v23, %v5253_v5  ;;  %v5209_v50 = vrot.slane %v5207_v8, 7  ;;  %v5210_v17 = vshll.u32 %v5202_v51, 16  ;;  %v5308_v57 = vsel %vm12255_vm12, %v5300_v34, %v5307_v45 }
 0x2ab   : > { %v5215_v15 = vshrl.u32 %v5203_v25, 16  ;;  %v5239_v43 = vrot.slane %v13206_v52, 4  ;;  %5255 = vst [vmem:[#allocation4 + $0xc] sm:$0xf] %v5254_v24  ;;  %v5218_v18 = vshll.u32 %v5203_v25, 16  ;;  %v5173_v28 = vsel %vm11955_vm2, 0, %v5172_v49 }
 0x2ac   : > { %v5142_v0 = vld [vmem:[#allocation4 + $0x30] sm:$0x1]  ;;  %v5444_v58 = vld [vmem:[#allocation4 + $0x24] sm:$0xf]  ;;  %5447 = vst.msk [vmem:[#allocation4 + $0x28] sm:$0xf] %vm15194_vm5, %v5308_v57  ;;  %v5212_v30 = vor.u32 %v5210_v17, %v5209_v50 }
 0x2ad   : > { %v5213_v20 = vrot.slane %v5209_v50, 4  ;;  %v5217_v35 = vrot.slane %v5215_v15, 7  ;;  %5174 = vst [vmem:[#allocation4 + $0x20] sm:$0x1] %v5173_v28  ;;  %v5176_v38 = vsel %vm11955_vm2, 0, %v5175_v12  ;;  %v5292_v62 = vrot.slane %v13198_v61, 4 }
 0x2ae   : > { %v5445_v41 = vsel %vm12245_vm7, %v5299_v6, %v5444_v58  ;;  %5177 = vst [vmem:[#allocation4 + $0x2c] sm:$0x1] %v5176_v38  ;;  %v6830_v19 = vld [vmem:[#allocation4 + $0x1c] sm:$0xf]  ;;  %v5309_v11 = vrot.slane %v13215_v36, 4  ;;  %v5143_v48 = vsel %vm11949_vm0, 0, %v5142_v0 }
 0x2af   : > { %5446 = vst [vmem:[#allocation4 + $0x24] sm:$0xf] %v5445_v41  ;;  %v5220_v56 = vor.u32 %v5218_v18, %v5217_v35  ;;  %v5222_v1 = vrot.slane %v5217_v35, 4  ;;  %v6868_v40 = vld [vmem:[#allocation4 + $0x1c] sm:$0xf]  ;;  %s11243_s29 = smov 12  }
 0x2b0   : > { %v5257_v2 = vld [vmem:[#allocation4 + $0x14] sm:$0x1]  ;;  %v5246_v31 = vld [vmem:[#allocation4] sm:$0xf]  ;;  %5144 = vst [vmem:[#allocation4 + $0x30] sm:$0x1] %v5143_v48 }
 0x2b1   : > { %v13247_v46 = vld [vmem:[%s11439_s27 + $0x10] sm:$0xf]  ;;  %v6829_v61 = vld [vmem:[#allocation4 + $0x18] sm:$0xf]  ;;  %v6828_v63 = vld [vmem:[#allocation4 + $0x10] sm:$0xf]  ;;  %v5258_v10 = vsel %vm11949_vm0, %v5239_v43, %v5257_v2  ;;  %v5221_v47 = vsel %vm12255_vm12, %v5213_v20, %v5220_v56  ;;  %v5247_v52 = vsel %vm12245_vm7, %v5212_v30, %v5246_v31 }
 0x2b2   : > { %v6858_v55 = vld [vmem:[#allocation4 + $0x18] sm:$0xe]  ;;  %v13255_v16 = vcombine.low %v6829_v61, %v6830_v19  ;;  %5259 = vst [vmem:[#allocation4 + $0x14] sm:$0x1] %v5258_v10  ;;  %5248 = vst [vmem:[#allocation4] sm:$0xf] %v5247_v52 }
 0x2b3   : > { %v6867_v3 = vld [vmem:[#allocation4 + $0x18] sm:$0xf]  ;;  %5249 = vst.msk [vmem:[#allocation4 + $0x4] sm:$0xf] %vm15194_vm5, %v5221_v47  ;;  %v5250_v33 = vld [vmem:[#allocation4 + $0x8] sm:$0x1]  ;;  %v10378_v26 = vcombine.low %v6858_v55, %v6830_v19 }
 0x2b4   : > { %v6897_v39 = vld [vmem:[#allocation4 + $0x18] sm:$0xe]  ;;  %v6827_v22 = vld [vmem:[#allocation4 + $0xc] sm:$0xf]  ;;  %v5251_v23 = vsel %vm11949_vm0, %v5222_v1, %v5250_v33  ;;  %7259 = vrot.lane.b32.xlu1 %v13255_v16, %s11243_s29  ;;  %v13264_v51 = vld [vmem:[#allocation4 + $0x28] sm:$0xf]  ;;  %v13266_v37 = vcombine.low %v6867_v3, %v6868_v40 }
 0x2b5   : > { %v6857_v32 = vld [vmem:[#allocation4 + $0xc] sm:$0xe]  ;;  %v10407_v13 = vcombine.low %v6897_v39, %v6868_v40  ;;  %v13262_v54 = vcombine.low %v6827_v22, %v6828_v63  ;;  %5252 = vst [vmem:[#allocation4 + $0x8] sm:$0x1] %v5251_v23  ;;  %v5441_v29 = vld [vmem:[#allocation4 + $0x20] sm:$0x1] }
 0x2b6   : > { %v6788_v42 = vld [vmem:[#allocation4 + $0xc] sm:$0xf]  ;;  %v10377_v27 = vcombine.low %v6857_v32, %v6828_v63  ;;  %v6789_v36 = vld [vmem:[#allocation4 + $0x10] sm:$0xf]  ;;  %vm5926_vm1 = vcmask 1046528   ;;  %v5442_v44 = vsel %vm11949_vm0, %v5292_v62, %v5441_v29  ;;  %v5311_v59 = vshrl.u32 %v13247_v46, 16 }
 0x2b7   : > { %v6817_v60 = vld [vmem:[#allocation4 + $0xc] sm:$0xe]  ;;  %v13270_v14 = vcombine.low %v6788_v42, %v6789_v36  ;;  %v5448_v9 = vld [vmem:[#allocation4 + $0x2c] sm:$0x1]  ;;  %7257 = vrot.lane.b32.xlu0 %v13262_v54, %s11243_s29  ;;  %v6869_v25 = vld [vmem:[#allocation4 + $0x24] sm:$0xf] }
 0x2b8   : > { %v7630_v8 = vshll.u32 %v13266_v37, 16  ;;  %5443 = vst [vmem:[#allocation4 + $0x20] sm:$0x1] %v5442_v44  ;;  %v7797_v49 = vrot.slane %v10407_v13, 1  ;;  %v10348_v5 = vcombine.low %v6817_v60, %v6789_v36  ;;  %v5449_v6 = vsel %vm11949_vm0, %v5309_v11, %v5448_v9  ;;  %v6790_v28 = vld [vmem:[#allocation4 + $0x18] sm:$0xf] }
 0x2b9   : > { %v13279_v34 = vcombine.low %v6869_v25, %v13264_v51  ;;  %v7477_v45 = vrot.slane %v10377_v27, 1  ;;  %v13281_v12 = vrot.slane %v10378_v26, 1  ;;  %v7320_v24 = vshrl.u32 %v13255_v16, 16  ;;  %5450 = vst [vmem:[#allocation4 + $0x2c] sm:$0x1] %v5449_v6  ;;  %s11244_s26 = smov 20  }
 0x2ba   : > { %v7160_v50 = vrot.slane %v10348_v5, 1  ;;  %v7322_v17 = vshll.u32 %v13255_v16, 16  ;;  %v7000_v15 = vshrl.u32 %v13270_v14, 16  ;;  %v7002_v43 = vshll.u32 %v13270_v14, 16  ;;  %v13292_v0 = vld [vmem:[#allocation4 + $0x1c] sm:$0xf] }
 0x2bb   : > { %v7642_v57 = vshll.u32 %v13279_v34, 16  ;;  %7579 = vrot.lane.b32.xlu1 %v13279_v34, %s11236_s15  ;;  %v13290_v18 = vld [vmem:[#allocation4 + $0x14] ss:$0 sps:$4 sm:$0x11]   ;;  %vm5755_vm3 = vsmask.f32 7424  ;;  %7577 = vrot.lane.b32.xlu0 %v13266_v37, %s11236_s15  ;;  %v13308_v63 = vcombine.low %v6790_v28, %v13292_v0 }
 0x2bc   : > { %v6787_v58 = vld [vmem:[#allocation4 + $0x4] sm:$0xf]  ;;  %v6816_v30 = vld [vmem:[#allocation4] sm:$0xe]  ;;  %v7478_v35 = vrot.slane %v13290_v18, 1  ;;  %v7324_v11 = vrot.slane %v7322_v17, 1 }
 0x2bd   : > { %v6786_v20 = vld [vmem:[#allocation4] sm:$0xf]  ;;  %v10942_v38 = vld [vmem:[#allocation4 + $0x8] ss:$0 sps:$4 sm:$0x11]   ;;  %v10347_v62 = vcombine.low %v6816_v30, %v6787_v58  ;;  %v7004_v3 = vrot.slane %v7002_v43, 1 }
 0x2be   : > { %v13297_v41 = vcombine.low %v6786_v20, %v6787_v58  ;;  %v10947_v19 = vld [vmem:[#allocation4 + $0x14] ss:$0 sps:$4 sm:$0x11]   ;;  %v7479_v56 = vsel %vm5926_vm1, %v7477_v45, %v7478_v35  ;;  %v7158_v48 = vrot.slane %v10942_v38, 1  ;;  %v13300_v40 = vld [vmem:[#allocation4 + $0x24] sm:$0xe] }
 0x2bf   : > { %v7157_v1 = vrot.slane %v10347_v62, 1  ;;  %7507 = vrot.lane.b32.xlu0 %v7479_v56, %s11244_s26  ;;  %v13303_v2 = vld [vmem:[#allocation4 + $0x20] ss:$0 sps:$4 sm:$0x11]   ;;  %v7161_v31 = vrot.slane %v10947_v19, 1  ;;  %v6995_v52 = vshll.u32 %v10942_v38, 16  ;;  %v7005_v36 = vor.u32 %v7004_v3, %v7000_v15 }
 0x2c0   : > { %v6988_v61 = vshrl.u32 %v13297_v41, 16  ;;  %v6990_v55 = vshll.u32 %v13297_v41, 16  ;;  %v10949_v47 = vld [vmem:[#allocation4 + $0x20] ss:$0 sps:$4 sm:$0x11]   ;;  %v7007_v39 = vshll.u32 %v10947_v19, 16  ;;  %v10408_v6 = vcombine.low %v13300_v40, %v13264_v51 }
 0x2c1   : > { %v7159_v10 = vsel %vm5926_vm1, %v7157_v1, %v7158_v48  ;;  %v6792_v33 = vld [vmem:[#allocation4 + $0x24] sm:$0xf]  ;;  %v13311_v26 = vld [vmem:[#allocation4 + $0x28] sm:$0xf]  ;;  %v7798_v22 = vrot.slane %v13303_v2, 1  ;;  %v7162_v32 = vsel %vm5926_vm1, %v7160_v50, %v7161_v31  ;;  %v7640_v23 = vshrl.u32 %v13279_v34, 16 }
 0x2c2   : > { %7187 = vrot.lane.b32.xlu1 %v7159_v10, %s11235_s12  ;;  %v6992_v13 = vrot.slane %v6990_v55, 1  ;;  %v7481_v42 = vrot.slane %v10949_v47, 1  ;;  %v6997_v27 = vrot.slane %v6995_v52, 1  ;;  %v7327_v29 = vshll.u32 %v10949_v47, 16  ;;  %s11245_s30 = smov 32   ;;  %v11011_v20 = vld [vmem:[%s15187_s7] sm:$0xff]  }
 0x2c3   : > { %v13317_v44 = vld [vmem:[#allocation4 + $0x2c] ss:$0 sps:$4 sm:$0x11]   ;;  %v7799_v60 = vsel %vm5926_vm1, %v7797_v49, %v7798_v22  ;;  %v7009_v25 = vrot.slane %v7007_v39, 1  ;;  %v7644_v5 = vrot.slane %v7642_v57, 1  ;;  %v7308_v45 = vshrl.u32 %v13262_v54, 16  ;;  %10719 = vmatprep.subr.bf16.mxu0 %v11011_v20 }
 0x2c4   : > { %v6993_v9 = vor.u32 %v6992_v13, %v6988_v61  ;;  %7827 = vrot.lane.b32.xlu0 %v7799_v60, %s11245_s30  ;;  %v7647_v34 = vshll.u32 %v13317_v44, 16  ;;  %v7310_v50 = vshll.u32 %v13262_v54, 16  ;;  %v13326_v17 = vld [vmem:[#allocation4 + $0x20] ss:$0 sps:$4 sm:$0x11]   ;;  %v7325_v15 = vor.u32 %v7324_v11, %v7320_v24  ;;  %s11246_s28 = smov 4   ;;  %10720 = vmatpush3.bf16.msra.mxu0 %v11011_v20 }
 0x2c5   : > { %v7315_v51 = vshll.u32 %v13290_v18, 16  ;;  %v13334_v43 = vcombine.low %v6792_v33, %v13311_v26  ;;  %v7482_v57 = vsel %vm5926_vm1, %v13281_v12, %v7481_v42  ;;  %v7329_v28 = vrot.slane %v7327_v29, 1  ;;  %v5265_v30 = vld [vmem:[%s11439_s27 + $0x14] sm:$0xf]  ;;  %v6818_v10 = vld [vmem:[#allocation4 + $0x18] sm:$0xe] }
 0x2c6   : > { %7189 = vrot.lane.b32.xlu1 %v7162_v32, %s11235_s12  ;;  %v6998_v49 = vsel %vm5755_vm3, %v6993_v9, %v6997_v27  ;;  %v7010_v54 = vsel %vm5755_vm3, %v7005_v36, %v7009_v25  ;;  %v7312_v58 = vrot.slane %v7310_v50, 1  ;;  %v7645_v35 = vor.u32 %v7644_v5, %v7640_v23  ;;  %v13345_v38 = vld [vmem:[#allocation4 + $0x2c] ss:$0 sps:$4 sm:$0x11]   ;;  %v6831_v52 = vld [vmem:[#allocation4 + $0x24] sm:$0xf] }
 0x2c7   : > { %v7649_v16 = vrot.slane %v7647_v34, 1  ;;  %v7014_v24 = vshll.u32 %v13308_v63, 16  ;;  %v7628_v18 = vshrl.u32 %v13266_v37, 16  ;;  %v7012_v12 = vshrl.u32 %v13308_v63, 16  ;;  %v13361_v32 = vld [vmem:[#allocation4 + $0x28] sm:$0xf] }
 0x2c8   : > { %7107 = vrot.lane.b32.xlu0 %v6998_v49, %s11246_s28  ;;  %v7019_v62 = vshll.u32 %v13326_v17, 16  ;;  %v7632_v19 = vrot.slane %v7630_v8, 1  ;;  %v7635_v11 = vshll.u32 %v13303_v2, 16  ;;  %v7313_v56 = vor.u32 %v7312_v58, %v7308_v45  ;;  %v6819_v8 = vld [vmem:[#allocation4 + $0x24] sm:$0xe]  ;;  %s11247_s25 = smov 28  }
 0x2c9   : > { %v7317_v1 = vrot.slane %v7315_v51, 1  ;;  %v7016_v48 = vrot.slane %v7014_v24, 1  ;;  %v7026_v40 = vshll.u32 %v13334_v43, 16  ;;  %v7330_v31 = vsel %vm5755_vm3, %v7325_v15, %v7329_v28  ;;  %v5178_v25 = vld [vmem:[#allocation4 + $0x38] sm:$0x1] }
 0x2ca   : > { %7509 = vrot.lane.b32.xlu1 %v7482_v57, %s11244_s26  ;;  %v7633_v61 = vor.u32 %v7632_v19, %v7628_v18  ;;  %v7637_v55 = vrot.slane %v7635_v11, 1  ;;  %v5319_v47 = vshrl.u32 %v5265_v30, 16  ;;  %v7031_v37 = vshll.u32 %v13345_v38, 16  ;;  %v5451_v50 = vld [vmem:[#allocation4 + $0x30] sm:$0xf]  ;;  %v11016_v58 = vld [vmem:[%s15187_s7 + $0x8] sm:$0xff]  }
 0x2cb   : > { %v5314_v2 = vshll.u32 %v13247_v46, 16  ;;  %v7650_v3 = vsel %vm5755_vm3, %v7645_v35, %v7649_v16  ;;  %v7021_v39 = vrot.slane %v7019_v62, 1  ;;  %v7024_v33 = vshrl.u32 %v13334_v43, 16  ;;  %v5145_v15 = vld [vmem:[#allocation4 + $0x3c] sm:$0x1]  ;;  %10721 = vmatprep.subr.bf16.mxu0 %v11016_v58 }
 0x2cc   : > { %7109 = vrot.lane.b32.xlu0 %v7010_v54, %s11246_s28  ;;  %v7028_v22 = vrot.slane %v7026_v40, 1  ;;  %v7318_v13 = vsel %vm5755_vm3, %v7313_v56, %v7317_v1  ;;  %v7017_v23 = vor.u32 %v7016_v48, %v7012_v12  ;;  %v7800_v42 = vrot.slane %v10408_v6, 1  ;;  %v5266_v54 = vld [vmem:[%s11439_s27 + $0x18] sm:$0xf]  ;;  %v5181_v16 = vld [vmem:[#allocation4 + $0x44] sm:$0x1]  ;;  %10722 = vmatpush3.bf16.msra.mxu0 %v11016_v58 }
 0x2cd   : > { %v10349_v27 = vcombine.low %v6818_v10, %v13292_v0  ;;  %v7638_v29 = vsel %vm5755_vm3, %v7633_v61, %v7637_v55  ;;  %v7801_v36 = vrot.slane %v13317_v44, 1  ;;  %v5313_v60 = vrot.slane %v5311_v59, 7  ;;  %v13378_v59 = vld [vmem:[#allocation4 + $0x2c] ss:$0 sps:$4 sm:$0x11]  }
 0x2ce   : > { %7429 = vrot.lane.b32.xlu1 %v7330_v31, %s11234_s18  ;;  %v13370_v9 = vrot.slane %v5319_v47, 7  ;;  %v7033_v5 = vrot.slane %v7031_v37, 1  ;;  %v10350_v34 = vcombine.low %v6819_v8, %v13311_v26  ;;  %v5322_v45 = vshll.u32 %v5265_v30, 16  ;;  %v5148_v24 = vld [vmem:[#allocation4 + $0x48] sm:$0x1] }
 0x2cf   : > { %v13374_v6 = vcombine.low %v6831_v52, %v13361_v32  ;;  %v7029_v0 = vor.u32 %v7028_v22, %v7024_v33  ;;  %v7167_v44 = vrot.slane %v13345_v38, 1  ;;  %v5316_v49 = vor.u32 %v5314_v2, %v5313_v60  ;;  %v13400_v11 = vld [vmem:[%s11439_s27 + $0x20] sm:$0xf]  ;;  %v5269_v31 = vld [vmem:[%s11439_s27 + $0x24] sm:$0xf] }
 0x2d0   : > { %7427 = vrot.lane.b32.xlu0 %v7318_v13, %s11234_s18  ;;  %v5317_v46 = vrot.slane %v5313_v60, 4  ;;  %v7163_v26 = vrot.slane %v10349_v27, 1  ;;  %v7164_v51 = vrot.slane %v13326_v17, 1  ;;  %v5324_v57 = vor.u32 %v5322_v45, %v13370_v9  ;;  %v5267_v17 = vld [vmem:[%s11439_s27 + $0x1c] sm:$0xf] }
 0x2d1   : > { %v5179_v28 = vsel %vm11955_vm2, 0, %v5178_v25  ;;  %v7022_v30 = vsel %vm5755_vm3, %v7017_v23, %v7021_v39  ;;  %v7802_v20 = vsel %vm5926_vm1, %v7800_v42, %v7801_v36  ;;  %v5452_v35 = vsel %vm12245_vm7, %v5316_v49, %v5451_v50  ;;  %v6859_v23 = vld [vmem:[#allocation4 + $0x24] sm:$0xe] }
 0x2d2   : > { %7749 = vrot.lane.b32.xlu1 %v7650_v3, %s11247_s25  ;;  %5180 = vst [vmem:[#allocation4 + $0x38] sm:$0x1] %v5179_v28  ;;  %v7166_v18 = vrot.slane %v10350_v34, 1  ;;  %v5325_v12 = vsel %vm12255_vm12, %v5317_v46, %v5324_v57  ;;  %5453 = vst [vmem:[#allocation4 + $0x30] sm:$0xf] %v5452_v35  ;;  %v7334_v62 = vshll.u32 %v13374_v6, 16  ;;  %v7034_v56 = vsel %vm5755_vm3, %v7029_v0, %v7033_v5 }
 0x2d3   : > { %v5146_v19 = vsel %vm11949_vm0, 0, %v5145_v15  ;;  %v5326_v1 = vrot.slane %v13370_v9, 4  ;;  %5454 = vst.msk [vmem:[#allocation4 + $0x34] sm:$0xf] %vm15194_vm5, %v5325_v12  ;;  %v5328_v48 = vshrl.u32 %v5266_v54, 16  ;;  %v5331_v40 = vshll.u32 %v5266_v54, 16 }
 0x2d4   : > { %7747 = vrot.lane.b32.xlu0 %v7638_v29, %s11247_s25  ;;  %5147 = vst [vmem:[#allocation4 + $0x3c] sm:$0x1] %v5146_v19  ;;  %v7165_v61 = vsel %vm5926_vm1, %v7163_v26, %v7164_v51  ;;  %v5336_v55 = vshrl.u32 %v5267_v17, 16  ;;  %v5339_v10 = vshll.u32 %v5267_v17, 16  ;;  %v5182_v47 = vsel %vm11955_vm2, 0, %v5181_v16 }
 0x2d5   : > { %v7339_v37 = vshll.u32 %v13378_v59, 16  ;;  %v5330_v8 = vrot.slane %v5328_v48, 7  ;;  %5183 = vst [vmem:[#allocation4 + $0x44] sm:$0x1] %v5182_v47  ;;  %v5149_v2 = vsel %vm11949_vm0, 0, %v5148_v24  ;;  %v5345_v52 = vshrl.u32 %v13400_v11, 16 }
 0x2d6   : > { %7111 = vrot.lane.b32.xlu1 %v7022_v30, %s11246_s28  ;;  %v5184_v3 = vld [vmem:[#allocation4 + $0x50] sm:$0x1]  ;;  %v7332_v39 = vshrl.u32 %v13374_v6, 16  ;;  %v7336_v33 = vrot.slane %v7334_v62, 1  ;;  %v5338_v22 = vrot.slane %v5336_v55, 7  ;;  %v5353_v13 = vshrl.u32 %v5269_v31, 16 }
 0x2d7   : > { %5150 = vst [vmem:[#allocation4 + $0x48] sm:$0x1] %v5149_v2  ;;  %v5333_v42 = vor.u32 %v5331_v40, %v5330_v8  ;;  %v5334_v27 = vrot.slane %v5330_v8, 4  ;;  %v5348_v29 = vshll.u32 %v13400_v11, 16  ;;  %v5356_v36 = vshll.u32 %v5269_v31, 16 }
 0x2d8   : > { %7829 = vrot.lane.b32.xlu0 %v7802_v20, %s11245_s30  ;;  %v5341_v9 = vor.u32 %v5339_v10, %v5338_v22  ;;  %v5347_v25 = vrot.slane %v5345_v52, 7  ;;  %v5355_v5 = vrot.slane %v5353_v13, 7  ;;  %v5185_v34 = vsel %vm11955_vm2, 0, %v5184_v3  ;;  %v5151_v11 = vld [vmem:[#allocation4 + $0x54] sm:$0x1] }
 0x2d9   : > { %v5455_v60 = vld [vmem:[#allocation4 + $0x38] sm:$0x1]  ;;  %v7168_v45 = vsel %vm5926_vm1, %v7166_v18, %v7167_v44  ;;  %v6833_v50 = vld [vmem:[#allocation4 + $0x30] sm:$0xf]  ;;  %v7341_v49 = vrot.slane %v7339_v37, 1  ;;  %v5343_v46 = vrot.slane %v5338_v22, 4  ;;  %v10379_v51 = vcombine.low %v6859_v23, %v13361_v32 }
 0x2da   : > { %7113 = vrot.lane.b32.xlu1 %v7034_v56, %s11246_s28  ;;  %v5456_v0 = vsel %vm11949_vm0, %v5326_v1, %v5455_v60  ;;  %v6871_v15 = vld [vmem:[#allocation4 + $0x30] sm:$0xf]  ;;  %5186 = vst [vmem:[#allocation4 + $0x50] sm:$0x1] %v5185_v34  ;;  %v6834_v26 = vld [vmem:[#allocation4 + $0x34] sm:$0xf]  ;;  %v7337_v57 = vor.u32 %v7336_v33, %v7332_v39  ;;  %v5342_v28 = vsel %vm12255_vm12, %v5334_v27, %v5341_v9 }
 0x2db   : > { %5457 = vst [vmem:[#allocation4 + $0x38] sm:$0x1] %v5456_v0  ;;  %v5458_v54 = vld [vmem:[#allocation4 + $0x3c] sm:$0xf]  ;;  %v13429_v38 = vld [vmem:[#allocation4 + $0x34] sm:$0xf]  ;;  %v10360_v58 = vcombine.low %v6833_v50, %v6834_v26  ;;  %v5350_v16 = vor.u32 %v5348_v29, %v5347_v25  ;;  %v5358_v18 = vor.u32 %v5356_v36, %v5355_v5 }
 0x2dc   : > { %7191 = vrot.lane.b32.xlu0 %v7165_v61, %s11235_s12  ;;  %v6860_v44 = vld [vmem:[#allocation4 + $0x30] sm:$0xe]  ;;  %v5459_v30 = vsel %vm12245_vm7, %v5333_v42, %v5458_v54  ;;  %5461 = vst.msk [vmem:[#allocation4 + $0x40] sm:$0xf] %vm15194_vm5, %v5342_v28  ;;  %v13437_v32 = vcombine.low %v6871_v15, %v13429_v38  ;;  %v5462_v35 = vld [vmem:[#allocation4 + $0x44] sm:$0x1]  ;;  %v7342_v56 = vsel %vm5755_vm3, %v7337_v57, %v7341_v49 }
 0x2dd   : > { %v6794_v20 = vld [vmem:[#allocation4 + $0x30] sm:$0xf]  ;;  %5460 = vst [vmem:[#allocation4 + $0x3c] sm:$0xf] %v5459_v30  ;;  %v13439_v17 = vld [vmem:[#allocation4 + $0x34] sm:$0xf]  ;;  %v5463_v40 = vsel %vm11949_vm0, %v5343_v46, %v5462_v35  ;;  %v10380_v31 = vcombine.low %v6860_v44, %v6834_v26 }
 0x2de   : > { %7193 = vrot.lane.b32.xlu1 %v7168_v45, %s11235_s12  ;;  %v5351_v24 = vrot.slane %v5347_v25, 4  ;;  %v7346_v12 = vshll.u32 %v10360_v58, 16  ;;  %v5360_v62 = vrot.slane %v5355_v5, 4  ;;  %v5465_v19 = vld [vmem:[#allocation4 + $0x48] sm:$0xf]  ;;  %v7483_v1 = vrot.slane %v10379_v51, 1 }
 0x2df   : > { %v7484_v48 = vrot.slane %v13378_v59, 1  ;;  %v7344_v61 = vshrl.u32 %v10360_v58, 16  ;;  %5464 = vst [vmem:[#allocation4 + $0x44] sm:$0x1] %v5463_v40  ;;  %v13448_v10 = vcombine.low %v6794_v20, %v13439_v17  ;;  %v7654_v47 = vshll.u32 %v13437_v32, 16 }
 0x2e0   : > { %7261 = vrot.lane.b32.xlu0 %v13374_v6, %s11243_s29  ;;  %v7348_v55 = vrot.slane %v7346_v12, 1  ;;  %v5359_v59 = vsel %vm12255_vm12, %v5351_v24, %v5358_v18  ;;  %v5466_v37 = vsel %vm12245_vm7, %v5350_v16, %v5465_v19  ;;  %v5152_v6 = vsel %vm11949_vm0, 0, %v5151_v11  ;;  %v6899_v42 = vld [vmem:[#allocation4 + $0x30] sm:$0xe] }
 0x2e1   : > { %v5469_v8 = vld [vmem:[#allocation4 + $0x50] sm:$0x1]  ;;  %5467 = vst [vmem:[#allocation4 + $0x48] sm:$0xf] %v5466_v37  ;;  %5468 = vst.msk [vmem:[#allocation4 + $0x4c] sm:$0xf] %vm15194_vm5, %v5359_v59  ;;  %v7485_v13 = vsel %vm5926_vm1, %v7483_v1, %v7484_v48  ;;  %v10409_v46 = vcombine.low %v6899_v42, %v13429_v38 }
 0x2e2   : > { %7263 = vrot.lane.b32.xlu1 %v10360_v58, %s11243_s29  ;;  %v10961_v2 = vld [vmem:[#allocation4 + $0x38] ss:$0 sps:$4 sm:$0x11]   ;;  %v5470_v52 = vsel %vm11949_vm0, %v5360_v62, %v5469_v8  ;;  %5153 = vst [vmem:[#allocation4 + $0x54] sm:$0x1] %v5152_v6  ;;  %v7349_v39 = vor.u32 %v7348_v55, %v7344_v61  ;;  %v7486_v22 = vrot.slane %v10380_v31, 1 }
 0x2e3   : > { %v6874_v3 = vld [vmem:[#allocation4 + $0x40] sm:$0xf]  ;;  %5471 = vst [vmem:[#allocation4 + $0x50] sm:$0x1] %v5470_v52  ;;  %v7351_v33 = vshll.u32 %v10961_v2, 16  ;;  %v7652_v36 = vshrl.u32 %v13437_v32, 16 }
 0x2e4   : > { %7431 = vrot.lane.b32.xlu0 %v7342_v56, %s11234_s18  ;;  %v6873_v23 = vld [vmem:[#allocation4 + $0x3c] sm:$0xf]  ;;  %v10968_v29 = vld [vmem:[#allocation4 + $0x38] ss:$0 sps:$4 sm:$0x11]   ;;  %v7656_v60 = vrot.slane %v7654_v47, 1 }
 0x2e5   : > { %v10390_v27 = vcombine.low %v6873_v23, %v6874_v3  ;;  %v7038_v9 = vshll.u32 %v13448_v10, 16  ;;  %v7353_v25 = vrot.slane %v7351_v33, 1  ;;  %v7487_v5 = vrot.slane %v10961_v2, 1  ;;  %v6796_v34 = vld [vmem:[#allocation4 + $0x3c] sm:$0xf] }
 0x2e6   : > { %v13465_v45 = vld [vmem:[#allocation4 + $0x40] sm:$0xf]  ;;  %v10967_v0 = vld [vmem:[#allocation4 + $0x44] ss:$0 sps:$4 sm:$0x11]   ;;  %v7659_v15 = vshll.u32 %v10968_v29, 16  ;;  %v7657_v28 = vor.u32 %v7656_v60, %v7652_v36 }
 0x2e7   : > { %v7666_v50 = vshll.u32 %v10390_v27, 16  ;;  %v7354_v49 = vsel %vm5755_vm3, %v7349_v39, %v7353_v25  ;;  %v13470_v26 = vld [vmem:[#allocation4 + $0x38] ss:$0 sps:$4 sm:$0x11]   ;;  %v6900_v51 = vld [vmem:[#allocation4 + $0x3c] sm:$0xe]  ;;  %v13474_v54 = vcombine.low %v6796_v34, %v13465_v45  ;;  %v7488_v44 = vsel %vm5926_vm1, %v7486_v22, %v7487_v5 }
 0x2e8   : > { %7511 = vrot.lane.b32.xlu0 %v7485_v13, %s11244_s26  ;;  %7433 = vrot.lane.b32.xlu1 %v7354_v49, %s11234_s18  ;;  %v7671_v57 = vshll.u32 %v10967_v0, 16  ;;  %v7664_v58 = vshrl.u32 %v10390_v27, 16  ;;  %v7661_v20 = vrot.slane %v7659_v15, 1  ;;  %v7036_v35 = vshrl.u32 %v13448_v10, 16  ;;  %v6820_v16 = vld [vmem:[#allocation4 + $0x30] sm:$0xe] }
 0x2e9   : > { %v7668_v30 = vrot.slane %v7666_v50, 1  ;;  %v5270_v38 = vld [vmem:[%s11439_s27 + $0x28] sm:$0xf]  ;;  %v10410_v24 = vcombine.low %v6900_v51, %v6874_v3  ;;  %v7040_v18 = vrot.slane %v7038_v9, 1  ;;  %v7043_v12 = vshll.u32 %v13470_v26, 16 }
 0x2ea   : > { %v7803_v62 = vrot.slane %v10409_v46, 1  ;;  %v13482_v19 = vld [vmem:[#allocation4 + $0x44] ss:$0 sps:$4 sm:$0x11]   ;;  %v7673_v11 = vrot.slane %v7671_v57, 1  ;;  %v7662_v56 = vsel %vm5755_vm3, %v7657_v28, %v7661_v20  ;;  %v7804_v1 = vrot.slane %v10968_v29, 1 }
 0x2eb   : > { %v7050_v48 = vshll.u32 %v13474_v54, 16  ;;  %v6835_v40 = vld [vmem:[#allocation4 + $0x3c] sm:$0xf]  ;;  %v7669_v31 = vor.u32 %v7668_v30, %v7664_v58  ;;  %v10351_v61 = vcombine.low %v6820_v16, %v13439_v17  ;;  %v7041_v55 = vor.u32 %v7040_v18, %v7036_v35  ;;  %v6837_v23 = vld [vmem:[#allocation4 + $0x48] sm:$0xf] }
 0x2ec   : > { %7581 = vrot.lane.b32.xlu0 %v13437_v32, %s11236_s15  ;;  %7513 = vrot.lane.b32.xlu1 %v7488_v44, %s11244_s26  ;;  %v13488_v32 = vld [vmem:[#allocation4 + $0x40] sm:$0xf]  ;;  %v7045_v47 = vrot.slane %v7043_v12, 1  ;;  %v7055_v59 = vshll.u32 %v13482_v19, 16  ;;  %v5362_v37 = vshrl.u32 %v5270_v38, 16  ;;  %v7805_v8 = vsel %vm5926_vm1, %v7803_v62, %v7804_v1 }
 0x2ed   : > { %v7806_v6 = vrot.slane %v10410_v24, 1  ;;  %v7807_v2 = vrot.slane %v10967_v0, 1  ;;  %v13495_v52 = vcombine.low %v6835_v40, %v13488_v32  ;;  %v5271_v3 = vld [vmem:[%s11439_s27 + $0x2c] sm:$0xf]  ;;  %v7674_v17 = vsel %vm5755_vm3, %v7669_v31, %v7673_v11  ;;  %v13500_v42 = vld [vmem:[#allocation4 + $0x4c] sm:$0xf] }
 0x2ee   : > { %v7048_v39 = vshrl.u32 %v13474_v54, 16  ;;  %v7052_v33 = vrot.slane %v7050_v48, 1  ;;  %v6821_v22 = vld [vmem:[#allocation4 + $0x3c] sm:$0xe]  ;;  %v7169_v13 = vrot.slane %v10351_v61, 1  ;;  %v7057_v29 = vrot.slane %v7055_v59, 1 }
 0x2ef   : > { %v7170_v36 = vrot.slane %v13470_v26, 1  ;;  %v13505_v60 = vld [vmem:[#allocation4 + $0x44] ss:$0 sps:$4 sm:$0x11]   ;;  %v5364_v9 = vrot.slane %v5362_v37, 7  ;;  %v7808_v25 = vsel %vm5926_vm1, %v7806_v6, %v7807_v2  ;;  %v7358_v5 = vshll.u32 %v13495_v52, 16 }
 0x2f0   : > { %7751 = vrot.lane.b32.xlu0 %v7662_v56, %s11247_s25  ;;  %7583 = vrot.lane.b32.xlu1 %v10390_v27, %s11236_s15  ;;  %v7046_v27 = vsel %vm5755_vm3, %v7041_v55, %v7045_v47  ;;  %v5365_v34 = vshll.u32 %v5270_v38, 16  ;;  %v5370_v50 = vshrl.u32 %v5271_v3, 16  ;;  %v5187_v0 = vld [vmem:[#allocation4 + $0x5c] sm:$0x1]  ;;  %v7053_v49 = vor.u32 %v7052_v33, %v7048_v39  ;;  %v5472_v26 = vld [vmem:[#allocation4 + $0x54] sm:$0xf] }
 0x2f1   : > { %v10352_v46 = vcombine.low %v6821_v22, %v13465_v45  ;;  %v13512_v15 = vcombine.low %v6837_v23, %v13500_v42  ;;  %v5373_v51 = vshll.u32 %v5271_v3, 16  ;;  %v6861_v57 = vld [vmem:[#allocation4 + $0x3c] sm:$0xe]  ;;  %v5368_v44 = vrot.slane %v5364_v9, 4  ;;  %v5154_v38 = vld [vmem:[#allocation4 + $0x60] sm:$0x1] }
 0x2f2   : > { %v5367_v28 = vor.u32 %v5365_v34, %v5364_v9  ;;  %v5372_v58 = vrot.slane %v5370_v50, 7  ;;  %v7173_v30 = vrot.slane %v13482_v19, 1  ;;  %v7171_v20 = vsel %vm5926_vm1, %v7169_v13, %v7170_v36  ;;  %v13517_v35 = vld [vmem:[#allocation4 + $0x50] ss:$0 sps:$4 sm:$0x11]  }
 0x2f3   : > { %v7363_v16 = vshll.u32 %v13505_v60, 16  ;;  %v5188_v45 = vsel %vm11955_vm2, 0, %v5187_v0  ;;  %v7356_v24 = vshrl.u32 %v13495_v52, 16  ;;  %v7360_v18 = vrot.slane %v7358_v5, 1  ;;  %v6875_v1 = vld [vmem:[#allocation4 + $0x48] sm:$0xf] }
 0x2f4   : > { %7831 = vrot.lane.b32.xlu0 %v7805_v8, %s11245_s30  ;;  %7753 = vrot.lane.b32.xlu1 %v7674_v17, %s11247_s25  ;;  %v5375_v12 = vor.u32 %v5373_v51, %v5372_v58  ;;  %v5473_v62 = vsel %vm12245_vm7, %v5367_v28, %v5472_v26  ;;  %5189 = vst [vmem:[#allocation4 + $0x5c] sm:$0x1] %v5188_v45  ;;  %v7172_v11 = vrot.slane %v10352_v46, 1  ;;  %v7370_v56 = vshll.u32 %v13512_v15, 16  ;;  %v13528_v48 = vld [vmem:[#allocation4 + $0x4c] sm:$0xf] }
 0x2f5   : > { %v7058_v19 = vsel %vm5755_vm3, %v7053_v49, %v7057_v29  ;;  %5474 = vst [vmem:[#allocation4 + $0x54] sm:$0xf] %v5473_v62  ;;  %v5272_v31 = vld [vmem:[%s11439_s27 + $0x30] sm:$0xf]  ;;  %v5273_v61 = vld [vmem:[%s11439_s27 + $0x34] sm:$0xf]  ;;  %v10381_v47 = vcombine.low %v6861_v57, %v13488_v32  ;;  %v7361_v6 = vor.u32 %v7360_v18, %v7356_v24  ;;  %v13540_v3 = vcombine.low %v6875_v1, %v13528_v48 }
 0x2f6   : > { %v5376_v40 = vsel %vm12255_vm12, %v5368_v44, %v5375_v12  ;;  %v6862_v55 = vld [vmem:[#allocation4 + $0x48] sm:$0xe]  ;;  %v7368_v59 = vshrl.u32 %v13512_v15, 16  ;;  %v7365_v37 = vrot.slane %v7363_v16, 1  ;;  %v5190_v8 = vld [vmem:[#allocation4 + $0x68] sm:$0x1]  ;;  %v7174_v33 = vsel %vm5926_vm1, %v7172_v11, %v7173_v30 }
 0x2f7   : > { %5475 = vst.msk [vmem:[#allocation4 + $0x58] sm:$0xf] %vm15194_vm5, %v5376_v40  ;;  %v5377_v2 = vrot.slane %v5372_v58, 4  ;;  %v5155_v17 = vsel %vm11949_vm0, 0, %v5154_v38  ;;  %v5157_v39 = vld [vmem:[#allocation4 + $0x6c] sm:$0x1]  ;;  %v10382_v23 = vcombine.low %v6862_v55, %v13500_v42 }
 0x2f8   : > { %7833 = vrot.lane.b32.xlu0 %v7808_v25, %s11245_s30  ;;  %7115 = vrot.lane.b32.xlu1 %v7046_v27, %s11246_s28  ;;  %v7372_v32 = vrot.slane %v7370_v56, 1  ;;  %v7375_v22 = vshll.u32 %v13517_v35, 16  ;;  %5156 = vst [vmem:[#allocation4 + $0x60] sm:$0x1] %v5155_v17  ;;  %v5379_v13 = vshrl.u32 %v5272_v31, 16  ;;  %v5382_v29 = vshll.u32 %v5272_v31, 16 }
 0x2f9   : > { %v13547_v27 = vld [vmem:[#allocation4 + $0x50] ss:$0 sps:$4 sm:$0x11]   ;;  %v5387_v36 = vshrl.u32 %v5273_v61, 16  ;;  %v5191_v9 = vsel %vm11955_vm2, 0, %v5190_v8  ;;  %v7489_v25 = vrot.slane %v10381_v47, 1  ;;  %v7366_v42 = vsel %vm5755_vm3, %v7361_v6, %v7365_v37 }
 0x2fa   : > { %v7490_v5 = vrot.slane %v13505_v60, 1  ;;  %v5381_v50 = vrot.slane %v5379_v13, 7  ;;  %5192 = vst [vmem:[#allocation4 + $0x68] sm:$0x1] %v5191_v9  ;;  %v5158_v0 = vsel %vm11949_vm0, 0, %v5157_v39  ;;  %v7678_v46 = vshll.u32 %v13540_v3, 16 }
 0x2fb   : > { %v5476_v34 = vld [vmem:[#allocation4 + $0x5c] sm:$0x1]  ;;  %5159 = vst [vmem:[#allocation4 + $0x6c] sm:$0x1] %v5158_v0  ;;  %v7373_v26 = vor.u32 %v7372_v32, %v7368_v59  ;;  %v7377_v60 = vrot.slane %v7375_v22, 1  ;;  %v5389_v44 = vrot.slane %v5387_v36, 7 }
 0x2fc   : > { %7195 = vrot.lane.b32.xlu0 %v7171_v20, %s11235_s12  ;;  %7117 = vrot.lane.b32.xlu1 %v7058_v19, %s11246_s28  ;;  %v6877_v49 = vld [vmem:[#allocation4 + $0x54] sm:$0xf]  ;;  %v5477_v51 = vsel %vm11949_vm0, %v5377_v2, %v5476_v34  ;;  %v6798_v57 = vld [vmem:[#allocation4 + $0x48] sm:$0xf]  ;;  %v13561_v28 = vld [vmem:[#allocation4 + $0x4c] sm:$0xf]  ;;  %v5384_v20 = vor.u32 %v5382_v29, %v5381_v50  ;;  %v7491_v45 = vsel %vm5926_vm1, %v7489_v25, %v7490_v5 }
 0x2fd   : > { %5478 = vst [vmem:[#allocation4 + $0x5c] sm:$0x1] %v5477_v51  ;;  %v7492_v58 = vrot.slane %v10382_v23, 1  ;;  %v5385_v16 = vrot.slane %v5381_v50, 4  ;;  %v6901_v24 = vld [vmem:[#allocation4 + $0x48] sm:$0xe]  ;;  %v13576_v11 = vcombine.low %v6798_v57, %v13561_v28  ;;  %v7378_v31 = vsel %vm5755_vm3, %v7373_v26, %v7377_v60 }
 0x2fe   : > { %v13563_v30 = vld [vmem:[#allocation4 + $0x58] sm:$0xf]  ;;  %v7676_v18 = vshrl.u32 %v13540_v3, 16  ;;  %v7683_v12 = vshll.u32 %v13547_v27, 16  ;;  %v5274_v62 = vld [vmem:[%s11439_s27 + $0x38] sm:$0xf]  ;;  %v10411_v37 = vcombine.low %v6901_v24, %v13528_v48 }
 0x2ff   : > { %v13568_v38 = vcombine.low %v6877_v49, %v13563_v30  ;;  %v7680_v19 = vrot.slane %v7678_v46, 1  ;;  %v5394_v1 = vrot.slane %v5389_v44, 4  ;;  %v5479_v40 = vld [vmem:[#allocation4 + $0x60] sm:$0xf]  ;;  %v6800_v47 = vld [vmem:[#allocation4 + $0x54] sm:$0xf] }
 0x300   : > { %7265 = vrot.lane.b32.xlu0 %v13495_v52, %s11243_s29  ;;  %7197 = vrot.lane.b32.xlu1 %v7174_v33, %s11235_s12  ;;  %v5390_v52 = vshll.u32 %v5273_v61, 16  ;;  %v7493_v61 = vrot.slane %v13517_v35, 1  ;;  %v13581_v59 = vld [vmem:[#allocation4 + $0x58] sm:$0xf]  ;;  %v5480_v6 = vsel %vm12245_vm7, %v5384_v20, %v5479_v40  ;;  %v5396_v17 = vshrl.u32 %v5274_v62, 16 }
 0x301   : > { %v7690_v55 = vshll.u32 %v13568_v38, 16  ;;  %v13584_v8 = vld [vmem:[#allocation4 + $0x50] ss:$0 sps:$4 sm:$0x11]   ;;  %v5483_v2 = vld [vmem:[#allocation4 + $0x68] sm:$0x1]  ;;  %v7681_v32 = vor.u32 %v7680_v19, %v7676_v18  ;;  %v13599_v13 = vcombine.low %v6800_v47, %v13581_v59 }
 0x302   : > { %v5392_v56 = vor.u32 %v5390_v52, %v5389_v44  ;;  %v6902_v35 = vld [vmem:[#allocation4 + $0x54] sm:$0xe]  ;;  %v7685_v39 = vrot.slane %v7683_v12, 1  ;;  %5481 = vst [vmem:[#allocation4 + $0x60] sm:$0xf] %v5480_v6  ;;  %v5484_v48 = vsel %vm11949_vm0, %v5394_v1, %v5483_v2  ;;  %v7062_v22 = vshll.u32 %v13576_v11, 16 }
 0x303   : > { %5485 = vst [vmem:[#allocation4 + $0x68] sm:$0x1] %v5484_v48  ;;  %v7494_v23 = vsel %vm5926_vm1, %v7492_v58, %v7493_v61  ;;  %v7688_v29 = vshrl.u32 %v13568_v38, 16  ;;  %v7692_v36 = vrot.slane %v7690_v55, 1  ;;  %v6822_v9 = vld [vmem:[#allocation4 + $0x48] sm:$0xe]  ;;  %v10412_v0 = vcombine.low %v6902_v35, %v13563_v30 }
 0x304   : > { %7435 = vrot.lane.b32.xlu0 %v7366_v42, %s11234_s18  ;;  %7267 = vrot.lane.b32.xlu1 %v13512_v15, %s11243_s29  ;;  %v5393_v15 = vsel %vm12255_vm12, %v5385_v16, %v5392_v56  ;;  %v13595_v33 = vld [vmem:[#allocation4 + $0x5c] ss:$0 sps:$4 sm:$0x11]   ;;  %v7067_v5 = vshll.u32 %v13584_v8, 16  ;;  %v7809_v34 = vrot.slane %v10411_v37, 1  ;;  %v13605_v50 = vrot.slane %v5396_v17, 7 }
 0x305   : > { %5482 = vst.msk [vmem:[#allocation4 + $0x64] sm:$0xf] %vm15194_vm5, %v5393_v15  ;;  %v7695_v25 = vshll.u32 %v13595_v33, 16  ;;  %v7810_v42 = vrot.slane %v13547_v27, 1  ;;  %v6839_v49 = vld [vmem:[#allocation4 + $0x54] sm:$0xf]  ;;  %v7686_v26 = vsel %vm5755_vm3, %v7681_v32, %v7685_v39  ;;  %v7693_v30 = vor.u32 %v7692_v36, %v7688_v29 }
 0x306   : > { %v13611_v46 = vld [vmem:[#allocation4 + $0x58] sm:$0xf]  ;;  %v5275_v51 = vld [vmem:[%s11439_s27 + $0x3c] sm:$0xf]  ;;  %v5399_v52 = vshll.u32 %v5274_v62, 16  ;;  %v7060_v60 = vshrl.u32 %v13576_v11, 16  ;;  %v10353_v27 = vcombine.low %v6822_v9, %v13561_v28 }
 0x307   : > { %v7064_v57 = vrot.slane %v7062_v22, 1  ;;  %v7074_v44 = vshll.u32 %v13599_v13, 16  ;;  %v5486_v58 = vld [vmem:[#allocation4 + $0x6c] sm:$0xf]  ;;  %v7697_v20 = vrot.slane %v7695_v25, 1  ;;  %v13622_v16 = vcombine.low %v6839_v49, %v13611_v46 }
 0x308   : > { %7515 = vrot.lane.b32.xlu0 %v7491_v45, %s11244_s26  ;;  %7437 = vrot.lane.b32.xlu1 %v7378_v31, %s11234_s18  ;;  %v5401_v45 = vor.u32 %v5399_v52, %v13605_v50  ;;  %v5193_v24 = vld [vmem:[#allocation4 + $0x74] sm:$0x1]  ;;  %v7069_v18 = vrot.slane %v7067_v5, 1  ;;  %v7811_v12 = vsel %vm5926_vm1, %v7809_v34, %v7810_v42  ;;  %v7812_v62 = vrot.slane %v10412_v0, 1  ;;  %v6823_v1 = vld [vmem:[#allocation4 + $0x54] sm:$0xe] }
 0x309   : > { %v7813_v19 = vrot.slane %v13595_v33, 1  ;;  %v7065_v56 = vor.u32 %v7064_v57, %v7060_v60  ;;  %v6841_v28 = vld [vmem:[#allocation4 + $0x60] sm:$0xf]  ;;  %v6863_v31 = vld [vmem:[#allocation4 + $0x54] sm:$0xe]  ;;  %v5404_v61 = vshrl.u32 %v5275_v51, 16  ;;  %v7698_v37 = vsel %vm5755_vm3, %v7693_v30, %v7697_v20 }
 0x30a   : > { %v5407_v55 = vshll.u32 %v5275_v51, 16  ;;  %v5487_v47 = vsel %vm12245_vm7, %v5401_v45, %v5486_v58  ;;  %v7072_v15 = vshrl.u32 %v13599_v13, 16  ;;  %v7076_v6 = vrot.slane %v7074_v44, 1  ;;  %v13637_v17 = vld [vmem:[#allocation4 + $0x5c] ss:$0 sps:$4 sm:$0x11]  }
 0x30b   : > { %5488 = vst [vmem:[#allocation4 + $0x6c] sm:$0xf] %v5487_v47  ;;  %v5402_v35 = vrot.slane %v13605_v50, 4  ;;  %v5406_v39 = vrot.slane %v5404_v61, 7  ;;  %v7175_v48 = vrot.slane %v10353_v27, 1  ;;  %v5194_v32 = vsel %vm11955_vm2, 0, %v5193_v24 }
 0x30c   : > { %7585 = vrot.lane.b32.xlu0 %v13540_v3, %s11236_s15  ;;  %7517 = vrot.lane.b32.xlu1 %v7494_v23, %s11244_s26  ;;  %v13618_v3 = vld [vmem:[#allocation4 + $0x5c] ss:$0 sps:$4 sm:$0x11]   ;;  %v13630_v40 = vld [vmem:[#allocation4 + $0x64] sm:$0xf]  ;;  %v7070_v22 = vsel %vm5755_vm3, %v7065_v56, %v7069_v18  ;;  %v7814_v23 = vsel %vm5926_vm1, %v7812_v62, %v7813_v19  ;;  %v7176_v29 = vrot.slane %v13584_v8, 1  ;;  %v7077_v9 = vor.u32 %v7076_v6, %v7072_v15 }
 0x30d   : > { %v7079_v2 = vshll.u32 %v13618_v3, 16  ;;  %v13643_v33 = vcombine.low %v6841_v28, %v13630_v40  ;;  %v5409_v36 = vor.u32 %v5407_v55, %v5406_v39  ;;  %5195 = vst [vmem:[#allocation4 + $0x74] sm:$0x1] %v5194_v32  ;;  %v10354_v5 = vcombine.low %v6823_v1, %v13581_v59  ;;  %v5160_v51 = vld [vmem:[#allocation4 + $0x78] sm:$0x1] }
 0x30e   : > { %v10383_v34 = vcombine.low %v6863_v31, %v13611_v46  ;;  %v7380_v50 = vshrl.u32 %v13622_v16, 16  ;;  %v7387_v42 = vshll.u32 %v13637_v17, 16  ;;  %v13658_v8 = vld [vmem:[#allocation4 + $0x68] ss:$0 sps:$4 sm:$0x11]   ;;  %v7177_v46 = vsel %vm5926_vm1, %v7175_v48, %v7176_v29 }
 0x30f   : > { %v7081_v25 = vrot.slane %v7079_v2, 1  ;;  %v5410_v49 = vsel %vm12255_vm12, %v5402_v35, %v5409_v36  ;;  %v7394_v52 = vshll.u32 %v13643_v33, 16  ;;  %v10233_v59 = vld [vmem:[%s11389_s16 + $0x10] sm:$0xf]  ;;  %v13665_v57 = vld [vmem:[#allocation4 + $0x64] sm:$0xf] }
 0x310   : > { %7755 = vrot.lane.b32.xlu0 %v7686_v26, %s11247_s25  ;;  %7587 = vrot.lane.b32.xlu1 %v13568_v38, %s11236_s15  ;;  %v7382_v38 = vshll.u32 %v13622_v16, 16  ;;  %5489 = vst.msk [vmem:[#allocation4 + $0x70] sm:$0xf] %vm15194_vm5, %v5410_v49  ;;  %v5411_v26 = vrot.slane %v5406_v39, 4  ;;  %v6879_v60 = vld [vmem:[#allocation4 + $0x60] sm:$0xf] }
 0x311   : > { %v7082_v44 = vsel %vm5755_vm3, %v7077_v9, %v7081_v25  ;;  %v7178_v58 = vrot.slane %v10354_v5, 1  ;;  %v7179_v30 = vrot.slane %v13618_v3, 1  ;;  %v7495_v20 = vrot.slane %v10383_v34, 1  ;;  %v10234_v27 = vld [vmem:[%s11389_s16 + $0x14] sm:$0xf] }
 0x312   : > { %v7384_v0 = vrot.slane %v7382_v38, 1  ;;  %v7392_v45 = vshrl.u32 %v13643_v33, 16  ;;  %v7389_v18 = vrot.slane %v7387_v42, 1  ;;  %v5196_v62 = vld [vmem:[#allocation4 + $0x80] sm:$0x1]  ;;  %v7396_v19 = vrot.slane %v7394_v52, 1 }
 0x313   : > { %v7399_v56 = vshll.u32 %v13658_v8, 16  ;;  %v13676_v1 = vcombine.low %v6879_v60, %v13665_v57  ;;  %v5499_v3 = vshrl.u32 %v10233_v59, 16  ;;  %v6864_v31 = vld [vmem:[#allocation4 + $0x60] sm:$0xe]  ;;  %v5502_v55 = vshll.u32 %v10233_v59, 16 }
 0x314   : > { %7835 = vrot.lane.b32.xlu0 %v7811_v12, %s11245_s30  ;;  %7757 = vrot.lane.b32.xlu1 %v7698_v37, %s11247_s25  ;;  %v7385_v24 = vor.u32 %v7384_v0, %v7380_v50  ;;  %v5161_v12 = vsel %vm11949_vm0, 0, %v5160_v51  ;;  %v5490_v28 = vld [vmem:[#allocation4 + $0x74] sm:$0x1]  ;;  %v5507_v47 = vshrl.u32 %v10234_v27, 16  ;;  %v5510_v37 = vshll.u32 %v10234_v27, 16 }
 0x315   : > { %5162 = vst [vmem:[#allocation4 + $0x78] sm:$0x1] %v5161_v12  ;;  %v5491_v61 = vsel %vm11949_vm0, %v5411_v26, %v5490_v28  ;;  %v7180_v15 = vsel %vm5926_vm1, %v7178_v58, %v7179_v30  ;;  %v6881_v6 = vld [vmem:[#allocation4 + $0x6c] sm:$0xf]  ;;  %v5501_v38 = vrot.slane %v5499_v3, 7  ;;  %v5197_v32 = vsel %vm11955_vm2, 0, %v5196_v62 }
 0x316   : > { %5492 = vst [vmem:[#allocation4 + $0x74] sm:$0x1] %v5491_v61  ;;  %v13682_v2 = vld [vmem:[#allocation4 + $0x68] ss:$0 sps:$4 sm:$0x11]   ;;  %v5509_v48 = vrot.slane %v5507_v47, 7  ;;  %v7397_v0 = vor.u32 %v7396_v19, %v7392_v45 }
 0x317   : > { %v13684_v35 = vld [vmem:[#allocation4 + $0x70] sm:$0xf]  ;;  %v6903_v39 = vld [vmem:[#allocation4 + $0x60] sm:$0xe]  ;;  %v7496_v29 = vrot.slane %v13637_v17, 1  ;;  %v7702_v36 = vshll.u32 %v13676_v1, 16  ;;  %v5504_v34 = vor.u32 %v5502_v55, %v5501_v38 }
 0x318   : > { %7837 = vrot.lane.b32.xlu0 %v7814_v23, %s11245_s30  ;;  %7119 = vrot.lane.b32.xlu1 %v7070_v22, %s11246_s28  ;;  %v10384_v22 = vcombine.low %v6864_v31, %v13630_v40  ;;  %v7390_v23 = vsel %vm5755_vm3, %v7385_v24, %v7389_v18  ;;  %v6802_v9 = vld [vmem:[#allocation4 + $0x60] sm:$0xf]  ;;  %v13694_v25 = vld [vmem:[#allocation4 + $0x64] sm:$0xf]  ;;  %5198 = vst [vmem:[#allocation4 + $0x80] sm:$0x1] %v5197_v32 }
 0x319   : > { %v13698_v5 = vcombine.low %v6881_v6, %v13684_v35  ;;  %v5505_v40 = vrot.slane %v5501_v38, 4  ;;  %v5512_v50 = vor.u32 %v5510_v37, %v5509_v48  ;;  %v10413_v42 = vcombine.low %v6903_v39, %v13665_v57  ;;  %v6804_v26 = vld [vmem:[#allocation4 + $0x6c] sm:$0xf]  ;;  %v11019_v57 = vld [vmem:[%s15187_s7 + $0x10] ss:$0 sps:$4 sm:$0x33]  }
 0x31a   : > { %v7700_v17 = vshrl.u32 %v13676_v1, 16  ;;  %v7707_v49 = vshll.u32 %v13682_v2, 16  ;;  %v13704_v51 = vcombine.low %v6802_v9, %v13694_v25  ;;  %v5514_v60 = vrot.slane %v5509_v48, 4  ;;  %v13719_v45 = vld [vmem:[#allocation4 + $0x68] ss:$0 sps:$4 sm:$0x11]  }
 0x31b   : > { %v5513_v52 = vsel %vm12255_vm12, %v5505_v40, %v5512_v50  ;;  %v7498_v58 = vrot.slane %v10384_v22, 1  ;;  %v7497_v30 = vsel %vm5926_vm1, %v7495_v20, %v7496_v29  ;;  %v7714_v27 = vshll.u32 %v13698_v5, 16  ;;  %v13721_v24 = vld [vmem:[#allocation4 + $0x70] sm:$0xf]  ;;  %v6904_v47 = vld [vmem:[#allocation4 + $0x6c] sm:$0xe] }
 0x31c   : > { %7199 = vrot.lane.b32.xlu0 %v7177_v46, %s11235_s12  ;;  %7121 = vrot.lane.b32.xlu1 %v7082_v44, %s11246_s28  ;;  %v5539_v59 = vld [vmem:[#allocation4 + $0x78] sm:$0xf]  ;;  %v7704_v46 = vrot.slane %v7702_v36, 1  ;;  %5542 = vst.msk [vmem:[#allocation4 + $0x7c] sm:$0xf] %vm15194_vm5, %v5513_v52  ;;  %v7499_v12 = vrot.slane %v13658_v8, 1  ;;  %v13739_v6 = vcombine.low %v6804_v26, %v13721_v24  ;;  %v10414_v9 = vcombine.low %v6904_v47, %v13684_v35 }
 0x31d   : > { %v5540_v44 = vsel %vm12245_vm7, %v5504_v34, %v5539_v59  ;;  %v13725_v62 = vld [vmem:[#allocation4 + $0x74] ss:$0 sps:$4 sm:$0x11]   ;;  %v7709_v3 = vrot.slane %v7707_v49, 1  ;;  %v7816_v31 = vrot.slane %v13682_v2, 1  ;;  %v7712_v37 = vshrl.u32 %v13698_v5, 16 }
 0x31e   : > { %5541 = vst [vmem:[#allocation4 + $0x78] sm:$0xf] %v5540_v44  ;;  %v7705_v20 = vor.u32 %v7704_v46, %v7700_v17  ;;  %v5163_v8 = vld [vmem:[#allocation4 + $0x84] sm:$0x1]  ;;  %vm8048_vm13 = vcmask 1041408   ;;  %v7500_v38 = vsel %vm5926_vm1, %v7498_v58, %v7499_v12  ;;  %v7719_v2 = vshll.u32 %v13725_v62, 16 }
 0x31f   : > { %v5543_v28 = vld [vmem:[#allocation4 + $0x80] sm:$0x1]  ;;  %10813 = vmatprep.subr.msk.bf16.mxu0 %vm8048_vm13, %v11019_v57  ;;  %v10235_v39 = vld [vmem:[%s11389_s16 + $0x18] sm:$0xf]  ;;  %v10236_v48 = vld [vmem:[%s11389_s16 + $0x1c] sm:$0xf] }
 0x320   : > { %7269 = vrot.lane.b32.xlu0 %v13622_v16, %s11243_s29  ;;  %7201 = vrot.lane.b32.xlu1 %v7180_v15, %s11235_s12  ;;  %v7401_v16 = vrot.slane %v7399_v56, 1  ;;  %v7815_v56 = vrot.slane %v10413_v42, 1  ;;  %v5544_v61 = vsel %vm11949_vm0, %v5514_v60, %v5543_v28  ;;  %v7716_v15 = vrot.slane %v7714_v27, 1  ;;  %v6824_v29 = vld [vmem:[#allocation4 + $0x60] sm:$0xe] }
 0x321   : > { %5545 = vst [vmem:[#allocation4 + $0x80] sm:$0x1] %v5544_v61  ;;  %v7084_v32 = vshrl.u32 %v13704_v51, 16  ;;  %v8050_v36 = vsel %vm8048_vm13, %v11019_v57, 0  ;;  %v6843_v40 = vld [vmem:[#allocation4 + $0x6c] sm:$0xf]  ;;  %v7710_v35 = vsel %vm5755_vm3, %v7705_v20, %v7709_v3  ;;  %v10355_v27 = vcombine.low %v6824_v29, %v13694_v25 }
 0x322   : > { %v7402_v18 = vsel %vm5755_vm3, %v7397_v0, %v7401_v16  ;;  %v7817_v34 = vsel %vm5926_vm1, %v7815_v56, %v7816_v31  ;;  %v13753_v50 = vld [vmem:[#allocation4 + $0x70] sm:$0xf]  ;;  %10724 = vmatpush3.bf16.msra.mxu0 %v8050_v36  ;;  %v5164_v0 = vsel %vm11949_vm0, 0, %v5163_v8  ;;  %v7717_v17 = vor.u32 %v7716_v15, %v7712_v37  ;;  %v13763_v49 = vld [vmem:[#allocation4 + $0x74] ss:$0 sps:$4 sm:$0x11]  }
 0x323   : > { %5165 = vst [vmem:[#allocation4 + $0x84] sm:$0x1] %v5164_v0  ;;  %v5516_v52 = vshrl.u32 %v10235_v39, 16  ;;  %v7721_v59 = vrot.slane %v7719_v2, 1  ;;  %v5519_v46 = vshll.u32 %v10235_v39, 16  ;;  %v5524_v26 = vshrl.u32 %v10236_v48, 16 }
 0x324   : > { %7439 = vrot.lane.b32.xlu0 %v7390_v23, %s11234_s18  ;;  %7271 = vrot.lane.b32.xlu1 %v13643_v33, %s11243_s29  ;;  %v7086_v33 = vshll.u32 %v13704_v51, 16  ;;  %v7091_v23 = vshll.u32 %v13719_v45, 16  ;;  %v5527_v60 = vshll.u32 %v10236_v48, 16  ;;  %v5199_v44 = vld [vmem:[#allocation4 + $0x8c] sm:$0x1]  ;;  %v7096_v12 = vshrl.u32 %v13739_v6, 16 }
 0x325   : > { %v13770_v56 = vcombine.low %v6843_v40, %v13753_v50  ;;  %v5526_v28 = vrot.slane %v5524_v26, 7  ;;  %v7819_v3 = vrot.slane %v13725_v62, 1  ;;  %v5200_v25 = vsel %vm11955_vm2, 0, %v5199_v44  ;;  %v6845_v15 = vld [vmem:[#allocation4 + $0x78] sm:$0xf] }
 0x326   : > { %v13727_v19 = vpop.permute.xlu1 %7259  ;;  %v7088_v22 = vrot.slane %v7086_v33, 1  ;;  %v7093_v58 = vrot.slane %v7091_v23, 1  ;;  %v7818_v33 = vrot.slane %v10414_v9, 1  ;;  %v7722_v8 = vsel %vm5755_vm3, %v7717_v17, %v7721_v59  ;;  %5201 = vst [vmem:[#allocation4 + $0x8c] sm:$0x1] %v5200_v25 }
 0x327   : > { %v7103_v37 = vshll.u32 %v13763_v49, 16  ;;  %v5529_v2 = vor.u32 %v5527_v60, %v5526_v28  ;;  %v7182_v62 = vrot.slane %v13719_v45, 1  ;;  %v7406_v48 = vshll.u32 %v13770_v56, 16  ;;  %v13794_v9 = vld [vmem:[#allocation4 + $0x74] ss:$0 sps:$4 sm:$0x11]  }
 0x328   : > { %7519 = vrot.lane.b32.xlu0 %v7497_v30, %s11244_s26  ;;  %7441 = vrot.lane.b32.xlu1 %v7402_v18, %s11234_s18  ;;  %v7089_v57 = vor.u32 %v7088_v22, %v7084_v32  ;;  %v6825_v30 = vld [vmem:[#allocation4 + $0x6c] sm:$0xe]  ;;  %v5518_v18 = vrot.slane %v5516_v52, 7  ;;  %v7820_v23 = vsel %vm5926_vm1, %v7818_v33, %v7819_v3  ;;  %v7181_v29 = vrot.slane %v10355_v27, 1  ;;  %v6883_v26 = vld [vmem:[#allocation4 + $0x78] sm:$0xf] }
 0x329   : > { %v13735_v55 = vpop.permute.xlu0 %7257  ;;  %v10356_v39 = vcombine.low %v6825_v30, %v13721_v24  ;;  %v7105_v0 = vrot.slane %v7103_v37, 1  ;;  %v5531_v17 = vrot.slane %v5526_v28, 4  ;;  %vm6617_vm14 = vcmask 31744   ;;  %v6865_v52 = vld [vmem:[#allocation4 + $0x6c] sm:$0xe] }
 0x32a   : > { %v5521_v31 = vor.u32 %v5519_v46, %v5518_v18  ;;  %v5522_v61 = vrot.slane %v5518_v18, 4  ;;  %v5546_v22 = vld [vmem:[#allocation4 + $0x84] sm:$0xf]  ;;  %v7094_v45 = vsel %vm5755_vm3, %v7089_v57, %v7093_v58  ;;  %v7404_v59 = vshrl.u32 %v13770_v56, 16  ;;  %v13812_v33 = vld [vmem:[#allocation4 + $0x7c] sm:$0xf] }
 0x32b   : > { %v7408_v46 = vrot.slane %v7406_v48, 1  ;;  %v7183_v60 = vsel %vm5926_vm1, %v7181_v29, %v7182_v62  ;;  %v7411_v57 = vshll.u32 %v13794_v9, 16  ;;  %v7185_v18 = vrot.slane %v13763_v49, 1  ;;  %v6866_v49 = vld [vmem:[#allocation4 + $0x78] sm:$0xe] }
 0x32c   : > { %7589 = vrot.lane.b32.xlu0 %v13676_v1, %s11236_s15  ;;  %7521 = vrot.lane.b32.xlu1 %v7500_v38, %s11244_s26  ;;  %v7098_v1 = vshll.u32 %v13739_v6, 16  ;;  %v13781_v38 = vld [vmem:[#allocation4 + $0x7c] sm:$0xf]  ;;  %v5530_v32 = vsel %vm12255_vm12, %v5522_v61, %v5529_v2  ;;  %v5547_v24 = vsel %vm12245_vm7, %v5521_v31, %v5546_v22  ;;  %v10385_v31 = vcombine.low %v6865_v52, %v13753_v50 }
 0x32d   : > { %v13758_v16 = vpop.permute.xlu1 %7579  ;;  %v13760_v42 = vpop.permute.xlu0 %7577  ;;  %v13792_v36 = vcombine.low %v6845_v15, %v13781_v38  ;;  %5549 = vst.msk [vmem:[#allocation4 + $0x88] sm:$0xf] %vm15194_vm5, %v5530_v32  ;;  %5548 = vst [vmem:[#allocation4 + $0x84] sm:$0xf] %v5547_v24  ;;  %v5550_v58 = vld [vmem:[#allocation4 + $0x8c] sm:$0x1]  ;;  %v7409_v25 = vor.u32 %v7408_v46, %v7404_v59 }
 0x32e   : > { %v7100_v47 = vrot.slane %v7098_v1, 1  ;;  %v7184_v1 = vrot.slane %v10356_v39, 1  ;;  %v5551_v28 = vsel %vm11949_vm0, %v5531_v17, %v5550_v58  ;;  %v7413_v2 = vrot.slane %v7411_v57, 1 }
 0x32f   : > { %v7418_v44 = vshll.u32 %v13792_v36, 16  ;;  %5552 = vst [vmem:[#allocation4 + $0x8c] sm:$0x1] %v5551_v28  ;;  %v7416_v37 = vshrl.u32 %v13792_v36, 16  ;;  %v13825_v39 = vcombine.low %v6883_v26, %v13812_v33  ;;  %vm6658_vm4 = vcmask 97280  }
 0x330   : > { %7759 = vrot.lane.b32.xlu0 %v7710_v35, %s11247_s25  ;;  %7591 = vrot.lane.b32.xlu1 %v13698_v5, %s11236_s15  ;;  %v7101_v40 = vor.u32 %v7100_v47, %v7096_v12  ;;  %v13810_v12 = vld [vmem:[#allocation4 + $0x80] ss:$0 sps:$4 sm:$0x11]   ;;  %v13820_v47 = vld [vmem:[#allocation3 + $0x4] sm:$0xf]  ;;  %v7186_v50 = vsel %vm5926_vm1, %v7184_v1, %v7185_v18  ;;  %v7502_v29 = vrot.slane %v13794_v9, 1  ;;  %v7414_v17 = vsel %vm5755_vm3, %v7409_v25, %v7413_v2 }
 0x331   : > { %v13774_v20 = vpop.permute.xlu0 %7507  ;;  %v7420_v15 = vrot.slane %v7418_v44, 1  ;;  %v7423_v62 = vshll.u32 %v13810_v12, 16  ;;  %vm6699_vm6 = vcmask 162816   ;;  %v7726_v1 = vshll.u32 %v13825_v39, 16  ;;  %v6905_v28 = vld [vmem:[#allocation4 + $0x78] sm:$0xe] }
 0x332   : > { %v7106_v30 = vsel %vm5755_vm3, %v7101_v40, %v7105_v0  ;;  %v10386_v0 = vcombine.low %v6866_v49, %v13781_v38  ;;  %vm15197_vm15 = vcmask 228352   ;;  %vm15195_vm5 = vcmask 293888   ;;  %v13883_v2 = vld [vmem:[#allocation3 + $0x8] ss:$0 sps:$4 sm:$0x11]  }
 0x333   : > { %v7421_v9 = vor.u32 %v7420_v15, %v7416_v37  ;;  %v7425_v59 = vrot.slane %v7423_v62, 1  ;;  %v7505_v58 = vrot.slane %v13810_v12, 1  ;;  %v10415_v15 = vcombine.low %v6905_v28, %v13812_v33 }
 0x334   : > { %v7188_v5 = vpop.permute.xlu1 %7187  ;;  %7839 = vrot.lane.b32.xlu0 %v7817_v34, %s11245_s30  ;;  %7761 = vrot.lane.b32.xlu1 %v7722_v8, %s11247_s25  ;;  %v5553_v8 = vld [vmem:[#allocation3] sm:$0xf]  ;;  %v6885_v24 = vld [vmem:[#allocation4 + $0x84] sm:$0xf]  ;;  %v11248_v21 = vmov (!%p10231_p9), 0  }
 0x336   : > { %v13800_v34 = vpop.permute.xlu0 %7827 }
 0x338   : > { %v7190_v35 = vpop.permute.xlu1 %7189  ;;  %7841 = vrot.lane.b32.xlu0 %v7820_v23, %s11245_s30  ;;  %7123 = vrot.lane.b32.xlu1 %v7094_v45, %s11246_s28  ;;  %v7501_v23 = vrot.slane %v10385_v31, 1  ;;  %v13833_v45 = vld [vmem:[#allocation4 + $0x88] sm:$0xf]  ;;  %v7728_v31 = vrot.slane %v7726_v1, 1  ;;  %v5583_v1 = vld [vmem:[#allocation3] sm:$0xe] }
 0x339   : > { %v13853_v46 = vcombine.low %v6885_v24, %v13833_v45 }
 0x33a   : > { %v7108_v27 = vpop.permute.xlu0 %7107 }
 0x33b   : > { %v7848_v61 = vsel %vm6617_vm14, %v13297_v41, %v7108_v27  ;;  %v13862_v27 = vld [vmem:[#allocation3 + $0x10] sm:$0xf]  ;;  %v7738_v12 = vshll.u32 %v13853_v46, 16  ;;  %v7736_v33 = vshrl.u32 %v13853_v46, 16 }
 0x33c   : > { %v7510_v3 = vpop.permute.xlu1 %7509  ;;  %7203 = vrot.lane.b32.xlu0 %v7183_v60, %s11235_s12  ;;  %7125 = vrot.lane.b32.xlu1 %v7106_v30, %s11246_s28  ;;  %v7868_v48 = vsel %vm941_vm8, %v7848_v61, %v7188_v5  ;;  %v13840_v5 = vcombine.low %v5553_v8, %v13820_v47  ;;  %v7503_v60 = vsel %vm5926_vm1, %v7501_v23, %v7502_v29  ;;  %v5555_v30 = vld [vmem:[#allocation3 + $0xc] sm:$0xf]  ;;  %v13872_v8 = vld [vmem:[#allocation4 + $0x8c] ss:$0 sps:$4 sm:$0x11]  }
 0x33d   : > { %v7426_v61 = vsel %vm5755_vm3, %v7421_v9, %v7425_v59  ;;  %v7740_v23 = vrot.slane %v7738_v12, 1  ;;  %v7743_v29 = vshll.u32 %v13872_v8, 16  ;;  %v7821_v9 = vrot.slane %v10415_v15, 1 }
 0x33e   : > { %v7110_v41 = vpop.permute.xlu0 %7109 }
 0x33f   : > { %v7850_v22 = vsel %vm6617_vm14, %v13270_v14, %v7110_v41 }
 0x340   : > { %v7430_v32 = vpop.permute.xlu1 %7429  ;;  %v7870_v40 = vsel %vm941_vm8, %v7850_v22, %v7190_v35  ;;  %7273 = vrot.lane.b32.xlu0 %v13770_v56, %s11243_s29  ;;  %7205 = vrot.lane.b32.xlu1 %v7186_v50, %s11235_s12  ;;  %v13847_v35 = vld [vmem:[#allocation4 + $0x80] ss:$0 sps:$4 sm:$0x11]   ;;  %v7888_v56 = vsel %vm6658_vm4, %v7868_v48, %v13735_v55  ;;  %v7504_v55 = vrot.slane %v10386_v0, 1  ;;  %v13886_v50 = vcombine.low %v5555_v30, %v13862_v27  ;;  %v6906_v22 = vld [vmem:[#allocation4 + $0x84] sm:$0xe] }
 0x341   : > { %v7890_v14 = vsel %vm6658_vm4, %v7870_v40, %v13727_v19  ;;  %v5759_v48 = vshll.u32 %v13840_v5, 16  ;;  %v5757_v0 = vshrl.u32 %v13840_v5, 16  ;;  %v7822_v59 = vrot.slane %v13847_v35, 1 }
 0x342   : > { %v7910_v38 = vsel %vm960_vm10, %v7890_v14, %v7430_v32  ;;  %v7428_v52 = vpop.permute.xlu0 %7427  ;;  %v5764_v14 = vshll.u32 %v13883_v2, 16 }
 0x343   : > { %v7908_v19 = vsel %vm960_vm10, %v7888_v56, %v7428_v52  ;;  %v7930_v44 = vsel %vm6699_vm6, %v7910_v38, %v7510_v3  ;;  %v7724_v3 = vshrl.u32 %v13825_v39, 16  ;;  %v10416_v38 = vcombine.low %v6906_v22, %v13833_v45 }
 0x344   : > { %v7750_v26 = vpop.permute.xlu1 %7749  ;;  %v7928_v57 = vsel %vm6699_vm6, %v7908_v19, %v13774_v20  ;;  %7443 = vrot.lane.b32.xlu0 %v7414_v17, %s11234_s18  ;;  %7275 = vrot.lane.b32.xlu1 %v13792_v36, %s11243_s29  ;;  %v7731_v20 = vshll.u32 %v13847_v35, 16  ;;  %v7950_v49 = vsel %vm973_vm9, %v7930_v44, %v13758_v16  ;;  %v7506_v16 = vsel %vm5926_vm1, %v7504_v55, %v7505_v58  ;;  %v13903_v17 = vld [vmem:[#allocation3 + $0x14] ss:$0 sps:$4 sm:$0x11]  }
 0x345   : > { %v7948_v18 = vsel %vm973_vm9, %v7928_v57, %v13760_v42  ;;  %v7729_v41 = vor.u32 %v7728_v31, %v7724_v3  ;;  %v7970_v32 = vsel %vm15197_vm15, %v7950_v49, %v7750_v26  ;;  %v5761_v52 = vrot.slane %v5759_v48, 1  ;;  %v13909_v26 = vld [vmem:[#allocation3 + $0x10] sm:$0xf]  ;;  %v5584_v31 = vld [vmem:[#allocation3 + $0xc] sm:$0xe] }
 0x346   : > { %v7748_v25 = vpop.permute.xlu0 %7747  ;;  %v7733_v62 = vrot.slane %v7731_v20, 1  ;;  %v7745_v44 = vrot.slane %v7743_v29, 1  ;;  %v5771_v57 = vshll.u32 %v13886_v50, 16  ;;  %v5766_v58 = vrot.slane %v5764_v14, 1  ;;  %v5596_v49 = vld [vmem:[#allocation3 + $0x18] sm:$0xf] }
 0x347   : > { %v7968_v42 = vsel %vm15197_vm15, %v7948_v18, %v7748_v25  ;;  %v10257_v45 = vcombine.low %v5583_v1, %v13820_v47  ;;  %v7823_v35 = vsel %vm5926_vm1, %v7821_v9, %v7822_v59  ;;  %v5769_v18 = vshrl.u32 %v13886_v50, 16  ;;  %v5635_v29 = vld [vmem:[#allocation3 + $0x18] sm:$0xf]  ;;  %v13953_v9 = vld [vmem:[#allocation3 + $0x1c] sm:$0xf] }
 0x348   : > { %v13876_v36 = vpop.permute.xlu1 %7111  ;;  %7523 = vrot.lane.b32.xlu0 %v7503_v60, %s11244_s26  ;;  %v7988_v37 = vsel %vm15196_vm11, %v7968_v42, %v13800_v34  ;;  %7445 = vrot.lane.b32.xlu1 %v7426_v61, %s11234_s18  ;;  %v7734_v56 = vsel %vm5755_vm3, %v7729_v41, %v7733_v62  ;;  %v7741_v60 = vor.u32 %v7740_v23, %v7736_v33  ;;  %v7824_v28 = vrot.slane %v10416_v38, 1  ;;  %v13930_v42 = vld [vmem:[#allocation3 + $0x1c] sm:$0xf]  ;;  %v13939_v41 = vld [vmem:[#allocation3 + $0x14] ss:$0 sps:$4 sm:$0x11]  }
 0x349   : > { %10725 = vmatprep.mubr.msk.bf16.mxu0 %vm15195_vm5, %v7988_v37  ;;  %v7825_v3 = vrot.slane %v13872_v8, 1  ;;  %v5762_v25 = vor.u32 %v5761_v52, %v5757_v0  ;;  %v5773_v47 = vrot.slane %v5771_v57, 1  ;;  %v5776_v12 = vshll.u32 %v13903_v17, 16  ;;  %v5624_v33 = vld [vmem:[#allocation3 + $0xc] sm:$0xe] }
 0x34a   : > { %v7830_v34 = vpop.permute.xlu0 %7829  ;;  %v7746_v20 = vsel %vm5755_vm3, %v7741_v60, %v7745_v44  ;;  %v5927_v15 = vrot.slane %v10257_v45, 1  ;;  %v13947_v23 = vld [vmem:[#allocation3 + $0x20] ss:$0 sps:$4 sm:$0x11]   ;;  %v6085_v14 = vshll.u32 %v13939_v41, 16  ;;  %v5931_v52 = vrot.slane %v13903_v17, 1 }
 0x34b   : > { %v7990_v40 = vsel %vm15196_vm11, %v7970_v32, %v7830_v34  ;;  %v7826_v8 = vsel %vm5926_vm1, %v7824_v28, %v7825_v3  ;;  %v5767_v48 = vsel %vm5755_vm3, %v5762_v25, %v5766_v58  ;;  %v5774_v34 = vor.u32 %v5773_v47, %v5769_v18  ;;  %v5625_v60 = vld [vmem:[#allocation3 + $0x18] sm:$0xe]  ;;  %v5637_v57 = vld [vmem:[#allocation3 + $0x24] sm:$0xf]  ;;  %v13960_v58 = vld [vmem:[#allocation3 + $0x28] sm:$0xf] }
 0x34c   : > { %v13895_v24 = vpop.permute.xlu1 %7113  ;;  %7593 = vrot.lane.b32.xlu0 %v13825_v39, %s11236_s15  ;;  %10726 = vmatmul.mubr.msk.bf16.vlgmr.msra.gmra.mrb[12].mxu0 %vm15195_vm5, %v7990_v40  ;;  %v5594_v39 = vld [vmem:[#allocation3 + $0xc] sm:$0xf]  ;;  %v5778_v22 = vrot.slane %v5776_v12, 1  ;;  %v10287_v44 = vcombine.low %v5624_v33, %v13909_v26  ;;  %v13964_v18 = vcombine.low %v5635_v29, %v13953_v9  ;;  %v13971_v47 = vcombine.low %v5637_v57, %v13960_v58  ;;  %v13991_v29 = vld [vmem:[#allocation3 + $0x1c] sm:$0xf] }
 0x34d   : > { %7525 = vrot.lane.b32.xlu1 %v7506_v16, %s11244_s26  ;;  %v13919_v30 = vcombine.low %v5594_v39, %v13909_v26  ;;  %v5928_v16 = vrot.slane %v13883_v2, 1  ;;  %v10288_v26 = vcombine.low %v5625_v60, %v13930_v42  ;;  %v7852_v12 = vsel %vm6617_vm14, %v13308_v63, %v13876_v36  ;;  %v14013_v60 = vld [vmem:[#allocation3 + $0x2c] ss:$0 sps:$4 sm:$0x11]  }
 0x34e   : > { %v13911_v19 = vpop.permute.xlu0 %7191  ;;  %v5779_v1 = vsel %vm5755_vm3, %v5774_v34, %v5778_v22  ;;  %v6412_v33 = vshll.u32 %v13971_v47, 16 }
 0x34f   : > { %v6080_v62 = vshll.u32 %v13919_v30, 16  ;;  %v5929_v2 = vsel %vm5926_vm1, %v5927_v15, %v5928_v16  ;;  %v6078_v40 = vshrl.u32 %v13919_v30, 16  ;;  %v6400_v15 = vshll.u32 %v13964_v18, 16  ;;  %v13984_v16 = vld [vmem:[#allocation3 + $0x20] ss:$0 sps:$4 sm:$0x11]  }
 0x350   : > { %v13914_v55 = vpop.permute.xlu1 %7193  ;;  %7763 = vrot.lane.b32.xlu0 %v7734_v56, %s11247_s25  ;;  %v6250_v22 = vrot.slane %v10288_v26, 1 }
 0x351   : > { %7595 = vrot.lane.b32.xlu1 %v13853_v46, %s11236_s15  ;;  %v10258_v46 = vcombine.low %v5584_v31, %v13862_v27  ;;  %v13944_v27 = vcombine.low %v5596_v49, %v13930_v42  ;;  %v6082_v0 = vrot.slane %v6080_v62, 1  ;;  %v6247_v49 = vrot.slane %v10287_v44, 1 }
 0x352   : > { %v13927_v61 = vpop.permute.xlu0 %7261 }
 0x353   : > { %v5930_v56 = vrot.slane %v10258_v46, 1  ;;  %v6092_v59 = vshll.u32 %v13944_v27, 16  ;;  %v6083_v45 = vor.u32 %v6082_v0, %v6078_v40  ;;  %v6090_v3 = vshrl.u32 %v13944_v27, 16 }
 0x354   : > { %7843 = vrot.lane.b32.xlu0 %v7823_v35, %s11245_s30  ;;  %v13935_v37 = vpop.permute.xlu1 %7263  ;;  %v6087_v35 = vrot.slane %v6085_v14, 1  ;;  %v6248_v46 = vrot.slane %v13939_v41, 1 }
 0x355   : > { %7765 = vrot.lane.b32.xlu1 %v7746_v20, %s11247_s25  ;;  %v5932_v17 = vsel %vm5926_vm1, %v5930_v56, %v5931_v52  ;;  %v6094_v31 = vrot.slane %v6092_v59, 1  ;;  %v6097_v20 = vshll.u32 %v13947_v23, 16  ;;  %v6402_v56 = vrot.slane %v6400_v15, 1 }
 0x356   : > { %v7432_v32 = vpop.permute.xlu0 %7431  ;;  %v6088_v42 = vsel %vm5755_vm3, %v6083_v45, %v6087_v35  ;;  %v5559_v45 = vld [vmem:[#allocation3 + $0x24] sm:$0xf]  ;;  %v14020_v35 = vld [vmem:[#allocation3 + $0x28] sm:$0xf] }
 0x357   : > { %v6095_v62 = vor.u32 %v6094_v31, %v6090_v3  ;;  %v6410_v3 = vshrl.u32 %v13971_v47, 16  ;;  %v14028_v31 = vld [vmem:[#allocation3 + $0x20] ss:$0 sps:$4 sm:$0x11]   ;;  %v14039_v15 = vcombine.low %v5559_v45, %v14020_v35 }
 0x358   : > { %7845 = vrot.lane.b32.xlu0 %v7826_v8, %s11245_s30  ;;  %v7872_v8 = vsel %vm941_vm8, %v7852_v12, %v13911_v19  ;;  %v6251_v19 = vrot.slane %v13947_v23, 1  ;;  %v6398_v23 = vshrl.u32 %v13964_v18, 16 }
 0x359   : > { %5876 = vrot.lane.b32.xlu1 %v5767_v48, %s11246_s28  ;;  %v7892_v63 = vsel %vm6658_vm4, %v7872_v8, %v13927_v61  ;;  %v5557_v48 = vld [vmem:[#allocation3 + $0x18] sm:$0xf]  ;;  %v7854_v61 = vsel %vm6617_vm14, %v13334_v43, %v13895_v24  ;;  %v6405_v43 = vshll.u32 %v13984_v16, 16  ;;  %v5666_v8 = vld [vmem:[#allocation3 + $0x24] sm:$0xe] }
 0x35a   : > { %v7512_v38 = vpop.permute.xlu0 %7511  ;;  %v7434_v39 = vpop.permute.xlu1 %7433  ;;  %v7912_v41 = vsel %vm960_vm10, %v7892_v63, %v7432_v32  ;;  %v6249_v32 = vsel %vm5926_vm1, %v6247_v49, %v6248_v46  ;;  %v7874_v0 = vsel %vm941_vm8, %v7854_v61, %v13914_v55  ;;  %v14016_v55 = vcombine.low %v5557_v48, %v13991_v29 }
 0x35b   : > { %v7932_v40 = vsel %vm6699_vm6, %v7912_v41, %v7512_v38  ;;  %v7894_v24 = vsel %vm6658_vm4, %v7874_v0, %v13935_v37  ;;  %v6403_v26 = vor.u32 %v6402_v56, %v6398_v23  ;;  %v6407_v12 = vrot.slane %v6405_v43, 1  ;;  %v14049_v41 = vld [vmem:[#allocation3 + $0x2c] ss:$0 sps:$4 sm:$0x11]  }
 0x35c   : > { %5957 = vrot.lane.b32.xlu0 %v5929_v2, %s11235_s12  ;;  %v11104_v2 = vld [vmem:[%s15186_s6] sm:$0xff]   ;;  %v6568_v48 = vrot.slane %v13984_v16, 1  ;;  %v5795_v23 = vshll.u32 %v14039_v15, 16  ;;  %v14058_v16 = vld [vmem:[#allocation3 + $0x28] sm:$0xf]  ;;  %v6571_v43 = vrot.slane %v14013_v60, 1 }
 0x35d   : > { %5878 = vrot.lane.b32.xlu1 %v5779_v1, %s11246_s28  ;;  %v5665_v1 = vld [vmem:[#allocation3 + $0x18] sm:$0xe]  ;;  %10745 = vmatprep.subr.bf16.mxu0 %v11104_v2 }
 0x35e   : > { %v7582_v28 = vpop.permute.xlu0 %7581  ;;  %v7514_v25 = vpop.permute.xlu1 %7513  ;;  %10746 = vmatpush3.bf16.msra.mxu0 %v11104_v2  ;;  %v5598_v2 = vld [vmem:[#allocation3 + $0x24] sm:$0xf] }
 0x35f   : > { %v7952_v14 = vsel %vm973_vm9, %v7932_v40, %v7582_v28  ;;  %v10317_v28 = vcombine.low %v5665_v1, %v13953_v9  ;;  %v6417_v9 = vshll.u32 %v14013_v60, 16  ;;  %v5781_v40 = vshrl.u32 %v14016_v55, 16 }
 0x360   : > { %6027 = vrot.lane.b32.xlu0 %v13919_v30, %s11243_s29  ;;  %v6099_v30 = vrot.slane %v6097_v20, 1  ;;  %v5800_v1 = vshll.u32 %v14049_v41, 16 }
 0x361   : > { %5959 = vrot.lane.b32.xlu1 %v5932_v17, %s11235_s12  ;;  %v6252_v17 = vsel %vm5926_vm1, %v6250_v22, %v6251_v19  ;;  %v6408_v19 = vsel %vm5755_vm3, %v6403_v26, %v6407_v12 }
 0x362   : > { %v7752_v36 = vpop.permute.xlu0 %7751  ;;  %v7584_v34 = vpop.permute.xlu1 %7583  ;;  %v6100_v52 = vsel %vm5755_vm3, %v6095_v62, %v6099_v30  ;;  %v5788_v62 = vshll.u32 %v14028_v31, 16  ;;  %v6567_v30 = vrot.slane %v10317_v28, 1  ;;  %v5802_v60 = vrot.slane %v5800_v1, 1 }
 0x363   : > { %v7972_v38 = vsel %vm15197_vm15, %v7952_v14, %v7752_v36 }
 0x364   : > { %6197 = vrot.lane.b32.xlu0 %v6088_v42, %s11234_s18  ;;  %v5783_v42 = vshll.u32 %v14016_v55, 16  ;;  %v6569_v14 = vsel %vm5926_vm1, %v6567_v30, %v6568_v48  ;;  %v5639_v48 = vld [vmem:[#allocation3 + $0x30] sm:$0xf] }
 0x365   : > { %6029 = vrot.lane.b32.xlu1 %v13944_v27, %s11243_s29  ;;  %v7914_v27 = vsel %vm960_vm10, %v7894_v24, %v7434_v39  ;;  %v11108_v39 = vld [vmem:[%s15186_s6 + $0x8] sm:$0xff]  }
 0x366   : > { %v7832_v59 = vpop.permute.xlu0 %7831  ;;  %v7754_v44 = vpop.permute.xlu1 %7753  ;;  %v7934_v37 = vsel %vm6699_vm6, %v7914_v27, %v7514_v25  ;;  %v6414_v25 = vrot.slane %v6412_v33, 1  ;;  %10747 = vmatprep.subr.bf16.mxu0 %v11108_v39  ;;  %v5585_v33 = vld [vmem:[#allocation3 + $0x18] sm:$0xe] }
 0x367   : > { %v7992_v57 = vsel %vm15196_vm11, %v7972_v38, %v7832_v59  ;;  %v7954_v20 = vsel %vm973_vm9, %v7934_v37, %v7584_v34  ;;  %10748 = vmatpush3.bf16.msra.mxu0 %v11108_v39  ;;  %v10318_v34 = vcombine.low %v5666_v8, %v13960_v58  ;;  %v5790_v58 = vrot.slane %v5788_v62, 1  ;;  %v5586_v37 = vld [vmem:[#allocation3 + $0x24] sm:$0xe]  ;;  %v14082_v39 = vld [vmem:[#allocation3 + $0x2c] ss:$0 sps:$4 sm:$0x11]  }
 0x368   : > { %6277 = vrot.lane.b32.xlu0 %v6249_v32, %s11244_s26  ;;  %10729 = vmatprep.mubr.msk.bf16.mxu0 %vm15195_vm5, %v7992_v57  ;;  %v7974_v49 = vsel %vm15197_vm15, %v7954_v20, %v7754_v44  ;;  %v6415_v22 = vor.u32 %v6414_v25, %v6410_v3  ;;  %v5785_v32 = vrot.slane %v5783_v42, 1  ;;  %v10259_v24 = vcombine.low %v5585_v33, %v13991_v29  ;;  %v5626_v42 = vld [vmem:[#allocation3 + $0x24] sm:$0xe] }
 0x369   : > { %6199 = vrot.lane.b32.xlu1 %v6100_v52, %s11234_s18  ;;  %v6570_v56 = vrot.slane %v10318_v34, 1  ;;  %v10269_v38 = vcombine.low %v5598_v2, %v14058_v16  ;;  %v5793_v44 = vshrl.u32 %v14039_v15, 16  ;;  %v5797_v57 = vrot.slane %v5795_v23, 1  ;;  %v14100_v2 = vld [vmem:[#allocation3 + $0x34] sm:$0xf] }
 0x36a   : > { %v7834_v46 = vpop.permute.xlu0 %7833  ;;  %v14041_v63 = vpop.permute.xlu1 %7115  ;;  %v5786_v27 = vor.u32 %v5785_v32, %v5781_v40  ;;  %v5933_v28 = vrot.slane %v10259_v24, 1  ;;  %v5934_v3 = vrot.slane %v14028_v31, 1  ;;  %v6109_v30 = vshll.u32 %v14082_v39, 16  ;;  %v5627_v40 = vld [vmem:[#allocation3 + $0x30] sm:$0xe] }
 0x36b   : > { %v7994_v36 = vsel %vm15196_vm11, %v7974_v49, %v7834_v46  ;;  %v6572_v29 = vsel %vm5926_vm1, %v6570_v56, %v6571_v43  ;;  %v6104_v20 = vshll.u32 %v10269_v38, 16  ;;  %v5798_v12 = vor.u32 %v5797_v57, %v5793_v44  ;;  %v5641_v23 = vld [vmem:[#allocation3 + $0x3c] sm:$0xf] }
 0x36c   : > { %6347 = vrot.lane.b32.xlu0 %v13964_v18, %s11236_s15  ;;  %10730 = vmatmul.mubr.msk.bf16.gmra.mrb[16].mxu0 %vm15195_vm5, %v7994_v36  ;;  %v6419_v18 = vrot.slane %v6417_v9, 1  ;;  %v5791_v25 = vsel %vm5755_vm3, %v5786_v27, %v5790_v58  ;;  %v10260_v49 = vcombine.low %v5586_v37, %v14020_v35  ;;  %v14092_v9 = vld [vmem:[#allocation3 + $0x38] ss:$0 sps:$4 sm:$0x11]   ;;  %v5935_v31 = vsel %vm5926_vm1, %v5933_v28, %v5934_v3  ;;  %v14104_v58 = vld [vmem:[#allocation3 + $0x40] sm:$0xf] }
 0x36d   : > { %6279 = vrot.lane.b32.xlu1 %v6252_v17, %s11244_s26  ;;  %v5600_v17 = vld [vmem:[#allocation3 + $0x30] sm:$0xf]  ;;  %v6102_v36 = vshrl.u32 %v10269_v38, 16  ;;  %v6106_v62 = vrot.slane %v6104_v20, 1  ;;  %v5803_v35 = vsel %vm5755_vm3, %v5798_v12, %v5802_v60  ;;  %v10289_v32 = vcombine.low %v5626_v42, %v14058_v16 }
 0x36e   : > { %v14054_v61 = vpop.permute.xlu0 %7195  ;;  %v14060_v0 = vpop.permute.xlu1 %7117  ;;  %v6420_v52 = vsel %vm5755_vm3, %v6415_v22, %v6419_v18  ;;  %v5936_v22 = vrot.slane %v10260_v49, 1  ;;  %v6111_v1 = vrot.slane %v6109_v30, 1  ;;  %v14108_v56 = vcombine.low %v5639_v48, %v14100_v2  ;;  %v14117_v37 = vld [vmem:[#allocation3 + $0x38] ss:$0 sps:$4 sm:$0x11]  }
 0x36f   : > { %v6121_v27 = vshll.u32 %v14092_v9, 16  ;;  %v14115_v57 = vcombine.low %v5641_v23, %v14104_v58  ;;  %v6253_v60 = vrot.slane %v10289_v32, 1  ;;  %v5561_v20 = vld [vmem:[#allocation3 + $0x30] sm:$0xf] }
 0x370   : > { %6517 = vrot.lane.b32.xlu0 %v6408_v19, %s11247_s25  ;;  %v5937_v19 = vrot.slane %v14049_v41, 1  ;;  %v6424_v3 = vshll.u32 %v14108_v56, 16  ;;  %v6422_v30 = vshrl.u32 %v14108_v56, 16  ;;  %v14143_v48 = vld [vmem:[#allocation3 + $0x44] ss:$0 sps:$4 sm:$0x11]  }
 0x371   : > { %6349 = vrot.lane.b32.xlu1 %v13971_v47, %s11236_s15  ;;  %v14076_v47 = vld [vmem:[#allocation3 + $0x34] sm:$0xf]  ;;  %v6123_v12 = vrot.slane %v6121_v27, 1 }
 0x372   : > { %v14071_v59 = vpop.permute.xlu0 %7265  ;;  %v14074_v45 = vpop.permute.xlu1 %7197  ;;  %v14087_v46 = vcombine.low %v5600_v17, %v14076_v47  ;;  %v5938_v41 = vsel %vm5926_vm1, %v5936_v22, %v5937_v19  ;;  %v10290_v16 = vcombine.low %v5627_v40, %v14076_v47  ;;  %v7856_v17 = vsel %vm6617_vm14, %v13448_v10, %v14041_v63 }
 0x373   : > { %v7876_v28 = vsel %vm941_vm8, %v7856_v17, %v14054_v61  ;;  %v6257_v61 = vrot.slane %v14092_v9, 1 }
 0x374   : > { %6597 = vrot.lane.b32.xlu0 %v6569_v14, %s11245_s30  ;;  %v6116_v33 = vshll.u32 %v14087_v46, 16  ;;  %v6107_v14 = vor.u32 %v6106_v62, %v6102_v36  ;;  %v6114_v24 = vshrl.u32 %v14087_v46, 16  ;;  %v7896_v10 = vsel %vm6658_vm4, %v7876_v28, %v14071_v59  ;;  %v14179_v28 = vld [vmem:[#allocation3 + $0x38] ss:$0 sps:$4 sm:$0x11]  }
 0x375   : > { %6519 = vrot.lane.b32.xlu1 %v6420_v52, %s11247_s25  ;;  %v6256_v42 = vrot.slane %v10290_v16, 1  ;;  %v7858_v36 = vsel %vm6617_vm14, %v13474_v54, %v14060_v0  ;;  %v6429_v54 = vshll.u32 %v14117_v37, 16 }
 0x376   : > { %v7436_v26 = vpop.permute.xlu0 %7435  ;;  %v14089_v8 = vpop.permute.xlu1 %7267  ;;  %v6118_v52 = vrot.slane %v6116_v33, 1  ;;  %v6112_v47 = vsel %vm5755_vm3, %v6107_v14, %v6111_v1  ;;  %v5667_v33 = vld [vmem:[#allocation3 + $0x30] sm:$0xe]  ;;  %v14165_v14 = vld [vmem:[#allocation3 + $0x40] sm:$0xf] }
 0x377   : > { %v10319_v27 = vcombine.low %v5667_v33, %v14100_v2  ;;  %v6431_v17 = vrot.slane %v6429_v54, 1 }
 0x378   : > { %6599 = vrot.lane.b32.xlu0 %v6572_v29, %s11245_s30  ;;  %v6254_v29 = vrot.slane %v14082_v39, 1  ;;  %v7916_v39 = vsel %vm960_vm10, %v7896_v10, %v7436_v26  ;;  %v7878_v26 = vsel %vm941_vm8, %v7858_v36, %v14074_v45  ;;  %v14161_v45 = vld [vmem:[%s15186_s6 + $0x10] ss:$0 sps:$4 sm:$0x33]  }
 0x379   : > { %5880 = vrot.lane.b32.xlu1 %v5791_v25, %s11246_s28  ;;  %v14129_v25 = vld [vmem:[#allocation3 + $0x34] sm:$0xf]  ;;  %v7898_v0 = vsel %vm6658_vm4, %v7878_v26, %v14089_v8  ;;  %v5563_v8 = vld [vmem:[#allocation3 + $0x3c] sm:$0xf]  ;;  %10814 = vmatprep.subr.msk.bf16.mxu0 %vm8048_vm13, %v14161_v45 }
 0x37a   : > { %v7516_v34 = vpop.permute.xlu0 %7515  ;;  %v7438_v18 = vpop.permute.xlu1 %7437  ;;  %v6255_v59 = vsel %vm5926_vm1, %v6253_v60, %v6254_v29  ;;  %v14156_v40 = vcombine.low %v5561_v20, %v14129_v25  ;;  %v6258_v60 = vsel %vm5926_vm1, %v6256_v42, %v6257_v61  ;;  %v6574_v42 = vrot.slane %v14117_v37, 1  ;;  %v5587_v61 = vld [vmem:[#allocation3 + $0x30] sm:$0xe] }
 0x37b   : > { %v7936_v62 = vsel %vm6699_vm6, %v7916_v39, %v7516_v34  ;;  %v6573_v39 = vrot.slane %v10319_v27, 1 }
 0x37c   : > { %5961 = vrot.lane.b32.xlu0 %v5935_v31, %s11235_s12  ;;  %v6436_v31 = vshll.u32 %v14115_v57, 16 }
 0x37d   : > { %5882 = vrot.lane.b32.xlu1 %v5803_v35, %s11246_s28  ;;  %v6426_v35 = vrot.slane %v6424_v3, 1  ;;  %v14183_v3 = vcombine.low %v5563_v8, %v14165_v14  ;;  %v6575_v54 = vsel %vm5926_vm1, %v6573_v39, %v6574_v42  ;;  %v5643_v39 = vld [vmem:[#allocation3 + $0x48] sm:$0xf] }
 0x37e   : > { %v7586_v43 = vpop.permute.xlu0 %7585  ;;  %v7518_v44 = vpop.permute.xlu1 %7517 }
 0x37f   : > { %v7956_v9 = vsel %vm973_vm9, %v7936_v62, %v7586_v43  ;;  %v6438_v43 = vrot.slane %v6436_v31, 1  ;;  %v6427_v16 = vor.u32 %v6426_v35, %v6422_v30  ;;  %v5602_v31 = vld [vmem:[#allocation3 + $0x3c] sm:$0xf]  ;;  %v5812_v62 = vshll.u32 %v14179_v28, 16  ;;  %v14202_v30 = vld [vmem:[#allocation3 + $0x40] sm:$0xf] }
 0x380   : > { %6031 = vrot.lane.b32.xlu0 %v10269_v38, %s11243_s29  ;;  %v6119_v38 = vor.u32 %v6118_v52, %v6114_v24  ;;  %v6441_v24 = vshll.u32 %v14143_v48, 16 }
 0x381   : > { %5963 = vrot.lane.b32.xlu1 %v5938_v41, %s11235_s12  ;;  %v6434_v41 = vshrl.u32 %v14115_v57, 16 }
 0x382   : > { %v7756_v63 = vpop.permute.xlu0 %7755  ;;  %v7588_v49 = vpop.permute.xlu1 %7587  ;;  %v6124_v22 = vsel %vm5755_vm3, %v6119_v38, %v6123_v12  ;;  %v6443_v38 = vrot.slane %v6441_v24, 1  ;;  %v14192_v12 = vld [vmem:[#allocation3 + $0x44] ss:$0 sps:$4 sm:$0x11]   ;;  %v5940_v24 = vrot.slane %v14179_v28, 1  ;;  %v8201_v28 = vsel %vm8048_vm13, %v14161_v45, 0 }
 0x383   : > { %v7976_v34 = vsel %vm15197_vm15, %v7956_v9, %v7756_v63  ;;  %v6439_v63 = vor.u32 %v6438_v43, %v6434_v41  ;;  %v5824_v37 = vshll.u32 %v14192_v12, 16  ;;  %v5604_v41 = vld [vmem:[#allocation3 + $0x48] sm:$0xf]  ;;  %10750 = vmatpush3.bf16.msra.mxu0 %v8201_v28 }
 0x384   : > { %6201 = vrot.lane.b32.xlu0 %v6112_v47, %s11234_s18  ;;  %v5807_v47 = vshll.u32 %v14156_v40, 16 }
 0x385   : > { %6033 = vrot.lane.b32.xlu1 %v14087_v46, %s11243_s29  ;;  %v7918_v46 = vsel %vm960_vm10, %v7898_v0, %v7438_v18  ;;  %v5668_v18 = vld [vmem:[#allocation3 + $0x3c] sm:$0xe]  ;;  %v6444_v35 = vsel %vm5755_vm3, %v6439_v63, %v6443_v38  ;;  %v6577_v0 = vrot.slane %v14143_v48, 1  ;;  %v5826_v48 = vrot.slane %v5824_v37, 1 }
 0x386   : > { %v7836_v19 = vpop.permute.xlu0 %7835  ;;  %v7758_v32 = vpop.permute.xlu1 %7757  ;;  %v7938_v1 = vsel %vm6699_vm6, %v7918_v46, %v7518_v44  ;;  %v10320_v10 = vcombine.low %v5668_v18, %v14104_v58  ;;  %v5805_v58 = vshrl.u32 %v14156_v40, 16  ;;  %v5814_v46 = vrot.slane %v5812_v62, 1  ;;  %v5629_v62 = vld [vmem:[#allocation3 + $0x48] sm:$0xe] }
 0x387   : > { %v7996_v23 = vsel %vm15196_vm11, %v7976_v34, %v7836_v19  ;;  %v7958_v52 = vsel %vm973_vm9, %v7938_v1, %v7588_v49  ;;  %v6432_v49 = vsel %vm5755_vm3, %v6427_v16, %v6431_v17  ;;  %v10261_v34 = vcombine.low %v5587_v61, %v14129_v25  ;;  %v5588_v1 = vld [vmem:[#allocation3 + $0x3c] sm:$0xe] }
 0x388   : > { %6281 = vrot.lane.b32.xlu0 %v6255_v59, %s11244_s26  ;;  %10733 = vmatprep.mubr.msk.bf16.mxu0 %vm15195_vm5, %v7996_v23  ;;  %v7978_v44 = vsel %vm15197_vm15, %v7958_v52, %v7758_v32  ;;  %v5819_v59 = vshll.u32 %v14183_v3, 16  ;;  %v6576_v9 = vrot.slane %v10320_v10, 1  ;;  %v5817_v32 = vshrl.u32 %v14183_v3, 16  ;;  %v14226_v52 = vld [vmem:[#allocation3 + $0x44] ss:$0 sps:$4 sm:$0x11]  }
 0x389   : > { %6203 = vrot.lane.b32.xlu1 %v6124_v22, %s11234_s18  ;;  %v10271_v22 = vcombine.low %v5602_v31, %v14202_v30  ;;  %v5939_v43 = vrot.slane %v10261_v34, 1  ;;  %v5943_v31 = vrot.slane %v14192_v12, 1 }
 0x38a   : > { %v7838_v29 = vpop.permute.xlu0 %7837  ;;  %v14185_v20 = vpop.permute.xlu1 %7119  ;;  %v5821_v23 = vrot.slane %v5819_v59, 1  ;;  %v6578_v25 = vsel %vm5926_vm1, %v6576_v9, %v6577_v0  ;;  %v5645_v9 = vld [vmem:[#allocation3 + $0x54] sm:$0xf] }
 0x38b   : > { %v7998_v2 = vsel %vm15196_vm11, %v7978_v44, %v7838_v29  ;;  %v6128_v18 = vshll.u32 %v10271_v22, 16  ;;  %v10262_v44 = vcombine.low %v5588_v1, %v14165_v14  ;;  %v5941_v10 = vsel %vm5926_vm1, %v5939_v43, %v5940_v24 }
 0x38c   : > { %6351 = vrot.lane.b32.xlu0 %v14108_v56, %s11236_s15  ;;  %10734 = vmatmul.mubr.msk.bf16.gmra.mrb[20].mxu0 %vm15195_vm5, %v7998_v2  ;;  %v5809_v56 = vrot.slane %v5807_v47, 1  ;;  %v5822_v17 = vor.u32 %v5821_v23, %v5817_v32  ;;  %v14236_v47 = vld [vmem:[#allocation3 + $0x50] ss:$0 sps:$4 sm:$0x11]   ;;  %v5628_v2 = vld [vmem:[#allocation3 + $0x3c] sm:$0xe] }
 0x38d   : > { %6283 = vrot.lane.b32.xlu1 %v6258_v60, %s11244_s26  ;;  %v6126_v63 = vshrl.u32 %v10271_v22, 16  ;;  %v6130_v38 = vrot.slane %v6128_v18, 1  ;;  %v6133_v14 = vshll.u32 %v14226_v52, 16  ;;  %v5942_v61 = vrot.slane %v10262_v44, 1 }
 0x38e   : > { %v14197_v36 = vpop.permute.xlu0 %7199  ;;  %v14204_v26 = vpop.permute.xlu1 %7121  ;;  %v5810_v33 = vor.u32 %v5809_v56, %v5805_v58  ;;  %v14246_v56 = vld [vmem:[#allocation3 + $0x4c] sm:$0xf]  ;;  %v10291_v59 = vcombine.low %v5628_v2, %v14202_v30  ;;  %v6145_v32 = vshll.u32 %v14236_v47, 16  ;;  %v14273_v18 = vld [vmem:[#allocation3 + $0x50] ss:$0 sps:$4 sm:$0x11]  }
 0x38f   : > { %v6131_v37 = vor.u32 %v6130_v38, %v6126_v63  ;;  %v14254_v0 = vcombine.low %v5643_v39, %v14246_v56  ;;  %v5944_v12 = vsel %vm5926_vm1, %v5942_v61, %v5943_v31  ;;  %v7862_v63 = vsel %vm6617_vm14, %v13599_v13, %v14204_v26 }
 0x390   : > { %6521 = vrot.lane.b32.xlu0 %v6432_v49, %s11247_s25  ;;  %v5815_v27 = vsel %vm5755_vm3, %v5810_v33, %v5814_v46  ;;  %v5827_v49 = vsel %vm5755_vm3, %v5822_v17, %v5826_v48  ;;  %v6259_v48 = vrot.slane %v10291_v59, 1  ;;  %v5565_v17 = vld [vmem:[#allocation3 + $0x48] sm:$0xf]  ;;  %v6453_v13 = vshll.u32 %v14273_v18, 16 }
 0x391   : > { %6353 = vrot.lane.b32.xlu1 %v14115_v57, %s11236_s15  ;;  %v14220_v57 = vld [vmem:[#allocation3 + $0x4c] sm:$0xf] }
 0x392   : > { %v14215_v19 = vpop.permute.xlu0 %7269  ;;  %v14218_v8 = vpop.permute.xlu1 %7201  ;;  %v14231_v60 = vcombine.low %v5604_v41, %v14220_v57  ;;  %v10292_v30 = vcombine.low %v5629_v62, %v14220_v57  ;;  %v7860_v41 = vsel %vm6617_vm14, %v13576_v11, %v14185_v20  ;;  %v6448_v57 = vshll.u32 %v14254_v0, 16 }
 0x393   : > { %v7880_v43 = vsel %vm941_vm8, %v7860_v41, %v14197_v36  ;;  %v6263_v36 = vrot.slane %v14236_v47, 1  ;;  %v7882_v47 = vsel %vm941_vm8, %v7862_v63, %v14218_v8 }
 0x394   : > { %6601 = vrot.lane.b32.xlu0 %v6575_v54, %s11245_s30  ;;  %v6140_v58 = vshll.u32 %v14231_v60, 16  ;;  %v6135_v54 = vrot.slane %v6133_v14, 1  ;;  %v6138_v33 = vshrl.u32 %v14231_v60, 16  ;;  %v6262_v2 = vrot.slane %v10292_v30, 1 }
 0x395   : > { %6523 = vrot.lane.b32.xlu1 %v6444_v35, %s11247_s25  ;;  %v14250_v35 = vld [vmem:[#allocation3 + $0x58] sm:$0xf]  ;;  %v14289_v14 = vld [vmem:[#allocation3 + $0x5c] ss:$0 sps:$4 sm:$0x11]   ;;  %v6455_v30 = vrot.slane %v6453_v13, 1 }
 0x396   : > { %v7440_v16 = vpop.permute.xlu0 %7439  ;;  %v14233_v29 = vpop.permute.xlu1 %7271  ;;  %v6142_v46 = vrot.slane %v6140_v58, 1  ;;  %v14261_v1 = vcombine.low %v5645_v9, %v14250_v35  ;;  %v6136_v24 = vsel %vm5755_vm3, %v6131_v37, %v6135_v54  ;;  %v5669_v58 = vld [vmem:[#allocation3 + $0x48] sm:$0xe]  ;;  %v5567_v9 = vld [vmem:[#allocation3 + $0x54] sm:$0xf]  ;;  %v6583_v13 = vrot.slane %v14289_v14, 1 }
 0x397   : > { %v7902_v26 = vsel %vm6658_vm4, %v7882_v47, %v14233_v29  ;;  %v14306_v37 = vld [vmem:[#allocation3 + $0x58] sm:$0xf] }
 0x398   : > { %6603 = vrot.lane.b32.xlu0 %v6578_v25, %s11245_s30  ;;  %v6260_v25 = vrot.slane %v14226_v52, 1  ;;  %v6143_v20 = vor.u32 %v6142_v46, %v6138_v33  ;;  %v6460_v28 = vshll.u32 %v14261_v1, 16  ;;  %v6458_v29 = vshrl.u32 %v14261_v1, 16 }
 0x399   : > { %5884 = vrot.lane.b32.xlu1 %v5815_v27, %s11246_s28  ;;  %v7900_v27 = vsel %vm6658_vm4, %v7880_v43, %v14215_v19  ;;  %v10321_v46 = vcombine.low %v5669_v58, %v14246_v56 }
 0x39a   : > { %v7520_v42 = vpop.permute.xlu0 %7519  ;;  %v7442_v45 = vpop.permute.xlu1 %7441  ;;  %v7920_v52 = vsel %vm960_vm10, %v7900_v27, %v7440_v16  ;;  %v6261_v38 = vsel %vm5926_vm1, %v6259_v48, %v6260_v25  ;;  %v6446_v16 = vshrl.u32 %v14254_v0, 16  ;;  %v11081_v25 = vld [vmem:[#allocation3 + $0x50] ss:$0 sps:$4 sm:$0x11]  }
 0x39b   : > { %v7940_v19 = vsel %vm6699_vm6, %v7920_v52, %v7520_v42  ;;  %v7922_v8 = vsel %vm960_vm10, %v7902_v26, %v7442_v45  ;;  %v5670_v45 = vld [vmem:[#allocation3 + $0x54] sm:$0xe]  ;;  %v5836_v63 = vshll.u32 %v11081_v25, 16 }
 0x39c   : > { %5965 = vrot.lane.b32.xlu0 %v5941_v10, %s11235_s12  ;;  %v14280_v10 = vld [vmem:[#allocation3 + $0x4c] sm:$0xf] }
 0x39d   : > { %5886 = vrot.lane.b32.xlu1 %v5827_v49, %s11246_s28  ;;  %v6450_v49 = vrot.slane %v6448_v57, 1  ;;  %v14302_v62 = vcombine.low %v5565_v17, %v14280_v10  ;;  %v6579_v17 = vrot.slane %v10321_v46, 1  ;;  %v5838_v58 = vrot.slane %v5836_v63, 1 }
 0x39e   : > { %v7590_v34 = vpop.permute.xlu0 %7589  ;;  %v7522_v23 = vpop.permute.xlu1 %7521 }
 0x39f   : > { %v7960_v39 = vsel %vm973_vm9, %v7940_v19, %v7590_v34  ;;  %v7942_v54 = vsel %vm6699_vm6, %v7922_v8, %v7522_v23  ;;  %v6465_v34 = vshll.u32 %v14289_v14, 16  ;;  %v6264_v23 = vsel %vm5926_vm1, %v6262_v2, %v6263_v36  ;;  %v5589_v2 = vld [vmem:[#allocation3 + $0x48] sm:$0xe]  ;;  %v5606_v36 = vld [vmem:[#allocation3 + $0x54] sm:$0xf] }
 0x3a0   : > { %6035 = vrot.lane.b32.xlu0 %v10271_v22, %s11243_s29  ;;  %v6147_v22 = vrot.slane %v6145_v32, 1  ;;  %v6451_v32 = vor.u32 %v6450_v49, %v6446_v16  ;;  %v5831_v43 = vshll.u32 %v14302_v62, 16  ;;  %v10263_v26 = vcombine.low %v5589_v2, %v14280_v10 }
 0x3a1   : > { %5967 = vrot.lane.b32.xlu1 %v5944_v12, %s11235_s12  ;;  %v6462_v12 = vrot.slane %v6460_v28, 1 }
 0x3a2   : > { %v7760_v11 = vpop.permute.xlu0 %7759  ;;  %v7592_v44 = vpop.permute.xlu1 %7591  ;;  %v6148_v42 = vsel %vm5755_vm3, %v6143_v20, %v6147_v22  ;;  %v6467_v20 = vrot.slane %v6465_v34, 1  ;;  %v14329_v22 = vld [vmem:[#allocation3 + $0x5c] ss:$0 sps:$4 sm:$0x11]   ;;  %v6456_v52 = vsel %vm5755_vm3, %v6451_v32, %v6455_v30 }
 0x3a3   : > { %v7980_v61 = vsel %vm15197_vm15, %v7960_v39, %v7760_v11  ;;  %v7962_v33 = vsel %vm973_vm9, %v7942_v54, %v7592_v44  ;;  %v10322_v11 = vcombine.low %v5670_v45, %v14250_v35  ;;  %v6463_v56 = vor.u32 %v6462_v12, %v6458_v29  ;;  %v5608_v54 = vld [vmem:[#allocation3 + $0x60] sm:$0xf]  ;;  %v14361_v34 = vld [vmem:[#allocation3 + $0x5c] ss:$0 sps:$4 sm:$0x11]  }
 0x3a4   : > { %6205 = vrot.lane.b32.xlu0 %v6136_v24, %s11234_s18  ;;  %v14320_v24 = vcombine.low %v5567_v9, %v14306_v37  ;;  %v6580_v44 = vrot.slane %v14273_v18, 1  ;;  %v5829_v35 = vshrl.u32 %v14302_v62, 16  ;;  %v5848_v18 = vshll.u32 %v14329_v22, 16  ;;  %v5590_v9 = vld [vmem:[#allocation3 + $0x54] sm:$0xe] }
 0x3a5   : > { %6037 = vrot.lane.b32.xlu1 %v14231_v60, %s11243_s29  ;;  %v6582_v47 = vrot.slane %v10322_v11, 1  ;;  %v6468_v39 = vsel %vm5755_vm3, %v6463_v56, %v6467_v20  ;;  %v5945_v29 = vrot.slane %v10263_v26, 1  ;;  %v5946_v12 = vrot.slane %v11081_v25, 1  ;;  %v5647_v20 = vld [vmem:[#allocation3 + $0x60] sm:$0xf] }
 0x3a6   : > { %v7840_v31 = vpop.permute.xlu0 %7839  ;;  %v7762_v59 = vpop.permute.xlu1 %7761  ;;  %v5843_v19 = vshll.u32 %v14320_v24, 16  ;;  %v6581_v49 = vsel %vm5926_vm1, %v6579_v17, %v6580_v44  ;;  %v5841_v8 = vshrl.u32 %v14320_v24, 16  ;;  %v5850_v14 = vrot.slane %v5848_v18, 1 }
 0x3a7   : > { %v8000_v60 = vsel %vm15196_vm11, %v7980_v61, %v7840_v31  ;;  %v7982_v41 = vsel %vm15197_vm15, %v7962_v33, %v7762_v59  ;;  %v6584_v10 = vsel %vm5926_vm1, %v6582_v47, %v6583_v13  ;;  %v10264_v30 = vcombine.low %v5590_v9, %v14306_v37  ;;  %v14383_v47 = vld [vmem:[#allocation3 + $0x70] sm:$0xf] }
 0x3a8   : > { %6285 = vrot.lane.b32.xlu0 %v6261_v38, %s11244_s26  ;;  %10737 = vmatprep.mubr.msk.bf16.mxu0 %vm15195_vm5, %v8000_v60  ;;  %v14338_v38 = vld [vmem:[#allocation3 + $0x58] sm:$0xf]  ;;  %v5845_v59 = vrot.slane %v5843_v19, 1  ;;  %v5947_v25 = vsel %vm5926_vm1, %v5945_v29, %v5946_v12  ;;  %v6157_v56 = vshll.u32 %v14361_v34, 16  ;;  %v5949_v44 = vrot.slane %v14329_v22, 1 }
 0x3a9   : > { %6207 = vrot.lane.b32.xlu1 %v6148_v42, %s11234_s18  ;;  %v10273_v42 = vcombine.low %v5606_v36, %v14338_v38  ;;  %v14379_v36 = vld [vmem:[#allocation3 + $0x64] sm:$0xf]  ;;  %v5649_v19 = vld [vmem:[#allocation3 + $0x6c] sm:$0xf] }
 0x3aa   : > { %v7842_v48 = vpop.permute.xlu0 %7841  ;;  %v14322_v57 = vpop.permute.xlu1 %7123  ;;  %v5846_v32 = vor.u32 %v5845_v59, %v5841_v8  ;;  %v6159_v18 = vrot.slane %v6157_v56, 1  ;;  %v14394_v59 = vcombine.low %v5649_v19, %v14383_v47  ;;  %v14406_v12 = vld [vmem:[#allocation3 + $0x68] ss:$0 sps:$4 sm:$0x11]   ;;  %v5571_v19 = vld [vmem:[#allocation3 + $0x6c] sm:$0xf] }
 0x3ab   : > { %v8002_v27 = vsel %vm15196_vm11, %v7982_v41, %v7842_v48  ;;  %v6152_v33 = vshll.u32 %v10273_v42, 16  ;;  %v14371_v48 = vld [vmem:[#allocation3 + $0x68] ss:$0 sps:$4 sm:$0x11]   ;;  %v7864_v9 = vsel %vm6617_vm14, %v13704_v51, %v14322_v57 }
 0x3ac   : > { %6355 = vrot.lane.b32.xlu0 %v14254_v0, %s11236_s15  ;;  %10738 = vmatmul.mubr.msk.bf16.gmra.mrb[24].mxu0 %vm15195_vm5, %v8002_v27  ;;  %v5833_v0 = vrot.slane %v5831_v43, 1  ;;  %v5630_v43 = vld [vmem:[#allocation3 + $0x54] sm:$0xe]  ;;  %v6150_v27 = vshrl.u32 %v10273_v42, 16  ;;  %v5851_v37 = vsel %vm5755_vm3, %v5846_v32, %v5850_v14  ;;  %v6266_v14 = vrot.slane %v14361_v34, 1 }
 0x3ad   : > { %6287 = vrot.lane.b32.xlu1 %v6264_v23, %s11244_s26  ;;  %v6154_v11 = vrot.slane %v6152_v33, 1  ;;  %v10293_v63 = vcombine.low %v5630_v43, %v14338_v38  ;;  %v6484_v43 = vshll.u32 %v14394_v59, 16  ;;  %v14422_v56 = vld [vmem:[#allocation3 + $0x74] ss:$0 sps:$4 sm:$0x11]  }
 0x3ae   : > { %v14334_v28 = vpop.permute.xlu0 %7203  ;;  %v14340_v16 = vpop.permute.xlu1 %7125  ;;  %v5834_v31 = vor.u32 %v5833_v0, %v5829_v35  ;;  %v5631_v0 = vld [vmem:[#allocation3 + $0x60] sm:$0xe] }
 0x3b0   : > { %6525 = vrot.lane.b32.xlu0 %v6456_v52, %s11247_s25  ;;  %v5839_v45 = vsel %vm5755_vm3, %v5834_v31, %v5838_v58  ;;  %v5948_v52 = vrot.slane %v10264_v30, 1  ;;  %v6169_v58 = vshll.u32 %v14371_v48, 16 }
 0x3b1   : > { %6357 = vrot.lane.b32.xlu1 %v14261_v1, %s11236_s15  ;;  %v14356_v1 = vld [vmem:[#allocation3 + $0x64] sm:$0xf] }
 0x3b2   : > { %v14351_v61 = vpop.permute.xlu0 %7273  ;;  %v14354_v60 = vpop.permute.xlu1 %7205  ;;  %v14366_v23 = vcombine.low %v5608_v54, %v14356_v1  ;;  %v5950_v22 = vsel %vm5926_vm1, %v5948_v52, %v5949_v44  ;;  %v10294_v38 = vcombine.low %v5631_v0, %v14356_v1  ;;  %v6265_v54 = vrot.slane %v10293_v63, 1 }
 0x3b4   : > { %6605 = vrot.lane.b32.xlu0 %v6581_v49, %s11245_s30  ;;  %v6164_v2 = vshll.u32 %v14366_v23, 16  ;;  %v14387_v49 = vcombine.low %v5647_v20, %v14379_v36  ;;  %v6162_v26 = vshrl.u32 %v14366_v23, 16  ;;  %v6268_v30 = vrot.slane %v10294_v38, 1 }
 0x3b5   : > { %6527 = vrot.lane.b32.xlu1 %v6468_v39, %s11247_s25  ;;  %v6155_v39 = vor.u32 %v6154_v11, %v6150_v27  ;;  %v7866_v27 = vsel %vm6617_vm14, %v13739_v6, %v14340_v16  ;;  %v6267_v11 = vsel %vm5926_vm1, %v6265_v54, %v6266_v14  ;;  %v6477_v6 = vshll.u32 %v14406_v12, 16 }
 0x3b6   : > { %v7444_v46 = vpop.permute.xlu0 %7443  ;;  %v14368_v41 = vpop.permute.xlu1 %7275  ;;  %v6166_v31 = vrot.slane %v6164_v2, 1  ;;  %v6472_v1 = vshll.u32 %v14387_v49, 16  ;;  %v5671_v2 = vld [vmem:[#allocation3 + $0x60] sm:$0xe] }
 0x3b7   : > { %v6160_v29 = vsel %vm5755_vm3, %v6155_v39, %v6159_v18  ;;  %v14439_v39 = vld [vmem:[#allocation3 + $0x70] sm:$0xf] }
 0x3b8   : > { %6607 = vrot.lane.b32.xlu0 %v6584_v10, %s11245_s30  ;;  %v7884_v10 = vsel %vm941_vm8, %v7864_v9, %v14334_v28  ;;  %v6167_v57 = vor.u32 %v6166_v31, %v6162_v26  ;;  %v6269_v28 = vrot.slane %v14371_v48, 1  ;;  %v7886_v48 = vsel %vm941_vm8, %v7866_v27, %v14354_v60  ;;  %v14446_v26 = vld [vmem:[#allocation3 + $0x68] ss:$0 sps:$4 sm:$0x11]   ;;  %v5672_v31 = vld [vmem:[#allocation3 + $0x6c] sm:$0xe] }
 0x3b9   : > { %5888 = vrot.lane.b32.xlu1 %v5839_v45, %s11246_s28  ;;  %v7904_v33 = vsel %vm6658_vm4, %v7884_v10, %v14351_v61  ;;  %v5569_v45 = vld [vmem:[#allocation3 + $0x60] sm:$0xf]  ;;  %v7906_v16 = vsel %vm6658_vm4, %v7886_v48, %v14368_v41  ;;  %v6482_v41 = vshrl.u32 %v14394_v59, 16 }
 0x3ba   : > { %v7524_v17 = vpop.permute.xlu0 %7523  ;;  %v7446_v35 = vpop.permute.xlu1 %7445  ;;  %v7924_v34 = vsel %vm960_vm10, %v7904_v33, %v7444_v46  ;;  %v6470_v46 = vshrl.u32 %v14387_v49, 16  ;;  %v6270_v9 = vsel %vm5926_vm1, %v6268_v30, %v6269_v28  ;;  %v6586_v30 = vrot.slane %v14406_v12, 1  ;;  %v5591_v28 = vld [vmem:[#allocation3 + $0x60] sm:$0xe] }
 0x3bb   : > { %v7944_v61 = vsel %vm6699_vm6, %v7924_v34, %v7524_v17  ;;  %v7926_v60 = vsel %vm960_vm10, %v7906_v16, %v7446_v35  ;;  %v5592_v16 = vld [vmem:[#allocation3 + $0x6c] sm:$0xe] }
 0x3bc   : > { %5969 = vrot.lane.b32.xlu0 %v5947_v25, %s11235_s12  ;;  %v14413_v25 = vld [vmem:[#allocation3 + $0x64] sm:$0xf] }
 0x3bd   : > { %5890 = vrot.lane.b32.xlu1 %v5851_v37, %s11246_s28  ;;  %v6474_v37 = vrot.slane %v6472_v1, 1  ;;  %v14435_v0 = vcombine.low %v5569_v45, %v14413_v25  ;;  %v14465_v45 = vld [vmem:[#allocation3 + $0x74] ss:$0 sps:$4 sm:$0x11]  }
 0x3be   : > { %v7594_v13 = vpop.permute.xlu0 %7593 }
 0x3bf   : > { %v7526_v8 = vpop.permute.xlu1 %7525  ;;  %v7964_v20 = vsel %vm973_vm9, %v7944_v61, %v7594_v13  ;;  %v6489_v13 = vshll.u32 %v14422_v56, 16  ;;  %v6475_v38 = vor.u32 %v6474_v37, %v6470_v46  ;;  %v5855_v10 = vshll.u32 %v14435_v0, 16 }
 0x3c0   : > { %6039 = vrot.lane.b32.xlu0 %v10273_v42, %s11243_s29  ;;  %v6171_v42 = vrot.slane %v6169_v58, 1  ;;  %v7946_v18 = vsel %vm6699_vm6, %v7926_v60, %v7526_v8  ;;  %v10323_v58 = vcombine.low %v5671_v2, %v14379_v36  ;;  %v6479_v8 = vrot.slane %v6477_v6, 1 }
 0x3c1   : > { %5971 = vrot.lane.b32.xlu1 %v5950_v22, %s11235_s12  ;;  %v6486_v22 = vrot.slane %v6484_v43, 1  ;;  %v5857_v27 = vrot.slane %v5855_v10, 1  ;;  %v6589_v6 = vrot.slane %v14422_v56, 1  ;;  %v10266_v56 = vcombine.low %v5592_v16, %v14439_v39 }
 0x3c2   : > { %v7764_v51 = vpop.permute.xlu0 %7763  ;;  %v6172_v17 = vsel %vm5755_vm3, %v6167_v57, %v6171_v42  ;;  %v6491_v57 = vrot.slane %v6489_v13, 1  ;;  %v5860_v42 = vshll.u32 %v14446_v26, 16  ;;  %v6585_v34 = vrot.slane %v10323_v58, 1  ;;  %v14499_v13 = vld [vmem:[#allocation3 + $0x74] ss:$0 sps:$4 sm:$0x11]  }
 0x3c3   : > { %v7596_v32 = vpop.permute.xlu1 %7595  ;;  %v7984_v52 = vsel %vm15197_vm15, %v7964_v20, %v7764_v51  ;;  %v10324_v51 = vcombine.low %v5672_v31, %v14383_v47  ;;  %v6487_v36 = vor.u32 %v6486_v22, %v6482_v41  ;;  %v5610_v47 = vld [vmem:[#allocation3 + $0x6c] sm:$0xf]  ;;  %v5952_v22 = vrot.slane %v14446_v26, 1 }
 0x3c4   : > { %6209 = vrot.lane.b32.xlu0 %v6160_v29, %s11234_s18  ;;  %v7966_v35 = vsel %vm973_vm9, %v7946_v18, %v7596_v32  ;;  %v14455_v29 = vcombine.low %v5571_v19, %v14439_v39  ;;  %v6480_v32 = vsel %vm5755_vm3, %v6475_v38, %v6479_v8  ;;  %v5862_v37 = vrot.slane %v5860_v42, 1  ;;  %v14492_v18 = vld [vmem:[#allocation3 + $0x7c] sm:$0xf]  ;;  %v14504_v39 = vld [vmem:[#allocation3 + $0x80] ss:$0 sps:$4 sm:$0x11]  }
 0x3c5   : > { %6041 = vrot.lane.b32.xlu1 %v14366_v23, %s11243_s29  ;;  %v6588_v48 = vrot.slane %v10324_v51, 1  ;;  %v6492_v20 = vsel %vm5755_vm3, %v6487_v36, %v6491_v57  ;;  %v6587_v12 = vsel %vm5926_vm1, %v6585_v34, %v6586_v30  ;;  %v6181_v51 = vshll.u32 %v14499_v13, 16  ;;  %v5651_v36 = vld [vmem:[#allocation3 + $0x78] sm:$0xf] }
 0x3c6   : > { %v7844_v44 = vpop.permute.xlu0 %7843  ;;  %v5867_v61 = vshll.u32 %v14455_v29, 16  ;;  %v5865_v60 = vshrl.u32 %v14455_v29, 16  ;;  %v5954_v34 = vrot.slane %v10266_v56, 1  ;;  %v6193_v16 = vshll.u32 %v14504_v39, 16 }
 0x3c7   : > { %v7766_v63 = vpop.permute.xlu1 %7765  ;;  %v8004_v23 = vsel %vm15196_vm11, %v7984_v52, %v7844_v44 }
 0x3c8   : > { %6289 = vrot.lane.b32.xlu0 %v6267_v11, %s11244_s26  ;;  %10741 = vmatprep.mubr.msk.bf16.mxu0 %vm15195_vm5, %v8004_v23  ;;  %v7986_v54 = vsel %vm15197_vm15, %v7966_v35, %v7766_v63  ;;  %v14474_v11 = vld [vmem:[#allocation3 + $0x70] sm:$0xf]  ;;  %v5869_v63 = vrot.slane %v5867_v61, 1  ;;  %v5872_v23 = vshll.u32 %v14465_v45, 16 }
 0x3c9   : > { %6211 = vrot.lane.b32.xlu1 %v6172_v17, %s11234_s18  ;;  %v10265_v17 = vcombine.low %v5591_v28, %v14413_v25  ;;  %v10275_v52 = vcombine.low %v5610_v47, %v14474_v11  ;;  %v6590_v25 = vsel %vm5926_vm1, %v6588_v48, %v6589_v6  ;;  %v14511_v28 = vld [vmem:[#allocation3 + $0x7c] sm:$0xf]  ;;  %v6183_v48 = vrot.slane %v6181_v51, 1 }
 0x3ca   : > { %v7846_v14 = vpop.permute.xlu0 %7845  ;;  %v5870_v38 = vor.u32 %v5869_v63, %v5865_v60  ;;  %v5874_v8 = vrot.slane %v5872_v23, 1  ;;  %v5653_v60 = vld [vmem:[#allocation3 + $0x84] sm:$0xf]  ;;  %v14522_v63 = vld [vmem:[#allocation3 + $0x88] sm:$0xf] }
 0x3cb   : > { %v14457_v1 = vpop.permute.xlu1 %5876  ;;  %v8006_v33 = vsel %vm15196_vm11, %v7986_v54, %v7846_v14  ;;  %v5951_v41 = vrot.slane %v10265_v17, 1  ;;  %v6176_v35 = vshll.u32 %v10275_v52, 16  ;;  %v5632_v14 = vld [vmem:[#allocation3 + $0x6c] sm:$0xe]  ;;  %v6174_v10 = vshrl.u32 %v10275_v52, 16 }
 0x3cc   : > { %6359 = vrot.lane.b32.xlu0 %v14387_v49, %s11236_s15  ;;  %10742 = vmatmul.mubr.msk.bf16.gmra.mrb[28].mxu0 %vm15195_vm5, %v8006_v33  ;;  %v5853_v49 = vshrl.u32 %v14435_v0, 16  ;;  %v5875_v57 = vsel %vm5755_vm3, %v5870_v38, %v5874_v8 }
 0x3cd   : > { %6291 = vrot.lane.b32.xlu1 %v6270_v9, %s11244_s26  ;;  %v5953_v26 = vsel %vm5926_vm1, %v5951_v41, %v5952_v22  ;;  %v6178_v33 = vrot.slane %v6176_v35, 1  ;;  %v11118_v41 = vld [vmem:[#allocation3 + $0x80] ss:$0 sps:$4 sm:$0x11]  }
 0x3ce   : > { %v14470_v43 = vpop.permute.xlu0 %5957  ;;  %v5858_v2 = vor.u32 %v5857_v27, %v5853_v49  ;;  %v5633_v49 = vld [vmem:[#allocation3 + $0x78] sm:$0xe]  ;;  %v10295_v27 = vcombine.low %v5632_v14, %v14474_v11  ;;  %v6619_v11 = vsel %vm6617_vm14, %v13840_v5, %v14457_v1  ;;  %v6195_v1 = vrot.slane %v6193_v16, 1 }
 0x3cf   : > { %v14476_v46 = vpop.permute.xlu1 %5878  ;;  %v6179_v61 = vor.u32 %v6178_v33, %v6174_v10  ;;  %v6639_v56 = vsel %vm941_vm8, %v6619_v11, %v14470_v43  ;;  %v6275_v43 = vrot.slane %v14504_v39, 1  ;;  %v6501_v33 = vshll.u32 %v11118_v41, 16 }
 0x3d0   : > { %6529 = vrot.lane.b32.xlu0 %v6480_v32, %s11247_s25  ;;  %v5863_v31 = vsel %vm5755_vm3, %v5858_v2, %v5862_v37  ;;  %v5955_v32 = vrot.slane %v14465_v45, 1  ;;  %v10296_v2 = vcombine.low %v5633_v49, %v14492_v18  ;;  %v6271_v23 = vrot.slane %v10295_v27, 1 }
 0x3d1   : > { %6361 = vrot.lane.b32.xlu1 %v14394_v59, %s11236_s15  ;;  %v5612_v59 = vld [vmem:[#allocation3 + $0x78] sm:$0xf]  ;;  %v6621_v8 = vsel %vm6617_vm14, %v13886_v50, %v14476_v46  ;;  %v6592_v11 = vrot.slane %v11118_v41, 1 }
 0x3d2   : > { %v14486_v44 = vpop.permute.xlu0 %6027  ;;  %v10276_v9 = vcombine.low %v5612_v59, %v14492_v18  ;;  %v5956_v37 = vsel %vm5926_vm1, %v5954_v34, %v5955_v32  ;;  %v6272_v59 = vrot.slane %v14499_v13, 1  ;;  %v6274_v38 = vrot.slane %v10296_v2, 1  ;;  %v11117_v34 = vld [vmem:[#allocation3 + $0x8c] ss:$0 sps:$4 sm:$0x11]  }
 0x3d3   : > { %v14490_v19 = vpop.permute.xlu1 %5959  ;;  %v6660_v22 = vsel %vm6658_vm4, %v6639_v56, %v14486_v44  ;;  %v5674_v2 = vld [vmem:[#allocation3 + $0x84] sm:$0xe] }
 0x3d4   : > { %6609 = vrot.lane.b32.xlu0 %v6587_v12, %s11245_s30  ;;  %v6188_v30 = vshll.u32 %v10276_v9, 16  ;;  %v6186_v45 = vshrl.u32 %v10276_v9, 16  ;;  %v6273_v44 = vsel %vm5926_vm1, %v6271_v23, %v6272_v59  ;;  %v6641_v10 = vsel %vm941_vm8, %v6621_v8, %v14490_v19 }
 0x3d5   : > { %6531 = vrot.lane.b32.xlu1 %v6492_v20, %s11247_s25  ;;  %v14517_v20 = vcombine.low %v5651_v36, %v14511_v28  ;;  %v10326_v23 = vcombine.low %v5674_v2, %v14522_v63 }
 0x3d6   : > { %v6198_v58 = vpop.permute.xlu0 %6197  ;;  %v6190_v6 = vrot.slane %v6188_v30, 1 }
 0x3d7   : > { %v6030_v54 = vpop.permute.xlu1 %6029  ;;  %v6496_v18 = vshll.u32 %v14517_v20, 16  ;;  %v6680_v13 = vsel %vm960_vm10, %v6660_v22, %v6198_v58  ;;  %v6594_v22 = vrot.slane %v10326_v23, 1 }
 0x3d8   : > { %6611 = vrot.lane.b32.xlu0 %v6590_v25, %s11245_s30  ;;  %v6184_v25 = vsel %vm5755_vm3, %v6179_v61, %v6183_v48  ;;  %v6191_v5 = vor.u32 %v6190_v6, %v6186_v45  ;;  %v6662_v51 = vsel %vm6658_vm4, %v6641_v10, %v6030_v54  ;;  %v6503_v48 = vrot.slane %v6501_v33, 1 }
 0x3d9   : > { %5892 = vrot.lane.b32.xlu1 %v5863_v31, %s11246_s28  ;;  %v6498_v39 = vrot.slane %v6496_v18, 1  ;;  %v6513_v6 = vshll.u32 %v11117_v34, 16 }
 0x3da   : > { %v6278_v42 = vpop.permute.xlu0 %6277  ;;  %v6196_v50 = vsel %vm5755_vm3, %v6191_v5, %v6195_v1  ;;  %v6595_v1 = vrot.slane %v11117_v34, 1 }
 0x3db   : > { %v6200_v47 = vpop.permute.xlu1 %6199  ;;  %v6701_v14 = vsel %vm6699_vm6, %v6680_v13, %v6278_v42  ;;  %v5673_v42 = vld [vmem:[#allocation3 + $0x78] sm:$0xe] }
 0x3dc   : > { %5973 = vrot.lane.b32.xlu0 %v5953_v26, %s11235_s12  ;;  %v6494_v26 = vshrl.u32 %v14517_v20, 16  ;;  %v6682_v32 = vsel %vm960_vm10, %v6662_v51, %v6200_v47  ;;  %v10325_v27 = vcombine.low %v5673_v42, %v14511_v28 }
 0x3dd   : > { %5894 = vrot.lane.b32.xlu1 %v5875_v57, %s11246_s28 }
 0x3de   : > { %v6348_v12 = vpop.permute.xlu0 %6347  ;;  %v6499_v61 = vor.u32 %v6498_v39, %v6494_v26  ;;  %v6591_v28 = vrot.slane %v10325_v27, 1 }
 0x3df   : > { %v6280_v17 = vpop.permute.xlu1 %6279  ;;  %v6721_v58 = vsel %vm973_vm9, %v6701_v14, %v6348_v12 }
 0x3e0   : > { %6043 = vrot.lane.b32.xlu0 %v10275_v52, %s11243_s29  ;;  %v10306_v52 = vcombine.low %v5653_v60, %v14522_v63  ;;  %v6703_v49 = vsel %vm6699_vm6, %v6682_v32, %v6280_v17  ;;  %v6504_v60 = vsel %vm5755_vm3, %v6499_v61, %v6503_v48  ;;  %v6596_v63 = vsel %vm5926_vm1, %v6594_v22, %v6595_v1 }
 0x3e1   : > { %5975 = vrot.lane.b32.xlu1 %v5956_v37, %s11235_s12 }
 0x3e2   : > { %v6518_v35 = vpop.permute.xlu0 %6517  ;;  %v6508_v57 = vshll.u32 %v10306_v52, 16  ;;  %v6506_v12 = vshrl.u32 %v10306_v52, 16 }
 0x3e3   : > { %v6350_v31 = vpop.permute.xlu1 %6349  ;;  %v6742_v46 = vsel %vm15197_vm15, %v6721_v58, %v6518_v35 }
 0x3e4   : > { %6213 = vrot.lane.b32.xlu0 %v6184_v25, %s11234_s18  ;;  %v6723_v54 = vsel %vm973_vm9, %v6703_v49, %v6350_v31  ;;  %v6510_v45 = vrot.slane %v6508_v57, 1  ;;  %v6515_v25 = vrot.slane %v6513_v6, 1 }
 0x3e5   : > { %6045 = vrot.lane.b32.xlu1 %v10276_v9, %s11243_s29  ;;  %v6276_v9 = vsel %vm5926_vm1, %v6274_v38, %v6275_v43 }
 0x3e6   : > { %v6598_v36 = vpop.permute.xlu0 %6597  ;;  %v6511_v56 = vor.u32 %v6510_v45, %v6506_v12 }
 0x3e7   : > { %v6520_v30 = vpop.permute.xlu1 %6519  ;;  %v6762_v19 = vsel %vm15196_vm11, %v6742_v46, %v6598_v36 }
 0x3e8   : > { %6293 = vrot.lane.b32.xlu0 %v6273_v44, %s11244_s26  ;;  %10751 = vmatprep.mubr.msk.bf16.mxu0 %vm15195_vm5, %v6762_v19  ;;  %v6744_v47 = vsel %vm15197_vm15, %v6723_v54, %v6520_v30  ;;  %v6516_v35 = vsel %vm5755_vm3, %v6511_v56, %v6515_v25 }
 0x3e9   : > { %6215 = vrot.lane.b32.xlu1 %v6196_v50, %s11234_s18 }
 0x3ea   : > { %v6600_v37 = vpop.permute.xlu0 %6599 }
 0x3eb   : > { %v5881_v16 = vpop.permute.xlu1 %5880  ;;  %v6764_v17 = vsel %vm15196_vm11, %v6744_v47, %v6600_v37 }
 0x3ec   : > { %6363 = vrot.lane.b32.xlu0 %v14517_v20, %s11236_s15  ;;  %10752 = vmatmul.mubr.msk.bf16.vlgmr.msra.gmra.mrb[12].mxu0 %vm15195_vm5, %v6764_v17  ;;  %v6593_v20 = vsel %vm5926_vm1, %v6591_v28, %v6592_v11  ;;  %v6623_v14 = vsel %vm6617_vm14, %v14016_v55, %v5881_v16 }
 0x3ed   : > { %6295 = vrot.lane.b32.xlu1 %v6276_v9, %s11244_s26 }
 0x3ee   : > { %v5962_v59 = vpop.permute.xlu0 %5961 }
 0x3ef   : > { %v5883_v18 = vpop.permute.xlu1 %5882  ;;  %v6643_v44 = vsel %vm941_vm8, %v6623_v14, %v5962_v59 }
 0x3f0   : > { %6533 = vrot.lane.b32.xlu0 %v6504_v60, %s11247_s25  ;;  %v6625_v33 = vsel %vm6617_vm14, %v14039_v15, %v5883_v18 }
 0x3f1   : > { %6365 = vrot.lane.b32.xlu1 %v10306_v52, %s11236_s15 }
 0x3f2   : > { %v6032_v5 = vpop.permute.xlu0 %6031 }
 0x3f3   : > { %v5964_v13 = vpop.permute.xlu1 %5963  ;;  %v6664_v26 = vsel %vm6658_vm4, %v6643_v44, %v6032_v5 }
 0x3f4   : > { %6613 = vrot.lane.b32.xlu0 %v6593_v20, %s11245_s30  ;;  %v6645_v50 = vsel %vm941_vm8, %v6625_v33, %v5964_v13 }
 0x3f5   : > { %6535 = vrot.lane.b32.xlu1 %v6516_v35, %s11247_s25 }
 0x3f6   : > { %v6202_v41 = vpop.permute.xlu0 %6201 }
 0x3f7   : > { %v6034_v31 = vpop.permute.xlu1 %6033  ;;  %v6684_v58 = vsel %vm960_vm10, %v6664_v26, %v6202_v41 }
 0x3f8   : > { %v6666_v36 = vsel %vm6658_vm4, %v6645_v50, %v6034_v31  ;;  %v8319_v50 = vld [vmem:[#allocation5 + $0xc] sm:$0x1] }
 0x3f9   : > { %6615 = vrot.lane.b32.xlu1 %v6596_v63, %s11245_s30 }
 0x3fa   : > { %v6282_v38 = vpop.permute.xlu0 %6281 }
 0x3fb   : > { %v6204_v52 = vpop.permute.xlu1 %6203  ;;  %v6705_v51 = vsel %vm6699_vm6, %v6684_v58, %v6282_v38 }
 0x3fc   : > { %v6686_v42 = vsel %vm960_vm10, %v6666_v36, %v6204_v52  ;;  %v8320_v36 = vsel %vm11949_vm0, 0, %v8319_v50 }
 0x3fd   : > { %8321 = vst [vmem:[#allocation5 + $0xc] sm:$0x1] %v8320_v36 }
 0x3fe   : > { %v6352_v43 = vpop.permute.xlu0 %6351 }
 0x3ff   : > { %v6284_v8 = vpop.permute.xlu1 %6283  ;;  %v6725_v46 = vsel %vm973_vm9, %v6705_v51, %v6352_v43 }
 0x400   : > { %v6707_v30 = vsel %vm6699_vm6, %v6686_v42, %v6284_v8 }
 0x402   : > { %v6522_v10 = vpop.permute.xlu0 %6521 }
 0x403   : > { %v6354_v39 = vpop.permute.xlu1 %6353  ;;  %v6746_v55 = vsel %vm15197_vm15, %v6725_v46, %v6522_v10 }
 0x404   : > { %v6727_v15 = vsel %vm973_vm9, %v6707_v30, %v6354_v39 }
 0x406   : > { %v6602_v57 = vpop.permute.xlu0 %6601 }
 0x407   : > { %v6524_v34 = vpop.permute.xlu1 %6523  ;;  %v6766_v32 = vsel %vm15196_vm11, %v6746_v55, %v6602_v57 }
 0x408   : > { %10755 = vmatprep.mubr.msk.bf16.mxu0 %vm15195_vm5, %v6766_v32  ;;  %v6748_v19 = vsel %vm15197_vm15, %v6727_v15, %v6524_v34 }
 0x40a   : > { %v6604_v49 = vpop.permute.xlu0 %6603 }
 0x40b   : > { %v5885_v9 = vpop.permute.xlu1 %5884  ;;  %v6768_v54 = vsel %vm15196_vm11, %v6748_v19, %v6604_v49 }
 0x40c   : > { %10756 = vmatmul.mubr.msk.bf16.gmra.mrb[16].mxu0 %vm15195_vm5, %v6768_v54  ;;  %v6627_v2 = vsel %vm6617_vm14, %v14156_v40, %v5885_v9 }
 0x40e   : > { %v5966_v27 = vpop.permute.xlu0 %5965 }
 0x40f   : > { %v5887_v61 = vpop.permute.xlu1 %5886  ;;  %v6647_v28 = vsel %vm941_vm8, %v6627_v2, %v5966_v27  ;;  %v8346_v2 = vld [vmem:[#allocation5 + $0x8] sm:$0x1] }
 0x410   : > { %v6629_v56 = vsel %vm6617_vm14, %v14183_v3, %v5887_v61 }
 0x412   : > { %v6036_v48 = vpop.permute.xlu0 %6035 }
 0x413   : > { %v5968_v47 = vpop.permute.xlu1 %5967  ;;  %v6668_v60 = vsel %vm6658_vm4, %v6647_v28, %v6036_v48 }
 0x414   : > { %v6649_v18 = vsel %vm941_vm8, %v6629_v56, %v5968_v47 }
 0x416   : > { %v6206_v37 = vpop.permute.xlu0 %6205 }
 0x417   : > { %v6038_v12 = vpop.permute.xlu1 %6037  ;;  %v6688_v23 = vsel %vm960_vm10, %v6668_v60, %v6206_v37 }
 0x418   : > { %v6670_v22 = vsel %vm6658_vm4, %v6649_v18, %v6038_v12 }
 0x41a   : > { %v6286_v45 = vpop.permute.xlu0 %6285 }
 0x41b   : > { %v6208_v6 = vpop.permute.xlu1 %6207  ;;  %v6709_v25 = vsel %vm6699_vm6, %v6688_v23, %v6286_v45  ;;  %v8349_v45 = vld [vmem:[#allocation5 + $0x14] sm:$0x1] }
 0x41c   : > { %v6690_v5 = vsel %vm960_vm10, %v6670_v22, %v6208_v6 }
 0x41e   : > { %v6356_v16 = vpop.permute.xlu0 %6355 }
 0x41f   : > { %v6288_v17 = vpop.permute.xlu1 %6287  ;;  %v6729_v20 = vsel %vm973_vm9, %v6709_v25, %v6356_v16 }
 0x420   : > { %v6711_v63 = vsel %vm6699_vm6, %v6690_v5, %v6288_v17  ;;  %v8350_v17 = vsel %vm11955_vm2, 0, %v8349_v45 }
 0x421   : > { %8351 = vst [vmem:[#allocation5 + $0x14] sm:$0x1] %v8350_v17  ;;  %v14693_v17 = vld [vmem:[%s15188_s8] ss:$0 sm:$0xff] }
 0x422   : > { %v6526_v11 = vpop.permute.xlu0 %6525 }
 0x423   : > { %v6358_v59 = vpop.permute.xlu1 %6357  ;;  %v6750_v40 = vsel %vm15197_vm15, %v6729_v20, %v6526_v11  ;;  %v8347_v11 = vsel %vm11955_vm2, 0, %v8346_v2 }
 0x424   : > { %v6731_v3 = vsel %vm973_vm9, %v6711_v63, %v6358_v59  ;;  %8348 = vst [vmem:[#allocation5 + $0x8] sm:$0x1] %v8347_v11  ;;  %v8343_v11 = vld [vmem:[#allocation5 + $0x6c] sm:$0x1] }
 0x426   : > { %v6606_v35 = vpop.permute.xlu0 %6605 }
 0x427   : > { %v6528_v1 = vpop.permute.xlu1 %6527  ;;  %v6770_v13 = vsel %vm15196_vm11, %v6750_v40, %v6606_v35 }
 0x428   : > { %10759 = vmatprep.mubr.msk.bf16.mxu0 %vm15195_vm5, %v6770_v13  ;;  %v6752_v41 = vsel %vm15197_vm15, %v6731_v3, %v6528_v1  ;;  %v8325_v1 = vld [vmem:[#allocation5 + $0x24] sm:$0x1] }
 0x429   : > { %v8326_v63 = vsel %vm11949_vm0, 0, %v8325_v1 }
 0x42a   : > { %v6608_v31 = vpop.permute.xlu0 %6607  ;;  %8327 = vst [vmem:[#allocation5 + $0x24] sm:$0x1] %v8326_v63  ;;  %v8340_v63 = vld [vmem:[#allocation5 + $0x60] sm:$0x1] }
 0x42b   : > { %v5889_v38 = vpop.permute.xlu1 %5888  ;;  %v6772_v52 = vsel %vm15196_vm11, %v6752_v41, %v6608_v31 }
 0x42c   : > { %10760 = vmatmul.mubr.msk.bf16.gmra.mrb[20].mxu0 %vm15195_vm5, %v6772_v52  ;;  %v6631_v46 = vsel %vm6617_vm14, %v14302_v62, %v5889_v38 }
 0x42e   : > { %v5970_v43 = vpop.permute.xlu0 %5969 }
 0x42f   : > { %v5891_v8 = vpop.permute.xlu1 %5890  ;;  %v6651_v55 = vsel %vm941_vm8, %v6631_v46, %v5970_v43  ;;  %v8355_v46 = vld [vmem:[#allocation5 + $0x2c] sm:$0x1] }
 0x430   : > { %v6633_v30 = vsel %vm6617_vm14, %v14320_v24, %v5891_v8  ;;  %v8316_v24 = vld [vmem:[#allocation5] sm:$0x1] }
 0x431   : > { %v8317_v12 = vsel %vm11949_vm0, 0, %v8316_v24  ;;  %v8334_v24 = vld [vmem:[#allocation5 + $0x48] sm:$0x1] }
 0x432   : > { %v6040_v14 = vpop.permute.xlu0 %6039  ;;  %8318 = vst [vmem:[#allocation5] sm:$0x1] %v8317_v12  ;;  %v8367_v12 = vld [vmem:[#allocation5 + $0x5c] sm:$0x1] }
 0x433   : > { %v5972_v44 = vpop.permute.xlu1 %5971  ;;  %v6672_v57 = vsel %vm6658_vm4, %v6651_v55, %v6040_v14  ;;  %v8356_v55 = vsel %vm11955_vm2, 0, %v8355_v46  ;;  %v8368_v45 = vsel %vm11955_vm2, 0, %v8367_v12 }
 0x434   : > { %v6653_v19 = vsel %vm941_vm8, %v6633_v30, %v5972_v44  ;;  %8357 = vst [vmem:[#allocation5 + $0x2c] sm:$0x1] %v8356_v55  ;;  %8369 = vst [vmem:[#allocation5 + $0x5c] sm:$0x1] %v8368_v45 }
 0x436   : > { %v6210_v26 = vpop.permute.xlu0 %6209 }
 0x437   : > { %v6042_v10 = vpop.permute.xlu1 %6041  ;;  %v6692_v34 = vsel %vm960_vm10, %v6672_v57, %v6210_v26  ;;  %v8352_v57 = vld [vmem:[#allocation5 + $0x20] sm:$0x1] }
 0x438   : > { %v6674_v49 = vsel %vm6658_vm4, %v6653_v19, %v6042_v10 }
 0x43a   : > { %v6290_v58 = vpop.permute.xlu0 %6289 }
 0x43b   : > { %v6212_v39 = vpop.permute.xlu1 %6211  ;;  %v6713_v15 = vsel %vm6699_vm6, %v6692_v34, %v6290_v58 }
 0x43c   : > { %v6694_v27 = vsel %vm960_vm10, %v6674_v49, %v6212_v39 }
 0x43e   : > { %v6360_v33 = vpop.permute.xlu0 %6359 }
 0x43f   : > { %v6292_v51 = vpop.permute.xlu1 %6291  ;;  %v6733_v62 = vsel %vm973_vm9, %v6713_v15, %v6360_v33  ;;  %v8331_v15 = vld [vmem:[#allocation5 + $0x3c] sm:$0x1] }
 0x440   : > { %v6715_v47 = vsel %vm6699_vm6, %v6694_v27, %v6292_v51  ;;  %v8322_v51 = vld [vmem:[#allocation5 + $0x18] sm:$0x1]  ;;  %v8332_v19 = vsel %vm11949_vm0, 0, %v8331_v15 }
 0x441   : > { %8333 = vst [vmem:[#allocation5 + $0x3c] sm:$0x1] %v8332_v19  ;;  %v8358_v27 = vld [vmem:[#allocation5 + $0x38] sm:$0x1]  ;;  %v8687_v19 = vld [vmem:[#allocation5 + $0x8] sm:$0x1] }
 0x442   : > { %v6530_v42 = vpop.permute.xlu0 %6529 }
 0x443   : > { %v6362_v32 = vpop.permute.xlu1 %6361  ;;  %v6754_v9 = vsel %vm15197_vm15, %v6733_v62, %v6530_v42  ;;  %v8328_v62 = vld [vmem:[#allocation5 + $0x30] sm:$0x1] }
 0x444   : > { %v6735_v37 = vsel %vm973_vm9, %v6715_v47, %v6362_v32  ;;  %v8353_v32 = vsel %vm11955_vm2, 0, %v8352_v57  ;;  %v8329_v49 = vsel %vm11949_vm0, 0, %v8328_v62  ;;  %v8694_v57 = vld [vmem:[#allocation5 + $0x14] sm:$0x1] }
 0x445   : > { %8354 = vst [vmem:[#allocation5 + $0x20] sm:$0x1] %v8353_v32  ;;  %8330 = vst [vmem:[#allocation5 + $0x30] sm:$0x1] %v8329_v49 }
 0x446   : > { %v6610_v54 = vpop.permute.xlu0 %6609 }
 0x447   : > { %v6532_v61 = vpop.permute.xlu1 %6531  ;;  %v6774_v48 = vsel %vm15196_vm11, %v6754_v9, %v6610_v54  ;;  %v8361_v9 = vld [vmem:[#allocation5 + $0x44] sm:$0x1] }
 0x448   : > { %10763 = vmatprep.mubr.msk.bf16.mxu0 %vm15195_vm5, %v6774_v48  ;;  %v6756_v6 = vsel %vm15197_vm15, %v6735_v37, %v6532_v61  ;;  %v8362_v54 = vsel %vm11955_vm2, 0, %v8361_v9  ;;  %v8359_v61 = vsel %vm11955_vm2, 0, %v8358_v27  ;;  %v8337_v48 = vld [vmem:[#allocation5 + $0x54] sm:$0x1]  ;;  %v8335_v37 = vsel %vm11949_vm0, 0, %v8334_v24 }
 0x449   : > { %8363 = vst [vmem:[#allocation5 + $0x44] sm:$0x1] %v8362_v54  ;;  %8360 = vst [vmem:[#allocation5 + $0x38] sm:$0x1] %v8359_v61  ;;  %v8338_v47 = vsel %vm11949_vm0, 0, %v8337_v48 }
 0x44a   : > { %v6612_v16 = vpop.permute.xlu0 %6611  ;;  %8339 = vst [vmem:[#allocation5 + $0x54] sm:$0x1] %v8338_v47  ;;  %8336 = vst [vmem:[#allocation5 + $0x48] sm:$0x1] %v8335_v37 }
 0x44b   : > { %v5893_v28 = vpop.permute.xlu1 %5892  ;;  %v6776_v60 = vsel %vm15196_vm11, %v6756_v6, %v6612_v16  ;;  %v8364_v6 = vld [vmem:[#allocation5 + $0x50] sm:$0x1] }
 0x44c   : > { %10764 = vmatmul.mubr.msk.bf16.gmra.mrb[24].mxu0 %vm15195_vm5, %v6776_v60  ;;  %v6635_v13 = vsel %vm6617_vm14, %v14435_v0, %v5893_v28  ;;  %v8365_v16 = vsel %vm11955_vm2, 0, %v8364_v6 }
 0x44d   : > { %8366 = vst [vmem:[#allocation5 + $0x50] sm:$0x1] %v8365_v16 }
 0x44e   : > { %v5974_v23 = vpop.permute.xlu0 %5973 }
 0x44f   : > { %v5895_v59 = vpop.permute.xlu1 %5894  ;;  %v6655_v3 = vsel %vm941_vm8, %v6635_v13, %v5974_v23 }
 0x450   : > { %v6637_v8 = vsel %vm6617_vm14, %v14455_v29, %v5895_v59  ;;  %v8323_v29 = vsel %vm11949_vm0, 0, %v8322_v51 }
 0x451   : > { %8324 = vst [vmem:[#allocation5 + $0x18] sm:$0x1] %v8323_v29  ;;  %v8683_v29 = vld [vmem:[#allocation5] sm:$0xf] }
 0x452   : > { %v6044_v56 = vpop.permute.xlu0 %6043 }
 0x453   : > { %v5976_v25 = vpop.permute.xlu1 %5975  ;;  %v6676_v41 = vsel %vm6658_vm4, %v6655_v3, %v6044_v56  ;;  %v8344_v56 = vsel %vm11949_vm0, 0, %v8343_v11 }
 0x454   : > { %v6657_v0 = vsel %vm941_vm8, %v6637_v8, %v5976_v25  ;;  %8345 = vst [vmem:[#allocation5 + $0x6c] sm:$0x1] %v8344_v56 }
 0x456   : > { %v6214_v18 = vpop.permute.xlu0 %6213 }
 0x457   : > { %v6046_v20 = vpop.permute.xlu1 %6045  ;;  %v6696_v38 = vsel %vm960_vm10, %v6676_v41, %v6214_v18 }
 0x458   : > { %v6678_v10 = vsel %vm6658_vm4, %v6657_v0, %v6046_v20 }
 0x45a   : > { %v6294_v22 = vpop.permute.xlu0 %6293 }
 0x45b   : > { %v6216_v40 = vpop.permute.xlu1 %6215  ;;  %v6717_v43 = vsel %vm6699_vm6, %v6696_v38, %v6294_v22  ;;  %v8373_v38 = vld [vmem:[#allocation5 + $0x74] sm:$0x1] }
 0x45c   : > { %v6698_v33 = vsel %vm960_vm10, %v6678_v10, %v6216_v40  ;;  %v8374_v8 = vsel %vm11955_vm2, 0, %v8373_v38  ;;  %v8697_v38 = vld [vmem:[#allocation5 + $0x18] sm:$0xf] }
 0x45d   : > { %8375 = vst [vmem:[#allocation5 + $0x74] sm:$0x1] %v8374_v8 }
 0x45e   : > { %v6364_v35 = vpop.permute.xlu0 %6363 }
 0x45f   : > { %v6296_v5 = vpop.permute.xlu1 %6295  ;;  %v6737_v14 = vsel %vm973_vm9, %v6717_v43, %v6364_v35 }
 0x460   : > { %v6719_v50 = vsel %vm6699_vm6, %v6698_v33, %v6296_v5 }
 0x462   : > { %v6534_v31 = vpop.permute.xlu0 %6533 }
 0x463   : > { %v6366_v52 = vpop.permute.xlu1 %6365  ;;  %v6758_v44 = vsel %vm15197_vm15, %v6737_v14, %v6534_v31  ;;  %v8341_v31 = vsel %vm11949_vm0, 0, %v8340_v63  ;;  %v8370_v14 = vld [vmem:[#allocation5 + $0x68] sm:$0x1] }
 0x464   : > { %v6739_v36 = vsel %vm973_vm9, %v6719_v50, %v6366_v52  ;;  %8342 = vst [vmem:[#allocation5 + $0x60] sm:$0x1] %v8341_v31  ;;  %v8371_v10 = vsel %vm11955_vm2, 0, %v8370_v14  ;;  %vm15248_vm2 = vcmask 27648   ;;  %v8708_v14 = vld [vmem:[#allocation5 + $0x2c] sm:$0x1] }
 0x465   : > { %8372 = vst [vmem:[#allocation5 + $0x68] sm:$0x1] %v8371_v10 }
 0x466   : > { %v6614_v26 = vpop.permute.xlu0 %6613 }
 0x467   : > { %v6536_v58 = vpop.permute.xlu1 %6535  ;;  %v6778_v39 = vsel %vm15196_vm11, %v6758_v44, %v6614_v26 }
 0x468   : > { %10767 = vmatprep.mubr.msk.bf16.mxu0 %vm15195_vm5, %v6778_v39  ;;  %v6760_v42 = vsel %vm15197_vm15, %v6739_v36, %v6536_v58  ;;  %v8690_v58 = vld [vmem:[#allocation5 + $0xc] sm:$0xf]  ;;  %vm15256_vm15 = vcmask (!%p10231_p9), 24576  }
 0x46b   : > { %v6616_v34 = vpop.permute.xlu1 %6615 }
 0x46c   : > { %v6780_v30 = vsel %vm15196_vm11, %v6760_v42, %v6616_v34 }
 0x46d   : > { %10768 = vmatmul.mubr.msk.bf16.gmra.mrb[28].mxu0 %vm15195_vm5, %v6780_v30  ;;  %vm15249_vm5 = vmmov %vm15248_vm2 }
 0x4bf   : > { %v10753_v2 = vpop.f32.mrb[12].mxu0 }
 0x4c0   : > { %v8385_v28 = vadd.f32 %v10753_v2, %v14693_v17  ;;  %v8237_v60 = vpop.f32.mrb[13].mxu0 }
 0x4c1   : > { %v8383_v23 = vadd.f32 %v14693_v17, %v8237_v60  ;;  %v10754_v59 = vpop.f32.mrb[14].mxu0 }
 0x4c2   : > { %v8405_v25 = vmax.f32 %v8385_v28, 0.0  ;;  %v8386_v18 = vadd.f32 %v10754_v59, %v14693_v17  ;;  %v8240_v20 = vpop.f32.mrb[15].mxu0 }
 0x4c3   : > { %v8403_v22 = vmax.f32 %v8383_v23, 0.0  ;;  %v8384_v40 = vadd.f32 %v14693_v17, %v8240_v20 }
 0x4c4   : > { %v10580_v35 = vpack.c.bf16 %v8405_v25, %v8405_v25  ;;  %v8406_v5 = vmax.f32 %v8386_v18, 0.0 }
 0x4c5   : > { %v10578_v1 = vpack.c.bf16 %v8403_v22, %v8403_v22  ;;  %v8404_v13 = vmax.f32 %v8384_v40, 0.0 }
 0x4c6   : > { %v8501_v3 = vshrl.u32 %v10580_v35, 16  ;;  %v10581_v41 = vpack.c.bf16 %v8406_v5, %v8406_v5  ;;  %v8504_v44 = vshll.u32 %v10580_v35, 16 }
 0x4c7   : > { %v8484_v52 = vshrl.u32 %v10578_v1, 16  ;;  %v10579_v43 = vpack.c.bf16 %v8404_v13, %v8404_v13  ;;  %v8487_v33 = vshll.u32 %v10578_v1, 16  ;;  %v8704_v13 = vld [vmem:[#allocation5 + $0x24] sm:$0xf] }
 0x4c8   : > { %v8503_v0 = vrot.slane %v8501_v3, 7  ;;  %v8509_v26 = vshrl.u32 %v10581_v41, 16  ;;  %v8512_v36 = vshll.u32 %v10581_v41, 16 }
 0x4c9   : > { %v8486_v39 = vrot.slane %v8484_v52, 7  ;;  %v8492_v51 = vshrl.u32 %v10579_v43, 16  ;;  %v8495_v34 = vshll.u32 %v10579_v43, 16 }
 0x4ca   : > { %v8506_v50 = vor.u32 %v8504_v44, %v8503_v0  ;;  %v8511_v46 = vrot.slane %v8509_v26, 7  ;;  %v8507_v32 = vrot.slane %v8503_v0, 4 }
 0x4cb   : > { %v8489_v55 = vor.u32 %v8487_v33, %v8486_v39  ;;  %v8494_v42 = vrot.slane %v8492_v51, 7  ;;  %v8490_v62 = vrot.slane %v8486_v39, 4  ;;  %v8701_v33 = vld [vmem:[#allocation5 + $0x20] sm:$0x1] }
 0x4cc   : > { %v8691_v30 = vsel %vm12245_vm7, %v8506_v50, %v8690_v58  ;;  %v8514_v15 = vor.u32 %v8512_v36, %v8511_v46  ;;  %v8516_v7 = vrot.slane %v8511_v46, 4 }
 0x4cd   : > { %8692 = vst [vmem:[#allocation5 + $0xc] sm:$0xf] %v8691_v30  ;;  %v8684_v49 = vsel %vm12245_vm7, %v8489_v55, %v8683_v29  ;;  %v8497_v9 = vor.u32 %v8495_v34, %v8494_v42  ;;  %v8499_v54 = vrot.slane %v8494_v42, 4 }
 0x4ce   : > { %8685 = vst [vmem:[#allocation5] sm:$0xf] %v8684_v49  ;;  %v8515_v27 = vsel %vm12255_vm12, %v8507_v32, %v8514_v15  ;;  %v8695_v61 = vsel %vm11949_vm0, %v8516_v7, %v8694_v57 }
 0x4cf   : > { %8693 = vst.msk [vmem:[#allocation5 + $0x10] sm:$0xf] %vm15248_vm2, %v8515_v27  ;;  %8696 = vst [vmem:[#allocation5 + $0x14] sm:$0x1] %v8695_v61  ;;  %v8498_v48 = vsel %vm12255_vm12, %v8490_v62, %v8497_v9  ;;  %v8688_v47 = vsel %vm11949_vm0, %v8499_v54, %v8687_v19 }
 0x4d0   : > { %8686 = vst.msk [vmem:[#allocation5 + $0x4] sm:$0xf] %vm15249_vm5, %v8498_v48  ;;  %8689 = vst [vmem:[#allocation5 + $0x8] sm:$0x1] %v8688_v47 }
 0x4d1   : > { %vm15250_vm5 = vmmov %vm15248_vm2  ;;  %8759 = vst.msk [vmem:[#allocation5 + $0x8] sm:$0x1] (!%p10231_p9), %vm15256_vm15, %v11248_v21 }
 0x4df   : > { %v10757_v24 = vpop.f32.mrb[16].mxu0 }
 0x4e0   : > { %v8389_v37 = vadd.f32 %v10757_v24, %v14693_v17  ;;  %v8253_v12 = vpop.f32.mrb[17].mxu0 }
 0x4e1   : > { %v8387_v45 = vadd.f32 %v14693_v17, %v8253_v12  ;;  %v10758_v6 = vpop.f32.mrb[18].mxu0 }
 0x4e2   : > { %v8409_v16 = vmax.f32 %v8389_v37, 0.0  ;;  %v8390_v2 = vadd.f32 %v10758_v6, %v14693_v17  ;;  %v8256_v28 = vpop.f32.mrb[19].mxu0 }
 0x4e3   : > { %v8407_v60 = vmax.f32 %v8387_v45, 0.0  ;;  %v8388_v11 = vadd.f32 %v14693_v17, %v8256_v28  ;;  %v8718_v28 = vld [vmem:[#allocation5 + $0x3c] sm:$0xf] }
 0x4e4   : > { %v10584_v23 = vpack.c.bf16 %v8409_v16, %v8409_v16  ;;  %v8410_v59 = vmax.f32 %v8390_v2, 0.0 }
 0x4e5   : > { %v10582_v56 = vpack.c.bf16 %v8407_v60, %v8407_v60  ;;  %v8408_v25 = vmax.f32 %v8388_v11, 0.0 }
 0x4e6   : > { %v8535_v18 = vshrl.u32 %v10584_v23, 16  ;;  %v10585_v20 = vpack.c.bf16 %v8410_v59, %v8410_v59  ;;  %v8538_v5 = vshll.u32 %v10584_v23, 16 }
 0x4e7   : > { %v8518_v22 = vshrl.u32 %v10582_v56, 16  ;;  %v10583_v40 = vpack.c.bf16 %v8408_v25, %v8408_v25  ;;  %v8521_v3 = vshll.u32 %v10582_v56, 16  ;;  %v8711_v56 = vld [vmem:[#allocation5 + $0x30] sm:$0xf] }
 0x4e8   : > { %v8537_v35 = vrot.slane %v8535_v18, 7  ;;  %v8543_v1 = vshrl.u32 %v10585_v20, 16  ;;  %v8546_v43 = vshll.u32 %v10585_v20, 16 }
 0x4e9   : > { %v8520_v63 = vrot.slane %v8518_v22, 7  ;;  %v8526_v41 = vshrl.u32 %v10583_v40, 16  ;;  %v8529_v44 = vshll.u32 %v10583_v40, 16  ;;  %v8722_v22 = vld [vmem:[#allocation5 + $0x44] sm:$0x1] }
 0x4ea   : > { %v8540_v31 = vor.u32 %v8538_v5, %v8537_v35  ;;  %v8545_v52 = vrot.slane %v8543_v1, 7  ;;  %v8541_v26 = vrot.slane %v8537_v35, 4 }
 0x4eb   : > { %v8523_v8 = vor.u32 %v8521_v3, %v8520_v63  ;;  %v8528_v0 = vrot.slane %v8526_v41, 7  ;;  %v8524_v51 = vrot.slane %v8520_v63, 4  ;;  %v8715_v3 = vld [vmem:[#allocation5 + $0x38] sm:$0x1] }
 0x4ec   : > { %v8705_v10 = vsel %vm12245_vm7, %v8540_v31, %v8704_v13  ;;  %v8548_v58 = vor.u32 %v8546_v43, %v8545_v52  ;;  %v8550_v39 = vrot.slane %v8545_v52, 4 }
 0x4ed   : > { %8706 = vst [vmem:[#allocation5 + $0x24] sm:$0xf] %v8705_v10  ;;  %v8698_v50 = vsel %vm12245_vm7, %v8523_v8, %v8697_v38  ;;  %v8531_v29 = vor.u32 %v8529_v44, %v8528_v0  ;;  %v8533_v46 = vrot.slane %v8528_v0, 4 }
 0x4ee   : > { %8699 = vst [vmem:[#allocation5 + $0x18] sm:$0xf] %v8698_v50  ;;  %v8549_v36 = vsel %vm12255_vm12, %v8541_v26, %v8548_v58  ;;  %v8709_v55 = vsel %vm11949_vm0, %v8550_v39, %v8708_v14 }
 0x4ef   : > { %8707 = vst.msk [vmem:[#allocation5 + $0x28] sm:$0xf] %vm15250_vm5, %v8549_v36  ;;  %8710 = vst [vmem:[#allocation5 + $0x2c] sm:$0x1] %v8709_v55  ;;  %v8532_v57 = vsel %vm12255_vm12, %v8524_v51, %v8531_v29  ;;  %v8702_v42 = vsel %vm11949_vm0, %v8533_v46, %v8701_v33 }
 0x4f0   : > { %8700 = vst.msk [vmem:[#allocation5 + $0x1c] sm:$0xf] %vm15248_vm2, %v8532_v57  ;;  %8703 = vst [vmem:[#allocation5 + $0x20] sm:$0x1] %v8702_v42 }
 0x4f1   : > { %vm15251_vm5 = vmmov %vm15248_vm2 }
 0x4ff   : > { %v10761_v34 = vpop.f32.mrb[20].mxu0 }
 0x500   : > { %v8393_v32 = vadd.f32 %v10761_v34, %v14693_v17  ;;  %v8269_v30 = vpop.f32.mrb[21].mxu0 }
 0x501   : > { %v8391_v15 = vadd.f32 %v14693_v17, %v8269_v30  ;;  %v10762_v7 = vpop.f32.mrb[22].mxu0 }
 0x502   : > { %v8413_v19 = vmax.f32 %v8393_v32, 0.0  ;;  %v8394_v62 = vadd.f32 %v10762_v7, %v14693_v17  ;;  %v8272_v49 = vpop.f32.mrb[23].mxu0 }
 0x503   : > { %v8411_v9 = vmax.f32 %v8391_v15, 0.0  ;;  %v8392_v54 = vadd.f32 %v14693_v17, %v8272_v49  ;;  %v8732_v49 = vld [vmem:[#allocation5 + $0x54] sm:$0xf] }
 0x504   : > { %v10588_v27 = vpack.c.bf16 %v8413_v19, %v8413_v19  ;;  %v8414_v61 = vmax.f32 %v8394_v62, 0.0 }
 0x505   : > { %v10586_v48 = vpack.c.bf16 %v8411_v9, %v8411_v9  ;;  %v8412_v47 = vmax.f32 %v8392_v54, 0.0 }
 0x506   : > { %v8569_v24 = vshrl.u32 %v10588_v27, 16  ;;  %v10589_v37 = vpack.c.bf16 %v8414_v61, %v8414_v61  ;;  %v8572_v16 = vshll.u32 %v10588_v27, 16 }
 0x507   : > { %v8552_v12 = vshrl.u32 %v10586_v48, 16  ;;  %v10587_v45 = vpack.c.bf16 %v8412_v47, %v8412_v47  ;;  %v8555_v11 = vshll.u32 %v10586_v48, 16  ;;  %v8725_v48 = vld [vmem:[#allocation5 + $0x48] sm:$0xf] }
 0x508   : > { %v8571_v6 = vrot.slane %v8569_v24, 7  ;;  %v8577_v2 = vshrl.u32 %v10589_v37, 16  ;;  %v8580_v18 = vshll.u32 %v10589_v37, 16 }
 0x509   : > { %v8554_v60 = vrot.slane %v8552_v12, 7  ;;  %v8560_v23 = vshrl.u32 %v10587_v45, 16  ;;  %v8563_v35 = vshll.u32 %v10587_v45, 16  ;;  %v8736_v12 = vld [vmem:[#allocation5 + $0x5c] sm:$0x1] }
 0x50a   : > { %v8574_v59 = vor.u32 %v8572_v16, %v8571_v6  ;;  %v8579_v25 = vrot.slane %v8577_v2, 7  ;;  %v8575_v5 = vrot.slane %v8571_v6, 4 }
 0x50b   : > { %v8557_v20 = vor.u32 %v8555_v11, %v8554_v60  ;;  %v8562_v40 = vrot.slane %v8560_v23, 7  ;;  %v8558_v41 = vrot.slane %v8554_v60, 4  ;;  %v8729_v11 = vld [vmem:[#allocation5 + $0x50] sm:$0x1] }
 0x50c   : > { %v8719_v1 = vsel %vm12245_vm7, %v8574_v59, %v8718_v28  ;;  %v8582_v13 = vor.u32 %v8580_v18, %v8579_v25  ;;  %v8584_v63 = vrot.slane %v8579_v25, 4 }
 0x50d   : > { %8720 = vst [vmem:[#allocation5 + $0x3c] sm:$0xf] %v8719_v1  ;;  %v8712_v31 = vsel %vm12245_vm7, %v8557_v20, %v8711_v56  ;;  %v8565_v38 = vor.u32 %v8563_v35, %v8562_v40  ;;  %v8567_v52 = vrot.slane %v8562_v40, 4 }
 0x50e   : > { %8713 = vst [vmem:[#allocation5 + $0x30] sm:$0xf] %v8712_v31  ;;  %v8583_v43 = vsel %vm12255_vm12, %v8575_v5, %v8582_v13  ;;  %v8723_v8 = vsel %vm11949_vm0, %v8584_v63, %v8722_v22 }
 0x50f   : > { %8721 = vst.msk [vmem:[#allocation5 + $0x40] sm:$0xf] %vm15251_vm5, %v8583_v43  ;;  %8724 = vst [vmem:[#allocation5 + $0x44] sm:$0x1] %v8723_v8  ;;  %v8566_v14 = vsel %vm12255_vm12, %v8558_v41, %v8565_v38  ;;  %v8716_v0 = vsel %vm11949_vm0, %v8567_v52, %v8715_v3 }
 0x510   : > { %8714 = vst.msk [vmem:[#allocation5 + $0x34] sm:$0xf] %vm15248_vm2, %v8566_v14  ;;  %8717 = vst [vmem:[#allocation5 + $0x38] sm:$0x1] %v8716_v0 }
 0x511   : > { %vm15252_vm5 = vmmov %vm15248_vm2 }
 0x51f   : > { %v10765_v44 = vpop.f32.mrb[24].mxu0 }
 0x520   : > { %v8397_v26 = vadd.f32 %v10765_v44, %v14693_v17  ;;  %v8285_v10 = vpop.f32.mrb[25].mxu0 }
 0x521   : > { %v8395_v58 = vadd.f32 %v14693_v17, %v8285_v10  ;;  %v10766_v39 = vpop.f32.mrb[26].mxu0 }
 0x522   : > { %v8417_v33 = vmax.f32 %v8397_v26, 0.0  ;;  %v8398_v51 = vadd.f32 %v10766_v39, %v14693_v17  ;;  %v8288_v50 = vpop.f32.mrb[27].mxu0 }
 0x523   : > { %v8415_v29 = vmax.f32 %v8395_v58, 0.0  ;;  %v8396_v46 = vadd.f32 %v14693_v17, %v8288_v50  ;;  %v8746_v50 = vld [vmem:[#allocation5 + $0x6c] sm:$0xf] }
 0x524   : > { %v10592_v36 = vpack.c.bf16 %v8417_v33, %v8417_v33  ;;  %v8418_v55 = vmax.f32 %v8398_v51, 0.0 }
 0x525   : > { %v10590_v57 = vpack.c.bf16 %v8415_v29, %v8415_v29  ;;  %v8416_v42 = vmax.f32 %v8396_v46, 0.0 }
 0x526   : > { %v8603_v34 = vshrl.u32 %v10592_v36, 16  ;;  %v10593_v32 = vpack.c.bf16 %v8418_v55, %v8418_v55  ;;  %v8606_v19 = vshll.u32 %v10592_v36, 16 }
 0x527   : > { %v8586_v30 = vshrl.u32 %v10590_v57, 16  ;;  %v10591_v15 = vpack.c.bf16 %v8416_v42, %v8416_v42  ;;  %v8589_v54 = vshll.u32 %v10590_v57, 16  ;;  %v8739_v57 = vld [vmem:[#allocation5 + $0x60] sm:$0xf] }
 0x528   : > { %v8605_v7 = vrot.slane %v8603_v34, 7  ;;  %v8611_v62 = vshrl.u32 %v10593_v32, 16  ;;  %v8614_v24 = vshll.u32 %v10593_v32, 16  ;;  %v8750_v32 = vld [vmem:[#allocation5 + $0x74] sm:$0x1] }
 0x529   : > { %v8588_v9 = vrot.slane %v8586_v30, 7  ;;  %v8594_v27 = vshrl.u32 %v10591_v15, 16  ;;  %v8597_v6 = vshll.u32 %v10591_v15, 16 }
 0x52a   : > { %v8608_v61 = vor.u32 %v8606_v19, %v8605_v7  ;;  %v8613_v47 = vrot.slane %v8611_v62, 7  ;;  %v8609_v16 = vrot.slane %v8605_v7, 4 }
 0x52b   : > { %v8591_v37 = vor.u32 %v8589_v54, %v8588_v9  ;;  %v8596_v45 = vrot.slane %v8594_v27, 7  ;;  %v8592_v23 = vrot.slane %v8588_v9, 4  ;;  %v8743_v9 = vld [vmem:[#allocation5 + $0x68] sm:$0x1] }
 0x52c   : > { %v8733_v2 = vsel %vm12245_vm7, %v8608_v61, %v8732_v49  ;;  %v8616_v28 = vor.u32 %v8614_v24, %v8613_v47  ;;  %v8618_v60 = vrot.slane %v8613_v47, 4 }
 0x52d   : > { %8734 = vst [vmem:[#allocation5 + $0x54] sm:$0xf] %v8733_v2  ;;  %v8726_v59 = vsel %vm12245_vm7, %v8591_v37, %v8725_v48  ;;  %v8599_v56 = vor.u32 %v8597_v6, %v8596_v45  ;;  %v8601_v25 = vrot.slane %v8596_v45, 4 }
 0x52e   : > { %8727 = vst [vmem:[#allocation5 + $0x48] sm:$0xf] %v8726_v59  ;;  %v8617_v18 = vsel %vm12255_vm12, %v8609_v16, %v8616_v28  ;;  %v8737_v20 = vsel %vm11949_vm0, %v8618_v60, %v8736_v12 }
 0x52f   : > { %8735 = vst.msk [vmem:[#allocation5 + $0x58] sm:$0xf] %vm15252_vm5, %v8617_v18  ;;  %8738 = vst [vmem:[#allocation5 + $0x5c] sm:$0x1] %v8737_v20  ;;  %v8600_v22 = vsel %vm12255_vm12, %v8592_v23, %v8599_v56  ;;  %v8730_v40 = vsel %vm11949_vm0, %v8601_v25, %v8729_v11 }
 0x530   : > { %8728 = vst.msk [vmem:[#allocation5 + $0x4c] sm:$0xf] %vm15248_vm2, %v8600_v22  ;;  %8731 = vst [vmem:[#allocation5 + $0x50] sm:$0x1] %v8730_v40 }
 0x531   : > { %vm15253_vm5 = vmmov %vm15248_vm2 }
 0x540   : > { %v10769_v35 = vpop.f32.mrb[28].mxu0 }
 0x541   : > { %v8401_v5 = vadd.f32 %v10769_v35, %v14693_v17  ;;  %v8301_v1 = vpop.f32.mrb[29].mxu0 }
 0x542   : > { %v8399_v13 = vadd.f32 %v14693_v17, %v8301_v1  ;;  %v10770_v63 = vpop.f32.mrb[30].mxu0 }
 0x543   : > { %v8421_v3 = vmax.f32 %v8401_v5, 0.0  ;;  %v8402_v41 = vadd.f32 %v10770_v63, %v14693_v17  ;;  %v8304_v31 = vpop.f32.mrb[31].mxu0 }
 0x544   : > { %v8419_v38 = vmax.f32 %v8399_v13, 0.0  ;;  %v8400_v52 = vadd.f32 %v14693_v17, %v8304_v31 }
 0x545   : > { %v10596_v43 = vpack.c.bf16 %v8421_v3, %v8421_v3  ;;  %v8422_v8 = vmax.f32 %v8402_v41, 0.0 }
 0x546   : > { %v10594_v14 = vpack.c.bf16 %v8419_v38, %v8419_v38  ;;  %v8420_v0 = vmax.f32 %v8400_v52, 0.0 }
 0x547   : > { %v8637_v44 = vshrl.u32 %v10596_v43, 16  ;;  %v10597_v26 = vpack.c.bf16 %v8422_v8, %v8422_v8  ;;  %v8640_v33 = vshll.u32 %v10596_v43, 16 }
 0x548   : > { %v8620_v10 = vshrl.u32 %v10594_v14, 16  ;;  %v10595_v58 = vpack.c.bf16 %v8420_v0, %v8420_v0  ;;  %v8623_v46 = vshll.u32 %v10594_v14, 16 }
 0x549   : > { %v8639_v39 = vrot.slane %v8637_v44, 7  ;;  %v8645_v51 = vshrl.u32 %v10597_v26, 16  ;;  %v8648_v34 = vshll.u32 %v10597_v26, 16 }
 0x54a   : > { %v8622_v29 = vrot.slane %v8620_v10, 7  ;;  %v8628_v36 = vshrl.u32 %v10595_v58, 16  ;;  %v8631_v15 = vshll.u32 %v10595_v58, 16 }
 0x54b   : > { %v8642_v55 = vor.u32 %v8640_v33, %v8639_v39  ;;  %v8647_v42 = vrot.slane %v8645_v51, 7  ;;  %v8643_v7 = vrot.slane %v8639_v39, 4  ;;  %8755 = sbr.rel (%p10231_p9) target bundleno = 1364 (0x554), region = 76 }
 0x54c   : > { %v8625_v17 = vor.u32 %v8623_v46, %v8622_v29  ;;  %v8630_v30 = vrot.slane %v8628_v36, 7  ;;  %v8626_v54 = vrot.slane %v8622_v29, 4 }
 0x54d   : > { %v8747_v19 = vsel %vm12245_vm7, %v8642_v55, %v8746_v50  ;;  %v8650_v62 = vor.u32 %v8648_v34, %v8647_v42  ;;  %v8652_v49 = vrot.slane %v8647_v42, 4 }
 0x54e   : > { %8748 = vst [vmem:[#allocation5 + $0x6c] sm:$0xf] %v8747_v19  ;;  %v8740_v27 = vsel %vm12245_vm7, %v8625_v17, %v8739_v57  ;;  %v8633_v61 = vor.u32 %v8631_v15, %v8630_v30  ;;  %v8635_v48 = vrot.slane %v8630_v30, 4  ;;  %vm15254_vm7 = vcmask (!%p10231_p9), 27648  }
 0x54f   : > { %8741 = vst [vmem:[#allocation5 + $0x60] sm:$0xf] %v8740_v27  ;;  %v8651_v47 = vsel %vm12255_vm12, %v8643_v7, %v8650_v62  ;;  %v8751_v24 = vsel %vm11949_vm0, %v8652_v49, %v8750_v32  ;;  %8756 = vst.msk [vmem:[#allocation5] sm:$0xf] (!%p10231_p9), %vm15254_vm7, %v11248_v21 }
 0x550   : > { %8749 = vst.msk [vmem:[#allocation5 + $0x70] sm:$0xf] %vm15253_vm5, %v8651_v47  ;;  %8752 = vst [vmem:[#allocation5 + $0x74] sm:$0x1] %v8751_v24  ;;  %v8634_v37 = vsel %vm12255_vm12, %v8626_v54, %v8633_v61  ;;  %v8744_v12 = vsel %vm11949_vm0, %v8635_v48, %v8743_v9 }
 0x551   : > { %8742 = vst.msk [vmem:[#allocation5 + $0x64] sm:$0xf] %vm15248_vm2, %v8634_v37  ;;  %8745 = vst [vmem:[#allocation5 + $0x68] sm:$0x1] %v8744_v12 }
 0x552   : > { %vm15255_vm11 = vmmov %vm15254_vm7 }
 0x553   : > { %8757 = vst.msk [vmem:[#allocation5 + $0x4] sm:$0xf] %vm15255_vm11, %v11248_v21 }
 0x554 PF: > { %8762 = sbr.rel (%p10232_p10) target bundleno = 1371 (0x55b), region = 80  ;;  %v11249_v4 = vmov (!%p10232_p10), 0   ;;  %vm15257_vm12 = vcmask (!%p10232_p10), 27648   ;;  %vm15259_vm5 = vcmask (!%p10232_p10), 24576  }
 0x555   : > { %8764 = vst.msk [vmem:[#allocation5 + $0x6c] sm:$0xf] (!%p10232_p10), %vm15257_vm12, %v11249_v4  ;;  %vm15258_vm0 = vmmov (!%p10232_p10), %vm15257_vm12 }
 0x556   : > { %8765 = vst.msk [vmem:[#allocation5 + $0x70] sm:$0xf] (!%p10232_p10), %vm15258_vm0, %v11249_v4 }
 0x557   : > { %8767 = vst.msk [vmem:[#allocation5 + $0x74] sm:$0x1] (!%p10232_p10), %vm15259_vm5, %v11249_v4 }
 0x55b PF: > { %v8801_v53 = vld [vmem:[#allocation5 + $0xc] sm:$0xf]  ;;  %v14803_v45 = vld [vmem:[#allocation5 + $0x10] sm:$0xf]  ;;  %v8769_v6 = vld [vmem:[#allocation5 + $0x4] sm:$0xf] }
 0x55c   : > { %v10490_v16 = vcombine.low %v8801_v53, %v14803_v45  ;;  %v8792_v2 = vld [vmem:[#allocation5] sm:$0xe]  ;;  %v11120_v60 = vld [vmem:[#allocation5 + $0x8] ss:$0 sps:$4 sm:$0x11]   ;;  %vm15260_vm11 = vcmask 228352  }
 0x55d   : > { %v8768_v28 = vld [vmem:[#allocation5] sm:$0xf]  ;;  %v10482_v11 = vcombine.low %v8792_v2, %v8769_v6  ;;  %v8770_v59 = vld [vmem:[#allocation5 + $0xc] sm:$0xf]  ;;  %v8771_v56 = vld [vmem:[#allocation5 + $0x10] sm:$0xf] }
 0x55e   : > { %v14806_v23 = vcombine.low %v8768_v28, %v8769_v6  ;;  %9146 = vrot.lane.b32.xlu0 %v10490_v16, %s11243_s29  ;;  %v8793_v25 = vld [vmem:[#allocation5 + $0xc] sm:$0xe]  ;;  %v9067_v20 = vrot.slane %v11120_v60, 1  ;;  %v14809_v22 = vcombine.low %v8770_v59, %v8771_v56  ;;  %v11124_v40 = vld [vmem:[#allocation5 + $0x14] ss:$0 sps:$4 sm:$0x11]  }
 0x55f   : > { %v9066_v18 = vrot.slane %v10482_v11, 1  ;;  %v10483_v35 = vcombine.low %v8793_v25, %v8771_v56  ;;  %v8938_v13 = vshll.u32 %v11120_v60, 16  ;;  %v8803_v63 = vld [vmem:[#allocation5 + $0x18] sm:$0xf]  ;;  %v9070_v31 = vrot.slane %v11124_v40, 1  ;;  %v11191_v21 = vld [vmem:[%s15189_s9] sm:$0xff]  }
 0x560   : > { %v8931_v5 = vshrl.u32 %v14806_v23, 16  ;;  %v8933_v1 = vshll.u32 %v14806_v23, 16  ;;  %v8804_v38 = vld [vmem:[#allocation5 + $0x1c] sm:$0xf]  ;;  %v8943_v52 = vshrl.u32 %v14809_v22, 16  ;;  %v8945_v0 = vshll.u32 %v14809_v22, 16  ;;  %10771 = vmatprep.subr.bf16.mxu1 %v11191_v21 }
 0x561   : > { %v9068_v3 = vsel %vm5926_vm1, %v9066_v18, %v9067_v20  ;;  %v9069_v41 = vrot.slane %v10483_v35, 1  ;;  %v8940_v8 = vrot.slane %v8938_v13, 1  ;;  %v10491_v14 = vcombine.low %v8803_v63, %v8804_v38  ;;  %v11127_v10 = vld [vmem:[#allocation5 + $0x20] ss:$0 sps:$4 sm:$0x11]   ;;  %10772 = vmatpush3.bf16.msra.mxu1 %v11191_v21  ;;  %v11192_v13 = vld [vmem:[%s15189_s9 + $0x8] sm:$0xff]  }
 0x562   : > { %9090 = vrot.lane.b32.xlu1 %v9068_v3, %s11235_s12  ;;  %v8935_v43 = vrot.slane %v8933_v1, 1  ;;  %v8950_v26 = vshll.u32 %v11124_v40, 16  ;;  %v8947_v39 = vrot.slane %v8945_v0, 1  ;;  %v11128_v50 = vld [vmem:[#allocation5 + $0x14] ss:$0 sps:$4 sm:$0x11]   ;;  %10773 = vmatprep.subr.bf16.mxu1 %v11192_v13 }
 0x563   : > { %v9071_v44 = vsel %vm5926_vm1, %v9069_v41, %v9070_v31  ;;  %v9199_v33 = vshrl.u32 %v10491_v14, 16  ;;  %v9201_v51 = vshll.u32 %v10491_v14, 16  ;;  %v9206_v46 = vshll.u32 %v11127_v10, 16  ;;  %v8826_v57 = vld [vmem:[#allocation5 + $0x18] sm:$0xe] }
 0x564   : > { %v8936_v58 = vor.u32 %v8935_v43, %v8931_v5  ;;  %v8952_v29 = vrot.slane %v8950_v26, 1  ;;  %v9187_v36 = vshrl.u32 %v10490_v16, 16  ;;  %v9189_v55 = vshll.u32 %v10490_v16, 16  ;;  %v8825_v30 = vld [vmem:[#allocation5 + $0xc] sm:$0xe] }
 0x565   : > { %v8948_v34 = vor.u32 %v8947_v39, %v8943_v52  ;;  %v9203_v17 = vrot.slane %v9201_v51, 1  ;;  %v9194_v32 = vshll.u32 %v11128_v50, 16  ;;  %v8836_v15 = vld [vmem:[#allocation5 + $0x24] sm:$0xf]  ;;  %v9208_v7 = vrot.slane %v9206_v46, 1  ;;  %10774 = vmatpush3.bf16.msra.mxu1 %v11192_v13 }
 0x566   : > { %9092 = vrot.lane.b32.xlu1 %v9071_v44, %s11235_s12  ;;  %v8941_v42 = vsel %vm5755_vm3, %v8936_v58, %v8940_v8  ;;  %v9191_v19 = vrot.slane %v9189_v55, 1  ;;  %v10507_v62 = vcombine.low %v8826_v57, %v8804_v38  ;;  %v14821_v49 = vld [vmem:[#allocation5 + $0x28] sm:$0xf]  ;;  %v8834_v9 = vld [vmem:[#allocation5 + $0x18] sm:$0xf]  ;;  %v10506_v48 = vcombine.low %v8825_v30, %v14803_v45 }
 0x567   : > { %9026 = vrot.lane.b32.xlu0 %v8941_v42, %s11246_s28  ;;  %v8953_v54 = vsel %vm5755_vm3, %v8948_v34, %v8952_v29  ;;  %v9204_v27 = vor.u32 %v9203_v17, %v9199_v33  ;;  %v9196_v61 = vrot.slane %v9194_v32, 1  ;;  %v14825_v47 = vld [vmem:[#allocation5 + $0x1c] sm:$0xf]  ;;  %v10515_v37 = vcombine.low %v8836_v15, %v14821_v49  ;;  %v14828_v12 = vld [vmem:[#allocation5 + $0x2c] ss:$0 sps:$4 sm:$0x11]  }
 0x568   : > { %v9192_v24 = vor.u32 %v9191_v19, %v9187_v36  ;;  %v9326_v4 = vrot.slane %v11127_v10, 1  ;;  %v10514_v53 = vcombine.low %v8834_v9, %v14825_v47  ;;  %v14835_v6 = vld [vmem:[#allocation5 + $0x20] ss:$0 sps:$4 sm:$0x11]   ;;  %v9325_v16 = vrot.slane %v10507_v62, 1 }
 0x569   : > { %v9209_v45 = vsel %vm5755_vm3, %v9204_v27, %v9208_v7  ;;  %v9323_v2 = vrot.slane %v11128_v50, 1  ;;  %v8772_v28 = vld [vmem:[#allocation5 + $0x18] sm:$0xf]  ;;  %v14839_v60 = vld [vmem:[#allocation5 + $0x1c] sm:$0xf]  ;;  %v9322_v59 = vrot.slane %v10506_v48, 1 }
 0x56a   : > { %9148 = vrot.lane.b32.xlu1 %v10491_v14, %s11243_s29  ;;  %v9197_v11 = vsel %vm5755_vm3, %v9192_v24, %v9196_v61  ;;  %v9457_v56 = vshll.u32 %v10515_v37, 16  ;;  %v9445_v25 = vshll.u32 %v10514_v53, 16  ;;  %v14843_v18 = vcombine.low %v8772_v28, %v14839_v60  ;;  %v14845_v20 = vld [vmem:[#allocation5 + $0x20] ss:$0 sps:$4 sm:$0x11]  }
 0x56b   : > { %9028 = vrot.lane.b32.xlu0 %v8953_v54, %s11246_s28  ;;  %v9455_v40 = vshrl.u32 %v10515_v37, 16  ;;  %v9462_v5 = vshll.u32 %v14828_v12, 16  ;;  %v8774_v1 = vld [vmem:[#allocation5 + $0x24] sm:$0xf]  ;;  %v9327_v63 = vsel %vm5926_vm1, %v9325_v16, %v9326_v4  ;;  %v8775_v41 = vld [vmem:[#allocation5 + $0x28] sm:$0xf]  ;;  %v9324_v31 = vsel %vm5926_vm1, %v9322_v59, %v9323_v2 }
 0x56c   : > { %v9459_v35 = vrot.slane %v9457_v56, 1  ;;  %v8957_v3 = vshll.u32 %v14843_v18, 16  ;;  %v9443_v38 = vshrl.u32 %v10514_v53, 16  ;;  %v9447_v52 = vrot.slane %v9445_v25, 1  ;;  %v8858_v14 = vld [vmem:[#allocation5 + $0x18] sm:$0xe] }
 0x56d   : > { %v9450_v43 = vshll.u32 %v14835_v6, 16  ;;  %v8962_v8 = vshll.u32 %v14845_v20, 16  ;;  %v14858_v0 = vcombine.low %v8774_v1, %v8775_v41  ;;  %v9464_v26 = vrot.slane %v9462_v5, 1  ;;  %v11139_v39 = vld [vmem:[#allocation5 + $0x2c] ss:$0 sps:$4 sm:$0x11]  }
 0x56e   : > { %9284 = vrot.lane.b32.xlu1 %v9209_v45, %s11234_s18  ;;  %v9460_v44 = vor.u32 %v9459_v35, %v9455_v40  ;;  %v8955_v10 = vshrl.u32 %v14843_v18, 16  ;;  %v8959_v58 = vrot.slane %v8957_v3, 1  ;;  %v9448_v51 = vor.u32 %v9447_v52, %v9443_v38  ;;  %v8859_v36 = vld [vmem:[#allocation5 + $0x24] sm:$0xe]  ;;  %v8794_v30 = vld [vmem:[#allocation5 + $0x18] sm:$0xe] }
 0x56f   : > { %9282 = vrot.lane.b32.xlu0 %v9197_v11, %s11234_s18  ;;  %v8969_v33 = vshll.u32 %v14858_v0, 16  ;;  %v9452_v50 = vrot.slane %v9450_v43, 1  ;;  %v10530_v29 = vcombine.low %v8858_v14, %v14825_v47  ;;  %v8964_v46 = vrot.slane %v8962_v8, 1  ;;  %v8795_v57 = vld [vmem:[#allocation5 + $0x24] sm:$0xe] }
 0x570   : > { %v9465_v55 = vsel %vm5755_vm3, %v9460_v44, %v9464_v26  ;;  %v8960_v42 = vor.u32 %v8959_v58, %v8955_v10  ;;  %v8967_v34 = vshrl.u32 %v14858_v0, 16  ;;  %v8974_v32 = vshll.u32 %v11139_v39, 16  ;;  %v8807_v9 = vld [vmem:[#allocation5 + $0x30] sm:$0xf]  ;;  %v8808_v54 = vld [vmem:[#allocation5 + $0x34] sm:$0xf] }
 0x571   : > { %v8971_v17 = vrot.slane %v8969_v33, 1  ;;  %v9453_v15 = vsel %vm5755_vm3, %v9448_v51, %v9452_v50  ;;  %v9578_v7 = vrot.slane %v10530_v29, 1  ;;  %v9579_v19 = vrot.slane %v14835_v6, 1  ;;  %v8805_v27 = vld [vmem:[#allocation5 + $0x24] sm:$0xf] }
 0x572   : > { %9348 = vrot.lane.b32.xlu1 %v9327_v63, %s11244_s26  ;;  %v10531_v62 = vcombine.low %v8859_v36, %v14821_v49  ;;  %v14872_v61 = vld [vmem:[#allocation5 + $0x28] sm:$0xf]  ;;  %v10485_v48 = vcombine.low %v8795_v57, %v8775_v41  ;;  %v10484_v47 = vcombine.low %v8794_v30, %v14839_v60  ;;  %v8965_v24 = vsel %vm5755_vm3, %v8960_v42, %v8964_v46  ;;  %v11145_v59 = vld [vmem:[#allocation5 + $0x38] ss:$0 sps:$4 sm:$0x11]  }
 0x573   : > { %9346 = vrot.lane.b32.xlu0 %v9324_v31, %s11244_s26  ;;  %v8976_v21 = vrot.slane %v8974_v32, 1  ;;  %v10493_v4 = vcombine.low %v8807_v9, %v8808_v54  ;;  %v9582_v6 = vrot.slane %v14828_v12, 1  ;;  %v10492_v45 = vcombine.low %v8805_v27, %v14872_v61  ;;  %v11146_v40 = vld [vmem:[#allocation5 + $0x2c] ss:$0 sps:$4 sm:$0x11]  }
 0x574   : > { %v9581_v49 = vrot.slane %v10531_v62, 1  ;;  %v9076_v16 = vrot.slane %v11139_v39, 1  ;;  %v9073_v2 = vrot.slane %v14845_v20, 1  ;;  %v9075_v60 = vrot.slane %v10485_v48, 1  ;;  %v8828_v5 = vld [vmem:[#allocation5 + $0x30] sm:$0xe] }
 0x575   : > { %v9072_v11 = vrot.slane %v10484_v47, 1  ;;  %v9225_v56 = vshll.u32 %v10493_v4, 16  ;;  %v9213_v35 = vshll.u32 %v10492_v45, 16  ;;  %v9223_v12 = vshrl.u32 %v10493_v4, 16  ;;  %v8840_v63 = vld [vmem:[#allocation5 + $0x3c] sm:$0xf] }
 0x576   : > { %9404 = vrot.lane.b32.xlu1 %v10515_v37, %s11236_s15  ;;  %v8972_v37 = vor.u32 %v8971_v17, %v8967_v34  ;;  %v9583_v25 = vsel %vm5926_vm1, %v9581_v49, %v9582_v6  ;;  %v9077_v20 = vsel %vm5926_vm1, %v9075_v60, %v9076_v16  ;;  %v9230_v13 = vshll.u32 %v11145_v59, 16  ;;  %v14889_v3 = vld [vmem:[#allocation5 + $0x40] sm:$0xf]  ;;  %v8827_v43 = vld [vmem:[#allocation5 + $0x24] sm:$0xe] }
 0x577   : > { %9402 = vrot.lane.b32.xlu0 %v10514_v53, %s11236_s15  ;;  %v9580_v53 = vsel %vm5926_vm1, %v9578_v7, %v9579_v19  ;;  %v9227_v1 = vrot.slane %v9225_v56, 1  ;;  %v9074_v41 = vsel %vm5926_vm1, %v9072_v11, %v9073_v2  ;;  %v9211_v31 = vshrl.u32 %v10492_v45, 16  ;;  %v8838_v8 = vld [vmem:[#allocation5 + $0x30] sm:$0xf]  ;;  %v8839_v14 = vld [vmem:[#allocation5 + $0x34] sm:$0xf] }
 0x578   : > { %v8977_v28 = vsel %vm5755_vm3, %v8972_v37, %v8976_v21  ;;  %v9215_v38 = vrot.slane %v9213_v35, 1  ;;  %v9218_v52 = vshll.u32 %v11146_v40, 16  ;;  %v10517_v44 = vcombine.low %v8840_v63, %v14889_v3  ;;  %v8776_v29 = vld [vmem:[#allocation5 + $0x30] sm:$0xf]  ;;  %v14896_v46 = vld [vmem:[#allocation5 + $0x34] sm:$0xf] }
 0x579   : > { %v9228_v26 = vor.u32 %v9227_v1, %v9223_v12  ;;  %v9232_v10 = vrot.slane %v9230_v13, 1  ;;  %v10509_v58 = vcombine.low %v8828_v5, %v8808_v54  ;;  %v10508_v51 = vcombine.low %v8827_v43, %v14872_v61  ;;  %v11152_v32 = vld [vmem:[#allocation5 + $0x38] ss:$0 sps:$4 sm:$0x11]   ;;  %v8778_v62 = vld [vmem:[#allocation5 + $0x3c] sm:$0xf] }
 0x57a   : > { %9540 = vrot.lane.b32.xlu1 %v9465_v55, %s11247_s25  ;;  %v9216_v39 = vor.u32 %v9215_v38, %v9211_v31  ;;  %v9220_v33 = vrot.slane %v9218_v52, 1  ;;  %v10516_v50 = vcombine.low %v8838_v8, %v8839_v14  ;;  %v9332_v36 = vrot.slane %v11145_v59, 1  ;;  %v14899_v55 = vld [vmem:[#allocation5 + $0x44] ss:$0 sps:$4 sm:$0x11]  }
 0x57b   : > { %9538 = vrot.lane.b32.xlu0 %v9453_v15, %s11247_s25  ;;  %v9481_v57 = vshll.u32 %v10517_v44, 16  ;;  %v9233_v42 = vsel %vm5755_vm3, %v9228_v26, %v9232_v10  ;;  %v9331_v34 = vrot.slane %v10509_v58, 1  ;;  %v9329_v17 = vrot.slane %v11146_v40, 1  ;;  %v14907_v9 = vld [vmem:[#allocation5 + $0x40] sm:$0xf] }
 0x57c   : > { %v14904_v30 = vcombine.low %v8776_v29, %v14896_v46  ;;  %v9221_v15 = vsel %vm5755_vm3, %v9216_v39, %v9220_v33  ;;  %v9328_v7 = vrot.slane %v10508_v51, 1  ;;  %v9469_v19 = vshll.u32 %v10516_v50, 16  ;;  %v14911_v48 = vld [vmem:[#allocation5 + $0x38] ss:$0 sps:$4 sm:$0x11]  }
 0x57d   : > { %v9479_v54 = vshrl.u32 %v10517_v44, 16  ;;  %v9483_v27 = vrot.slane %v9481_v57, 1  ;;  %v9486_v61 = vshll.u32 %v14899_v55, 16  ;;  %v9333_v47 = vsel %vm5926_vm1, %v9331_v34, %v9332_v36  ;;  %v8860_v37 = vld [vmem:[#allocation5 + $0x30] sm:$0xe] }
 0x57e   : > { %9030 = vrot.lane.b32.xlu1 %v8965_v24, %s11246_s28  ;;  %v8981_v24 = vshll.u32 %v14904_v30, 16  ;;  %v14917_v21 = vcombine.low %v8778_v62, %v14907_v9  ;;  %v9471_v49 = vrot.slane %v9469_v19, 1  ;;  %v9474_v6 = vshll.u32 %v11152_v32, 16  ;;  %v11157_v59 = vld [vmem:[#allocation5 + $0x44] ss:$0 sps:$4 sm:$0x11]  }
 0x57f   : > { %9602 = vrot.lane.b32.xlu0 %v9580_v53, %s11245_s30  ;;  %v9467_v53 = vshrl.u32 %v10516_v50, 16  ;;  %v9488_v16 = vrot.slane %v9486_v61, 1  ;;  %v8986_v2 = vshll.u32 %v14911_v48, 16  ;;  %v8979_v60 = vshrl.u32 %v14904_v30, 16  ;;  %v8861_v35 = vld [vmem:[#allocation5 + $0x3c] sm:$0xe] }
 0x580   : > { %v8983_v11 = vrot.slane %v8981_v24, 1  ;;  %v8993_v56 = vshll.u32 %v14917_v21, 16  ;;  %v9476_v40 = vrot.slane %v9474_v6, 1  ;;  %v9585_v1 = vrot.slane %v11152_v32, 1  ;;  %v8797_v38 = vld [vmem:[#allocation5 + $0x3c] sm:$0xe] }
 0x581   : > { %v8988_v5 = vrot.slane %v8986_v2, 1  ;;  %v8991_v63 = vshrl.u32 %v14917_v21, 16  ;;  %v8998_v31 = vshll.u32 %v11157_v59, 16  ;;  %v10533_v43 = vcombine.low %v8861_v35, %v14889_v3  ;;  %v8811_v8 = vld [vmem:[#allocation5 + $0x48] sm:$0xf] }
 0x582   : > { %9032 = vrot.lane.b32.xlu1 %v8977_v28, %s11246_s28  ;;  %v10532_v28 = vcombine.low %v8860_v37, %v8839_v14  ;;  %v8984_v13 = vor.u32 %v8983_v11, %v8979_v60  ;;  %v14931_v14 = vld [vmem:[#allocation5 + $0x4c] sm:$0xf]  ;;  %v8809_v26 = vld [vmem:[#allocation5 + $0x3c] sm:$0xf]  ;;  %v14933_v10 = vld [vmem:[#allocation5 + $0x40] sm:$0xf]  ;;  %v10487_v39 = vcombine.low %v8797_v38, %v14907_v9 }
 0x583   : > { %9604 = vrot.lane.b32.xlu0 %v9583_v25, %s11245_s30  ;;  %v9472_v25 = vor.u32 %v9471_v49, %v9467_v53  ;;  %v9588_v58 = vrot.slane %v14899_v55, 1  ;;  %v10495_v3 = vcombine.low %v8811_v8, %v14931_v14  ;;  %v9587_v36 = vrot.slane %v10533_v43, 1  ;;  %v14945_v55 = vld [vmem:[#allocation5 + $0x50] ss:$0 sps:$4 sm:$0x11]  }
 0x584   : > { %v8989_v33 = vsel %vm5755_vm3, %v8984_v13, %v8988_v5  ;;  %v9082_v32 = vrot.slane %v11157_v59, 1  ;;  %v8830_v61 = vld [vmem:[#allocation5 + $0x48] sm:$0xe]  ;;  %v14958_v53 = vld [vmem:[#allocation5 + $0x58] sm:$0xf]  ;;  %vm15261_vm15 = vcmask 261120  }
 0x585   : > { %v9477_v52 = vsel %vm5755_vm3, %v9472_v25, %v9476_v40  ;;  %v9589_v19 = vsel %vm5926_vm1, %v9587_v36, %v9588_v58  ;;  %v14961_v2 = vld [vmem:[#allocation5 + $0x4c] sm:$0xf]  ;;  %v11193_v43 = vld [vmem:[%s15189_s9 + $0x10] ss:$0 sps:$4 sm:$0x33]  }
 0x586   : > { %9096 = vrot.lane.b32.xlu1 %v9077_v20, %s11235_s12  ;;  %v9584_v20 = vrot.slane %v10532_v28, 1  ;;  %v14969_v5 = vld [vmem:[#allocation5 + $0x4c] sm:$0xf]  ;;  %10815 = vmatprep.subr.msk.bf16.mxu1 %vm8048_vm13, %v11193_v43  ;;  %v9790_v58 = vsel %vm8048_vm13, %v11193_v43, 0  ;;  %vm15264_vm13 = vmmov %vm15261_vm15 }
 0x587   : > { %9094 = vrot.lane.b32.xlu0 %v9074_v41, %s11235_s12  ;;  %v8995_v41 = vrot.slane %v8993_v56, 1  ;;  %v10511_v56 = vcombine.low %v8830_v61, %v14931_v14  ;;  %10776 = vmatpush3.bf16.msra.mxu1 %v9790_v58  ;;  %vm15267_vm12 = vmmov %vm15264_vm13 }
 0x588   : > { %v9586_v29 = vsel %vm5926_vm1, %v9584_v20, %v9585_v1  ;;  %v9338_v20 = vrot.slane %v14945_v55, 1  ;;  %v14972_v1 = vld [vmem:[#allocation5 + $0x5c] ss:$0 sps:$4 sm:$0x11]  }
 0x589   : > { %v8996_v51 = vor.u32 %v8995_v41, %v8991_v63  ;;  %v14976_v41 = vld [vmem:[#allocation5 + $0x50] ss:$0 sps:$4 sm:$0x11]   ;;  %v9337_v38 = vrot.slane %v10511_v56, 1  ;;  %v8798_v56 = vld [vmem:[#allocation5 + $0x48] sm:$0xe] }
 0x58a   : > { %9152 = vrot.lane.b32.xlu1 %v10493_v4, %s11243_s29  ;;  %v9330_v4 = vsel %vm5926_vm1, %v9328_v7, %v9329_v17  ;;  %v9081_v17 = vrot.slane %v10487_v39, 1  ;;  %v14949_v7 = vld [vmem:[#allocation5 + $0x44] ss:$0 sps:$4 sm:$0x11]  }
 0x58b   : > { %9150 = vrot.lane.b32.xlu0 %v10492_v45, %s11243_s29  ;;  %v9484_v45 = vor.u32 %v9483_v27, %v9479_v54  ;;  %v9247_v54 = vshrl.u32 %v10495_v3, 16  ;;  %v9254_v27 = vshll.u32 %v14945_v55, 16  ;;  %v9242_v37 = vshll.u32 %v14949_v7, 16 }
 0x58c   : > { %v9335_v13 = vrot.slane %v14949_v7, 1 }
 0x58d   : > { %v9489_v12 = vsel %vm5755_vm3, %v9484_v45, %v9488_v16  ;;  %v8829_v45 = vld [vmem:[#allocation5 + $0x3c] sm:$0xe]  ;;  %v8842_v16 = vld [vmem:[#allocation5 + $0x48] sm:$0xf]  ;;  %v9256_v11 = vrot.slane %v9254_v27, 1  ;;  %v9244_v59 = vrot.slane %v9242_v37, 1 }
 0x58e   : > { %9288 = vrot.lane.b32.xlu1 %v9233_v42, %s11234_s18  ;;  %v10494_v42 = vcombine.low %v8809_v26, %v14933_v10  ;;  %v10510_v40 = vcombine.low %v8829_v45, %v14933_v10  ;;  %v10518_v35 = vcombine.low %v8842_v16, %v14961_v2  ;;  %v8782_v26 = vld [vmem:[#allocation5 + $0x54] sm:$0xf]  ;;  %v8783_v10 = vld [vmem:[#allocation5 + $0x58] sm:$0xf] }
 0x58f   : > { %9286 = vrot.lane.b32.xlu0 %v9221_v15, %s11234_s18  ;;  %v9249_v15 = vshll.u32 %v10495_v3, 16  ;;  %v14996_v36 = vcombine.low %v8782_v26, %v8783_v10  ;;  %v8799_v45 = vld [vmem:[#allocation5 + $0x54] sm:$0xe] }
 0x590   : > { %v9237_v9 = vshll.u32 %v10494_v42, 16  ;;  %v9334_v14 = vrot.slane %v10510_v40, 1  ;;  %v8814_v40 = vld [vmem:[#allocation5 + $0x58] sm:$0xf] }
 0x591   : > { %v9251_v24 = vrot.slane %v9249_v15, 1 }
 0x592   : > { %9352 = vrot.lane.b32.xlu1 %v9333_v47, %s11244_s26  ;;  %v9083_v47 = vsel %vm5926_vm1, %v9081_v17, %v9082_v32  ;;  %v9239_v6 = vrot.slane %v9237_v9, 1  ;;  %v8862_v17 = vld [vmem:[#allocation5 + $0x48] sm:$0xe]  ;;  %v9017_v9 = vshll.u32 %v14996_v36, 16 }
 0x593   : > { %9350 = vrot.lane.b32.xlu0 %v9330_v4, %s11244_s26  ;;  %v8844_v4 = vld [vmem:[#allocation5 + $0x54] sm:$0xf]  ;;  %v9252_v60 = vor.u32 %v9251_v24, %v9247_v54  ;;  %v10534_v61 = vcombine.low %v8862_v17, %v14961_v2 }
 0x594   : > { %v10519_v28 = vcombine.low %v8844_v4, %v14958_v53 }
 0x596   : > { %9408 = vrot.lane.b32.xlu1 %v10517_v44, %s11236_s15  ;;  %v8796_v44 = vld [vmem:[#allocation5 + $0x30] sm:$0xe]  ;;  %v9505_v63 = vshll.u32 %v10519_v28, 16  ;;  %v9503_v39 = vshrl.u32 %v10519_v28, 16 }
 0x597   : > { %9406 = vrot.lane.b32.xlu0 %v10516_v50, %s11236_s15  ;;  %v9000_v50 = vrot.slane %v8998_v31, 1  ;;  %v10486_v57 = vcombine.low %v8796_v44, %v14896_v46  ;;  %v9079_v46 = vrot.slane %v14911_v48, 1  ;;  %v9235_v48 = vshrl.u32 %v10494_v42, 16 }
 0x598   : > { %v9257_v31 = vsel %vm5755_vm3, %v9252_v60, %v9256_v11  ;;  %v9493_v44 = vshll.u32 %v10518_v35, 16  ;;  %v9590_v60 = vrot.slane %v10534_v61, 1  ;;  %v9591_v11 = vrot.slane %v14976_v41, 1 }
 0x599   : > { %v9001_v34 = vsel %vm5755_vm3, %v8996_v51, %v9000_v50  ;;  %v9078_v62 = vrot.slane %v10486_v57, 1  ;;  %v9240_v25 = vor.u32 %v9239_v6, %v9235_v48  ;;  %v9510_v51 = vshll.u32 %v14972_v1, 16  ;;  %v14991_v50 = vld [vmem:[#allocation5 + $0x50] ss:$0 sps:$4 sm:$0x11]  }
 0x59a   : > { %9544 = vrot.lane.b32.xlu1 %v9489_v12, %s11247_s25  ;;  %v8780_v12 = vld [vmem:[#allocation5 + $0x48] sm:$0xf]  ;;  %v9336_v57 = vsel %vm5926_vm1, %v9334_v14, %v9335_v13  ;;  %v9495_v55 = vrot.slane %v9493_v44, 1  ;;  %v9010_v7 = vshll.u32 %v14991_v50, 16  ;;  %v9019_v48 = vrot.slane %v9017_v9, 1 }
 0x59b   : > { %9542 = vrot.lane.b32.xlu0 %v9477_v52, %s11247_s25  ;;  %v9080_v49 = vsel %vm5926_vm1, %v9078_v62, %v9079_v46  ;;  %v14981_v52 = vcombine.low %v8780_v12, %v14969_v5  ;;  %v9245_v8 = vsel %vm5755_vm3, %v9240_v25, %v9244_v59  ;;  %v9512_v15 = vrot.slane %v9510_v51, 1  ;;  %v11175_v46 = vld [vmem:[#allocation5 + $0x5c] ss:$0 sps:$4 sm:$0x11]   ;;  %v8815_v59 = vld [vmem:[#allocation5 + $0x60] sm:$0xf] }
 0x59c   : > { %v9012_v37 = vrot.slane %v9010_v7, 1  ;;  %v9022_v6 = vshll.u32 %v11175_v46, 16  ;;  %v8813_v25 = vld [vmem:[#allocation5 + $0x54] sm:$0xf]  ;;  %v10489_v12 = vcombine.low %v8799_v45, %v8783_v10  ;;  %v9088_v14 = vrot.slane %v11175_v46, 1 }
 0x59d   : > { %v10496_v43 = vcombine.low %v8813_v25, %v8814_v40  ;;  %v11181_v44 = vld [vmem:[#allocation5 + $0x68] ss:$0 sps:$4 sm:$0x11]   ;;  %v8849_v7 = vld [vmem:[#allocation5 + $0x70] sm:$0xf] }
 0x59e   : > { %9034 = vrot.lane.b32.xlu1 %v8989_v33, %s11246_s28  ;;  %v9507_v33 = vrot.slane %v9505_v63, 1  ;;  %v9024_v63 = vrot.slane %v9022_v6, 1  ;;  %v11187_v6 = vld [vmem:[#allocation5 + $0x74] ss:$0 sps:$4 sm:$0x11]  }
 0x59f   : > { %9606 = vrot.lane.b32.xlu0 %v9586_v29, %s11245_s30  ;;  %v9005_v29 = vshll.u32 %v14981_v52, 16  ;;  %v9261_v51 = vshll.u32 %v10496_v43, 16 }
 0x5a0   : > { %v9508_v32 = vor.u32 %v9507_v33, %v9503_v39  ;;  %v9085_v39 = vrot.slane %v14991_v50, 1  ;;  %v11182_v33 = vld [vmem:[#allocation5 + $0x5c] ss:$0 sps:$4 sm:$0x11]   ;;  %v8831_v50 = vld [vmem:[#allocation5 + $0x54] sm:$0xe] }
 0x5a1   : > { %v9007_v62 = vrot.slane %v9005_v29, 1  ;;  %v9263_v17 = vrot.slane %v9261_v51, 1 }
 0x5a2   : > { %9036 = vrot.lane.b32.xlu1 %v9001_v34, %s11246_s28  ;;  %v9498_v34 = vshll.u32 %v14976_v41, 16  ;;  %v9513_v24 = vsel %vm5755_vm3, %v9508_v32, %v9512_v15  ;;  %v9592_v41 = vsel %vm5926_vm1, %v9590_v60, %v9591_v11  ;;  %v9266_v32 = vshll.u32 %v11182_v33, 16  ;;  %v8848_v15 = vld [vmem:[#allocation5 + $0x6c] sm:$0xf] }
 0x5a3   : > { %9608 = vrot.lane.b32.xlu0 %v9589_v19, %s11245_s30  ;;  %v9003_v19 = vshrl.u32 %v14981_v52, 16  ;;  %v9341_v11 = vrot.slane %v11182_v33, 1 }
 0x5a4   : > { %v9500_v27 = vrot.slane %v9498_v34, 1 }
 0x5a5   : > { %v9008_v4 = vor.u32 %v9007_v62, %v9003_v19  ;;  %v8846_v19 = vld [vmem:[#allocation5 + $0x60] sm:$0xf]  ;;  %v8847_v62 = vld [vmem:[#allocation5 + $0x64] sm:$0xf] }
 0x5a6   : > { %9100 = vrot.lane.b32.xlu1 %v9083_v47, %s11235_s12  ;;  %v8863_v47 = vld [vmem:[#allocation5 + $0x54] sm:$0xe] }
 0x5a7   : > { %9098 = vrot.lane.b32.xlu0 %v9080_v49, %s11235_s12  ;;  %v9015_v49 = vshrl.u32 %v14996_v36, 16  ;;  %v10535_v2 = vcombine.low %v8863_v47, %v14958_v53  ;;  %v9268_v47 = vrot.slane %v9266_v32, 1 }
 0x5a9   : > { %v9020_v13 = vor.u32 %v9019_v48, %v9015_v49  ;;  %v9593_v53 = vrot.slane %v10535_v2, 1  ;;  %v9344_v48 = vrot.slane %v11181_v44, 1  ;;  %v11188_v2 = vld [vmem:[#allocation5 + $0x68] ss:$0 sps:$4 sm:$0x11]  }
 0x5aa   : > { %9156 = vrot.lane.b32.xlu1 %v10495_v3, %s11243_s29  ;;  %v9339_v3 = vsel %vm5926_vm1, %v9337_v38, %v9338_v20  ;;  %v9013_v20 = vsel %vm5755_vm3, %v9008_v4, %v9012_v37  ;;  %v10488_v38 = vcombine.low %v8798_v56, %v14969_v5  ;;  %v10520_v37 = vcombine.low %v8846_v19, %v8847_v62 }
 0x5ab   : > { %9154 = vrot.lane.b32.xlu0 %v10494_v42, %s11243_s29  ;;  %v9491_v42 = vshrl.u32 %v10518_v35, 16 }
 0x5ac   : > { %v9084_v58 = vrot.slane %v10488_v38, 1 }
 0x5ad   : > { %v9496_v54 = vor.u32 %v9495_v55, %v9491_v42  ;;  %v9259_v42 = vshrl.u32 %v10496_v43, 16  ;;  %v8832_v55 = vld [vmem:[#allocation5 + $0x60] sm:$0xe] }
 0x5ae   : > { %9292 = vrot.lane.b32.xlu1 %v9257_v31, %s11234_s18  ;;  %v9086_v34 = vsel %vm5926_vm1, %v9084_v58, %v9085_v39  ;;  %v9600_v58 = vrot.slane %v11187_v6, 1 }
 0x5af   : > { %9290 = vrot.lane.b32.xlu0 %v9245_v8, %s11234_s18  ;;  %v9501_v16 = vsel %vm5755_vm3, %v9496_v54, %v9500_v27  ;;  %v9087_v8 = vrot.slane %v10489_v12, 1  ;;  %v10521_v27 = vcombine.low %v8848_v15, %v8849_v7  ;;  %v9264_v61 = vor.u32 %v9263_v17, %v9259_v42 }
 0x5b0   : > { %v9515_v12 = vshrl.u32 %v10520_v37, 16 }
 0x5b1   : > { %v9089_v5 = vsel %vm5926_vm1, %v9087_v8, %v9088_v14  ;;  %v9529_v45 = vshll.u32 %v10521_v27, 16  ;;  %v9527_v56 = vshrl.u32 %v10521_v27, 16 }
 0x5b2   : > { %9356 = vrot.lane.b32.xlu1 %v9339_v3, %s11244_s26 }
 0x5b3   : > { %9354 = vrot.lane.b32.xlu0 %v9336_v57, %s11244_s26  ;;  %v9278_v57 = vshll.u32 %v11181_v44, 16  ;;  %v9531_v25 = vrot.slane %v9529_v45, 1 }
 0x5b5   : > { %v9280_v9 = vrot.slane %v9278_v57, 1 }
 0x5b6   : > { %9412 = vrot.lane.b32.xlu1 %v10519_v28, %s11236_s15  ;;  %v8816_v28 = vld [vmem:[#allocation5 + $0x64] sm:$0xf] }
 0x5b7   : > { %9410 = vrot.lane.b32.xlu0 %v10518_v35, %s11236_s15  ;;  %v9594_v35 = vrot.slane %v14972_v1, 1  ;;  %v10497_v31 = vcombine.low %v8815_v59, %v8816_v28  ;;  %v9025_v1 = vsel %vm5755_vm3, %v9020_v13, %v9024_v63  ;;  %v10513_v54 = vcombine.low %v8832_v55, %v8816_v28  ;;  %v8865_v63 = vld [vmem:[#allocation5 + $0x6c] sm:$0xe] }
 0x5b8   : > { %v9517_v59 = vshll.u32 %v10520_v37, 16  ;;  %v9522_v13 = vshll.u32 %v11188_v2, 16 }
 0x5b9   : > { %v9273_v26 = vshll.u32 %v10497_v31, 16  ;;  %v9595_v10 = vsel %vm5926_vm1, %v9593_v53, %v9594_v35  ;;  %v9271_v3 = vshrl.u32 %v10497_v31, 16  ;;  %v9343_v49 = vrot.slane %v10513_v54, 1 }
 0x5ba   : > { %9548 = vrot.lane.b32.xlu1 %v9513_v24, %s11247_s25  ;;  %v10512_v24 = vcombine.low %v8831_v50, %v8814_v40  ;;  %v9534_v40 = vshll.u32 %v11187_v6, 16  ;;  %v9532_v53 = vor.u32 %v9531_v25, %v9527_v56 }
 0x5bb   : > { %9546 = vrot.lane.b32.xlu0 %v9501_v16, %s11247_s25  ;;  %v9275_v29 = vrot.slane %v9273_v26, 1  ;;  %v9269_v16 = vsel %vm5755_vm3, %v9264_v61, %v9268_v47  ;;  %v9345_v28 = vsel %vm5926_vm1, %v9343_v49, %v9344_v48 }
 0x5bc   : > { %v9340_v60 = vrot.slane %v10512_v24, 1  ;;  %v9536_v38 = vrot.slane %v9534_v40, 1 }
 0x5bd   : > { %v9276_v46 = vor.u32 %v9275_v29, %v9271_v3 }
 0x5be   : > { %9038 = vrot.lane.b32.xlu1 %v9013_v20, %s11246_s28  ;;  %v9342_v35 = vsel %vm5926_vm1, %v9340_v60, %v9341_v11  ;;  %v9519_v20 = vrot.slane %v9517_v59, 1  ;;  %v9537_v26 = vsel %vm5755_vm3, %v9532_v53, %v9536_v38 }
 0x5bf   : > { %9610 = vrot.lane.b32.xlu0 %v9592_v41, %s11245_s30  ;;  %v9281_v4 = vsel %vm5755_vm3, %v9276_v46, %v9280_v9 }
 0x5c0   : > { %v9520_v14 = vor.u32 %v9519_v20, %v9515_v12 }
 0x5c2   : > { %9040 = vrot.lane.b32.xlu1 %v9025_v1, %s11246_s28  ;;  %v9524_v1 = vrot.slane %v9522_v13, 1 }
 0x5c3   : > { %9612 = vrot.lane.b32.xlu0 %v9595_v10, %s11245_s30 }
 0x5c4   : > { %v9525_v33 = vsel %vm5755_vm3, %v9520_v14, %v9524_v1  ;;  %vm15263_vm3 = vmmov %vm15260_vm11 }
 0x5c5   : > { %vm15266_vm7 = vmmov %vm15263_vm3 }
 0x5c6   : > { %9104 = vrot.lane.b32.xlu1 %v9089_v5, %s11235_s12  ;;  %v9597_v5 = vrot.slane %v11188_v2, 1  ;;  %vm15269_vm5 = vmmov %vm15263_vm3 }
 0x5c7   : > { %9102 = vrot.lane.b32.xlu0 %v9086_v34, %s11235_s12 }
 0x5ca   : > { %9160 = vrot.lane.b32.xlu1 %v10497_v31, %s11243_s29  ;;  %v8864_v31 = vld [vmem:[#allocation5 + $0x60] sm:$0xe] }
 0x5cb   : > { %9158 = vrot.lane.b32.xlu0 %v10496_v43, %s11243_s29  ;;  %v10537_v43 = vcombine.low %v8865_v63, %v8849_v7  ;;  %v10536_v44 = vcombine.low %v8864_v31, %v8847_v62 }
 0x5cd   : > { %v9599_v10 = vrot.slane %v10537_v43, 1  ;;  %v9596_v51 = vrot.slane %v10536_v44, 1 }
 0x5ce   : > { %9296 = vrot.lane.b32.xlu1 %v9281_v4, %s11234_s18 }
 0x5cf   : > { %9294 = vrot.lane.b32.xlu0 %v9269_v16, %s11234_s18  ;;  %v9601_v29 = vsel %vm5926_vm1, %v9599_v10, %v9600_v58  ;;  %v9598_v42 = vsel %vm5926_vm1, %v9596_v51, %v9597_v5  ;;  %vm15262_vm1 = vcmask 293888  }
 0x5d0   : > { %v9147_v41 = vpop.permute.xlu0 %9146  ;;  %vm15265_vm2 = vmmov %vm15262_vm1 }
 0x5d1   : > { %vm15268_vm0 = vmmov %vm15262_vm1 }
 0x5d2   : > { %9360 = vrot.lane.b32.xlu1 %v9345_v28, %s11244_s26 }
 0x5d3   : > { %9358 = vrot.lane.b32.xlu0 %v9342_v35, %s11244_s26 }
 0x5d4   : > { %v9091_v8 = vpop.permute.xlu1 %9090 }
 0x5d6   : > { %9416 = vrot.lane.b32.xlu1 %v10521_v27, %s11236_s15 }
 0x5d7   : > { %9414 = vrot.lane.b32.xlu0 %v10520_v37, %s11236_s15 }
 0x5d8   : > { %v9093_v39 = vpop.permute.xlu1 %9092 }
 0x5d9   : > { %v9027_v3 = vpop.permute.xlu0 %9026 }
 0x5da   : > { %9552 = vrot.lane.b32.xlu1 %v9537_v26, %s11247_s25  ;;  %v9619_v7 = vsel %vm6617_vm14, %v14806_v23, %v9027_v3 }
 0x5db   : > { %9550 = vrot.lane.b32.xlu0 %v9525_v33, %s11247_s25  ;;  %v9635_v46 = vsel %vm941_vm8, %v9619_v7, %v9091_v8 }
 0x5dc   : > { %v9149_v57 = vpop.permute.xlu1 %9148  ;;  %v9651_v27 = vsel %vm6658_vm4, %v9635_v46, %v9147_v41 }
 0x5dd   : > { %v9029_v55 = vpop.permute.xlu0 %9028 }
 0x5de   : > { %9616 = vrot.lane.b32.xlu1 %v9601_v29, %s11245_s30  ;;  %v9621_v19 = vsel %vm6617_vm14, %v14809_v22, %v9029_v55 }
 0x5df   : > { %9614 = vrot.lane.b32.xlu0 %v9598_v42, %s11245_s30  ;;  %v9637_v9 = vsel %vm941_vm8, %v9621_v19, %v9093_v39 }
 0x5e0   : > { %v9285_v34 = vpop.permute.xlu1 %9284  ;;  %v9653_v24 = vsel %vm6658_vm4, %v9637_v9, %v9149_v57 }
 0x5e1   : > { %v9283_v17 = vpop.permute.xlu0 %9282  ;;  %v9669_v48 = vsel %vm960_vm10, %v9653_v24, %v9285_v34 }
 0x5e2   : > { %v9667_v47 = vsel %vm960_vm10, %v9651_v27, %v9283_v17 }
 0x5e4   : > { %v9349_v32 = vpop.permute.xlu1 %9348 }
 0x5e5   : > { %v9347_v15 = vpop.permute.xlu0 %9346  ;;  %v9685_v45 = vsel %vm6699_vm6, %v9669_v48, %v9349_v32 }
 0x5e6   : > { %v9683_v37 = vsel %vm6699_vm6, %v9667_v47, %v9347_v15 }
 0x5e8   : > { %v9405_v50 = vpop.permute.xlu1 %9404 }
 0x5e9   : > { %v9403_v62 = vpop.permute.xlu0 %9402  ;;  %v9701_v16 = vsel %vm973_vm9, %v9685_v45, %v9405_v50 }
 0x5ea   : > { %v9699_v23 = vsel %vm973_vm9, %v9683_v37, %v9403_v62 }
 0x5ec   : > { %v9541_v54 = vpop.permute.xlu1 %9540 }
 0x5ed   : > { %v9539_v61 = vpop.permute.xlu0 %9538  ;;  %v9717_v11 = vsel %vm15263_vm3, %v9701_v16, %v9541_v54 }
 0x5ee   : > { %v9715_v22 = vsel %vm15260_vm11, %v9699_v23, %v9539_v61  ;;  %vm15270_vm11 = vmmov %vm15267_vm12 }
 0x5f0   : > { %v9031_v4 = vpop.permute.xlu1 %9030 }
 0x5f1   : > { %v9603_v49 = vpop.permute.xlu0 %9602  ;;  %v9623_v41 = vsel %vm6617_vm14, %v14843_v18, %v9031_v4 }
 0x5f2   : > { %v9731_v6 = vsel %vm15261_vm15, %v9715_v22, %v9603_v49  ;;  %vm15271_vm15 = vmmov %vm15268_vm0 }
 0x5f3   : > { %10777 = vmatprep.mubr.msk.bf16.mxu1 %vm15262_vm1, %v9731_v6  ;;  %vm15272_vm1 = vmmov %vm15263_vm3 }
 0x5f4   : > { %v9033_v60 = vpop.permute.xlu1 %9032  ;;  %vm15273_vm3 = vmmov %vm15270_vm11 }
 0x5f5   : > { %v9605_v2 = vpop.permute.xlu0 %9604  ;;  %v9625_v1 = vsel %vm6617_vm14, %v14858_v0, %v9033_v60 }
 0x5f6   : > { %v9733_v59 = vsel %vm15264_vm13, %v9717_v11, %v9605_v2  ;;  %vm15274_vm13 = vmmov %vm15268_vm0 }
 0x5f7   : > { %10778 = vmatmul.mubr.msk.bf16.vlgmr.msra.gmra.mrb[36].mxu1 %vm15265_vm2, %v9733_v59  ;;  %vm15275_vm2 = vmmov %vm15272_vm1 }
 0x5f8   : > { %v9097_v28 = vpop.permute.xlu1 %9096 }
 0x5f9   : > { %v9095_v56 = vpop.permute.xlu0 %9094  ;;  %v9641_v26 = vsel %vm941_vm8, %v9625_v1, %v9097_v28 }
 0x5fa   : > { %v9639_v53 = vsel %vm941_vm8, %v9623_v41, %v9095_v56 }
 0x5fc   : > { %v9153_v25 = vpop.permute.xlu1 %9152 }
 0x5fd   : > { %v9151_v40 = vpop.permute.xlu0 %9150  ;;  %v9657_v18 = vsel %vm6658_vm4, %v9641_v26, %v9153_v25 }
 0x5fe   : > { %v9655_v43 = vsel %vm6658_vm4, %v9639_v53, %v9151_v40 }
 0x600   : > { %v9289_v35 = vpop.permute.xlu1 %9288 }
 0x601   : > { %v9287_v12 = vpop.permute.xlu0 %9286  ;;  %v9673_v51 = vsel %vm960_vm10, %v9657_v18, %v9289_v35 }
 0x602   : > { %v9671_v14 = vsel %vm960_vm10, %v9655_v43, %v9287_v12 }
 0x604   : > { %v9353_v20 = vpop.permute.xlu1 %9352 }
 0x605   : > { %v9351_v13 = vpop.permute.xlu0 %9350  ;;  %v9689_v3 = vsel %vm6699_vm6, %v9673_v51, %v9353_v20 }
 0x606   : > { %v9687_v44 = vsel %vm6699_vm6, %v9671_v14, %v9351_v13 }
 0x608   : > { %v9409_v63 = vpop.permute.xlu1 %9408 }
 0x609   : > { %v9407_v31 = vpop.permute.xlu0 %9406  ;;  %v9705_v0 = vsel %vm973_vm9, %v9689_v3, %v9409_v63 }
 0x60a   : > { %v9703_v10 = vsel %vm973_vm9, %v9687_v44, %v9407_v31 }
 0x60c   : > { %v9545_v38 = vpop.permute.xlu1 %9544 }
 0x60d   : > { %v9543_v8 = vpop.permute.xlu0 %9542  ;;  %v9721_v57 = vsel %vm15269_vm5, %v9705_v0, %v9545_v38  ;;  %vm15280_vm5 = vmmov %vm15273_vm3 }
 0x60e   : > { %v9719_v39 = vsel %vm15266_vm7, %v9703_v10, %v9543_v8  ;;  %vm15276_vm7 = vmmov %vm15273_vm3 }
 0x610   : > { %v9035_v58 = vpop.permute.xlu1 %9034 }
 0x611   : > { %v9607_v33 = vpop.permute.xlu0 %9606  ;;  %v9627_v54 = vsel %vm6617_vm14, %v14904_v30, %v9035_v58 }
 0x612   : > { %v9735_v5 = vsel %vm15267_vm12, %v9719_v39, %v9607_v33  ;;  %vm15277_vm12 = vmmov %vm15268_vm0 }
 0x613   : > { %10781 = vmatprep.mubr.msk.bf16.mxu1 %vm15268_vm0, %v9735_v5  ;;  %vm15278_vm0 = vmmov %vm15272_vm1 }
 0x614   : > { %v9037_v29 = vpop.permute.xlu1 %9036 }
 0x615   : > { %v9609_v42 = vpop.permute.xlu0 %9608  ;;  %v9629_v23 = vsel %vm6617_vm14, %v14917_v21, %v9037_v29 }
 0x616   : > { %v9737_v55 = vsel %vm15270_vm11, %v9721_v57, %v9609_v42  ;;  %v10538_v42 = vld [vmem:[%s15190_s10] ss:$0 sm:$0xff] }
 0x617   : > { %10782 = vmatmul.mubr.msk.bf16.gmra.mrb[40].mxu1 %vm15271_vm15, %v9737_v55 }
 0x618   : > { %v9101_v34 = vpop.permute.xlu1 %9100 }
 0x619   : > { %v9099_v17 = vpop.permute.xlu0 %9098  ;;  %v9645_v22 = vsel %vm941_vm8, %v9629_v23, %v9101_v34 }
 0x61a   : > { %v9643_v27 = vsel %vm941_vm8, %v9627_v54, %v9099_v17 }
 0x61c   : > { %v9157_v32 = vpop.permute.xlu1 %9156 }
 0x61d   : > { %v9155_v15 = vpop.permute.xlu0 %9154  ;;  %v9661_v30 = vsel %vm6658_vm4, %v9645_v22, %v9157_v32 }
 0x61e   : > { %v9659_v47 = vsel %vm6658_vm4, %v9643_v27, %v9155_v15 }
 0x620   : > { %v9293_v7 = vpop.permute.xlu1 %9292 }
 0x621   : > { %v9291_v50 = vpop.permute.xlu0 %9290  ;;  %v9677_v16 = vsel %vm960_vm10, %v9661_v30, %v9293_v7 }
 0x622   : > { %v9675_v37 = vsel %vm960_vm10, %v9659_v47, %v9291_v50 }
 0x624   : > { %v9357_v19 = vpop.permute.xlu1 %9356 }
 0x625   : > { %v9355_v62 = vpop.permute.xlu0 %9354  ;;  %v9693_v11 = vsel %vm6699_vm6, %v9677_v16, %v9357_v19 }
 0x626   : > { %v9691_v4 = vsel %vm6699_vm6, %v9675_v37, %v9355_v62 }
 0x628   : > { %v9413_v46 = vpop.permute.xlu1 %9412 }
 0x629   : > { %v9411_v9 = vpop.permute.xlu0 %9410  ;;  %v9709_v21 = vsel %vm973_vm9, %v9693_v11, %v9413_v46 }
 0x62a   : > { %v9707_v49 = vsel %vm973_vm9, %v9691_v4, %v9411_v9 }
 0x62c   : > { %v9549_v61 = vpop.permute.xlu1 %9548 }
 0x62d   : > { %v9547_v24 = vpop.permute.xlu0 %9546  ;;  %v9725_v59 = vsel %vm15275_vm2, %v9709_v21, %v9549_v61 }
 0x62e   : > { %v9723_v6 = vsel %vm15272_vm1, %v9707_v49, %v9547_v24 }
 0x630   : > { %v9039_v48 = vpop.permute.xlu1 %9038 }
 0x631   : > { %v9611_v45 = vpop.permute.xlu0 %9610  ;;  %v9631_v43 = vsel %vm6617_vm14, %v14981_v52, %v9039_v48 }
 0x632   : > { %v9739_v60 = vsel %vm15273_vm3, %v9723_v6, %v9611_v45 }
 0x633   : > { %10785 = vmatprep.mubr.msk.bf16.mxu1 %vm15274_vm13, %v9739_v60 }
 0x634   : > { %v9041_v2 = vpop.permute.xlu1 %9040 }
 0x635   : > { %v9613_v28 = vpop.permute.xlu0 %9612  ;;  %v9633_v38 = vsel %vm6617_vm14, %v14996_v36, %v9041_v2 }
 0x636   : > { %v9741_v56 = vsel %vm15276_vm7, %v9725_v59, %v9613_v28 }
 0x637   : > { %10786 = vmatmul.mubr.msk.bf16.gmra.mrb[44].mxu1 %vm15277_vm12, %v9741_v56 }
 0x638   : > { %v9105_v25 = vpop.permute.xlu1 %9104 }
 0x639   : > { %v9103_v40 = vpop.permute.xlu0 %9102  ;;  %v9649_v8 = vsel %vm941_vm8, %v9633_v38, %v9105_v25 }
 0x63a   : > { %v9647_v14 = vsel %vm941_vm8, %v9631_v43, %v9103_v40  ;;  %vm15279_vm8 = vmmov %vm15278_vm0 }
 0x63c   : > { %v9161_v35 = vpop.permute.xlu1 %9160 }
 0x63d   : > { %v9159_v12 = vpop.permute.xlu0 %9158  ;;  %v9665_v1 = vsel %vm6658_vm4, %v9649_v8, %v9161_v35 }
 0x63e   : > { %v9663_v26 = vsel %vm6658_vm4, %v9647_v14, %v9159_v12  ;;  %vm15281_vm4 = vmmov %vm15273_vm3 }
 0x640   : > { %v9297_v20 = vpop.permute.xlu1 %9296 }
 0x641   : > { %v9295_v13 = vpop.permute.xlu0 %9294  ;;  %v9681_v10 = vsel %vm960_vm10, %v9665_v1, %v9297_v20 }
 0x642   : > { %v9679_v18 = vsel %vm960_vm10, %v9663_v26, %v9295_v13  ;;  %vm15282_vm10 = vmmov %vm15277_vm12 }
 0x643   : > { %vm15283_vm11 = vmmov %vm15282_vm10 }
 0x644   : > { %v9361_v63 = vpop.permute.xlu1 %9360 }
 0x645   : > { %v9359_v31 = vpop.permute.xlu0 %9358  ;;  %v9697_v39 = vsel %vm6699_vm6, %v9681_v10, %v9361_v63 }
 0x646   : > { %v9695_v36 = vsel %vm6699_vm6, %v9679_v18, %v9359_v31 }
 0x648   : > { %v9417_v41 = vpop.permute.xlu1 %9416 }
 0x649   : > { %v9415_v53 = vpop.permute.xlu0 %9414  ;;  %v9713_v52 = vsel %vm973_vm9, %v9697_v39, %v9417_v41 }
 0x64a   : > { %v9711_v33 = vsel %vm973_vm9, %v9695_v36, %v9415_v53 }
 0x64c   : > { %v9553_v44 = vpop.permute.xlu1 %9552 }
 0x64d   : > { %v9551_v58 = vpop.permute.xlu0 %9550  ;;  %v9729_v51 = vsel %vm15278_vm0, %v9713_v52, %v9553_v44 }
 0x64e   : > { %v9727_v3 = vsel %vm15279_vm8, %v9711_v33, %v9551_v58 }
 0x650   : > { %v9617_v5 = vpop.permute.xlu1 %9616 }
 0x651   : > { %v9745_v0 = vsel %vm15280_vm5, %v9729_v51, %v9617_v5  ;;  %v9615_v29 = vpop.permute.xlu0 %9614 }
 0x652   : > { %v9743_v57 = vsel %vm15281_vm4, %v9727_v3, %v9615_v29 }
 0x653   : > { %10789 = vmatprep.mubr.msk.bf16.mxu1 %vm15282_vm10, %v9743_v57 }
 0x654   : > { %10790 = vmatmul.mubr.msk.bf16.gmra.mrb[48].mxu1 %vm15283_vm11, %v9745_v0 }
 0x6ca   : > { %v10779_v55 = vpop.f32.mrb[36].mxu1 }
 0x6cb   : > { %v9835_v34 = vadd.f32 %v10779_v55, %v10538_v42  ;;  %v9826_v17 = vpop.f32.mrb[37].mxu1 }
 0x6cc   : > { %v9827_v32 = vadd.f32 %v10538_v42, %v9826_v17  ;;  %v10780_v15 = vpop.f32.mrb[38].mxu1 }
 0x6cd   : > { %v9891_v7 = vmax.f32 %v9835_v34, 0.0  ;;  %v9838_v50 = vadd.f32 %v10780_v15, %v10538_v42  ;;  %v9829_v19 = vpop.f32.mrb[39].mxu1 }
 0x6ce   : > { %v9889_v62 = vmax.f32 %v9827_v32, 0.0  ;;  %v9830_v46 = vadd.f32 %v10538_v42, %v9829_v19 }
 0x6cf   : > { %9907 = vst.msk [vmem:[%s11444_s14 + $0x10] sm:$0xff] %vm6617_vm14, %v9891_v7  ;;  %v9892_v9 = vmax.f32 %v9838_v50, 0.0 }
 0x6d0   : > { %9905 = vst.msk [vmem:[%s11444_s14] sm:$0xff] %vm6617_vm14, %v9889_v62  ;;  %v9890_v54 = vmax.f32 %v9830_v46, 0.0 }
 0x6d1   : > { %9908 = vst.msk [vmem:[%s11444_s14 + $0x18] sm:$0xff] %vm6617_vm14, %v9892_v9 }
 0x6d2   : > { %9906 = vst.msk [vmem:[%s11444_s14 + $0x8] sm:$0xff] %vm6617_vm14, %v9890_v54 }
 0x6ea   : > { %v10783_v27 = vpop.f32.mrb[40].mxu1 }
 0x6eb   : > { %v9851_v61 = vadd.f32 %v10783_v27, %v10538_v42  ;;  %v9842_v47 = vpop.f32.mrb[41].mxu1 }
 0x6ec   : > { %v9843_v24 = vadd.f32 %v10538_v42, %v9842_v47  ;;  %v10784_v37 = vpop.f32.mrb[42].mxu1 }
 0x6ed   : > { %v9895_v23 = vmax.f32 %v9851_v61, 0.0  ;;  %v9854_v4 = vadd.f32 %v10784_v37, %v10538_v42  ;;  %v9845_v22 = vpop.f32.mrb[43].mxu1 }
 0x6ee   : > { %v9893_v49 = vmax.f32 %v9843_v24, 0.0  ;;  %v9846_v48 = vadd.f32 %v10538_v42, %v9845_v22 }
 0x6ef   : > { %9911 = vst.msk [vmem:[%s11444_s14 + $0x30] sm:$0xff] %vm6617_vm14, %v9895_v23  ;;  %v9896_v30 = vmax.f32 %v9854_v4, 0.0 }
 0x6f0   : > { %9909 = vst.msk [vmem:[%s11444_s14 + $0x20] sm:$0xff] %vm6617_vm14, %v9893_v49  ;;  %v9894_v6 = vmax.f32 %v9846_v48, 0.0 }
 0x6f1   : > { %9912 = vst.msk [vmem:[%s11444_s14 + $0x38] sm:$0xff] %vm6617_vm14, %v9896_v30 }
 0x6f2   : > { %9910 = vst.msk [vmem:[%s11444_s14 + $0x28] sm:$0xff] %vm6617_vm14, %v9894_v6 }
 0x70a   : > { %v10787_v45 = vpop.f32.mrb[44].mxu1 }
 0x70b   : > { %v9867_v16 = vadd.f32 %v10787_v45, %v10538_v42  ;;  %v9858_v60 = vpop.f32.mrb[45].mxu1 }
 0x70c   : > { %v9859_v11 = vadd.f32 %v10538_v42, %v9858_v60  ;;  %v10788_v21 = vpop.f32.mrb[46].mxu1 }
 0x70d   : > { %v9899_v2 = vmax.f32 %v9867_v16, 0.0  ;;  %v9870_v59 = vadd.f32 %v10788_v21, %v10538_v42  ;;  %v9861_v28 = vpop.f32.mrb[47].mxu1 }
 0x70e   : > { %v9897_v56 = vmax.f32 %v9859_v11, 0.0  ;;  %v9862_v25 = vadd.f32 %v10538_v42, %v9861_v28 }
 0x70f   : > { %9915 = vst.msk [vmem:[%s11444_s14 + $0x50] sm:$0xff] %vm6617_vm14, %v9899_v2  ;;  %v9900_v40 = vmax.f32 %v9870_v59, 0.0 }
 0x710   : > { %9913 = vst.msk [vmem:[%s11444_s14 + $0x40] sm:$0xff] %vm6617_vm14, %v9897_v56  ;;  %v9898_v35 = vmax.f32 %v9862_v25, 0.0 }
 0x711   : > { %9916 = vst.msk [vmem:[%s11444_s14 + $0x58] sm:$0xff] %vm6617_vm14, %v9900_v40 }
 0x712   : > { %9914 = vst.msk [vmem:[%s11444_s14 + $0x48] sm:$0xff] %vm6617_vm14, %v9898_v35 }
 0x727   : > { %v10791_v12 = vpop.f32.mrb[48].mxu1 }
 0x728   : > { %v9883_v20 = vadd.f32 %v10791_v12, %v10538_v42  ;;  %v9874_v13 = vpop.f32.mrb[49].mxu1 }
 0x729   : > { %v9875_v63 = vadd.f32 %v10538_v42, %v9874_v13  ;;  %v10792_v31 = vpop.f32.mrb[50].mxu1 }
 0x72a   : > { %v9903_v41 = vmax.f32 %v9883_v20, 0.0  ;;  %v9886_v53 = vadd.f32 %v10792_v31, %v10538_v42  ;;  %v9877_v38 = vpop.f32.mrb[51].mxu1 }
 0x72b   : > { %v9901_v43 = vmax.f32 %v9875_v63, 0.0  ;;  %v9878_v8 = vadd.f32 %v10538_v42, %v9877_v38 }
 0x72c   : > { %9919 = vst.msk [vmem:[%s11444_s14 + $0x70] sm:$0xff] %vm6617_vm14, %v9903_v41  ;;  %v9904_v14 = vmax.f32 %v9886_v53, 0.0 }
 0x72d   : > { %9917 = vst.msk [vmem:[%s11444_s14 + $0x60] sm:$0xff] %vm6617_vm14, %v9901_v43  ;;  %v9902_v1 = vmax.f32 %v9878_v8, 0.0 }
 0x72e   : > { %9920 = vst.msk [vmem:[%s11444_s14 + $0x78] sm:$0xff] %vm6617_vm14, %v9904_v14 }
 0x72f   : > { %9918 = vst.msk [vmem:[%s11444_s14 + $0x68] sm:$0xff] %vm6617_vm14, %v9902_v1 }
 0x730 PF: > { %s21_s21 = sadd.s32 1, %s11232_s21   ;;  %s15284_s17 = smov %s11224_s19 }
 0x731   : > { %p18_p11 = scmp.ge.s32.totalorder %s21_s21, 6   ;;  %s15285_s18 = smov %s11228_s20 }
 0x732   : > { %s15286_s19 = smov %s15289_s22  ;;  %s15287_s20 = smov %s15293_s23 }
 0x733   :  { %20 = sbr.rel (!%p18_p11) target bundleno = 3 (0x3), region = 136 }

</bundles_post_ra>
